<compile_context>
chip_gen: v5e
topology: v5e:2x2
jax: 0.10.0
libtpu: 0.0.40
codegen_flags: <defaults>
</compile_context>

<pallas_src>
import functools

import jax
import jax.numpy as jnp
from jax import lax
from jax.experimental import pallas as pl
from jax.experimental.pallas import tpu as pltpu

_LANE = 128  # lane width: every channel dimension is zero-padded to a multiple of this


def _round_up(x, m):
    return ((x + m - 1) // m) * m


def _fold_conv_bn(w, b, gamma, beta, mean, var, eps):
    # w: (Cout, Cin, 3, 3) torch layout -> (9, Cin, Cout) with BN scale folded in,
    # tap index = dy*3 + dx.  `shift` is the remaining per-channel add.
    s = gamma / jnp.sqrt(var + eps)
    wt = jnp.transpose(w, (2, 3, 1, 0)).reshape(9, w.shape[1], w.shape[0])
    return wt * s[None, None, :], (b - mean) * s + beta


def _vmem_bytes(TH, W1, W2, Cinp, Chp, Cop, Ccat):
    R = TH // 2
    bf, f4 = 2, 4
    scratch = ((TH + 4) * W2 * 3 * Ccat * bf          # dx-packed concat slab
               + (TH + 2) * W2 * 3 * Cop * bf         # dx-packed conv1 output slab
               + (TH + 2) * W2 * Cop * f4)            # f32 accumulator
    acts = 2 * ((R + 2) * W1 * Cinp * bf              # x1 tile + halo (double-buffered)
                + (TH + 4) * W2 * Chp * bf            # x2 tile + halo
                + TH * W2 * Cop * bf)                 # output tile
    weights = 2 * (Cinp * 4 * Chp * bf + 4 * Chp * f4
                   + 3 * 3 * Ccat * Cop * bf + 3 * 3 * Cop * Cop * bf + 2 * Cop * f4)
    return scratch + acts + weights


def _pick_tile_h(H2, W1, W2, Cinp, Chp, Cop, Ccat, budget):
    # Largest even divisor of H2 whose per-tile VMEM footprint fits the budget.
    best, th = 2, 2
    cap = H2 if H2 <= 64 else 64   # bound the unrolled per-row deconv store loop
    while th <= cap:
        if H2 % th == 0 and _vmem_bytes(th, W1, W2, Cinp, Chp, Cop, Ccat) <= budget:
            best = th
        th += 2
    return best


# ---------------------------------------------------------------------------
# Fused kernel: deconv 2x2 + pad + concat + (Conv3x3+BN+ReLU) x 2 for one
# (batch, TH-output-rows) tile.  Everything intermediate lives only in VMEM.
# ---------------------------------------------------------------------------
def _up_kernel(x1m_ref, x1h0_ref, x1h1_ref, x2m_ref, x2h0_ref, x2h1_ref,
               wd_ref, bd_ref, w1_ref, s1_ref, w2_ref, s2_ref,
               o_ref, cat_ref, y1_ref, acc_ref,
               *, TH, R, W1, W2, Cinp, Chp, Ccat, Cop, NT):
    t = pl.program_id(1)
    c0 = Ccat                 # start of the dx=1 (centre) block in the packed slab
    cup = c0 + Chp            # start of the upsampled half inside the centre block

    # -- 1. skip connection (x2) rows -> centre block, skip half (aligned stores) ----
    cat_ref[0:TH, :, c0:c0 + Chp] = x2m_ref[0]
    cat_ref[TH:TH + 2, :, c0:c0 + Chp] = x2h0_ref[0]
    cat_ref[TH + 2:TH + 4, :, c0:c0 + Chp] = x2h1_ref[0]

    # -- 2. ConvTranspose2d(k=2, s=2) on the x1 rows feeding this tile (incl. halo) ---
    xr = jnp.concatenate([x1m_ref[0], x1h0_ref[0], x1h1_ref[0]], axis=0)
    ym = jnp.dot(xr.reshape((R + 2) * W1, Cinp), wd_ref[...],
                 preferred_element_type=jnp.float32) + bd_ref[...]
    ym = ym.astype(jnp.bfloat16)                       # columns ordered (dy, dx, co)
    # depth-to-space along W: split lanes (dx, co) then fold dx into the W position
    up0 = ym[:, 0:2 * Chp].reshape((R + 2) * W1, 2, Chp).reshape(R + 2, W2, Chp)
    up1 = ym[:, 2 * Chp:4 * Chp].reshape((R + 2) * W1, 2, Chp).reshape(R + 2, W2, Chp)
    for m in range(R + 2):                             # cat rows 2m / 2m+1 (dy = 0 / 1)
        cat_ref[2 * m, :, cup:cup + Chp] = up0[m]
        cat_ref[2 * m + 1, :, cup:cup + Chp] = up1[m]

    # -- 3. rows outside the real image must be 0 (the deconv bias is not) -----------
    @pl.when(t == 0)
    def _():
        cat_ref[0:2, :, c0:c0 + Ccat] = jnp.zeros((2, W2, Ccat), jnp.bfloat16)

    @pl.when(t == NT - 1)
    def _():
        cat_ref[TH + 2:TH + 4, :, c0:c0 + Ccat] = jnp.zeros((2, W2, Ccat), jnp.bfloat16)

    # -- 4. dx-packing: build dx=0 / dx=2 blocks with two bulk shifted copies ---------
    cat_ref[:, 1:W2, 0:Ccat] = cat_ref[:, 0:W2 - 1, c0:c0 + Ccat]
    cat_ref[:, 0:1, 0:Ccat] = jnp.zeros((TH + 4, 1, Ccat), jnp.bfloat16)
    cat_ref[:, 0:W2 - 1, 2 * Ccat:3 * Ccat] = cat_ref[:, 1:W2, c0:c0 + Ccat]
    cat_ref[:, W2 - 1:W2, 2 * Ccat:3 * Ccat] = jnp.zeros((TH + 4, 1, Ccat), jnp.bfloat16)

    # -- 5. conv1 (3x3, BN scale folded): 3 dots over dy, K = 3*Ccat, VMEM f32 acc ----
    M1 = (TH + 2) * W2
    acc_ref[...] = jnp.dot(cat_ref[0:TH + 2].reshape(M1, 3 * Ccat), w1_ref[0],
                           preferred_element_type=jnp.float32)
    acc_ref[...] += jnp.dot(cat_ref[1:TH + 3].reshape(M1, 3 * Ccat), w1_ref[1],
                            preferred_element_type=jnp.float32)
    acc_ref[...] += jnp.dot(cat_ref[2:TH + 4].reshape(M1, 3 * Ccat), w1_ref[2],
                            preferred_element_type=jnp.float32)
    y1 = jnp.maximum(acc_ref[...] + s1_ref[...], 0.0).astype(jnp.bfloat16)
    y1_ref[:, :, Cop:2 * Cop] = y1.reshape(TH + 2, W2, Cop)

    # conv2's zero padding of the conv1 output at the image top / bottom
    @pl.when(t == 0)
    def _():
        y1_ref[0:1, :, Cop:2 * Cop] = jnp.zeros((1, W2, Cop), jnp.bfloat16)

    @pl.when(t == NT - 1)
    def _():
        y1_ref[TH + 1:TH + 2, :, Cop:2 * Cop] = jnp.zeros((1, W2, Cop), jnp.bfloat16)

    y1_ref[:, 1:W2, 0:Cop] = y1_ref[:, 0:W2 - 1, Cop:2 * Cop]
    y1_ref[:, 0:1, 0:Cop] = jnp.zeros((TH + 2, 1, Cop), jnp.bfloat16)
    y1_ref[:, 0:W2 - 1, 2 * Cop:3 * Cop] = y1_ref[:, 1:W2, Cop:2 * Cop]
    y1_ref[:, W2 - 1:W2, 2 * Cop:3 * Cop] = jnp.zeros((TH + 2, 1, Cop), jnp.bfloat16)

    # -- 6. conv2 (3x3, BN scale folded): 3 dots over dy, K = 3*Cop -------------------
    M2 = TH * W2
    acc_ref[0:M2, :] = jnp.dot(y1_ref[0:TH].reshape(M2, 3 * Cop), w2_ref[0],
                               preferred_element_type=jnp.float32)
    acc_ref[0:M2, :] += jnp.dot(y1_ref[1:TH + 1].reshape(M2, 3 * Cop), w2_ref[1],
                                preferred_element_type=jnp.float32)
    acc_ref[0:M2, :] += jnp.dot(y1_ref[2:TH + 2].reshape(M2, 3 * Cop), w2_ref[2],
                                preferred_element_type=jnp.float32)
    out = jnp.maximum(acc_ref[0:M2, :] + s2_ref[...], 0.0).astype(o_ref.dtype)
    o_ref[0] = out.reshape(TH, W2, Cop)


def _up_fused(x1p, x2p, wd, bd, w1p, s1, w2p, s2, *, TH):
    N, H1p, W1, Cinp = x1p.shape                      # H1p = H1 + 2 (1-row halo pad)
    _, H2p, W2, Chp = x2p.shape                       # H2p = H2 + 4 (2-row halo pad)
    H2 = H2p - 4
    Cop = w1p.shape[2]
    Ccat = w1p.shape[1] // 3
    R = TH // 2
    NT = H2 // TH

    kernel = functools.partial(_up_kernel, TH=TH, R=R, W1=W1, W2=W2, Cinp=Cinp,
                               Chp=Chp, Ccat=Ccat, Cop=Cop, NT=NT)

    est = _vmem_bytes(TH, W1, W2, Cinp, Chp, Cop, Ccat)
    vmem_limit = min(48 * 1024 * 1024, max(32 * 1024 * 1024, est + 8 * 1024 * 1024))

    return pl.pallas_call(
        kernel,
        out_shape=jax.ShapeDtypeStruct((N, H2, W2, Cop), jnp.bfloat16),
        grid=(N, NT),
        in_specs=[
            # x1 tile + 2 bottom-halo rows (top halo is inside the main block thanks to
            # the 1-row H pad of the input).
            pl.BlockSpec((1, R, W1, Cinp), lambda n, t: (n, t, 0, 0)),
            pl.BlockSpec((1, 1, W1, Cinp), lambda n, t: (n, (t + 1) * R, 0, 0)),
            pl.BlockSpec((1, 1, W1, Cinp), lambda n, t: (n, (t + 1) * R + 1, 0, 0)),
            # x2 tile + 2x2 bottom-halo rows (2-row H pad of the input).
            pl.BlockSpec((1, TH, W2, Chp), lambda n, t: (n, t, 0, 0)),
            pl.BlockSpec((1, 2, W2, Chp), lambda n, t: (n, (t + 1) * (TH // 2), 0, 0)),
            pl.BlockSpec((1, 2, W2, Chp), lambda n, t: (n, (t + 1) * (TH // 2) + 1, 0, 0)),
            # constant params (index maps constant -> DMA'd once).
            pl.BlockSpec((Cinp, 4 * Chp), lambda n, t: (0, 0)),
            pl.BlockSpec((1, 4 * Chp), lambda n, t: (0, 0)),
            pl.BlockSpec((3, 3 * Ccat, Cop), lambda n, t: (0, 0, 0)),
            pl.BlockSpec((1, Cop), lambda n, t: (0, 0)),
            pl.BlockSpec((3, 3 * Cop, Cop), lambda n, t: (0, 0, 0)),
            pl.BlockSpec((1, Cop), lambda n, t: (0, 0)),
        ],
        out_specs=pl.BlockSpec((1, TH, W2, Cop), lambda n, t: (n, t, 0, 0)),
        scratch_shapes=[
            pltpu.VMEM((TH + 4, W2, 3 * Ccat), jnp.bfloat16),   # dx-packed concat slab
            pltpu.VMEM((TH + 2, W2, 3 * Cop), jnp.bfloat16),    # dx-packed conv1 output
            pltpu.VMEM(((TH + 2) * W2, Cop), jnp.float32),      # f32 accumulator
        ],
        compiler_params=pltpu.CompilerParams(
            dimension_semantics=("parallel", "parallel"),
            vmem_limit_bytes=vmem_limit),
    )(x1p, x1p, x1p, x2p, x2p, x2p, wd, bd, w1p, s1, w2p, s2)


# ---------------------------------------------------------------------------
# Up.forward (bilinear=False path), public NCHW / float32 interface.
# ---------------------------------------------------------------------------
def up_forward(x1_nchw, x2_nchw, p, eps=1e-5, tile_h=None):
    N, C1, H1, W1 = x1_nchw.shape
    _, Cskip, H2, W2 = x2_nchw.shape
    Cout = p["c1_w"].shape[0]
    Cup = p["up_w"].shape[1]
    assert Cskip == Cup, "skip-connection channels must match the deconv output"
    # TODO(synk): only the standard U-Net case diffY == diffX == 0 is fused.
    assert H2 == 2 * H1 and W2 == 2 * W1

    Cinp = _round_up(C1, _LANE)
    Chp = _round_up(Cup, _LANE)
    Cop = _round_up(Cout, _LANE)
    Ccat = 2 * Chp

    if tile_h is None:
        tile_h = _pick_tile_h(H2, W1, W2, Cinp, Chp, Cop, Ccat,
                              budget=40 * 1024 * 1024)
    assert tile_h % 2 == 0 and H2 % tile_h == 0

    # NCHW -> NHWC, channel-pad to the lane width, H-pad with the halo rows (all fused
    # into one XLA pass per tensor), cast to bf16.
    x1 = jnp.transpose(x1_nchw, (0, 2, 3, 1))
    x1 = jnp.pad(x1, ((0, 0), (1, 1), (0, 0), (0, Cinp - C1))).astype(jnp.bfloat16)
    x2 = jnp.transpose(x2_nchw, (0, 2, 3, 1))
    x2 = jnp.pad(x2, ((0, 0), (2, 2), (0, 0), (0, Chp - Cskip))).astype(jnp.bfloat16)

    # ConvTranspose2d weight -> (Cinp, 4*Chp) with columns ordered (dy, dx, co);
    # bias zero-padded so padded output channels stay exactly 0 before the concat.
    w_t = jnp.transpose(p["up_w"], (2, 3, 0, 1))                  # (dy, dx, C1, Cup)
    w_pad = jnp.zeros((2, 2, Cinp, Chp), jnp.float32).at[:, :, :C1, :Cup].set(w_t)
    wd = jnp.transpose(w_pad, (2, 0, 1, 3)).reshape(Cinp, 4 * Chp).astype(jnp.bfloat16)
    bdv = jnp.zeros((Chp,), jnp.float32).at[:Cup].set(p["up_b"])
    bd = jnp.tile(bdv, 4)[None, :]                                # (1, 4*Chp) f32

    # Fold BN (eval mode) into the conv weights and pack dx along K:
    #   W1p[dy, dx*Ccat + c, o],  c-layout per dx block = [x2 skip (Chp) | up (Chp)].
    w1f, shift1 = _fold_conv_bn(p["c1_w"], p["c1_b"], p["bn1_g"], p["bn1_b"],
                                p["bn1_m"], p["bn1_v"], eps)
    w2f, shift2 = _fold_conv_bn(p["c2_w"], p["c2_b"], p["bn2_g"], p["bn2_b"],
                                p["bn2_m"], p["bn2_v"], eps)
    w1p = jnp.zeros((3, 3 * Ccat, Cop), jnp.float32)
    w2p = jnp.zeros((3, 3 * Cop, Cop), jnp.float32)
    for dy in range(3):
        for dx in range(3):
            tap1 = w1f[dy * 3 + dx]                               # (Cskip + Cup, Cout)
            base = dx * Ccat
            w1p = w1p.at[dy, base:base + Cskip, :Cout].set(tap1[:Cskip])
            w1p = w1p.at[dy, base + Chp:base + Chp + Cup, :Cout].set(tap1[Cskip:])
            w2p = w2p.at[dy, dx * Cop:dx * Cop + Cout, :Cout].set(w2f[dy * 3 + dx])
    w1p = w1p.astype(jnp.bfloat16)
    w2p = w2p.astype(jnp.bfloat16)
    s1 = jnp.zeros((1, Cop), jnp.float32).at[0, :Cout].set(shift1)
    s2 = jnp.zeros((1, Cop), jnp.float32).at[0, :Cout].set(shift2)

    out = _up_fused(x1, x2, wd, bd, w1p, s1, w2p, s2, TH=tile_h)   # (N, H2, W2, Cop) bf16
    out = out[:, :, :, :Cout]                                      # drop channel padding
    return jnp.transpose(out, (0, 3, 1, 2)).astype(jnp.float32)    # NCHW f32 (module I/F)


# ---------------------------------------------------------------------------
# Pure-JAX f32 reference (for correctness check)
# ---------------------------------------------------------------------------
def up_forward_ref(x1, x2, p, eps=1e-5):
    N, Cin, H, W = x1.shape
    Cup = p["up_w"].shape[1]
    t = jnp.einsum('nchw,cokl->nohwkl', x1, p["up_w"])
    t = t.transpose(0, 1, 2, 4, 3, 5).reshape(N, Cup, 2 * H, 2 * W)
    t = t + p["up_b"][None, :, None, None]

    diffY = x2.shape[2] - t.shape[2]
    diffX = x2.shape[3] - t.shape[3]
    t = jnp.pad(t, ((0, 0), (0, 0),
                    (diffY // 2, diffY - diffY // 2),
                    (diffX // 2, diffX - diffX // 2)))
    x = jnp.concatenate([x2, t], axis=1)

    def cbr(x, w, b, g, be, m, v):
        y = lax.conv_general_dilated(x, w, (1, 1), ((1, 1), (1, 1)),
                                     dimension_numbers=('NCHW', 'OIHW', 'NCHW'))
        y = y + b[None, :, None, None]
        y = (y - m[None, :, None, None]) / jnp.sqrt(v[None, :, None, None] + eps)
        y = y * g[None, :, None, None] + be[None, :, None, None]
        return jnp.maximum(y, 0.0)

    x = cbr(x, p["c1_w"], p["c1_b"], p["bn1_g"], p["bn1_b"], p["bn1_m"], p["bn1_v"])
    x = cbr(x, p["c2_w"], p["c2_b"], p["bn2_g"], p["bn2_b"], p["bn2_m"], p["bn2_v"])
    return x


if __name__ == "__main__":
    key = jax.random.PRNGKey(0)
    in_channels, out_channels = 8, 4
    N, H, W = 2, 8, 8          # x1 spatial; x2 (skip connection) is 2x larger

    ks = jax.random.split(key, 16)
    Chalf = in_channels // 2
    params = {
        # ConvTranspose2d(in_channels, in_channels//2, k=2, s=2): weight (Cin, Chalf, 2, 2)
        "up_w": jax.random.normal(ks[0], (in_channels, Chalf, 2, 2), jnp.float32) * 0.1,
        "up_b": jax.random.normal(ks[1], (Chalf,), jnp.float32) * 0.1,
        # DoubleConv(in_channels, out_channels)
        "c1_w": jax.random.normal(ks[2], (out_channels, in_channels, 3, 3), jnp.float32) * 0.1,
        "c1_b": jax.random.normal(ks[3], (out_channels,), jnp.float32) * 0.1,
        "bn1_g": 1.0 + 0.1 * jax.random.normal(ks[4], (out_channels,), jnp.float32),
        "bn1_b": 0.1 * jax.random.normal(ks[5], (out_channels,), jnp.float32),
        "bn1_m": 0.1 * jax.random.normal(ks[6], (out_channels,), jnp.float32),
        "bn1_v": jax.random.uniform(ks[7], (out_channels,), jnp.float32, 0.5, 1.5),
        "c2_w": jax.random.normal(ks[8], (out_channels, out_channels, 3, 3), jnp.float32) * 0.1,
        "c2_b": jax.random.normal(ks[9], (out_channels,), jnp.float32) * 0.1,
        "bn2_g": 1.0 + 0.1 * jax.random.normal(ks[10], (out_channels,), jnp.float32),
        "bn2_b": 0.1 * jax.random.normal(ks[11], (out_channels,), jnp.float32),
        "bn2_m": 0.1 * jax.random.normal(ks[12], (out_channels,), jnp.float32),
        "bn2_v": jax.random.uniform(ks[13], (out_channels,), jnp.float32, 0.5, 1.5),
    }

    x1 = jax.random.normal(ks[14], (N, in_channels, H, W), jnp.float32)        # NCHW
    x2 = jax.random.normal(ks[15], (N, Chalf, 2 * H, 2 * W), jnp.float32)      # NCHW skip

    # tile_h=8 -> 2 row tiles per image: exercises the halo handling at a real tile seam.
    up_fn = jax.jit(functools.partial(up_forward, tile_h=8))
    out = jax.block_until_ready(up_fn(x1, x2, params))

    ref = jax.block_until_ready(up_forward_ref(x1, x2, params))
    assert out.shape == (N, out_channels, 2 * H, 2 * W), out.shape
    # bf16 MXU inputs / intermediates / output with f32 accumulation -> loosened tolerance.
    err = float(jnp.max(jnp.abs(out - ref)))
    assert jnp.allclose(out, ref, rtol=3e-2, atol=3e-2), err

    print("KERNEL_OK")
</pallas_src>

<mosaic_0001>
module attributes {stable_mosaic.version = 11 : i64} {
  func.func @_up_kernel(%arg0: i32, %arg1: i32, %arg2: memref<1x4x8x128xbf16, #tpu.memory_space<vmem>>, %arg3: memref<1x1x8x128xbf16, #tpu.memory_space<vmem>>, %arg4: memref<1x1x8x128xbf16, #tpu.memory_space<vmem>>, %arg5: memref<1x8x16x128xbf16, #tpu.memory_space<vmem>>, %arg6: memref<1x2x16x128xbf16, #tpu.memory_space<vmem>>, %arg7: memref<1x2x16x128xbf16, #tpu.memory_space<vmem>>, %arg8: memref<128x512xbf16, #tpu.memory_space<vmem>>, %arg9: memref<1x512xf32, #tpu.memory_space<vmem>>, %arg10: memref<3x768x128xbf16, #tpu.memory_space<vmem>>, %arg11: memref<1x128xf32, #tpu.memory_space<vmem>>, %arg12: memref<3x384x128xbf16, #tpu.memory_space<vmem>>, %arg13: memref<1x128xf32, #tpu.memory_space<vmem>>, %arg14: memref<1x8x16x128xbf16, #tpu.memory_space<vmem>>, %arg15: memref<12x16x768xbf16, #tpu.memory_space<vmem>>, %arg16: memref<10x16x384xbf16, #tpu.memory_space<vmem>>, %arg17: memref<160x128xf32, #tpu.memory_space<vmem>>) attributes {dimension_semantics = [#tpu.dimension_semantics<parallel>, #tpu.dimension_semantics<parallel>], iteration_bounds = array<i64: 2, 2>, scalar_prefetch = 0 : i64, scratch_operands = 3 : i64, tpu.core_type = #tpu.core_type<tc>, window_params = [{transform_indices = @transform_0, window_bounds = array<i64: 1, 4, 8, 128>}, {transform_indices = @transform_1, window_bounds = array<i64: 1, 1, 8, 128>}, {transform_indices = @transform_2, window_bounds = array<i64: 1, 1, 8, 128>}, {transform_indices = @transform_3, window_bounds = array<i64: 1, 8, 16, 128>}, {transform_indices = @transform_4, window_bounds = array<i64: 1, 2, 16, 128>}, {transform_indices = @transform_5, window_bounds = array<i64: 1, 2, 16, 128>}, {pipeline_mode = #tpu.pipeline_mode<synchronous>, transform_indices = @transform_6, window_bounds = array<i64: 128, 512>}, {pipeline_mode = #tpu.pipeline_mode<synchronous>, transform_indices = @transform_7, window_bounds = array<i64: 1, 512>}, {pipeline_mode = #tpu.pipeline_mode<synchronous>, transform_indices = @transform_8, window_bounds = array<i64: 3, 768, 128>}, {pipeline_mode = #tpu.pipeline_mode<synchronous>, transform_indices = @transform_9, window_bounds = array<i64: 1, 128>}, {pipeline_mode = #tpu.pipeline_mode<synchronous>, transform_indices = @transform_10, window_bounds = array<i64: 3, 384, 128>}, {pipeline_mode = #tpu.pipeline_mode<synchronous>, transform_indices = @transform_11, window_bounds = array<i64: 1, 128>}, {transform_indices = @transform_12, window_bounds = array<i64: 1, 8, 16, 128>}]} {
    %c0 = arith.constant 0 : index
    %c0_0 = arith.constant 0 : index
    %c0_1 = arith.constant 0 : index
    %c0_2 = arith.constant 0 : index
    %0 = vector.load %arg5[%c0, %c0_0, %c0_1, %c0_2] : memref<1x8x16x128xbf16, #tpu.memory_space<vmem>>, vector<1x8x16x128xbf16>
    %1 = vector.shape_cast %0 : vector<1x8x16x128xbf16> to vector<8x16x128xbf16>
    %c0_3 = arith.constant 0 : index
    %c0_4 = arith.constant 0 : index
    %c256 = arith.constant 256 : index
    %2 = vector.load %arg15[%c0_3, %c0_4, %c256] : memref<12x16x768xbf16, #tpu.memory_space<vmem>>, vector<8x16x128xbf16>
    tpu.vector_store %arg15[%c0_3, %c0_4, %c256], %1 {strides = array<i32>} : memref<12x16x768xbf16, #tpu.memory_space<vmem>>, vector<8x16x128xbf16>,
    %c0_5 = arith.constant 0 : index
    %c0_6 = arith.constant 0 : index
    %c0_7 = arith.constant 0 : index
    %c0_8 = arith.constant 0 : index
    %3 = vector.load %arg6[%c0_5, %c0_6, %c0_7, %c0_8] : memref<1x2x16x128xbf16, #tpu.memory_space<vmem>>, vector<1x2x16x128xbf16>
    %4 = vector.shape_cast %3 : vector<1x2x16x128xbf16> to vector<2x16x128xbf16>
    %c8 = arith.constant 8 : index
    %c0_9 = arith.constant 0 : index
    %c256_10 = arith.constant 256 : index
    %5 = vector.load %arg15[%c8, %c0_9, %c256_10] : memref<12x16x768xbf16, #tpu.memory_space<vmem>>, vector<2x16x128xbf16>
    tpu.vector_store %arg15[%c8, %c0_9, %c256_10], %4 {strides = array<i32>} : memref<12x16x768xbf16, #tpu.memory_space<vmem>>, vector<2x16x128xbf16>,
    %c0_11 = arith.constant 0 : index
    %c0_12 = arith.constant 0 : index
    %c0_13 = arith.constant 0 : index
    %c0_14 = arith.constant 0 : index
    %6 = vector.load %arg7[%c0_11, %c0_12, %c0_13, %c0_14] : memref<1x2x16x128xbf16, #tpu.memory_space<vmem>>, vector<1x2x16x128xbf16>
    %7 = vector.shape_cast %6 : vector<1x2x16x128xbf16> to vector<2x16x128xbf16>
    %c10 = arith.constant 10 : index
    %c0_15 = arith.constant 0 : index
    %c256_16 = arith.constant 256 : index
    %8 = vector.load %arg15[%c10, %c0_15, %c256_16] : memref<12x16x768xbf16, #tpu.memory_space<vmem>>, vector<2x16x128xbf16>
    tpu.vector_store %arg15[%c10, %c0_15, %c256_16], %7 {strides = array<i32>} : memref<12x16x768xbf16, #tpu.memory_space<vmem>>, vector<2x16x128xbf16>,
    %c0_17 = arith.constant 0 : index
    %c0_18 = arith.constant 0 : index
    %c0_19 = arith.constant 0 : index
    %c0_20 = arith.constant 0 : index
    %9 = vector.load %arg2[%c0_17, %c0_18, %c0_19, %c0_20] : memref<1x4x8x128xbf16, #tpu.memory_space<vmem>>, vector<1x4x8x128xbf16>
    %10 = vector.shape_cast %9 : vector<1x4x8x128xbf16> to vector<4x8x128xbf16>
    %c0_21 = arith.constant 0 : index
    %c0_22 = arith.constant 0 : index
    %c0_23 = arith.constant 0 : index
    %c0_24 = arith.constant 0 : index
    %11 = vector.load %arg3[%c0_21, %c0_22, %c0_23, %c0_24] : memref<1x1x8x128xbf16, #tpu.memory_space<vmem>>, vector<1x1x8x128xbf16>
    %12 = vector.shape_cast %11 : vector<1x1x8x128xbf16> to vector<1x8x128xbf16>
    %c0_25 = arith.constant 0 : index
    %c0_26 = arith.constant 0 : index
    %c0_27 = arith.constant 0 : index
    %c0_28 = arith.constant 0 : index
    %13 = vector.load %arg4[%c0_25, %c0_26, %c0_27, %c0_28] : memref<1x1x8x128xbf16, #tpu.memory_space<vmem>>, vector<1x1x8x128xbf16>
    %14 = vector.shape_cast %13 : vector<1x1x8x128xbf16> to vector<1x8x128xbf16>
    %15 = tpu.concatenate %10, %12, %14 in 0 : vector<4x8x128xbf16>, vector<1x8x128xbf16>, vector<1x8x128xbf16> -> vector<6x8x128xbf16>
    %16 = vector.shape_cast %15 : vector<6x8x128xbf16> to vector<48x128xbf16>
    %c0_29 = arith.constant 0 : index
    %c0_30 = arith.constant 0 : index
    %17 = vector.load %arg8[%c0_29, %c0_30] : memref<128x512xbf16, #tpu.memory_space<vmem>>, vector<128x512xbf16>
    %cst = arith.constant dense<0.000000e+00> : vector<48x512xf32>
    %18 = tpu.matmul %16, %17, %cst {dimension_numbers = #tpu.dot_dimension_numbers<[1], [0], [0], [1], [0, 0, 1, 1], [], []>} : vector<48x128xbf16>, vector<128x512xbf16>, vector<48x512xf32> -> vector<48x512xf32>
    %c0_31 = arith.constant 0 : index
    %c0_32 = arith.constant 0 : index
    %19 = vector.load %arg9[%c0_31, %c0_32] : memref<1x512xf32, #tpu.memory_space<vmem>>, vector<1x512xf32>
    %20 = vector.broadcast %19 : vector<1x512xf32> to vector<48x512xf32>
    %21 = arith.addf %18, %20 : vector<48x512xf32>
    %22 = arith.truncf %21 : vector<48x512xf32> to vector<48x512xbf16>
    %23 = vector.extract_strided_slice %22 {offsets = [0, 0], sizes = [48, 256], strides = [1, 1]} : vector<48x512xbf16> to vector<48x256xbf16>
    %24 = vector.shape_cast %23 : vector<48x256xbf16> to vector<48x2x128xbf16>
    %25 = vector.shape_cast %24 : vector<48x2x128xbf16> to vector<6x16x128xbf16>
    %26 = vector.extract_strided_slice %22 {offsets = [0, 256], sizes = [48, 256], strides = [1, 1]} : vector<48x512xbf16> to vector<48x256xbf16>
    %27 = vector.shape_cast %26 : vector<48x256xbf16> to vector<48x2x128xbf16>
    %28 = vector.shape_cast %27 : vector<48x2x128xbf16> to vector<6x16x128xbf16>
    %29 = vector.extract_strided_slice %25 {offsets = [0, 0, 0], sizes = [1, 16, 128], strides = [1, 1, 1]} : vector<6x16x128xbf16> to vector<1x16x128xbf16>
    %30 = vector.shape_cast %29 : vector<1x16x128xbf16> to vector<16x128xbf16>
    %c0_33 = arith.constant 0 : index
    %c0_34 = arith.constant 0 : index
    %c384 = arith.constant 384 : index
    %31 = vector.load %arg15[%c0_33, %c0_34, %c384] : memref<12x16x768xbf16, #tpu.memory_space<vmem>>, vector<1x16x128xbf16>
    %32 = vector.shape_cast %31 : vector<1x16x128xbf16> to vector<16x128xbf16>
    %33 = vector.shape_cast %30 : vector<16x128xbf16> to vector<1x16x128xbf16>
    tpu.vector_store %arg15[%c0_33, %c0_34, %c384], %33 {strides = array<i32>} : memref<12x16x768xbf16, #tpu.memory_space<vmem>>, vector<1x16x128xbf16>,
    %34 = vector.extract_strided_slice %28 {offsets = [0, 0, 0], sizes = [1, 16, 128], strides = [1, 1, 1]} : vector<6x16x128xbf16> to vector<1x16x128xbf16>
    %35 = vector.shape_cast %34 : vector<1x16x128xbf16> to vector<16x128xbf16>
    %c1 = arith.constant 1 : index
    %c0_35 = arith.constant 0 : index
    %c384_36 = arith.constant 384 : index
    %36 = vector.load %arg15[%c1, %c0_35, %c384_36] : memref<12x16x768xbf16, #tpu.memory_space<vmem>>, vector<1x16x128xbf16>
    %37 = vector.shape_cast %36 : vector<1x16x128xbf16> to vector<16x128xbf16>
    %38 = vector.shape_cast %35 : vector<16x128xbf16> to vector<1x16x128xbf16>
    tpu.vector_store %arg15[%c1, %c0_35, %c384_36], %38 {strides = array<i32>} : memref<12x16x768xbf16, #tpu.memory_space<vmem>>, vector<1x16x128xbf16>,
    %39 = vector.extract_strided_slice %25 {offsets = [1, 0, 0], sizes = [1, 16, 128], strides = [1, 1, 1]} : vector<6x16x128xbf16> to vector<1x16x128xbf16>
    %40 = vector.shape_cast %39 : vector<1x16x128xbf16> to vector<16x128xbf16>
    %c2 = arith.constant 2 : index
    %c0_37 = arith.constant 0 : index
    %c384_38 = arith.constant 384 : index
    %41 = vector.load %arg15[%c2, %c0_37, %c384_38] : memref<12x16x768xbf16, #tpu.memory_space<vmem>>, vector<1x16x128xbf16>
    %42 = vector.shape_cast %41 : vector<1x16x128xbf16> to vector<16x128xbf16>
    %43 = vector.shape_cast %40 : vector<16x128xbf16> to vector<1x16x128xbf16>
    tpu.vector_store %arg15[%c2, %c0_37, %c384_38], %43 {strides = array<i32>} : memref<12x16x768xbf16, #tpu.memory_space<vmem>>, vector<1x16x128xbf16>,
    %44 = vector.extract_strided_slice %28 {offsets = [1, 0, 0], sizes = [1, 16, 128], strides = [1, 1, 1]} : vector<6x16x128xbf16> to vector<1x16x128xbf16>
    %45 = vector.shape_cast %44 : vector<1x16x128xbf16> to vector<16x128xbf16>
    %c3 = arith.constant 3 : index
    %c0_39 = arith.constant 0 : index
    %c384_40 = arith.constant 384 : index
    %46 = vector.load %arg15[%c3, %c0_39, %c384_40] : memref<12x16x768xbf16, #tpu.memory_space<vmem>>, vector<1x16x128xbf16>
    %47 = vector.shape_cast %46 : vector<1x16x128xbf16> to vector<16x128xbf16>
    %48 = vector.shape_cast %45 : vector<16x128xbf16> to vector<1x16x128xbf16>
    tpu.vector_store %arg15[%c3, %c0_39, %c384_40], %48 {strides = array<i32>} : memref<12x16x768xbf16, #tpu.memory_space<vmem>>, vector<1x16x128xbf16>,
    %49 = vector.extract_strided_slice %25 {offsets = [2, 0, 0], sizes = [1, 16, 128], strides = [1, 1, 1]} : vector<6x16x128xbf16> to vector<1x16x128xbf16>
    %50 = vector.shape_cast %49 : vector<1x16x128xbf16> to vector<16x128xbf16>
    %c4 = arith.constant 4 : index
    %c0_41 = arith.constant 0 : index
    %c384_42 = arith.constant 384 : index
    %51 = vector.load %arg15[%c4, %c0_41, %c384_42] : memref<12x16x768xbf16, #tpu.memory_space<vmem>>, vector<1x16x128xbf16>
    %52 = vector.shape_cast %51 : vector<1x16x128xbf16> to vector<16x128xbf16>
    %53 = vector.shape_cast %50 : vector<16x128xbf16> to vector<1x16x128xbf16>
    tpu.vector_store %arg15[%c4, %c0_41, %c384_42], %53 {strides = array<i32>} : memref<12x16x768xbf16, #tpu.memory_space<vmem>>, vector<1x16x128xbf16>,
    %54 = vector.extract_strided_slice %28 {offsets = [2, 0, 0], sizes = [1, 16, 128], strides = [1, 1, 1]} : vector<6x16x128xbf16> to vector<1x16x128xbf16>
    %55 = vector.shape_cast %54 : vector<1x16x128xbf16> to vector<16x128xbf16>
    %c5 = arith.constant 5 : index
    %c0_43 = arith.constant 0 : index
    %c384_44 = arith.constant 384 : index
    %56 = vector.load %arg15[%c5, %c0_43, %c384_44] : memref<12x16x768xbf16, #tpu.memory_space<vmem>>, vector<1x16x128xbf16>
    %57 = vector.shape_cast %56 : vector<1x16x128xbf16> to vector<16x128xbf16>
    %58 = vector.shape_cast %55 : vector<16x128xbf16> to vector<1x16x128xbf16>
    tpu.vector_store %arg15[%c5, %c0_43, %c384_44], %58 {strides = array<i32>} : memref<12x16x768xbf16, #tpu.memory_space<vmem>>, vector<1x16x128xbf16>,
    %59 = vector.extract_strided_slice %25 {offsets = [3, 0, 0], sizes = [1, 16, 128], strides = [1, 1, 1]} : vector<6x16x128xbf16> to vector<1x16x128xbf16>
    %60 = vector.shape_cast %59 : vector<1x16x128xbf16> to vector<16x128xbf16>
    %c6 = arith.constant 6 : index
    %c0_45 = arith.constant 0 : index
    %c384_46 = arith.constant 384 : index
    %61 = vector.load %arg15[%c6, %c0_45, %c384_46] : memref<12x16x768xbf16, #tpu.memory_space<vmem>>, vector<1x16x128xbf16>
    %62 = vector.shape_cast %61 : vector<1x16x128xbf16> to vector<16x128xbf16>
    %63 = vector.shape_cast %60 : vector<16x128xbf16> to vector<1x16x128xbf16>
    tpu.vector_store %arg15[%c6, %c0_45, %c384_46], %63 {strides = array<i32>} : memref<12x16x768xbf16, #tpu.memory_space<vmem>>, vector<1x16x128xbf16>,
    %64 = vector.extract_strided_slice %28 {offsets = [3, 0, 0], sizes = [1, 16, 128], strides = [1, 1, 1]} : vector<6x16x128xbf16> to vector<1x16x128xbf16>
    %65 = vector.shape_cast %64 : vector<1x16x128xbf16> to vector<16x128xbf16>
    %c7 = arith.constant 7 : index
    %c0_47 = arith.constant 0 : index
    %c384_48 = arith.constant 384 : index
    %66 = vector.load %arg15[%c7, %c0_47, %c384_48] : memref<12x16x768xbf16, #tpu.memory_space<vmem>>, vector<1x16x128xbf16>
    %67 = vector.shape_cast %66 : vector<1x16x128xbf16> to vector<16x128xbf16>
    %68 = vector.shape_cast %65 : vector<16x128xbf16> to vector<1x16x128xbf16>
    tpu.vector_store %arg15[%c7, %c0_47, %c384_48], %68 {strides = array<i32>} : memref<12x16x768xbf16, #tpu.memory_space<vmem>>, vector<1x16x128xbf16>,
    %69 = vector.extract_strided_slice %25 {offsets = [4, 0, 0], sizes = [1, 16, 128], strides = [1, 1, 1]} : vector<6x16x128xbf16> to vector<1x16x128xbf16>
    %70 = vector.shape_cast %69 : vector<1x16x128xbf16> to vector<16x128xbf16>
    %c8_49 = arith.constant 8 : index
    %c0_50 = arith.constant 0 : index
    %c384_51 = arith.constant 384 : index
    %71 = vector.load %arg15[%c8_49, %c0_50, %c384_51] : memref<12x16x768xbf16, #tpu.memory_space<vmem>>, vector<1x16x128xbf16>
    %72 = vector.shape_cast %71 : vector<1x16x128xbf16> to vector<16x128xbf16>
    %73 = vector.shape_cast %70 : vector<16x128xbf16> to vector<1x16x128xbf16>
    tpu.vector_store %arg15[%c8_49, %c0_50, %c384_51], %73 {strides = array<i32>} : memref<12x16x768xbf16, #tpu.memory_space<vmem>>, vector<1x16x128xbf16>,
    %74 = vector.extract_strided_slice %28 {offsets = [4, 0, 0], sizes = [1, 16, 128], strides = [1, 1, 1]} : vector<6x16x128xbf16> to vector<1x16x128xbf16>
    %75 = vector.shape_cast %74 : vector<1x16x128xbf16> to vector<16x128xbf16>
    %c9 = arith.constant 9 : index
    %c0_52 = arith.constant 0 : index
    %c384_53 = arith.constant 384 : index
    %76 = vector.load %arg15[%c9, %c0_52, %c384_53] : memref<12x16x768xbf16, #tpu.memory_space<vmem>>, vector<1x16x128xbf16>
    %77 = vector.shape_cast %76 : vector<1x16x128xbf16> to vector<16x128xbf16>
    %78 = vector.shape_cast %75 : vector<16x128xbf16> to vector<1x16x128xbf16>
    tpu.vector_store %arg15[%c9, %c0_52, %c384_53], %78 {strides = array<i32>} : memref<12x16x768xbf16, #tpu.memory_space<vmem>>, vector<1x16x128xbf16>,
    %79 = vector.extract_strided_slice %25 {offsets = [5, 0, 0], sizes = [1, 16, 128], strides = [1, 1, 1]} : vector<6x16x128xbf16> to vector<1x16x128xbf16>
    %80 = vector.shape_cast %79 : vector<1x16x128xbf16> to vector<16x128xbf16>
    %c10_54 = arith.constant 10 : index
    %c0_55 = arith.constant 0 : index
    %c384_56 = arith.constant 384 : index
    %81 = vector.load %arg15[%c10_54, %c0_55, %c384_56] : memref<12x16x768xbf16, #tpu.memory_space<vmem>>, vector<1x16x128xbf16>
    %82 = vector.shape_cast %81 : vector<1x16x128xbf16> to vector<16x128xbf16>
    %83 = vector.shape_cast %80 : vector<16x128xbf16> to vector<1x16x128xbf16>
    tpu.vector_store %arg15[%c10_54, %c0_55, %c384_56], %83 {strides = array<i32>} : memref<12x16x768xbf16, #tpu.memory_space<vmem>>, vector<1x16x128xbf16>,
    %84 = vector.extract_strided_slice %28 {offsets = [5, 0, 0], sizes = [1, 16, 128], strides = [1, 1, 1]} : vector<6x16x128xbf16> to vector<1x16x128xbf16>
    %85 = vector.shape_cast %84 : vector<1x16x128xbf16> to vector<16x128xbf16>
    %c11 = arith.constant 11 : index
    %c0_57 = arith.constant 0 : index
    %c384_58 = arith.constant 384 : index
    %86 = vector.load %arg15[%c11, %c0_57, %c384_58] : memref<12x16x768xbf16, #tpu.memory_space<vmem>>, vector<1x16x128xbf16>
    %87 = vector.shape_cast %86 : vector<1x16x128xbf16> to vector<16x128xbf16>
    %88 = vector.shape_cast %85 : vector<16x128xbf16> to vector<1x16x128xbf16>
    tpu.vector_store %arg15[%c11, %c0_57, %c384_58], %88 {strides = array<i32>} : memref<12x16x768xbf16, #tpu.memory_space<vmem>>, vector<1x16x128xbf16>,
    %c0_i32 = arith.constant 0 : i32
    %89 = arith.cmpi eq, %arg1, %c0_i32 : i32
    %90 = arith.extui %89 : i1 to i32
    %c0_i32_59 = arith.constant 0 : i32
    %91 = arith.cmpi ne, %90, %c0_i32_59 : i32
    scf.if %91 {
      %cst_181 = arith.constant 0.000000e+00 : bf16
      %181 = vector.broadcast %cst_181 : bf16 to vector<2x16x256xbf16>
      %c0_182 = arith.constant 0 : index
      %c0_183 = arith.constant 0 : index
      %c256_184 = arith.constant 256 : index
      %182 = vector.load %arg15[%c0_182, %c0_183, %c256_184] : memref<12x16x768xbf16, #tpu.memory_space<vmem>>, vector<2x16x256xbf16>
      tpu.vector_store %arg15[%c0_182, %c0_183, %c256_184], %181 {strides = array<i32>} : memref<12x16x768xbf16, #tpu.memory_space<vmem>>, vector<2x16x256xbf16>,
    } else {
    }
    %c1_i32 = arith.constant 1 : i32
    %92 = arith.cmpi eq, %arg1, %c1_i32 : i32
    %93 = arith.extui %92 : i1 to i32
    %c0_i32_60 = arith.constant 0 : i32
    %94 = arith.cmpi ne, %93, %c0_i32_60 : i32
    scf.if %94 {
      %cst_181 = arith.constant 0.000000e+00 : bf16
      %181 = vector.broadcast %cst_181 : bf16 to vector<2x16x256xbf16>
      %c10_182 = arith.constant 10 : index
      %c0_183 = arith.constant 0 : index
      %c256_184 = arith.constant 256 : index
      %182 = vector.load %arg15[%c10_182, %c0_183, %c256_184] : memref<12x16x768xbf16, #tpu.memory_space<vmem>>, vector<2x16x256xbf16>
      tpu.vector_store %arg15[%c10_182, %c0_183, %c256_184], %181 {strides = array<i32>} : memref<12x16x768xbf16, #tpu.memory_space<vmem>>, vector<2x16x256xbf16>,
    } else {
    }
    %c0_61 = arith.constant 0 : index
    %c0_62 = arith.constant 0 : index
    %c256_63 = arith.constant 256 : index
    %95 = vector.load %arg15[%c0_61, %c0_62, %c256_63] : memref<12x16x768xbf16, #tpu.memory_space<vmem>>, vector<12x15x256xbf16>
    %c0_64 = arith.constant 0 : index
    %c1_65 = arith.constant 1 : index
    %c0_66 = arith.constant 0 : index
    %96 = vector.load %arg15[%c0_64, %c1_65, %c0_66] : memref<12x16x768xbf16, #tpu.memory_space<vmem>>, vector<12x15x256xbf16>
    tpu.vector_store %arg15[%c0_64, %c1_65, %c0_66], %95 {strides = array<i32>} : memref<12x16x768xbf16, #tpu.memory_space<vmem>>, vector<12x15x256xbf16>,
    %cst_67 = arith.constant 0.000000e+00 : bf16
    %97 = vector.broadcast %cst_67 : bf16 to vector<12x1x256xbf16>
    %c0_68 = arith.constant 0 : index
    %c0_69 = arith.constant 0 : index
    %c0_70 = arith.constant 0 : index
    %98 = vector.load %arg15[%c0_68, %c0_69, %c0_70] : memref<12x16x768xbf16, #tpu.memory_space<vmem>>, vector<12x1x256xbf16>
    tpu.vector_store %arg15[%c0_68, %c0_69, %c0_70], %97 {strides = array<i32>} : memref<12x16x768xbf16, #tpu.memory_space<vmem>>, vector<12x1x256xbf16>,
    %c0_71 = arith.constant 0 : index
    %c1_72 = arith.constant 1 : index
    %c256_73 = arith.constant 256 : index
    %99 = vector.load %arg15[%c0_71, %c1_72, %c256_73] : memref<12x16x768xbf16, #tpu.memory_space<vmem>>, vector<12x15x256xbf16>
    %c0_74 = arith.constant 0 : index
    %c0_75 = arith.constant 0 : index
    %c512 = arith.constant 512 : index
    %100 = vector.load %arg15[%c0_74, %c0_75, %c512] : memref<12x16x768xbf16, #tpu.memory_space<vmem>>, vector<12x15x256xbf16>
    tpu.vector_store %arg15[%c0_74, %c0_75, %c512], %99 {strides = array<i32>} : memref<12x16x768xbf16, #tpu.memory_space<vmem>>, vector<12x15x256xbf16>,
    %cst_76 = arith.constant 0.000000e+00 : bf16
    %101 = vector.broadcast %cst_76 : bf16 to vector<12x1x256xbf16>
    %c0_77 = arith.constant 0 : index
    %c15 = arith.constant 15 : index
    %c512_78 = arith.constant 512 : index
    %102 = vector.load %arg15[%c0_77, %c15, %c512_78] : memref<12x16x768xbf16, #tpu.memory_space<vmem>>, vector<12x1x256xbf16>
    tpu.vector_store %arg15[%c0_77, %c15, %c512_78], %101 {strides = array<i32>} : memref<12x16x768xbf16, #tpu.memory_space<vmem>>, vector<12x1x256xbf16>,
    %c0_79 = arith.constant 0 : index
    %c0_80 = arith.constant 0 : index
    %c0_81 = arith.constant 0 : index
    %103 = vector.load %arg15[%c0_79, %c0_80, %c0_81] : memref<12x16x768xbf16, #tpu.memory_space<vmem>>, vector<10x16x768xbf16>
    %104 = vector.shape_cast %103 : vector<10x16x768xbf16> to vector<160x768xbf16>
    %c0_82 = arith.constant 0 : index
    %c0_83 = arith.constant 0 : index
    %c0_84 = arith.constant 0 : index
    %105 = vector.load %arg10[%c0_82, %c0_83, %c0_84] : memref<3x768x128xbf16, #tpu.memory_space<vmem>>, vector<1x768x128xbf16>
    %106 = vector.shape_cast %105 : vector<1x768x128xbf16> to vector<768x128xbf16>
    %cst_85 = arith.constant dense<0.000000e+00> : vector<160x128xf32>
    %107 = tpu.matmul %104, %106, %cst_85 {dimension_numbers = #tpu.dot_dimension_numbers<[1], [0], [0], [1], [0, 0, 1, 1], [], []>} : vector<160x768xbf16>, vector<768x128xbf16>, vector<160x128xf32> -> vector<160x128xf32>
    %c0_86 = arith.constant 0 : index
    %c0_87 = arith.constant 0 : index
    %108 = vector.load %arg17[%c0_86, %c0_87] : memref<160x128xf32, #tpu.memory_space<vmem>>, vector<160x128xf32>
    tpu.vector_store %arg17[%c0_86, %c0_87], %107 {strides = array<i32>} : memref<160x128xf32, #tpu.memory_space<vmem>>, vector<160x128xf32>,
    %c0_88 = arith.constant 0 : index
    %c0_89 = arith.constant 0 : index
    %109 = vector.load %arg17[%c0_88, %c0_89] : memref<160x128xf32, #tpu.memory_space<vmem>>, vector<160x128xf32>
    %c1_90 = arith.constant 1 : index
    %c0_91 = arith.constant 0 : index
    %c0_92 = arith.constant 0 : index
    %110 = vector.load %arg15[%c1_90, %c0_91, %c0_92] : memref<12x16x768xbf16, #tpu.memory_space<vmem>>, vector<10x16x768xbf16>
    %111 = vector.shape_cast %110 : vector<10x16x768xbf16> to vector<160x768xbf16>
    %c1_93 = arith.constant 1 : index
    %c0_94 = arith.constant 0 : index
    %c0_95 = arith.constant 0 : index
    %112 = vector.load %arg10[%c1_93, %c0_94, %c0_95] : memref<3x768x128xbf16, #tpu.memory_space<vmem>>, vector<1x768x128xbf16>
    %113 = vector.shape_cast %112 : vector<1x768x128xbf16> to vector<768x128xbf16>
    %cst_96 = arith.constant dense<0.000000e+00> : vector<160x128xf32>
    %114 = tpu.matmul %111, %113, %cst_96 {dimension_numbers = #tpu.dot_dimension_numbers<[1], [0], [0], [1], [0, 0, 1, 1], [], []>} : vector<160x768xbf16>, vector<768x128xbf16>, vector<160x128xf32> -> vector<160x128xf32>
    %115 = arith.addf %109, %114 : vector<160x128xf32>
    %c0_97 = arith.constant 0 : index
    %c0_98 = arith.constant 0 : index
    %116 = vector.load %arg17[%c0_97, %c0_98] : memref<160x128xf32, #tpu.memory_space<vmem>>, vector<160x128xf32>
    tpu.vector_store %arg17[%c0_97, %c0_98], %115 {strides = array<i32>} : memref<160x128xf32, #tpu.memory_space<vmem>>, vector<160x128xf32>,
    %c0_99 = arith.constant 0 : index
    %c0_100 = arith.constant 0 : index
    %117 = vector.load %arg17[%c0_99, %c0_100] : memref<160x128xf32, #tpu.memory_space<vmem>>, vector<160x128xf32>
    %c2_101 = arith.constant 2 : index
    %c0_102 = arith.constant 0 : index
    %c0_103 = arith.constant 0 : index
    %118 = vector.load %arg15[%c2_101, %c0_102, %c0_103] : memref<12x16x768xbf16, #tpu.memory_space<vmem>>, vector<10x16x768xbf16>
    %119 = vector.shape_cast %118 : vector<10x16x768xbf16> to vector<160x768xbf16>
    %c2_104 = arith.constant 2 : index
    %c0_105 = arith.constant 0 : index
    %c0_106 = arith.constant 0 : index
    %120 = vector.load %arg10[%c2_104, %c0_105, %c0_106] : memref<3x768x128xbf16, #tpu.memory_space<vmem>>, vector<1x768x128xbf16>
    %121 = vector.shape_cast %120 : vector<1x768x128xbf16> to vector<768x128xbf16>
    %cst_107 = arith.constant dense<0.000000e+00> : vector<160x128xf32>
    %122 = tpu.matmul %119, %121, %cst_107 {dimension_numbers = #tpu.dot_dimension_numbers<[1], [0], [0], [1], [0, 0, 1, 1], [], []>} : vector<160x768xbf16>, vector<768x128xbf16>, vector<160x128xf32> -> vector<160x128xf32>
    %123 = arith.addf %117, %122 : vector<160x128xf32>
    %c0_108 = arith.constant 0 : index
    %c0_109 = arith.constant 0 : index
    %124 = vector.load %arg17[%c0_108, %c0_109] : memref<160x128xf32, #tpu.memory_space<vmem>>, vector<160x128xf32>
    tpu.vector_store %arg17[%c0_108, %c0_109], %123 {strides = array<i32>} : memref<160x128xf32, #tpu.memory_space<vmem>>, vector<160x128xf32>,
    %c0_110 = arith.constant 0 : index
    %c0_111 = arith.constant 0 : index
    %125 = vector.load %arg17[%c0_110, %c0_111] : memref<160x128xf32, #tpu.memory_space<vmem>>, vector<160x128xf32>
    %c0_112 = arith.constant 0 : index
    %c0_113 = arith.constant 0 : index
    %126 = vector.load %arg11[%c0_112, %c0_113] : memref<1x128xf32, #tpu.memory_space<vmem>>, vector<1x128xf32>
    %127 = vector.broadcast %126 : vector<1x128xf32> to vector<160x128xf32>
    %128 = arith.addf %125, %127 : vector<160x128xf32>
    %cst_114 = arith.constant 0.000000e+00 : f32
    %129 = vector.broadcast %cst_114 : f32 to vector<160x128xf32>
    %130 = arith.maximumf %128, %129 : vector<160x128xf32>
    %131 = arith.truncf %130 : vector<160x128xf32> to vector<160x128xbf16>
    %132 = vector.shape_cast %131 : vector<160x128xbf16> to vector<10x16x128xbf16>
    %c0_115 = arith.constant 0 : index
    %c0_116 = arith.constant 0 : index
    %c128 = arith.constant 128 : index
    %133 = vector.load %arg16[%c0_115, %c0_116, %c128] : memref<10x16x384xbf16, #tpu.memory_space<vmem>>, vector<10x16x128xbf16>
    tpu.vector_store %arg16[%c0_115, %c0_116, %c128], %132 {strides = array<i32>} : memref<10x16x384xbf16, #tpu.memory_space<vmem>>, vector<10x16x128xbf16>,
    %c0_i32_117 = arith.constant 0 : i32
    %134 = arith.cmpi eq, %arg1, %c0_i32_117 : i32
    %135 = arith.extui %134 : i1 to i32
    %c0_i32_118 = arith.constant 0 : i32
    %136 = arith.cmpi ne, %135, %c0_i32_118 : i32
    scf.if %136 {
      %cst_181 = arith.constant 0.000000e+00 : bf16
      %181 = vector.broadcast %cst_181 : bf16 to vector<1x16x128xbf16>
      %c0_182 = arith.constant 0 : index
      %c0_183 = arith.constant 0 : index
      %c128_184 = arith.constant 128 : index
      %182 = vector.load %arg16[%c0_182, %c0_183, %c128_184] : memref<10x16x384xbf16, #tpu.memory_space<vmem>>, vector<1x16x128xbf16>
      tpu.vector_store %arg16[%c0_182, %c0_183, %c128_184], %181 {strides = array<i32>} : memref<10x16x384xbf16, #tpu.memory_space<vmem>>, vector<1x16x128xbf16>,
    } else {
    }
    %c1_i32_119 = arith.constant 1 : i32
    %137 = arith.cmpi eq, %arg1, %c1_i32_119 : i32
    %138 = arith.extui %137 : i1 to i32
    %c0_i32_120 = arith.constant 0 : i32
    %139 = arith.cmpi ne, %138, %c0_i32_120 : i32
    scf.if %139 {
      %cst_181 = arith.constant 0.000000e+00 : bf16
      %181 = vector.broadcast %cst_181 : bf16 to vector<1x16x128xbf16>
      %c9_182 = arith.constant 9 : index
      %c0_183 = arith.constant 0 : index
      %c128_184 = arith.constant 128 : index
      %182 = vector.load %arg16[%c9_182, %c0_183, %c128_184] : memref<10x16x384xbf16, #tpu.memory_space<vmem>>, vector<1x16x128xbf16>
      tpu.vector_store %arg16[%c9_182, %c0_183, %c128_184], %181 {strides = array<i32>} : memref<10x16x384xbf16, #tpu.memory_space<vmem>>, vector<1x16x128xbf16>,
    } else {
    }
    %c0_121 = arith.constant 0 : index
    %c0_122 = arith.constant 0 : index
    %c128_123 = arith.constant 128 : index
    %140 = vector.load %arg16[%c0_121, %c0_122, %c128_123] : memref<10x16x384xbf16, #tpu.memory_space<vmem>>, vector<10x15x128xbf16>
    %c0_124 = arith.constant 0 : index
    %c1_125 = arith.constant 1 : index
    %c0_126 = arith.constant 0 : index
    %141 = vector.load %arg16[%c0_124, %c1_125, %c0_126] : memref<10x16x384xbf16, #tpu.memory_space<vmem>>, vector<10x15x128xbf16>
    tpu.vector_store %arg16[%c0_124, %c1_125, %c0_126], %140 {strides = array<i32>} : memref<10x16x384xbf16, #tpu.memory_space<vmem>>, vector<10x15x128xbf16>,
    %cst_127 = arith.constant 0.000000e+00 : bf16
    %142 = vector.broadcast %cst_127 : bf16 to vector<10x1x128xbf16>
    %c0_128 = arith.constant 0 : index
    %c0_129 = arith.constant 0 : index
    %c0_130 = arith.constant 0 : index
    %143 = vector.load %arg16[%c0_128, %c0_129, %c0_130] : memref<10x16x384xbf16, #tpu.memory_space<vmem>>, vector<10x1x128xbf16>
    tpu.vector_store %arg16[%c0_128, %c0_129, %c0_130], %142 {strides = array<i32>} : memref<10x16x384xbf16, #tpu.memory_space<vmem>>, vector<10x1x128xbf16>,
    %c0_131 = arith.constant 0 : index
    %c1_132 = arith.constant 1 : index
    %c128_133 = arith.constant 128 : index
    %144 = vector.load %arg16[%c0_131, %c1_132, %c128_133] : memref<10x16x384xbf16, #tpu.memory_space<vmem>>, vector<10x15x128xbf16>
    %c0_134 = arith.constant 0 : index
    %c0_135 = arith.constant 0 : index
    %c256_136 = arith.constant 256 : index
    %145 = vector.load %arg16[%c0_134, %c0_135, %c256_136] : memref<10x16x384xbf16, #tpu.memory_space<vmem>>, vector<10x15x128xbf16>
    tpu.vector_store %arg16[%c0_134, %c0_135, %c256_136], %144 {strides = array<i32>} : memref<10x16x384xbf16, #tpu.memory_space<vmem>>, vector<10x15x128xbf16>,
    %cst_137 = arith.constant 0.000000e+00 : bf16
    %146 = vector.broadcast %cst_137 : bf16 to vector<10x1x128xbf16>
    %c0_138 = arith.constant 0 : index
    %c15_139 = arith.constant 15 : index
    %c256_140 = arith.constant 256 : index
    %147 = vector.load %arg16[%c0_138, %c15_139, %c256_140] : memref<10x16x384xbf16, #tpu.memory_space<vmem>>, vector<10x1x128xbf16>
    tpu.vector_store %arg16[%c0_138, %c15_139, %c256_140], %146 {strides = array<i32>} : memref<10x16x384xbf16, #tpu.memory_space<vmem>>, vector<10x1x128xbf16>,
    %c0_141 = arith.constant 0 : index
    %c0_142 = arith.constant 0 : index
    %c0_143 = arith.constant 0 : index
    %148 = vector.load %arg16[%c0_141, %c0_142, %c0_143] : memref<10x16x384xbf16, #tpu.memory_space<vmem>>, vector<8x16x384xbf16>
    %149 = vector.shape_cast %148 : vector<8x16x384xbf16> to vector<128x384xbf16>
    %c0_144 = arith.constant 0 : index
    %c0_145 = arith.constant 0 : index
    %c0_146 = arith.constant 0 : index
    %150 = vector.load %arg12[%c0_144, %c0_145, %c0_146] : memref<3x384x128xbf16, #tpu.memory_space<vmem>>, vector<1x384x128xbf16>
    %151 = vector.shape_cast %150 : vector<1x384x128xbf16> to vector<384x128xbf16>
    %cst_147 = arith.constant dense<0.000000e+00> : vector<128x128xf32>
    %152 = tpu.matmul %149, %151, %cst_147 {dimension_numbers = #tpu.dot_dimension_numbers<[1], [0], [0], [1], [0, 0, 1, 1], [], []>} : vector<128x384xbf16>, vector<384x128xbf16>, vector<128x128xf32> -> vector<128x128xf32>
    %c0_148 = arith.constant 0 : index
    %c0_149 = arith.constant 0 : index
    %153 = vector.load %arg17[%c0_148, %c0_149] : memref<160x128xf32, #tpu.memory_space<vmem>>, vector<128x128xf32>
    tpu.vector_store %arg17[%c0_148, %c0_149], %152 {strides = array<i32>} : memref<160x128xf32, #tpu.memory_space<vmem>>, vector<128x128xf32>,
    %c0_150 = arith.constant 0 : index
    %c0_151 = arith.constant 0 : index
    %154 = vector.load %arg17[%c0_150, %c0_151] : memref<160x128xf32, #tpu.memory_space<vmem>>, vector<128x128xf32>
    %c1_152 = arith.constant 1 : index
    %c0_153 = arith.constant 0 : index
    %c0_154 = arith.constant 0 : index
    %155 = vector.load %arg16[%c1_152, %c0_153, %c0_154] : memref<10x16x384xbf16, #tpu.memory_space<vmem>>, vector<8x16x384xbf16>
    %156 = vector.shape_cast %155 : vector<8x16x384xbf16> to vector<128x384xbf16>
    %c1_155 = arith.constant 1 : index
    %c0_156 = arith.constant 0 : index
    %c0_157 = arith.constant 0 : index
    %157 = vector.load %arg12[%c1_155, %c0_156, %c0_157] : memref<3x384x128xbf16, #tpu.memory_space<vmem>>, vector<1x384x128xbf16>
    %158 = vector.shape_cast %157 : vector<1x384x128xbf16> to vector<384x128xbf16>
    %cst_158 = arith.constant dense<0.000000e+00> : vector<128x128xf32>
    %159 = tpu.matmul %156, %158, %cst_158 {dimension_numbers = #tpu.dot_dimension_numbers<[1], [0], [0], [1], [0, 0, 1, 1], [], []>} : vector<128x384xbf16>, vector<384x128xbf16>, vector<128x128xf32> -> vector<128x128xf32>
    %160 = arith.addf %154, %159 : vector<128x128xf32>
    %c0_159 = arith.constant 0 : index
    %c0_160 = arith.constant 0 : index
    %161 = vector.load %arg17[%c0_159, %c0_160] : memref<160x128xf32, #tpu.memory_space<vmem>>, vector<128x128xf32>
    tpu.vector_store %arg17[%c0_159, %c0_160], %160 {strides = array<i32>} : memref<160x128xf32, #tpu.memory_space<vmem>>, vector<128x128xf32>,
    %c0_161 = arith.constant 0 : index
    %c0_162 = arith.constant 0 : index
    %162 = vector.load %arg17[%c0_161, %c0_162] : memref<160x128xf32, #tpu.memory_space<vmem>>, vector<128x128xf32>
    %c2_163 = arith.constant 2 : index
    %c0_164 = arith.constant 0 : index
    %c0_165 = arith.constant 0 : index
    %163 = vector.load %arg16[%c2_163, %c0_164, %c0_165] : memref<10x16x384xbf16, #tpu.memory_space<vmem>>, vector<8x16x384xbf16>
    %164 = vector.shape_cast %163 : vector<8x16x384xbf16> to vector<128x384xbf16>
    %c2_166 = arith.constant 2 : index
    %c0_167 = arith.constant 0 : index
    %c0_168 = arith.constant 0 : index
    %165 = vector.load %arg12[%c2_166, %c0_167, %c0_168] : memref<3x384x128xbf16, #tpu.memory_space<vmem>>, vector<1x384x128xbf16>
    %166 = vector.shape_cast %165 : vector<1x384x128xbf16> to vector<384x128xbf16>
    %cst_169 = arith.constant dense<0.000000e+00> : vector<128x128xf32>
    %167 = tpu.matmul %164, %166, %cst_169 {dimension_numbers = #tpu.dot_dimension_numbers<[1], [0], [0], [1], [0, 0, 1, 1], [], []>} : vector<128x384xbf16>, vector<384x128xbf16>, vector<128x128xf32> -> vector<128x128xf32>
    %168 = arith.addf %162, %167 : vector<128x128xf32>
    %c0_170 = arith.constant 0 : index
    %c0_171 = arith.constant 0 : index
    %169 = vector.load %arg17[%c0_170, %c0_171] : memref<160x128xf32, #tpu.memory_space<vmem>>, vector<128x128xf32>
    tpu.vector_store %arg17[%c0_170, %c0_171], %168 {strides = array<i32>} : memref<160x128xf32, #tpu.memory_space<vmem>>, vector<128x128xf32>,
    %c0_172 = arith.constant 0 : index
    %c0_173 = arith.constant 0 : index
    %170 = vector.load %arg17[%c0_172, %c0_173] : memref<160x128xf32, #tpu.memory_space<vmem>>, vector<128x128xf32>
    %c0_174 = arith.constant 0 : index
    %c0_175 = arith.constant 0 : index
    %171 = vector.load %arg13[%c0_174, %c0_175] : memref<1x128xf32, #tpu.memory_space<vmem>>, vector<1x128xf32>
    %172 = vector.broadcast %171 : vector<1x128xf32> to vector<128x128xf32>
    %173 = arith.addf %170, %172 : vector<128x128xf32>
    %cst_176 = arith.constant 0.000000e+00 : f32
    %174 = vector.broadcast %cst_176 : f32 to vector<128x128xf32>
    %175 = arith.maximumf %173, %174 : vector<128x128xf32>
    %176 = arith.truncf %175 : vector<128x128xf32> to vector<128x128xbf16>
    %177 = vector.shape_cast %176 : vector<128x128xbf16> to vector<8x16x128xbf16>
    %c0_177 = arith.constant 0 : index
    %c0_178 = arith.constant 0 : index
    %c0_179 = arith.constant 0 : index
    %c0_180 = arith.constant 0 : index
    %178 = vector.load %arg14[%c0_177, %c0_178, %c0_179, %c0_180] : memref<1x8x16x128xbf16, #tpu.memory_space<vmem>>, vector<1x8x16x128xbf16>
    %179 = vector.shape_cast %178 : vector<1x8x16x128xbf16> to vector<8x16x128xbf16>
    %180 = vector.shape_cast %177 : vector<8x16x128xbf16> to vector<1x8x16x128xbf16>
    tpu.vector_store %arg14[%c0_177, %c0_178, %c0_179, %c0_180], %180 {strides = array<i32>} : memref<1x8x16x128xbf16, #tpu.memory_space<vmem>>, vector<1x8x16x128xbf16>,
    return
  }
  func.func @transform_0(%arg0: i32, %arg1: i32) -> (i32, i32, i32, i32) {
    %c0_i32 = arith.constant 0 : i32
    %c0_i32_0 = arith.constant 0 : i32
    %c0_i32_1 = arith.constant 0 : i32
    return %arg0, %arg1, %c0_i32, %c0_i32_0 : i32, i32, i32, i32
  }
  func.func @transform_1(%arg0: i32, %arg1: i32) -> (i32, i32, i32, i32) {
    %c1_i32 = arith.constant 1 : i32
    %0 = arith.addi %arg1, %c1_i32 : i32
    %c4_i32 = arith.constant 4 : i32
    %1 = arith.muli %0, %c4_i32 : i32
    %c0_i32 = arith.constant 0 : i32
    %c0_i32_0 = arith.constant 0 : i32
    %c0_i32_1 = arith.constant 0 : i32
    return %arg0, %1, %c0_i32, %c0_i32_0 : i32, i32, i32, i32
  }
  func.func @transform_2(%arg0: i32, %arg1: i32) -> (i32, i32, i32, i32) {
    %c1_i32 = arith.constant 1 : i32
    %0 = arith.addi %arg1, %c1_i32 : i32
    %c4_i32 = arith.constant 4 : i32
    %1 = arith.muli %0, %c4_i32 : i32
    %c1_i32_0 = arith.constant 1 : i32
    %2 = arith.addi %1, %c1_i32_0 : i32
    %c0_i32 = arith.constant 0 : i32
    %c0_i32_1 = arith.constant 0 : i32
    %c0_i32_2 = arith.constant 0 : i32
    return %arg0, %2, %c0_i32, %c0_i32_1 : i32, i32, i32, i32
  }
  func.func @transform_3(%arg0: i32, %arg1: i32) -> (i32, i32, i32, i32) {
    %c0_i32 = arith.constant 0 : i32
    %c0_i32_0 = arith.constant 0 : i32
    %c0_i32_1 = arith.constant 0 : i32
    return %arg0, %arg1, %c0_i32, %c0_i32_0 : i32, i32, i32, i32
  }
  func.func @transform_4(%arg0: i32, %arg1: i32) -> (i32, i32, i32, i32) {
    %c1_i32 = arith.constant 1 : i32
    %0 = arith.addi %arg1, %c1_i32 : i32
    %c4_i32 = arith.constant 4 : i32
    %1 = arith.muli %0, %c4_i32 : i32
    %c0_i32 = arith.constant 0 : i32
    %c0_i32_0 = arith.constant 0 : i32
    %c0_i32_1 = arith.constant 0 : i32
    return %arg0, %1, %c0_i32, %c0_i32_0 : i32, i32, i32, i32
  }
  func.func @transform_5(%arg0: i32, %arg1: i32) -> (i32, i32, i32, i32) {
    %c1_i32 = arith.constant 1 : i32
    %0 = arith.addi %arg1, %c1_i32 : i32
    %c4_i32 = arith.constant 4 : i32
    %1 = arith.muli %0, %c4_i32 : i32
    %c1_i32_0 = arith.constant 1 : i32
    %2 = arith.addi %1, %c1_i32_0 : i32
    %c0_i32 = arith.constant 0 : i32
    %c0_i32_1 = arith.constant 0 : i32
    %c0_i32_2 = arith.constant 0 : i32
    return %arg0, %2, %c0_i32, %c0_i32_1 : i32, i32, i32, i32
  }
  func.func @transform_6(%arg0: i32, %arg1: i32) -> (i32, i32) {
    %c0_i32 = arith.constant 0 : i32
    %c0_i32_0 = arith.constant 0 : i32
    %c0_i32_1 = arith.constant 0 : i32
    return %c0_i32, %c0_i32_0 : i32, i32
  }
  func.func @transform_7(%arg0: i32, %arg1: i32) -> (i32, i32) {
    %c0_i32 = arith.constant 0 : i32
    %c0_i32_0 = arith.constant 0 : i32
    %c0_i32_1 = arith.constant 0 : i32
    return %c0_i32, %c0_i32_0 : i32, i32
  }
  func.func @transform_8(%arg0: i32, %arg1: i32) -> (i32, i32, i32) {
    %c0_i32 = arith.constant 0 : i32
    %c0_i32_0 = arith.constant 0 : i32
    %c0_i32_1 = arith.constant 0 : i32
    %c0_i32_2 = arith.constant 0 : i32
    return %c0_i32, %c0_i32_0, %c0_i32_1 : i32, i32, i32
  }
  func.func @transform_9(%arg0: i32, %arg1: i32) -> (i32, i32) {
    %c0_i32 = arith.constant 0 : i32
    %c0_i32_0 = arith.constant 0 : i32
    %c0_i32_1 = arith.constant 0 : i32
    return %c0_i32, %c0_i32_0 : i32, i32
  }
  func.func @transform_10(%arg0: i32, %arg1: i32) -> (i32, i32, i32) {
    %c0_i32 = arith.constant 0 : i32
    %c0_i32_0 = arith.constant 0 : i32
    %c0_i32_1 = arith.constant 0 : i32
    %c0_i32_2 = arith.constant 0 : i32
    return %c0_i32, %c0_i32_0, %c0_i32_1 : i32, i32, i32
  }
  func.func @transform_11(%arg0: i32, %arg1: i32) -> (i32, i32) {
    %c0_i32 = arith.constant 0 : i32
    %c0_i32_0 = arith.constant 0 : i32
    %c0_i32_1 = arith.constant 0 : i32
    return %c0_i32, %c0_i32_0 : i32, i32
  }
  func.func @transform_12(%arg0: i32, %arg1: i32) -> (i32, i32, i32, i32) {
    %c0_i32 = arith.constant 0 : i32
    %c0_i32_0 = arith.constant 0 : i32
    %c0_i32_1 = arith.constant 0 : i32
    return %arg0, %arg1, %c0_i32, %c0_i32_0 : i32, i32, i32, i32
  }
}

</mosaic_0001>

<bundles_post_ra>
// kernel: tile.8
= control target key start
LH: loop header
LB: loop body
LE: loop exit
PB: predicated region body
PF: predicated region fallthrough
CT: control target
= control target key end

     0   :  { %s22_s0 = inlined_call_operand.vmem [shape: f32[128], index: 0, kind: input, shape index: {}]   ;;  %s23_s1 = inlined_call_operand.vmem [shape: f32[4,128], index: 1, kind: output, shape index: {}]  }
   0x1   :  { %v4_v0 = vld [vmem:[%s22_s0] ss:$0 sm:$0xff] }
   0x2   :  { %5 = vst [vmem:[%s23_s1] sm:$0xf] %v4_v0 }

// kernel: up_forward.1
= control target key start
LH: loop header
LB: loop body
LE: loop exit
PB: predicated region body
PF: predicated region fallthrough
CT: control target
= control target key end

     0   :  { %s11129_s21 = smov 0   ;;  %s11131_s22 = smov 0   ;;  %s13008_s0 = inlined_call_operand.vmem [shape: bf16[2,10,8,128], index: 0, kind: input, shape index: {}, may-alias: {0,1,2}]   ;;  %s13009_s1 = inlined_call_operand.vmem [shape: bf16[2,10,8,128], index: 1, kind: input, shape index: {}, may-alias: {0,1,2}]   ;;  %s13010_s2 = inlined_call_operand.vmem [shape: bf16[2,10,8,128], index: 2, kind: input, shape index: {}, may-alias: {0,1,2}]   ;;  %s13011_s3 = inlined_call_operand.vmem [shape: bf16[2,20,16,128], index: 3, kind: input, shape index: {}, may-alias: {3,4,5}]   ;;  %s13012_s4 = inlined_call_operand.vmem [shape: bf16[2,20,16,128], index: 4, kind: input, shape index: {}, may-alias: {3,4,5}]   ;;  %s13013_s5 = inlined_call_operand.vmem [shape: bf16[2,20,16,128], index: 5, kind: input, shape index: {}, may-alias: {3,4,5}]   ;;  %s13014_s6 = inlined_call_operand.vmem [shape: bf16[128,512], index: 6, kind: input, shape index: {}]   ;;  %s13015_s7 = inlined_call_operand.vmem [shape: f32[1,512], index: 7, kind: input, shape index: {}]   ;;  %s13016_s8 = inlined_call_operand.vmem [shape: bf16[3,768,128], index: 8, kind: input, shape index: {}]   ;;  %s13017_s9 = inlined_call_operand.vmem [shape: f32[1,128], index: 9, kind: input, shape index: {}]   ;;  %s13018_s10 = inlined_call_operand.vmem [shape: bf16[3,384,128], index: 10, kind: input, shape index: {}]   ;;  %s13019_s11 = inlined_call_operand.vmem [shape: f32[1,128], index: 11, kind: input, shape index: {}]   ;;  %s13020_s12 = inlined_call_operand.vmem [shape: bf16[2,16,16,128], index: 12, kind: output, shape index: {}]  }
   0x1   :  { %13026 = sst [smem:[#allocation10_spill]] %s13016_s8  ;;  %s11133_s23 = smov 0  }
   0x2   :  { %13027 = sst [smem:[#allocation11_spill]] %s13017_s9  ;;  %s11135_s24 = smov 0  }
   0x3   :  { %13028 = sst [smem:[#allocation12_spill]] %s13018_s10  ;;  %s11137_s25 = smov 0  }
   0x4   :  { %13029 = sst [smem:[#allocation13_spill]] %s13019_s11 }
   0x5 LB: > { %13030 = sst [smem:[#allocation5_spill]] %s11050_s23  ;;  %s31_s26 = sadd.s32 1, %s11050_s23  ;;  %s11058_s25 = sphi %s11137_s25, %s22_s25   ;;  %s11054_s24 = sphi %s11135_s24, %s13068_s24   ;;  %s11050_s23 = sphi %s11133_s23, %s13067_s23   ;;  %s11046_s22 = sphi %s11131_s22, %s13066_s22   ;;  %s11042_s21 = sphi %s11129_s21, %s13065_s21  }
   0x6   : > { %13031 = sst [smem:[#allocation6_spill]] %s11054_s24  ;;  %s34_s27 = sadd.s32 1, %s11054_s24 }
   0x7   : > { %13032 = sst [smem:[#allocation7_spill]] %s11058_s25  ;;  %p32_p0 = scmp.ge.s32.totalorder %s31_s26, 2 }
   0x8   : > { %p8042_p1 = scmp.ge.s32.totalorder %s11058_s25, 1  ;;  %p525_p2 = scmp.lt.s32.totalorder %s11058_s25, 5 }
   0x9   : > { %s13070_s26 = smov (%p32_p0, %s31_s26), 0  ;;  %s13072_s27 = smov (!%p32_p0, %s34_s27), %s11054_s24 }
   0xa   : > { %13033 = sst [smem:[#allocation8_spill]] %s13070_s26  ;;  %p526_p3 = pnand %p8042_p1, %p525_p2 }
   0xb   : > { %p36_p4 = scmp.ge.s32.totalorder %s13072_s27, 2  ;;  %s11182_s29 = sshll.u32 (!%p526_p3), %s11042_s21, 2 }
   0xc   : > { %529 = sbr.rel (%p526_p3) target bundleno = 1848 (0x738), region = 68  ;;  %p646_p5 = scmp.lt.s32.totalorder (!%p526_p3), %s11046_s22, 1 }
   0xd   : > { %s13074_s27 = smov (%p36_p4, %s13072_s27), 0  ;;  %p648_p6 = scmp.lt.s32.totalorder (!%p526_p3), %s11182_s29, 9 }
   0xe   : > { %13034 = sst [smem:[#allocation9_spill]] %s13074_s27  ;;  %s11187_s30 = sshll.u32 (!%p526_p3), %s11042_s21, 3 }
   0xf   : > { %p693_p7 = scmp.lt.s32.totalorder (!%p526_p3), %s11187_s30, 19  ;;  %s11201_s18 = sadd.s32 (!%p526_p3), 8, %s11187_s30 }
  0x10   : > { %p711_p8 = scmp.lt.s32.totalorder (!%p526_p3), %s11201_s18, 19  ;;  %s10408_s16 = sadd.s32 (!%p526_p3), 2, %s11201_s18 }
  0x11   : > { %v8190_v0 = vld [vmem:[%s13014_s6 + $0xe0] sm:$0xf]  ;;  %v10442_v1 = vld [vmem:[%s13014_s6 + $0xec] sm:$0xf0]  ;;  %s13076_s22 = smov (!%p646_p5, %s11046_s22), 1  ;;  %p727_p9 = scmp.lt.s32.totalorder %s10408_s16, 19 }
  0x12   : > { %v8174_v2 = vld [vmem:[%s13014_s6 + $0xc0] sm:$0xf]  ;;  %v8191_v3 = vor.u32 %v10442_v1, %v8190_v0  ;;  %v10438_v4 = vld [vmem:[%s13014_s6 + $0xcc] sm:$0xf0]  ;;  %s649_s17 = scalar_select %p648_p6, %s11182_s29, 9 }
  0x13   : > { %v8175_v5 = vor.u32 %v10438_v4, %v8174_v2  ;;  %v8158_v6 = vld [vmem:[%s13014_s6 + $0xa0] sm:$0xf]  ;;  %v10434_v7 = vld [vmem:[%s13014_s6 + $0xac] sm:$0xf0]  ;;  %s11211_s14 = smul.u32 10, %s13076_s22  ;;  %s13078_s18 = smov (!%p711_p8, %s11201_s18), 19 }
  0x14   : > { %1026 = vmatpush.bf16.msra.mxu1 %v8191_v3  ;;  %v8159_v8 = vor.u32 %v10434_v7, %v8158_v6  ;;  %v8142_v9 = vld [vmem:[%s13014_s6 + $0x80] sm:$0xf]  ;;  %v10430_v10 = vld [vmem:[%s13014_s6 + $0x8c] sm:$0xf0]  ;;  %s11214_s15 = smul.u32 40, %s13076_s22  ;;  %p741_p10 = scmp.lt.s32.totalorder %s11187_s30, 15 }
  0x15   : > { %v8143_v11 = vor.u32 %v10430_v10, %v8142_v9  ;;  %v8126_v12 = vld [vmem:[%s13014_s6 + $0x60] sm:$0xf]  ;;  %v10426_v13 = vld [vmem:[%s13014_s6 + $0x6c] sm:$0xf0]  ;;  %s694_s27 = scalar_select %p693_p7, %s11187_s30, 19 }
  0x16   : > { %v8127_v14 = vor.u32 %v10426_v13, %v8126_v12  ;;  %v8110_v15 = vld [vmem:[%s13014_s6 + $0x40] sm:$0xf]  ;;  %v10422_v16 = vld [vmem:[%s13014_s6 + $0x4c] sm:$0xf0]  ;;  %s651_s28 = sadd.s32 %s11211_s14, %s649_s17  ;;  %s8054_s10 = sshll.u32 %s13078_s18, 1 }
  0x17   : > { %s8050_s13 = sshll.u32 %s694_s27, 1  ;;  %v8111_v17 = vor.u32 %v10422_v16, %v8110_v15  ;;  %s8044_s11 = sshll.u32 %s651_s28, 2  ;;  %v8094_v18 = vld [vmem:[%s13014_s6 + $0x20] sm:$0xf]  ;;  %v10418_v19 = vld [vmem:[%s13014_s6 + $0x2c] sm:$0xf0] }
  0x18   : > { %1027 = vmatpush.bf16.msra.mxu1 %v8175_v5  ;;  %s697_s23 = sadd.s32 %s11214_s15, %s8050_s13  ;;  %s13080_s16 = smov (!%p727_p9, %s10408_s16), 19  ;;  %v8095_v20 = vor.u32 %v10418_v19, %v8094_v18  ;;  %v8078_v21 = vld [vmem:[%s13014_s6] sm:$0xf]  ;;  %v10414_v22 = vld [vmem:[%s13014_s6 + $0xc] sm:$0xf0] }
  0x19   : > { %s8051_s25 = sshll.u32 %s697_s23, 2  ;;  %s8062_s23 = sshll.u32 %s13076_s22, 5  ;;  %v10440_v25 = vld [vmem:[%s13014_s6 + $0xe4] sm:$0xf]  ;;  %v8192_v26 = vld [vmem:[%s13014_s6 + $0xf0] sm:$0xf0]  ;;  %v8079_v28 = vor.u32 %v10414_v22, %v8078_v21 }
  0x1a   : > { %s11237_s27 = scalar_lea.vmem %s13011_s3, %s8051_s25  ;;  %s13082_s30 = smov (!%p741_p10, %s11187_s30), 15  ;;  %v10436_v30 = vld [vmem:[%s13014_s6 + $0xc4] sm:$0xf]  ;;  %v8195_v32 = vor.u32 %v10440_v25, %v8192_v26  ;;  %v8176_v33 = vld [vmem:[%s13014_s6 + $0xd0] sm:$0xf0] }
  0x1b   : > { %s11252_s22 = scalar_lea.vmem %s13008_s0, %s8044_s11  ;;  %s8061_s13 = sshll.u32 %s13082_s30, 1  ;;  %v750_v23 = vld [vmem:[%s11237_s27] sm:$0xf]  ;;  %v751_v24 = vld [vmem:[%s11237_s27 + $0x4] sm:$0xf]  ;;  %v8179_v43 = vor.u32 %v10436_v30, %v8176_v33 }
  0x1c   : > { %1028 = vmatpush.bf16.msra.mxu1 %v8159_v8  ;;  %s11256_s24 = sadd.s32 %s11214_s15, %s8054_s10  ;;  %s745_s26 = sadd.s32 %s8062_s23, %s8061_s13  ;;  %v752_v27 = vld [vmem:[%s11237_s27 + $0x8] sm:$0xf]  ;;  %v753_v29 = vld [vmem:[%s11237_s27 + $0xc] sm:$0xf]  ;;  %766 = vst [vmem:[#allocation2 + $0x8] sm:$0xf] %v750_v23 }
  0x1d   : > { %s8058_s11 = sshll.u32 %s13080_s16, 1  ;;  %s8063_s8 = sshll.u32 %s745_s26, 2  ;;  %v754_v31 = vld [vmem:[%s11237_s27 + $0x10] sm:$0xf]  ;;  %767 = vst [vmem:[#allocation2 + $0x20] sm:$0xf] %v751_v24 }
  0x1e   : > { %s11270_s23 = scalar_lea.vmem %s13020_s12, %s8063_s8  ;;  %s8055_s13 = sshll.u32 %s11256_s24, 2  ;;  %v755_v34 = vld [vmem:[%s11237_s27 + $0x14] sm:$0xf]  ;;  %768 = vst [vmem:[#allocation2 + $0x38] sm:$0xf] %v752_v27  ;;  %v11286_v35 = vld [vmem:[%s11252_s22] sm:$0xff] }
  0x1f   : > { %s11282_s26 = sadd.s32 %s11214_s15, %s8058_s11  ;;  %v756_v36 = vld [vmem:[%s11237_s27 + $0x18] sm:$0xf]  ;;  %v757_v37 = vld [vmem:[%s11237_s27 + $0x1c] sm:$0xf]  ;;  %769 = vst [vmem:[#allocation2 + $0x50] sm:$0xf] %v753_v29  ;;  %s11322_s15 = scalar_lea.vmem %s13012_s4, %s8055_s13 }
  0x20   : > { %1029 = vmatpush.bf16.msra.mxu1 %v8143_v11  ;;  %v758_v38 = vld [vmem:[%s11237_s27 + $0x20] sm:$0xf]  ;;  %v759_v39 = vld [vmem:[%s11237_s27 + $0x24] sm:$0xf]  ;;  %770 = vst [vmem:[#allocation2 + $0x68] sm:$0xf] %v754_v31 }
  0x21   : > { %v10432_v40 = vld [vmem:[%s13014_s6 + $0xa4] sm:$0xf]  ;;  %v8160_v41 = vld [vmem:[%s13014_s6 + $0xb0] sm:$0xf0]  ;;  %s8059_s18 = sshll.u32 %s11282_s26, 2  ;;  %s11301_s11 = sadd.s32 4, %s11182_s29 }
  0x22   : > { %v760_v42 = vld [vmem:[%s11237_s27 + $0x28] sm:$0xf]  ;;  %771 = vst [vmem:[#allocation2 + $0x80] sm:$0xf] %v755_v34  ;;  %v761_v44 = vld [vmem:[%s11237_s27 + $0x2c] sm:$0xf]  ;;  %v8163_v53 = vor.u32 %v10432_v40, %v8160_v41  ;;  %s11344_s28 = scalar_lea.vmem %s13013_s5, %s8059_s18 }
  0x23   : > { %772 = vst [vmem:[#allocation2 + $0x98] sm:$0xf] %v756_v36  ;;  %v10441_v45 = vld [vmem:[%s13014_s6 + $0xec] sm:$0xf]  ;;  %v8200_v46 = vld [vmem:[%s13014_s6 + $0xf8] sm:$0xf0] }
  0x24   : > { %1030 = vmatpush.bf16.msra.mxu1 %v8127_v14  ;;  %773 = vst [vmem:[#allocation2 + $0xb0] sm:$0xf] %v757_v37  ;;  %v8203_v47 = vor.u32 %v10441_v45, %v8200_v46  ;;  %v10437_v48 = vld [vmem:[%s13014_s6 + $0xcc] sm:$0xf]  ;;  %v8184_v49 = vld [vmem:[%s13014_s6 + $0xd8] sm:$0xf0] }
  0x25   : > { %v762_v50 = vld [vmem:[%s11237_s27 + $0x30] sm:$0xf]  ;;  %v763_v51 = vld [vmem:[%s11237_s27 + $0x34] sm:$0xf]  ;;  %774 = vst [vmem:[#allocation2 + $0xc8] sm:$0xf] %v758_v38  ;;  %v8187_v56 = vor.u32 %v10437_v48, %v8184_v49 }
  0x26   : > { %v764_v52 = vld [vmem:[%s11237_s27 + $0x38] sm:$0xf]  ;;  %775 = vst [vmem:[#allocation2 + $0xe0] sm:$0xf] %v759_v39  ;;  %v10428_v54 = vld [vmem:[%s13014_s6 + $0x84] sm:$0xf]  ;;  %1098 = vmatpush.bf16.msra.mxu3 %v8203_v47 }
  0x27   : > { %v8144_v55 = vld [vmem:[%s13014_s6 + $0x90] sm:$0xf0]  ;;  %776 = vst [vmem:[#allocation2 + $0xf8] sm:$0xf] %v760_v42  ;;  %v10433_v57 = vld [vmem:[%s13014_s6 + $0xac] sm:$0xf] }
  0x28   : > { %1031 = vmatpush.bf16.msra.mxu1 %v8111_v17  ;;  %v8168_v58 = vld [vmem:[%s13014_s6 + $0xb8] sm:$0xf0]  ;;  %777 = vst [vmem:[#allocation2 + $0x110] sm:$0xf] %v761_v44  ;;  %v782_v60 = vld [vmem:[%s11322_s15] sm:$0xf]  ;;  %v8147_v2 = vor.u32 %v10428_v54, %v8144_v55 }
  0x29   : > { %v765_v59 = vld [vmem:[%s11237_s27 + $0x3c] sm:$0xf]  ;;  %778 = vst [vmem:[#allocation2 + $0x128] sm:$0xf] %v762_v50  ;;  %v783_v61 = vld [vmem:[%s11322_s15 + $0x4] sm:$0xf]  ;;  %v8171_v3 = vor.u32 %v10433_v57, %v8168_v58 }
  0x2a   : > { %v10424_v62 = vld [vmem:[%s13014_s6 + $0x64] sm:$0xf]  ;;  %v8128_v63 = vld [vmem:[%s13014_s6 + $0x70] sm:$0xf0]  ;;  %p663_p11 = scmp.lt.s32.totalorder %s11301_s11, 9  ;;  %s673_s26 = sadd.s32 1, %s11301_s11  ;;  %1099 = vmatpush.bf16.msra.mxu3 %v8187_v56 }
  0x2b   : > { %v8198_v0 = vld [vmem:[%s13014_s6 + $0xe8] sm:$0xf]  ;;  %779 = vst [vmem:[#allocation2 + $0x140] sm:$0xf] %v763_v51  ;;  %p11363_p12 = scmp.lt.s32.totalorder %s673_s26, 9  ;;  %v8131_v15 = vor.u32 %v10424_v62, %v8128_v63  ;;  %p8216_p13 = scmp.ne.s32.totalorder %s11042_s21, 0 }
  0x2c   : > { %1032 = vmatpush.bf16.msra.mxu1 %v8095_v20  ;;  %v784_v1 = vld [vmem:[%s11322_s15 + $0x8] sm:$0xf]  ;;  %v10443_v4 = vld [vmem:[%s13014_s6 + $0xf4] sm:$0xf0]  ;;  %780 = vst [vmem:[#allocation2 + $0x158] sm:$0xf] %v764_v52 }
  0x2d   : > { %v10429_v5 = vld [vmem:[%s13014_s6 + $0x8c] sm:$0xf]  ;;  %v8152_v6 = vld [vmem:[%s13014_s6 + $0x98] sm:$0xf0]  ;;  %v11376_v7 = vor.u32 %v10443_v4, %v8198_v0  ;;  %781 = vst [vmem:[#allocation2 + $0x170] sm:$0xf] %v765_v59 }
  0x2e   : > { %v785_v8 = vld [vmem:[%s11322_s15 + $0xc] sm:$0xf]  ;;  %v791_v9 = vld [vmem:[%s11344_s28] sm:$0xf]  ;;  %787 = vst [vmem:[#allocation2 + $0x188] sm:$0xf] %v782_v60  ;;  %1100 = vmatpush.bf16.msra.mxu3 %v8171_v3  ;;  %v8155_v16 = vor.u32 %v10429_v5, %v8152_v6 }
  0x2f   : > { %v792_v10 = vld [vmem:[%s11344_s28 + $0x4] sm:$0xf]  ;;  %v8112_v12 = vld [vmem:[%s13014_s6 + $0x50] sm:$0xf0]  ;;  %s11390_s8 = scalar_select %p663_p11, %s11301_s11, 9  ;;  %10964 = vmatpush.bf16.msra.mxu2 %v11376_v7  ;;  %v11397_v14 = vld [vmem:[%s11252_s22 + $0x8] sm:$0xff] }
  0x30   : > { %1033 = vmatpush.bf16.msra.mxu1 %v8079_v28  ;;  %v10420_v11 = vld [vmem:[%s13014_s6 + $0x44] sm:$0xf]  ;;  %v10425_v13 = vld [vmem:[%s13014_s6 + $0x6c] sm:$0xf]  ;;  %788 = vst [vmem:[#allocation2 + $0x1a0] sm:$0xf] %v783_v61 }
  0x31   : > { %s13084_s26 = smov (!%p11363_p12, %s673_s26), 9  ;;  %v8182_v17 = vld [vmem:[%s13014_s6 + $0xc8] sm:$0xf]  ;;  %789 = vst [vmem:[#allocation2 + $0x1b8] sm:$0xf] %v784_v1  ;;  %v8115_v25 = vor.u32 %v10420_v11, %v8112_v12  ;;  %s666_s9 = sadd.s32 %s11211_s14, %s11390_s8 }
  0x32   : > { %v8136_v18 = vld [vmem:[%s13014_s6 + $0x78] sm:$0xf0]  ;;  %v10439_v19 = vld [vmem:[%s13014_s6 + $0xd4] sm:$0xf0]  ;;  %790 = vst [vmem:[#allocation2 + $0x1d0] sm:$0xf] %v785_v8  ;;  %1101 = vmatpush.bf16.msra.mxu3 %v8155_v16  ;;  %s679_s24 = sadd.s32 %s11211_s14, %s13084_s26 }
  0x33   : > { %1034 = vmatmul.bf16.vlgmr.msra.gmra.mxu1 %v11286_v35  ;;  %v793_v20 = vld [vmem:[%s11344_s28 + $0x8] sm:$0xf]  ;;  %v794_v21 = vld [vmem:[%s11344_s28 + $0xc] sm:$0xf]  ;;  %v8183_v22 = vor.u32 %v10439_v19, %v8182_v17  ;;  %796 = vst [vmem:[#allocation2 + $0x1e8] sm:$0xf] %v791_v9  ;;  %v8139_v26 = vor.u32 %v10425_v13, %v8136_v18 }
  0x34   : > { %1050 = vmatpush.bf16.msrb.mxu1 %v8195_v32  ;;  %v10416_v23 = vld [vmem:[%s13014_s6 + $0x24] sm:$0xf]  ;;  %v8096_v24 = vld [vmem:[%s13014_s6 + $0x30] sm:$0xf0]  ;;  %797 = vst [vmem:[#allocation2 + $0x200] sm:$0xf] %v792_v10 }
  0x35   : > { %v10421_v27 = vld [vmem:[%s13014_s6 + $0x4c] sm:$0xf]  ;;  %v8120_v28 = vld [vmem:[%s13014_s6 + $0x58] sm:$0xf0]  ;;  %798 = vst [vmem:[#allocation2 + $0x218] sm:$0xf] %v793_v20  ;;  %10965 = vmatpush.bf16.msra.mxu2 %v8183_v22  ;;  %v8099_v34 = vor.u32 %v10416_v23, %v8096_v24 }
  0x36   : > { %v8166_v29 = vld [vmem:[%s13014_s6 + $0xa8] sm:$0xf]  ;;  %v10435_v30 = vld [vmem:[%s13014_s6 + $0xb4] sm:$0xf0]  ;;  %799 = vst [vmem:[#allocation2 + $0x230] sm:$0xf] %v794_v21  ;;  %1102 = vmatpush.bf16.msra.mxu3 %v8139_v26  ;;  %v8123_v36 = vor.u32 %v10421_v27, %v8120_v28 }
  0x37   : > { %v8167_v31 = vor.u32 %v10435_v30, %v8166_v29  ;;  %v8150_v32 = vld [vmem:[%s13014_s6 + $0x88] sm:$0xf]  ;;  %v10431_v33 = vld [vmem:[%s13014_s6 + $0x94] sm:$0xf0]  ;;  %s8046_s14 = sshll.u32 %s666_s9, 2  ;;  %s8048_s26 = sshll.u32 %s679_s24, 2 }
  0x38   : > { %1051 = vmatpush.bf16.msrb.mxu1 %v8179_v43  ;;  %v10412_v37 = vld [vmem:[%s13014_s6 + $0x4] sm:$0xf]  ;;  %v8080_v38 = vld [vmem:[%s13014_s6 + $0x10] sm:$0xf0]  ;;  %v10417_v39 = vld [vmem:[%s13014_s6 + $0x2c] sm:$0xf]  ;;  %v8151_v41 = vor.u32 %v10431_v33, %v8150_v32  ;;  %s668_s30 = scalar_lea.vmem %s13009_s1, %s8046_s14  ;;  %s681_s8 = scalar_lea.vmem %s13010_s2, %s8048_s26 }
  0x39   : > { %10966 = vmatpush.bf16.msra.mxu2 %v8167_v31  ;;  %v8104_v40 = vld [vmem:[%s13014_s6 + $0x38] sm:$0xf0]  ;;  %v8134_v42 = vld [vmem:[%s13014_s6 + $0x68] sm:$0xf]  ;;  %v10427_v43 = vld [vmem:[%s13014_s6 + $0x74] sm:$0xf0]  ;;  %v8083_v44 = vor.u32 %v10412_v37, %v8080_v38 }
  0x3a   : > { %1103 = vmatpush.bf16.msra.mxu3 %v8123_v36  ;;  %v8107_v45 = vor.u32 %v10417_v39, %v8104_v40  ;;  %v10413_v46 = vld [vmem:[%s13014_s6 + $0xc] sm:$0xf]  ;;  %v8088_v47 = vld [vmem:[%s13014_s6 + $0x18] sm:$0xf0]  ;;  %v8135_v48 = vor.u32 %v10427_v43, %v8134_v42  ;;  %v8118_v49 = vld [vmem:[%s13014_s6 + $0x48] sm:$0xf] }
  0x3b   : > { %v10423_v50 = vld [vmem:[%s13014_s6 + $0x54] sm:$0xf0]  ;;  %v8074_v51 = vld [vmem:[%s668_s30] sm:$0xf]  ;;  %v8102_v56 = vld [vmem:[%s13014_s6 + $0x28] sm:$0xf] }
  0x3c   : > { %1052 = vmatpush.bf16.msrb.mxu1 %v8163_v53  ;;  %v10411_v52 = vld [vmem:[%s681_s8 - $0x4] sm:$0xf0]  ;;  %v8091_v53 = vor.u32 %v10413_v46, %v8088_v47  ;;  %v8119_v54 = vor.u32 %v10423_v50, %v8118_v49  ;;  %v10419_v57 = vld [vmem:[%s13014_s6 + $0x34] sm:$0xf0]  ;;  %v8086_v59 = vld [vmem:[%s13014_s6 + $0x8] sm:$0xf] }
  0x3d   : > { %10967 = vmatpush.bf16.msra.mxu2 %v8151_v41  ;;  %v8075_v55 = vor.u32 %v10411_v52, %v8074_v51  ;;  %v8103_v58 = vor.u32 %v10419_v57, %v8102_v56  ;;  %v10415_v60 = vld [vmem:[%s13014_s6 + $0x14] sm:$0xf0]  ;;  %v838_v5 = vld [vmem:[%s13015_s7] sm:$0xf] }
  0x3e   : > { %1104 = vmatpush.bf16.msra.mxu3 %v8107_v45  ;;  %v8087_v61 = vor.u32 %v10415_v60, %v8086_v59  ;;  %v11511_v6 = vperm.slane %v838_v5, 0  ;;  %v11519_v12 = vperm.slane %v838_v5, 2  ;;  %v11521_v16 = vperm.slane %v838_v5, 3 }
  0x40   : > { %1053 = vmatpush.bf16.msrb.mxu1 %v8147_v2 }
  0x41   : > { %10968 = vmatpush.bf16.msra.mxu2 %v8135_v48 }
  0x42   : > { %1105 = vmatpush.bf16.msra.mxu3 %v8091_v53 }
  0x43   : > { %1039 = vmatmul.bf16.gmra.mxu1 %v11397_v14 }
  0x44   : > { %1054 = vmatpush.bf16.msrb.mxu1 %v8131_v15 }
  0x45   : > { %10969 = vmatpush.bf16.msra.mxu2 %v8119_v54  ;;  %1106 = vmatmul.bf16.vlgmr.msra.gmra.mxu3 %v11286_v35 }
  0x48   : > { %1055 = vmatpush.bf16.msrb.mxu1 %v8115_v25 }
  0x49   : > { %10970 = vmatpush.bf16.msra.mxu2 %v8103_v58 }
  0x4c   : > { %1056 = vmatpush.bf16.msrb.mxu1 %v8099_v34 }
  0x4d   : > { %10971 = vmatpush.bf16.msra.mxu2 %v8087_v61 }
  0x50   : > { %1057 = vmatpush.bf16.msrb.mxu1 %v8083_v44  ;;  %1087 = vmatmul.bf16.vlgmr.msra.gmra.mxu2 %v11397_v14 }
  0x53   : > { %1044 = vmatmul.bf16.gmra.mxu1 %v8075_v55 }
  0x54   : > { %1074 = vmatpush.bf16.msra.mxu1 %v11376_v7  ;;  %v11513_v7 = vperm.slane %v838_v5, 1 }
  0x55   : > { %1111 = vmatmul.bf16.gmra.mxu3 %v11397_v14 }
  0x58   : > { %1075 = vmatpush.bf16.msra.mxu1 %v8183_v22 }
  0x5c   : > { %1076 = vmatpush.bf16.msra.mxu1 %v8167_v31 }
  0x60   : > { %1077 = vmatpush.bf16.msra.mxu1 %v8151_v41  ;;  %1092 = vmatmul.bf16.gmra.mxu2 %v8075_v55 }
  0x63   : > { %1058 = vmatmul.bf16.vlgmr.msrb.gmra.mxu1 %v11286_v35 }
  0x64   : > { %1078 = vmatpush.bf16.msra.mxu1 %v8135_v48 }
  0x65   : > { %1116 = vmatmul.bf16.gmra.mxu3 %v8075_v55 }
  0x68   : > { %1079 = vmatpush.bf16.msra.mxu1 %v8119_v54 }
  0x6c   : > { %1080 = vmatpush.bf16.msra.mxu1 %v8103_v58 }
  0x70   : > { %1081 = vmatpush.bf16.msra.mxu1 %v8087_v61 }
  0x73   : > { %1063 = vmatmul.bf16.gmra.mxu1 %v11397_v14 }
  0x83   : > { %1068 = vmatmul.bf16.gmra.mxu1 %v8075_v55 }
  0x93   : > { %1082 = vmatmul.bf16.vlgmr.msra.gmra.mxu1 %v11286_v35 }
  0xb0   : > { %v1035_v62 = vpop.f32.mrf.mxu1 }
  0xb1   : > { %v1036_v10 = vadd.f32 %v1035_v62, %v11511_v6 }
  0xb8   : > { %v1037_v63 = vpop.f32.mrf.mxu1 }
  0xb9   : > { %v1038_v24 = vadd.f32 %v1037_v63, %v11511_v6 }
  0xc0   : > { %v1040_v0 = vpop.f32.mrf.mxu1 }
  0xc1   : > { %v1041_v41 = vadd.f32 %v1040_v0, %v11511_v6 }
  0xc8   : > { %v11500_v1 = vpop.f32.mrf.mxu1  ;;  %v11504_v3 = vpop.f32.mrf.mxu3 }
  0xc9   : > { %v1043_v58 = vadd.f32 %v11500_v1, %v11511_v6 }
  0xd0   : > { %v11502_v2 = vpop.f32.mrf.mxu1  ;;  %v11515_v35 = vpop.f32.mrf.mxu3 }
  0xd3   : > { %v1088_v9 = vpop.f32.mrf.mxu2 }
  0xd4   : > { %v1089_v17 = vadd.f32 %v1088_v9, %v11519_v12 }
  0xd8   : > { %v11506_v4 = vpop.f32.mrf.mxu1  ;;  %v1112_v20 = vpop.f32.mrf.mxu3 }
  0xd9   : > { %v1113_v22 = vadd.f32 %v1112_v20, %v11521_v16 }
  0xdb   : > { %v1090_v23 = vpop.f32.mrf.mxu2  ;;  %v8212_v26 = vpack.i.bf16 %v1113_v22, %v1089_v17 }
  0xdc   : > { %v1091_v33 = vadd.f32 %v1090_v23, %v11519_v12 }
  0xdd   : > { %v1226_v28 = vunpack.c.l.b16 %v8212_v26  ;;  %v1227_v29 = vunpack.c.h.b16 %v8212_v26 }
  0xdf   : > { %v1228_v32 = vpack.c.b16 %v1226_v28, %v1226_v28  ;;  %v1229_v37 = vpack.c.b16 %v1227_v29, %v1227_v29 }
  0xe0   : > { %v1059_v8 = vpop.f32.mrf.mxu1  ;;  %v1114_v38 = vpop.f32.mrf.mxu3 }
  0xe1   : > { %v1060_v11 = vadd.f32 %v1059_v8, %v11513_v7  ;;  %1233 = vst [vmem:[#allocation2 + $0xfc] sm:$0xf] %v1228_v32  ;;  %v1115_v40 = vadd.f32 %v1114_v38, %v11521_v16 }
  0xe2   : > { %1234 = vst [vmem:[#allocation2 + $0x114] sm:$0xf] %v1229_v37 }
  0xe3   : > { %v8204_v13 = vpack.i.bf16 %v1060_v11, %v1036_v10  ;;  %v1093_v43 = vpop.f32.mrf.mxu2  ;;  %v8213_v44 = vpack.i.bf16 %v1115_v40, %v1091_v33 }
  0xe4   : > { %v1094_v51 = vadd.f32 %v1093_v43, %v11519_v12 }
  0xe5   : > { %v1182_v14 = vunpack.c.l.b16 %v8204_v13  ;;  %v1183_v15 = vunpack.c.h.b16 %v8204_v13  ;;  %v1244_v46 = vunpack.c.l.b16 %v8213_v44  ;;  %v1245_v47 = vunpack.c.h.b16 %v8213_v44 }
  0xe6   : > { %v1110_v44 = vadd.f32 %v11515_v35, %v11521_v16 }
  0xe7   : > { %v1184_v18 = vpack.c.b16 %v1182_v14, %v1182_v14  ;;  %v1185_v19 = vpack.c.b16 %v1183_v15, %v1183_v15  ;;  %v1246_v50 = vpack.c.b16 %v1244_v46, %v1244_v46  ;;  %v1247_v54 = vpack.c.b16 %v1245_v47, %v1245_v47 }
  0xe8   : > { %v1061_v21 = vpop.f32.mrf.mxu1  ;;  %v1117_v55 = vpop.f32.mrf.mxu3 }
  0xe9   : > { %1188 = vst [vmem:[#allocation2 + $0xc] sm:$0xf] %v1184_v18  ;;  %v1062_v25 = vadd.f32 %v1061_v21, %v11513_v7  ;;  %v1118_v57 = vadd.f32 %v1117_v55, %v11521_v16  ;;  %v1046_v18 = vadd.f32 %v11502_v2, %v11511_v6  ;;  %v1048_v2 = vadd.f32 %v11506_v4, %v11511_v6 }
  0xea   : > { %1189 = vst [vmem:[#allocation2 + $0x24] sm:$0xf] %v1185_v19 }
  0xeb   : > { %v8205_v27 = vpack.i.bf16 %v1062_v25, %v1038_v24  ;;  %1251 = vst [vmem:[#allocation2 + $0x15c] sm:$0xf] %v1246_v50  ;;  %v8214_v60 = vpack.i.bf16 %v1118_v57, %v1094_v51  ;;  %v1095_v62 = vpop.f32.mrf.mxu2 }
  0xec   : > { %1252 = vst [vmem:[#allocation2 + $0x174] sm:$0xf] %v1247_v54  ;;  %v1096_v10 = vadd.f32 %v1095_v62, %v11519_v12 }
  0xed   : > { %v1199_v30 = vunpack.c.l.b16 %v8205_v27  ;;  %v1200_v31 = vunpack.c.h.b16 %v8205_v27  ;;  %v1261_v63 = vunpack.c.l.b16 %v8214_v60  ;;  %v1262_v0 = vunpack.c.h.b16 %v8214_v60 }
  0xef   : > { %v1201_v34 = vpack.c.b16 %v1199_v30, %v1199_v30  ;;  %v1202_v36 = vpack.c.b16 %v1200_v31, %v1200_v31  ;;  %v1263_v9 = vpack.c.b16 %v1261_v63, %v1261_v63  ;;  %v1264_v14 = vpack.c.b16 %v1262_v0, %v1262_v0 }
  0xf0   : > { %v1064_v39 = vpop.f32.mrf.mxu1  ;;  %v1119_v15 = vpop.f32.mrf.mxu3 }
  0xf1   : > { %1206 = vst [vmem:[#allocation2 + $0x6c] sm:$0xf] %v1201_v34  ;;  %v1065_v42 = vadd.f32 %v1064_v39, %v11513_v7  ;;  %v1120_v17 = vadd.f32 %v1119_v15, %v11521_v16  ;;  %v1108_v39 = vadd.f32 %v11504_v3, %v11521_v16 }
  0xf2   : > { %1207 = vst [vmem:[#allocation2 + $0x84] sm:$0xf] %v1202_v36 }
  0xf3   : > { %v8206_v45 = vpack.i.bf16 %v1065_v42, %v1041_v41  ;;  %1268 = vst [vmem:[#allocation2 + $0x1bc] sm:$0xf] %v1263_v9  ;;  %v8215_v20 = vpack.i.bf16 %v1120_v17, %v1096_v10 }
  0xf4   : > { %1269 = vst [vmem:[#allocation2 + $0x1d4] sm:$0xf] %v1264_v14 }
  0xf5   : > { %v1217_v48 = vunpack.c.l.b16 %v8206_v45  ;;  %v1218_v49 = vunpack.c.h.b16 %v8206_v45  ;;  %v1278_v22 = vunpack.c.l.b16 %v8215_v20  ;;  %v1279_v23 = vunpack.c.h.b16 %v8215_v20 }
  0xf7   : > { %v1219_v52 = vpack.c.b16 %v1217_v48, %v1217_v48  ;;  %v1220_v53 = vpack.c.b16 %v1218_v49, %v1218_v49  ;;  %v1280_v26 = vpack.c.b16 %v1278_v22, %v1278_v22  ;;  %v1281_v29 = vpack.c.b16 %v1279_v23, %v1279_v23 }
  0xf8   : > { %v1066_v56 = vpop.f32.mrf.mxu1 }
  0xf9   : > { %1224 = vst [vmem:[#allocation2 + $0xcc] sm:$0xf] %v1219_v52  ;;  %v1067_v59 = vadd.f32 %v1066_v56, %v11513_v7 }
  0xfa   : > { %1225 = vst [vmem:[#allocation2 + $0xe4] sm:$0xf] %v1220_v53 }
  0xfb   : > { %v8207_v61 = vpack.i.bf16 %v1067_v59, %v1043_v58  ;;  %1285 = vst [vmem:[#allocation2 + $0x21c] sm:$0xf] %v1280_v26 }
  0xfc   : > { %1286 = vst [vmem:[#allocation2 + $0x234] sm:$0xf] %v1281_v29 }
  0xfd   : > { %v1235_v5 = vunpack.c.l.b16 %v8207_v61  ;;  %v1236_v8 = vunpack.c.h.b16 %v8207_v61 }
  0xff   : > { %v1237_v11 = vpack.c.b16 %v1235_v5, %v1235_v5  ;;  %v1238_v13 = vpack.c.b16 %v1236_v8, %v1236_v8 }
 0x100   : > { %v1069_v1 = vpop.f32.mrf.mxu1 }
 0x101   : > { %1242 = vst [vmem:[#allocation2 + $0x12c] sm:$0xf] %v1237_v11  ;;  %v1070_v19 = vadd.f32 %v1069_v1, %v11513_v7 }
 0x102   : > { %1243 = vst [vmem:[#allocation2 + $0x144] sm:$0xf] %v1238_v13 }
 0x103   : > { %v8208_v21 = vpack.i.bf16 %v1070_v19, %v1046_v18 }
 0x105   : > { %v1253_v24 = vunpack.c.l.b16 %v8208_v21  ;;  %v1254_v25 = vunpack.c.h.b16 %v8208_v21 }
 0x107   : > { %v1255_v27 = vpack.c.b16 %v1253_v24, %v1253_v24  ;;  %v1256_v28 = vpack.c.b16 %v1254_v25, %v1254_v25 }
 0x108   : > { %v1071_v30 = vpop.f32.mrf.mxu1 }
 0x109   : > { %1259 = vst [vmem:[#allocation2 + $0x18c] sm:$0xf] %v1255_v27  ;;  %v1072_v31 = vadd.f32 %v1071_v30, %v11513_v7 }
 0x10a   : > { %1260 = vst [vmem:[#allocation2 + $0x1a4] sm:$0xf] %v1256_v28 }
 0x10b   : > { %v8209_v32 = vpack.i.bf16 %v1072_v31, %v1048_v2 }
 0x10d   : > { %v1270_v33 = vunpack.c.l.b16 %v8209_v32  ;;  %v1271_v34 = vunpack.c.h.b16 %v8209_v32 }
 0x10f   : > { %v1272_v36 = vpack.c.b16 %v1270_v33, %v1270_v33  ;;  %v1273_v37 = vpack.c.b16 %v1271_v34, %v1271_v34 }
 0x110   : > { %v1083_v38 = vpop.f32.mrf.mxu1 }
 0x111   : > { %1276 = vst [vmem:[#allocation2 + $0x1ec] sm:$0xf] %v1272_v36  ;;  %v1084_v40 = vadd.f32 %v1083_v38, %v11519_v12 }
 0x112   : > { %1277 = vst [vmem:[#allocation2 + $0x204] sm:$0xf] %v1273_v37 }
 0x113   : > { %v8210_v41 = vpack.i.bf16 %v1108_v39, %v1084_v40 }
 0x115   : > { %v1190_v4 = vunpack.c.l.b16 %v8210_v41  ;;  %v1191_v6 = vunpack.c.h.b16 %v8210_v41 }
 0x117   : > { %v1192_v42 = vpack.c.b16 %v1190_v4, %v1190_v4  ;;  %v1193_v7 = vpack.c.b16 %v1191_v6, %v1191_v6 }
 0x118   : > { %v1085_v43 = vpop.f32.mrf.mxu1 }
 0x119   : > { %1197 = vst [vmem:[#allocation2 + $0x3c] sm:$0xf] %v1192_v42  ;;  %v1086_v45 = vadd.f32 %v1085_v43, %v11519_v12 }
 0x11a   : > { %1198 = vst [vmem:[#allocation2 + $0x54] sm:$0xf] %v1193_v7 }
 0x11b   : > { %v8211_v46 = vpack.i.bf16 %v1110_v44, %v1086_v45 }
 0x11d   : > { %v1208_v47 = vunpack.c.l.b16 %v8211_v46  ;;  %v1209_v3 = vunpack.c.h.b16 %v8211_v46 }
 0x11e   : > { %1290 = sbr.rel (%p8216_p13) target bundleno = 296 (0x128), region = 72 }
 0x11f   : > { %v1210_v48 = vpack.c.b16 %v1208_v47, %v1208_v47  ;;  %v1211_v49 = vpack.c.b16 %v1209_v3, %v1209_v3 }
 0x121   : > { %1215 = vst [vmem:[#allocation2 + $0x9c] sm:$0xf] %v1210_v48 }
 0x122   : > { %1216 = vst [vmem:[#allocation2 + $0xb4] sm:$0xf] %v1211_v49 }
 0x123   : > { %v11060_v50 = vmov 0  }
 0x124   : > { %1291 = vst [vmem:[#allocation2 + $0x8] sm:$0xff] %v11060_v50 }
 0x125   : > { %1292 = vst [vmem:[#allocation2 + $0x20] sm:$0xff] %v11060_v50 }
 0x126   : > { %1293 = vst [vmem:[#allocation2 + $0x38] sm:$0xff] %v11060_v50 }
 0x127   : > { %1294 = vst [vmem:[#allocation2 + $0x50] sm:$0xff] %v11060_v50 }
 0x128 PF: > { %p8217_p0 = scmp.ne.s32.totalorder %s11042_s21, 1 }
 0x12a   : > { %1298 = sbr.rel (%p8217_p0) target bundleno = 308 (0x134), region = 76 }
 0x12f   : > { %v11061_v35 = vmov 0  }
 0x130   : > { %1299 = vst [vmem:[#allocation2 + $0x1e8] sm:$0xff] %v11061_v35 }
 0x131   : > { %1300 = vst [vmem:[#allocation2 + $0x200] sm:$0xff] %v11061_v35 }
 0x132   : > { %1301 = vst [vmem:[#allocation2 + $0x218] sm:$0xff] %v11061_v35 }
 0x133   : > { %1302 = vst [vmem:[#allocation2 + $0x230] sm:$0xff] %v11061_v35 }
 0x134 PF: > { %s13036_s11 = sld [smem:[#allocation10_spill]]  ;;  %vm1327_vm0 = vsmask.f32 256  ;;  %vm1546_vm1 = vcmask 1043456   ;;  %vm1547_vm2 = vsmask.f32 7938 }
 0x135   : > { %v1303_v63 = vld [vmem:[#allocation2 + $0x8] sm:$0xff]  ;;  %vm1549_vm3 = vcmask 1047556   ;;  %vm1550_vm4 = vsmask.f32 7954  ;;  %v1304_v8 = vld [vmem:[#allocation2 + $0x20] sm:$0xff]  ;;  %vm11609_vm6 = vmand %vm1546_vm1, %vm1547_vm2  ;;  %vm1601_vm9 = vcmask 1040384  }
 0x136   : > { %v1331_v9 = vshrl.u32 %v1303_v63, 16  ;;  %v1334_v10 = vshll.u32 %v1303_v63, 16  ;;  %vm1328_vm5 = vsmask.f32 4368  ;;  %v1339_v13 = vshrl.u32 %v1304_v8, 16  ;;  %vm1551_vm7 = vmand %vm1549_vm3, %vm1550_vm4  ;;  %v1553_v22 = vld [vmem:[#allocation2] sm:$0xff] }
 0x137   : > { %v1342_v14 = vshll.u32 %v1304_v8, 16  ;;  %vm11626_vm8 = vmor %vm1551_vm7, %vm11609_vm6  ;;  %vm1603_vm11 = vcmask 1044484   ;;  %vm1604_vm12 = vsmask.f32 4352  ;;  %v1305_v26 = vld [vmem:[#allocation2 + $0x38] sm:$0xff]  ;;  %v1306_v27 = vld [vmem:[#allocation2 + $0x50] sm:$0xff] }
 0x138   : > { %v1333_v18 = vrot.slane %v1331_v9, 7  ;;  %v1341_v20 = vrot.slane %v1339_v13, 7  ;;  %vm11632_vm10 = vmor %vm1327_vm0, %vm1328_vm5  ;;  %v1347_v29 = vshrl.u32 %v1305_v26, 16  ;;  %v1350_v30 = vshll.u32 %v1305_v26, 16  ;;  %v1307_v31 = vld [vmem:[#allocation2 + $0x68] sm:$0xff]  ;;  %v1557_v7 = vld [vmem:[#allocation2 + $0x30] sm:$0xff] }
 0x139   : > { %v1355_v2 = vshrl.u32 %v1306_v27, 16  ;;  %v1358_v34 = vshll.u32 %v1306_v27, 16  ;;  %v1363_v36 = vshrl.u32 %v1307_v31, 16  ;;  %v1366_v37 = vshll.u32 %v1307_v31, 16  ;;  %vm11654_vm13 = vmand %vm1601_vm9, %vm1327_vm0  ;;  %v1308_v43 = vld [vmem:[#allocation2 + $0x80] sm:$0xff]  ;;  %s13061_s29 = sld [smem:[#allocation11_spill]] }
 0x13a   : > { %v10511_v12 = vld [vmem:[%s13036_s11 + $0x38] sm:$0xff]  ;;  %v10510_v53 = vld [vmem:[%s13036_s11 + $0x30] sm:$0xff]  ;;  %v10509_v57 = vld [vmem:[%s13036_s11 + $0x28] sm:$0xff]  ;;  %v1336_v24 = vor.u32 %v1334_v10, %v1333_v18  ;;  %v1337_v25 = vrot.slane %v1333_v18, 4  ;;  %v1344_v28 = vor.u32 %v1342_v14, %v1341_v20  ;;  %v1349_v4 = vrot.slane %v1347_v29, 7 }
 0x13b   : > { %v10519_v16 = vld [vmem:[%s13036_s11 + $0x78] sm:$0xff]  ;;  %2761 = vmatpush.bf16.msra.mxu0 %v10511_v12  ;;  %v10518_v54 = vld [vmem:[%s13036_s11 + $0x70] sm:$0xff]  ;;  %v10517_v58 = vld [vmem:[%s13036_s11 + $0x68] sm:$0xff]  ;;  %v1357_v6 = vrot.slane %v1355_v2, 7  ;;  %v1365_v44 = vrot.slane %v1363_v36, 7  ;;  %v1371_v50 = vshrl.u32 %v1308_v43, 16 }
 0x13c   : > { %v10527_v51 = vld [vmem:[%s13036_s11 + $0xb8] sm:$0xff]  ;;  %2820 = vmatpush.bf16.msrb.mxu1 %v10519_v16  ;;  %v10526_v55 = vld [vmem:[%s13036_s11 + $0xb0] sm:$0xff]  ;;  %v10525_v59 = vld [vmem:[%s13036_s11 + $0xa8] sm:$0xff]  ;;  %v1554_v33 = vsel %vm11626_vm8, %v1336_v24, %v1553_v22  ;;  %v1345_v41 = vsel %vm11632_vm10, %v1337_v25, %v1344_v28  ;;  %v1352_v46 = vor.u32 %v1350_v30, %v1349_v4  ;;  %v1353_v47 = vrot.slane %v1349_v4, 4 }
 0x13d   : > { %v10535_v52 = vld [vmem:[%s13036_s11 + $0xf8] sm:$0xff]  ;;  %2879 = vmatpush.bf16.msrb.mxu2 %v10527_v51  ;;  %v10534_v56 = vld [vmem:[%s13036_s11 + $0xf0] sm:$0xff]  ;;  %v10533_v60 = vld [vmem:[%s13036_s11 + $0xe8] sm:$0xff]  ;;  %1555 = vst [vmem:[#allocation2] sm:$0xff] %v1554_v33  ;;  %v1360_v3 = vor.u32 %v1358_v34, %v1357_v6  ;;  %v1368_v49 = vor.u32 %v1366_v37, %v1365_v44  ;;  %vm1924_vm0 = vsmask.f32 7424 }
 0x13e   : > { %2938 = vmatpush.bf16.msrb.mxu3 %v10535_v52  ;;  %v10508_v61 = vld [vmem:[%s13036_s11 + $0x20] sm:$0xff]  ;;  %v10507_v11 = vld [vmem:[%s13036_s11 + $0x18] sm:$0xff]  ;;  %v10506_v32 = vld [vmem:[%s13036_s11 + $0x10] sm:$0xff]  ;;  %1556 = vst [vmem:[#allocation2 + $0x18] sm:$0xff] %v1345_v41  ;;  %v1558_v51 = vsel %vm11626_vm8, %v1352_v46, %v1557_v7  ;;  %v1374_v52 = vshll.u32 %v1308_v43, 16  ;;  %vm1977_vm9 = vcmask 1047559  }
 0x13f   : > { %2762 = vmatpush.bf16.msra.mxu0 %v10510_v53  ;;  %v10516_v62 = vld [vmem:[%s13036_s11 + $0x60] sm:$0xff]  ;;  %v10515_v1 = vld [vmem:[%s13036_s11 + $0x58] sm:$0xff]  ;;  %v10514_v38 = vld [vmem:[%s13036_s11 + $0x50] sm:$0xff]  ;;  %v1361_v16 = vsel %vm11632_vm10, %v1353_v47, %v1360_v3  ;;  %1559 = vst [vmem:[#allocation2 + $0x30] sm:$0xff] %v1558_v51  ;;  %vm1975_vm7 = vsmask.f32 7950 }
 0x140   : > { %2821 = vmatpush.bf16.msrb.mxu1 %v10518_v54  ;;  %v10524_v0 = vld [vmem:[%s13036_s11 + $0xa0] sm:$0xff]  ;;  %v10523_v17 = vld [vmem:[%s13036_s11 + $0x98] sm:$0xff]  ;;  %v10522_v39 = vld [vmem:[%s13036_s11 + $0x90] sm:$0xff]  ;;  %1560 = vst [vmem:[#allocation2 + $0x48] sm:$0xff] %v1361_v16 }
 0x141   : > { %2880 = vmatpush.bf16.msrb.mxu2 %v10526_v55  ;;  %v10532_v5 = vld [vmem:[%s13036_s11 + $0xe0] sm:$0xff]  ;;  %v10531_v19 = vld [vmem:[%s13036_s11 + $0xd8] sm:$0xff]  ;;  %v10530_v40 = vld [vmem:[%s13036_s11 + $0xd0] sm:$0xff] }
 0x142   : > { %2939 = vmatpush.bf16.msrb.mxu3 %v10534_v56  ;;  %vm11660_vm14 = vmand %vm1603_vm11, %vm1604_vm12  ;;  %v1561_v48 = vld [vmem:[#allocation2 + $0x60] sm:$0xff]  ;;  %v10505_v35 = vld [vmem:[%s13036_s11 + $0x8] sm:$0xff]  ;;  %v1369_v56 = vrot.slane %v1365_v44, 4  ;;  %vm1668_vm11 = vsmask.f32 7440 }
 0x143   : > { %2763 = vmatpush.bf16.msra.mxu0 %v10509_v57  ;;  %v10513_v12 = vld [vmem:[%s13036_s11 + $0x48] sm:$0xff]  ;;  %vm11684_vm15 = vmor %vm11660_vm14, %vm11654_vm13  ;;  %v1373_v57 = vrot.slane %v1371_v50, 7  ;;  %v10448_v8 = vld [vmem:[#allocation2 + $0x1c] sm:$0xf0]  ;;  %vm1978_vm14 = vsmask.f32 7966 }
 0x144   : > { %2822 = vmatpush.bf16.msrb.mxu1 %v10517_v58  ;;  %v10521_v53 = vld [vmem:[%s13036_s11 + $0x88] sm:$0xff]  ;;  %v1562_v58 = vsel %vm11626_vm8, %v1368_v49, %v1561_v48  ;;  %v1309_v10 = vld [vmem:[#allocation2 + $0x98] sm:$0xff]  ;;  %v8230_v13 = vld [vmem:[#allocation2 + $0x20] sm:$0xf0] }
 0x145   : > { %2881 = vmatpush.bf16.msrb.mxu2 %v10525_v59  ;;  %v10529_v54 = vld [vmem:[%s13036_s11 + $0xc8] sm:$0xff]  ;;  %v10504_v59 = vld [vmem:[%s13036_s11] sm:$0xff]  ;;  %1563 = vst [vmem:[#allocation2 + $0x60] sm:$0xff] %v1562_v58  ;;  %v10551_v18 = vld [vmem:[%s13036_s11 + $0x178] sm:$0xff]  ;;  %v1382_v20 = vshll.u32 %v1309_v10, 16 }
 0x146   : > { %2940 = vmatpush.bf16.msrb.mxu3 %v10533_v60  ;;  %v10512_v60 = vld [vmem:[%s13036_s11 + $0x40] sm:$0xff]  ;;  %v8228_v63 = vld [vmem:[#allocation2 + $0x8] sm:$0xf]  ;;  %v10445_v9 = vld [vmem:[#allocation2 + $0xc] sm:$0xf] }
 0x147   : > { %2764 = vmatpush.bf16.msra.mxu0 %v10508_v61  ;;  %v10520_v61 = vld [vmem:[%s13036_s11 + $0x80] sm:$0xff]  ;;  %v8229_v22 = vor.u32 %v10448_v8, %v8228_v63  ;;  %v8233_v24 = vor.u32 %v10445_v9, %v8230_v13  ;;  %v1610_v25 = vld [vmem:[#allocation2 + $0x30] sm:$0x11]  ;;  %v10447_v26 = vld [vmem:[#allocation2 + $0x14] sm:$0xf0] }
 0x148   : > { %2823 = vmatpush.bf16.msrb.mxu1 %v10516_v62  ;;  %v1607_v62 = vld [vmem:[#allocation2] sm:$0x11]  ;;  %v8222_v27 = vld [vmem:[#allocation2 + $0x18] sm:$0xf0]  ;;  %v1611_v28 = vsel %vm11684_vm15, 0, %v1610_v25  ;;  %v10542_v29 = vld [vmem:[%s13036_s11 + $0x130] sm:$0xff] }
 0x149   : > { %2882 = vmatpush.bf16.msrb.mxu2 %v10524_v0  ;;  %v1376_v0 = vor.u32 %v1374_v52, %v1373_v57  ;;  %1612 = vst [vmem:[#allocation2 + $0x30] sm:$0x11] %v1611_v28  ;;  %v10550_v2 = vld [vmem:[%s13036_s11 + $0x170] sm:$0xff]  ;;  %v10549_v41 = vld [vmem:[%s13036_s11 + $0x168] sm:$0xff]  ;;  %v8252_v45 = vld [vmem:[#allocation2 + $0x38] sm:$0xf] }
 0x14a   : > { %2941 = vmatpush.bf16.msrb.mxu3 %v10532_v5  ;;  %v1608_v5 = vsel %vm11684_vm15, 0, %v1607_v62  ;;  %v1310_v4 = vld [vmem:[#allocation2 + $0xb0] sm:$0xff]  ;;  %v1311_v3 = vld [vmem:[#allocation2 + $0xc8] sm:$0xff]  ;;  %v10451_v48 = vld [vmem:[#allocation2 + $0x3c] sm:$0xf] }
 0x14b   : > { %2765 = vmatpush.bf16.msra.mxu0 %v10507_v11  ;;  %v10528_v11 = vld [vmem:[%s13036_s11 + $0xc0] sm:$0xff]  ;;  %1609 = vst [vmem:[#allocation2] sm:$0x11] %v1608_v5  ;;  %v1377_v14 = vsel %vm11632_vm10, %v1369_v56, %v1376_v0  ;;  %v1387_v6 = vshrl.u32 %v1310_v4, 16  ;;  %v1390_v7 = vshll.u32 %v1310_v4, 16  ;;  %v1395_v50 = vshrl.u32 %v1311_v3, 16  ;;  %vm11813_vm2 = vmand %vm1549_vm3, %vm1924_vm0 }
 0x14c   : > { %2824 = vmatpush.bf16.msrb.mxu1 %v10515_v1  ;;  %v1379_v1 = vshrl.u32 %v1309_v10, 16  ;;  %1564 = vst [vmem:[#allocation2 + $0x78] sm:$0xff] %v1377_v14  ;;  %v1613_v31 = vld [vmem:[#allocation2 + $0x60] sm:$0x11]  ;;  %v10454_v46 = vld [vmem:[#allocation2 + $0x4c] sm:$0xf0] }
 0x14d   : > { %2883 = vmatpush.bf16.msrb.mxu2 %v10523_v17  ;;  %v10543_v17 = vld [vmem:[%s13036_s11 + $0x138] sm:$0xff]  ;;  %v1614_v33 = vsel %vm11684_vm15, 0, %v1613_v31  ;;  %v1389_v44 = vrot.slane %v1387_v6, 7  ;;  %v8254_v49 = vld [vmem:[#allocation2 + $0x50] sm:$0xf0]  ;;  %v8253_v58 = vor.u32 %v10454_v46, %v8252_v45  ;;  %v1312_v5 = vld [vmem:[#allocation2 + $0xe0] sm:$0xff] }
 0x14e   : > { %2942 = vmatpush.bf16.msrb.mxu3 %v10531_v19  ;;  %v1381_v19 = vrot.slane %v1379_v1, 7  ;;  %1615 = vst [vmem:[#allocation2 + $0x60] sm:$0x11] %v1614_v33  ;;  %v8246_v51 = vld [vmem:[#allocation2 + $0x48] sm:$0xf0]  ;;  %v10540_v8 = vld [vmem:[%s13036_s11 + $0x120] sm:$0xff] }
 0x14f   : > { %2766 = vmatpush.bf16.msra.mxu0 %v10506_v32  ;;  %v1565_v32 = vld [vmem:[#allocation2 + $0x90] sm:$0xff]  ;;  %v1392_v47 = vor.u32 %v1390_v7, %v1389_v44  ;;  %v10548_v9 = vld [vmem:[%s13036_s11 + $0x160] sm:$0xff]  ;;  %v1403_v10 = vshrl.u32 %v1312_v5, 16  ;;  %v8276_v13 = vld [vmem:[#allocation2 + $0x68] sm:$0xf] }
 0x150   : > { %2825 = vmatpush.bf16.msrb.mxu1 %v10514_v38  ;;  %v1384_v30 = vor.u32 %v1382_v20, %v1381_v19  ;;  %v1385_v43 = vrot.slane %v1381_v19, 4  ;;  %v8244_v56 = vld [vmem:[#allocation2 + $0x30] sm:$0xf]  ;;  %v10450_v57 = vld [vmem:[#allocation2 + $0x34] sm:$0xf] }
 0x151   : > { %2884 = vmatpush.bf16.msrb.mxu2 %v10522_v39  ;;  %v8249_v63 = vor.u32 %v10450_v57, %v8246_v51  ;;  %v1405_v1 = vrot.slane %v1403_v10, 7  ;;  %v10457_v19 = vld [vmem:[#allocation2 + $0x6c] sm:$0xf]  ;;  %v8300_v45 = vld [vmem:[#allocation2 + $0x98] sm:$0xf] }
 0x152   : > { %2943 = vmatpush.bf16.msrb.mxu3 %v10530_v40  ;;  %v8220_v34 = vld [vmem:[#allocation2] sm:$0xf]  ;;  %v10444_v36 = vld [vmem:[#allocation2 + $0x4] sm:$0xf]  ;;  %v1566_v37 = vsel %vm11626_vm8, %v1384_v30, %v1565_v32  ;;  %v10541_v40 = vld [vmem:[%s13036_s11 + $0x128] sm:$0xff] }
 0x153   : > { %2767 = vmatpush.bf16.msra.mxu0 %v10505_v35  ;;  %v8221_v38 = vor.u32 %v10447_v26, %v8220_v34  ;;  %v8225_v39 = vor.u32 %v10444_v36, %v8222_v27  ;;  %1567 = vst [vmem:[#allocation2 + $0x90] sm:$0xff] %v1566_v37  ;;  %v10453_v35 = vld [vmem:[#allocation2 + $0x44] sm:$0xf0]  ;;  %v10459_v27 = vld [vmem:[#allocation2 + $0x74] sm:$0xf0]  ;;  %v1573_v37 = vld [vmem:[#allocation2 + $0xf0] sm:$0xff] }
 0x154   : > { %2826 = vmatpush.bf16.msrb.mxu1 %v10513_v12  ;;  %v1393_v12 = vsel %vm11632_vm10, %v1385_v43, %v1392_v47  ;;  %v8245_v62 = vor.u32 %v10453_v35, %v8244_v56  ;;  %v8270_v28 = vld [vmem:[#allocation2 + $0x78] sm:$0xf0]  ;;  %v10466_v46 = vld [vmem:[#allocation2 + $0xac] sm:$0xf0]  ;;  %vm1667_vm3 = vsmask.f32 3328 }
 0x155   : > { %2885 = vmatpush.bf16.msrb.mxu2 %v10521_v53  ;;  %1568 = vst [vmem:[#allocation2 + $0xa8] sm:$0xff] %v1393_v12  ;;  %v1397_v53 = vrot.slane %v1395_v50, 7  ;;  %v8268_v31 = vld [vmem:[#allocation2 + $0x60] sm:$0xf]  ;;  %v10456_v32 = vld [vmem:[#allocation2 + $0x64] sm:$0xf]  ;;  %v8301_v57 = vor.u32 %v10466_v46, %v8300_v45  ;;  %vm11826_vm4 = vmand %vm1546_vm1, %vm1667_vm3 }
 0x156   : > { %2944 = vmatpush.bf16.msrb.mxu3 %v10529_v54  ;;  %v1398_v54 = vshll.u32 %v1311_v3, 16  ;;  %v10463_v47 = vld [vmem:[#allocation2 + $0x9c] sm:$0xf]  ;;  %v8302_v50 = vld [vmem:[#allocation2 + $0xb0] sm:$0xf0]  ;;  %vm11837_vm5 = vmor %vm11813_vm2, %vm11826_vm4  ;;  %vm1974_vm1 = vcmask 1043459  }
 0x157   : > { %2768 = vmatpush.bf16.msra.mxu0 %v10504_v59  ;;  %v8257_v59 = vor.u32 %v10451_v48, %v8254_v49  ;;  %v1401_v14 = vrot.slane %v1397_v53, 4  ;;  %v1315_v49 = vld [vmem:[#allocation2 + $0x128] sm:$0xff]  ;;  %v8348_v45 = vld [vmem:[#allocation2 + $0xf8] sm:$0xf]  ;;  %vm11858_vm12 = vmand %vm1974_vm1, %vm1975_vm7 }
 0x158   : > { %2827 = vmatpush.bf16.msrb.mxu1 %v10512_v60  ;;  %v1400_v60 = vor.u32 %v1398_v54, %v1397_v53  ;;  %v1427_v12 = vshrl.u32 %v1315_v49, 16  ;;  %vm11863_vm0 = vmor %vm1667_vm3, %vm1668_vm11 }
 0x159   : > { %2886 = vmatpush.bf16.msrb.mxu2 %v10520_v61  ;;  %v1569_v61 = vld [vmem:[#allocation2 + $0xc0] sm:$0xff]  ;;  %vm1979_vm2 = vmand %vm1977_vm9, %vm1978_vm14 }
 0x15a   : > { %2945 = vmatpush.bf16.msrb.mxu3 %v10528_v11  ;;  %2769 = vmatmul.bf16.vlgmr.msra.gmra.mxu0 %v8221_v38  ;;  %v1616_v16 = vld [vmem:[#allocation2 + $0x90] sm:$0x11]  ;;  %v1570_v0 = vsel %vm11626_vm8, %v1400_v60, %v1569_v61  ;;  %v1406_v11 = vshll.u32 %v1312_v5, 16  ;;  %v8269_v38 = vor.u32 %v10459_v27, %v8268_v31  ;;  %v1429_v51 = vrot.slane %v1427_v12, 7  ;;  %v1577_v60 = vld [vmem:[#allocation2 + $0x120] sm:$0xff]  ;;  %v10539_v5 = vld [vmem:[%s13036_s11 + $0x118] sm:$0xff] }
 0x15b   : > { %2997 = vmatpush.bf16.msrb.mxu0 %v10543_v17  ;;  %2828 = vmatmul.bf16.vlgmr.msrb.gmra.mxu1 %v8225_v39  ;;  %v1617_v52 = vsel %vm11684_vm15, 0, %v1616_v16  ;;  %1571 = vst [vmem:[#allocation2 + $0xc0] sm:$0xff] %v1570_v0  ;;  %v8273_v39 = vor.u32 %v10456_v32, %v8270_v28  ;;  %v1316_v0 = vld [vmem:[#allocation2 + $0x140] sm:$0xff]  ;;  %vm11879_vm3 = vmor %vm1979_vm2, %vm11858_vm12 }
 0x15c   : > { %3056 = vmatpush.bf16.msra.mxu1 %v10551_v18  ;;  %2887 = vmatmul.bf16.vlgmr.msrb.gmra.mxu2 %v8229_v22  ;;  %1618 = vst [vmem:[#allocation2 + $0x90] sm:$0x11] %v1617_v52  ;;  %v10460_v18 = vld [vmem:[#allocation2 + $0x7c] sm:$0xf0]  ;;  %v1313_v22 = vld [vmem:[#allocation2 + $0xf8] sm:$0xff]  ;;  %v1408_v25 = vor.u32 %v1406_v11, %v1405_v1  ;;  %v1430_v52 = vshll.u32 %v1315_v49, 16 }
 0x15d   : > { %2946 = vmatmul.bf16.vlgmr.msrb.gmra.mxu3 %v8233_v24  ;;  %v8278_v24 = vld [vmem:[#allocation2 + $0x80] sm:$0xf0]  ;;  %v1411_v26 = vshrl.u32 %v1313_v22, 16  ;;  %v8277_v33 = vor.u32 %v10460_v18, %v8276_v13  ;;  %v10465_v16 = vld [vmem:[#allocation2 + $0xa4] sm:$0xf0]  ;;  %v1438_v10 = vshll.u32 %v1316_v0, 16 }
 0x15e   : > { %v8281_v34 = vor.u32 %v10457_v19, %v8278_v24  ;;  %v8294_v56 = vld [vmem:[#allocation2 + $0xa8] sm:$0xf0]  ;;  %v1433_v11 = vrot.slane %v1429_v51, 4  ;;  %v1317_v19 = vld [vmem:[#allocation2 + $0x158] sm:$0xff] }
 0x15f   : > { %2998 = vmatpush.bf16.msrb.mxu0 %v10542_v29  ;;  %v1409_v29 = vsel %vm11632_vm10, %v1401_v14, %v1408_v25  ;;  %v1413_v30 = vrot.slane %v1411_v26, 7  ;;  %v8324_v14 = vld [vmem:[#allocation2 + $0xc8] sm:$0xf]  ;;  %v10469_v18 = vld [vmem:[#allocation2 + $0xcc] sm:$0xf]  ;;  %v1443_v25 = vshrl.u32 %v1317_v19, 16 }
 0x160   : > { %3057 = vmatpush.bf16.msra.mxu1 %v10550_v2  ;;  %v1414_v2 = vshll.u32 %v1313_v22, 16  ;;  %1572 = vst [vmem:[#allocation2 + $0xd8] sm:$0xff] %v1409_v29  ;;  %v1446_v29 = vshll.u32 %v1317_v19, 16  ;;  %v10481_v19 = vld [vmem:[#allocation2 + $0x12c] sm:$0xf] }
 0x161   : > { %v1417_v7 = vrot.slane %v1413_v30, 4  ;;  %v1445_v28 = vrot.slane %v1443_v25, 7 }
 0x162   : > { %v1619_v17 = vld [vmem:[#allocation2 + $0xc0] sm:$0x11]  ;;  %v1416_v36 = vor.u32 %v1414_v2, %v1413_v30 }
 0x163   : > { %2999 = vmatpush.bf16.msrb.mxu0 %v10541_v40  ;;  %v1620_v20 = vsel %vm11684_vm15, 0, %v1619_v17  ;;  %v8292_v53 = vld [vmem:[#allocation2 + $0x90] sm:$0xf]  ;;  %v10462_v54 = vld [vmem:[#allocation2 + $0x94] sm:$0xf] }
 0x164   : > { %3058 = vmatpush.bf16.msra.mxu1 %v10549_v41  ;;  %1621 = vst [vmem:[#allocation2 + $0xc0] sm:$0x11] %v1620_v20  ;;  %v1574_v40 = vsel %vm11626_vm8, %v1416_v36, %v1573_v37  ;;  %v1314_v41 = vld [vmem:[#allocation2 + $0x110] sm:$0xff]  ;;  %v8293_v61 = vor.u32 %v10465_v16, %v8292_v53  ;;  %v10472_v17 = vld [vmem:[#allocation2 + $0xdc] sm:$0xf0] }
 0x165   : > { %1575 = vst [vmem:[#allocation2 + $0xf0] sm:$0xff] %v1574_v40  ;;  %v1419_v4 = vshrl.u32 %v1314_v41, 16  ;;  %v1422_v6 = vshll.u32 %v1314_v41, 16  ;;  %v8326_v20 = vld [vmem:[#allocation2 + $0xe0] sm:$0xf0]  ;;  %v8325_v32 = vor.u32 %v10472_v17, %v8324_v14  ;;  %v1581_v36 = vld [vmem:[#allocation2 + $0x150] sm:$0xff] }
 0x166   : > { %v1318_v40 = vld [vmem:[#allocation2 + $0x170] sm:$0xff] }
 0x167   : > { %3000 = vmatpush.bf16.msrb.mxu0 %v10540_v8  ;;  %v1421_v43 = vrot.slane %v1419_v4, 7  ;;  %v10547_v8 = vld [vmem:[%s13036_s11 + $0x158] sm:$0xff]  ;;  %v10538_v41 = vld [vmem:[%s13036_s11 + $0x110] sm:$0xff] }
 0x168   : > { %3059 = vmatpush.bf16.msra.mxu1 %v10548_v9  ;;  %v1435_v9 = vshrl.u32 %v1316_v0, 16  ;;  %v10471_v30 = vld [vmem:[#allocation2 + $0xd4] sm:$0xf0]  ;;  %v8318_v31 = vld [vmem:[#allocation2 + $0xd8] sm:$0xf0]  ;;  %v10546_v4 = vld [vmem:[%s13036_s11 + $0x150] sm:$0xff] }
 0x169   : > { %v1424_v44 = vor.u32 %v1422_v6, %v1421_v43  ;;  %v1451_v6 = vshrl.u32 %v1318_v40, 16  ;;  %v1449_v43 = vrot.slane %v1445_v28, 4 }
 0x16a   : > { %2774 = vmatmul.bf16.gmra.mxu0 %v8245_v62  ;;  %v8297_v62 = vor.u32 %v10462_v54, %v8294_v56  ;;  %v1437_v13 = vrot.slane %v1435_v9, 7  ;;  %v10545_v9 = vld [vmem:[%s13036_s11 + $0x148] sm:$0xff] }
 0x16b   : > { %2833 = vmatmul.bf16.gmra.mxu1 %v8249_v63  ;;  %v1425_v3 = vsel %vm11632_vm10, %v1417_v7, %v1424_v44  ;;  %3001 = vmatpush.bf16.msrb.mxu0 %v10539_v5  ;;  %v8316_v27 = vld [vmem:[#allocation2 + $0xc0] sm:$0xf]  ;;  %v10468_v2 = vld [vmem:[#allocation2 + $0xc4] sm:$0xf]  ;;  %v1454_v7 = vshll.u32 %v1318_v40, 16  ;;  %v1453_v44 = vrot.slane %v1451_v6, 7 }
 0x16c   : > { %2892 = vmatmul.bf16.gmra.mxu2 %v8253_v58  ;;  %v1622_v48 = vld [vmem:[#allocation2 + $0xf0] sm:$0x11]  ;;  %1576 = vst [vmem:[#allocation2 + $0x108] sm:$0xff] %v1425_v3  ;;  %v8305_v58 = vor.u32 %v10463_v47, %v8302_v50  ;;  %3060 = vmatpush.bf16.msra.mxu1 %v10547_v8  ;;  %v1440_v1 = vor.u32 %v1438_v10, %v1437_v13  ;;  %v1319_v50 = vld [vmem:[#allocation2 + $0x188] sm:$0xff]  ;;  %v1320_v5 = vld [vmem:[#allocation2 + $0x1a0] sm:$0xff] }
 0x16d   : > { %2951 = vmatmul.bf16.gmra.mxu3 %v8257_v59  ;;  %v1623_v35 = vsel %vm11684_vm15, 0, %v1622_v48  ;;  %v1432_v59 = vor.u32 %v1430_v52, %v1429_v51  ;;  %v8317_v37 = vor.u32 %v10471_v30, %v8316_v27  ;;  %v1456_v46 = vor.u32 %v1454_v7, %v1453_v44  ;;  %v10478_v3 = vld [vmem:[#allocation2 + $0x10c] sm:$0xf0]  ;;  %v10475_v48 = vld [vmem:[#allocation2 + $0xfc] sm:$0xf]  ;;  %v10537_v8 = vld [vmem:[%s13036_s11 + $0x108] sm:$0xff] }
 0x16e   : > { %1624 = vst [vmem:[#allocation2 + $0xf0] sm:$0x11] %v1623_v35  ;;  %v1441_v22 = vsel %vm11632_vm10, %v1433_v11, %v1440_v1  ;;  %v8350_v35 = vld [vmem:[#allocation2 + $0x110] sm:$0xf0]  ;;  %v1459_v16 = vshrl.u32 %v1319_v50, 16  ;;  %v1462_v53 = vshll.u32 %v1319_v50, 16 }
 0x16f   : > { %v1578_v63 = vsel %vm11626_vm8, %v1432_v59, %v1577_v60  ;;  %1580 = vst [vmem:[#allocation2 + $0x138] sm:$0xff] %v1441_v22  ;;  %3002 = vmatpush.bf16.msrb.mxu0 %v10538_v41  ;;  %v1457_v12 = vsel %vm11632_vm10, %v1449_v43, %v1456_v46  ;;  %v8353_v59 = vor.u32 %v10475_v48, %v8350_v35  ;;  %v1467_v10 = vshrl.u32 %v1320_v5, 16  ;;  %v8372_v1 = vld [vmem:[#allocation2 + $0x128] sm:$0xf]  ;;  %v8374_v22 = vld [vmem:[#allocation2 + $0x140] sm:$0xf0] }
 0x170   : > { %1579 = vst [vmem:[#allocation2 + $0x120] sm:$0xff] %v1578_v63  ;;  %3061 = vmatpush.bf16.msra.mxu1 %v10546_v4  ;;  %v1461_v52 = vrot.slane %v1459_v16, 7  ;;  %v1470_v11 = vshll.u32 %v1320_v5, 16  ;;  %v1322_v41 = vld [vmem:[#allocation2 + $0x1d0] sm:$0xff]  ;;  %v10619_v4 = vld [vmem:[%s13036_s11 + $0x1b8] sm:$0xff] }
 0x171   : > { %1584 = vst [vmem:[#allocation2 + $0x168] sm:$0xff] %v1457_v12  ;;  %v1469_v13 = vrot.slane %v1467_v10, 7  ;;  %v1483_v6 = vshrl.u32 %v1322_v41, 16  ;;  %3900 = vmatpush.bf16.msra.mxu2 %v10619_v4  ;;  %v10627_v7 = vld [vmem:[%s13036_s11 + $0x1f8] sm:$0xff]  ;;  %v1486_v44 = vshll.u32 %v1322_v41, 16  ;;  %v10536_v10 = vld [vmem:[%s13036_s11 + $0x100] sm:$0xff] }
 0x172   : > { %v1464_v60 = vor.u32 %v1462_v53, %v1461_v52  ;;  %v1465_v14 = vrot.slane %v1461_v52, 4  ;;  %3959 = vmatpush.bf16.msra.mxu3 %v10627_v7  ;;  %v8396_v48 = vld [vmem:[#allocation2 + $0x158] sm:$0xf]  ;;  %v10490_v12 = vld [vmem:[#allocation2 + $0x16c] sm:$0xf0] }
 0x173   : > { %v10477_v51 = vld [vmem:[#allocation2 + $0x104] sm:$0xf0]  ;;  %3003 = vmatpush.bf16.msrb.mxu0 %v10537_v8  ;;  %v1472_v17 = vor.u32 %v1470_v11, %v1469_v13  ;;  %v1485_v43 = vrot.slane %v1483_v6, 7  ;;  %v10487_v16 = vld [vmem:[#allocation2 + $0x15c] sm:$0xf]  ;;  %v8397_v5 = vor.u32 %v10490_v12, %v8396_v48  ;;  %v10622_v6 = vld [vmem:[%s13036_s11 + $0x1d0] sm:$0xff] }
 0x174   : > { %3062 = vmatpush.bf16.msra.mxu1 %v10545_v9  ;;  %v10625_v9 = vld [vmem:[%s13036_s11 + $0x1e8] sm:$0xff]  ;;  %v8422_v7 = vld [vmem:[#allocation2 + $0x1a0] sm:$0xf0] }
 0x175   : > { %v8340_v54 = vld [vmem:[#allocation2 + $0xf0] sm:$0xf]  ;;  %v10474_v56 = vld [vmem:[#allocation2 + $0xf4] sm:$0xf]  ;;  %v10493_v4 = vld [vmem:[#allocation2 + $0x18c] sm:$0xf] }
 0x177   : > { %v1625_v24 = vld [vmem:[#allocation2 + $0x120] sm:$0x11]  ;;  %3004 = vmatpush.bf16.msrb.mxu0 %v10536_v10 }
 0x178   : > { %v1626_v26 = vsel %vm11684_vm15, 0, %v1625_v24  ;;  %v1473_v24 = vsel %vm11632_vm10, %v1465_v14, %v1472_v17  ;;  %v10616_v14 = vld [vmem:[%s13036_s11 + $0x1a0] sm:$0xff]  ;;  %v1927_v17 = vld [vmem:[#allocation2 + $0x28] sm:$0xff] }
 0x179   : > { %1627 = vst [vmem:[#allocation2 + $0x120] sm:$0x11] %v1626_v26 }
 0x17a   : > { %2779 = vmatmul.bf16.gmra.mxu0 %v8269_v38  ;;  %v8321_v38 = vor.u32 %v10468_v2, %v8318_v31  ;;  %1588 = vst [vmem:[#allocation2 + $0x198] sm:$0xff] %v1473_v24 }
 0x17b   : > { %2838 = vmatmul.bf16.gmra.mxu1 %v8273_v39 }
 0x17c   : > { %2897 = vmatmul.bf16.gmra.mxu2 %v8277_v33  ;;  %v8329_v33 = vor.u32 %v10469_v18, %v8326_v20  ;;  %v10484_v18 = vld [vmem:[#allocation2 + $0x13c] sm:$0xf0]  ;;  %v1321_v20 = vld [vmem:[#allocation2 + $0x1b8] sm:$0xff] }
 0x17d   : > { %2956 = vmatmul.bf16.gmra.mxu3 %v8281_v34  ;;  %v1448_v34 = vor.u32 %v1446_v29, %v1445_v28  ;;  %v1475_v26 = vshrl.u32 %v1321_v20, 16  ;;  %v10483_v28 = vld [vmem:[#allocation2 + $0x134] sm:$0xf0]  ;;  %v1478_v30 = vshll.u32 %v1321_v20, 16  ;;  %v1643_v20 = vld [vmem:[#allocation2 + $0x8] sm:$0xff] }
 0x17e   : > { %v1671_v24 = vshrl.u32 %v1643_v20, 16 }
 0x17f   : > { %v1582_v39 = vsel %vm11626_vm8, %v1448_v34, %v1581_v36  ;;  %v1477_v29 = vrot.slane %v1475_v26, 7  ;;  %v8377_v34 = vor.u32 %v10481_v19, %v8374_v22  ;;  %v10624_v22 = vld [vmem:[%s13036_s11 + $0x1e0] sm:$0xff] }
 0x180   : > { %1583 = vst [vmem:[#allocation2 + $0x150] sm:$0xff] %v1582_v39  ;;  %v8364_v2 = vld [vmem:[#allocation2 + $0x120] sm:$0xf]  ;;  %v10480_v31 = vld [vmem:[#allocation2 + $0x124] sm:$0xf] }
 0x181   : > { %v1480_v36 = vor.u32 %v1478_v30, %v1477_v29  ;;  %v1481_v46 = vrot.slane %v1477_v29, 4  ;;  %v10544_v26 = vld [vmem:[%s13036_s11 + $0x140] sm:$0xff]  ;;  %v1673_v29 = vrot.slane %v1671_v24, 4 }
 0x182   : > { %3063 = vmatpush.bf16.msra.mxu1 %v10544_v26 }
 0x187   : > { %v1628_v47 = vld [vmem:[#allocation2 + $0x150] sm:$0x11] }
 0x188   : > { %v1629_v49 = vsel %vm11684_vm15, 0, %v1628_v47  ;;  %v1488_v47 = vor.u32 %v1486_v44, %v1485_v43  ;;  %v10613_v43 = vld [vmem:[%s13036_s11 + $0x188] sm:$0xff] }
 0x189   : > { %1630 = vst [vmem:[#allocation2 + $0x150] sm:$0x11] %v1629_v49 }
 0x18a   : > { %2784 = vmatmul.bf16.gmra.mxu0 %v8293_v61  ;;  %v1585_v61 = vld [vmem:[#allocation2 + $0x180] sm:$0xff]  ;;  %v1489_v52 = vsel %vm11632_vm10, %v1481_v46, %v1488_v47 }
 0x18b   : > { %2843 = vmatmul.bf16.gmra.mxu1 %v8297_v62  ;;  %v8341_v62 = vor.u32 %v10477_v51, %v8340_v54  ;;  %v1586_v0 = vsel %vm11626_vm8, %v1464_v60, %v1585_v61  ;;  %v10626_v51 = vld [vmem:[%s13036_s11 + $0x1f0] sm:$0xff]  ;;  %1592 = vst [vmem:[#allocation2 + $0x1c8] sm:$0xff] %v1489_v52  ;;  %v10489_v61 = vld [vmem:[#allocation2 + $0x164] sm:$0xf0]  ;;  %v8425_v52 = vor.u32 %v10493_v4, %v8422_v7 }
 0x18c   : > { %2902 = vmatmul.bf16.gmra.mxu2 %v8301_v57  ;;  %v8342_v57 = vld [vmem:[#allocation2 + $0x108] sm:$0xf0]  ;;  %1587 = vst [vmem:[#allocation2 + $0x180] sm:$0xff] %v1586_v0  ;;  %v8398_v54 = vld [vmem:[#allocation2 + $0x170] sm:$0xf0]  ;;  %3960 = vmatpush.bf16.msra.mxu3 %v10626_v51 }
 0x18d   : > { %2961 = vmatmul.bf16.gmra.mxu3 %v8305_v58  ;;  %v8349_v58 = vor.u32 %v10478_v3, %v8348_v45  ;;  %v8345_v63 = vor.u32 %v10474_v56, %v8342_v57  ;;  %v10618_v45 = vld [vmem:[%s13036_s11 + $0x1b0] sm:$0xff]  ;;  %v1644_v3 = vld [vmem:[#allocation2 + $0x20] sm:$0xff]  ;;  %v10617_v56 = vld [vmem:[%s13036_s11 + $0x1a8] sm:$0xff]  ;;  %v8401_v8 = vor.u32 %v10487_v16, %v8398_v54 }
 0x18e   : > { %v1680_v50 = vshll.u32 %v1644_v3, 16  ;;  %v1684_v35 = vshrl.u32 %v1644_v3, 16  ;;  %3901 = vmatpush.bf16.msra.mxu2 %v10618_v45  ;;  %v8390_v0 = vld [vmem:[#allocation2 + $0x168] sm:$0xf0]  ;;  %v10495_v3 = vld [vmem:[#allocation2 + $0x194] sm:$0xf0] }
 0x190   : > { %v11809_v57 = vrot.slane %v1680_v50, 5  ;;  %v8388_v60 = vld [vmem:[#allocation2 + $0x150] sm:$0xf]  ;;  %3961 = vmatpush.bf16.msra.mxu3 %v10625_v9  ;;  %v8414_v50 = vld [vmem:[#allocation2 + $0x198] sm:$0xf0] }
 0x192   : > { %3902 = vmatpush.bf16.msra.mxu2 %v10617_v56  ;;  %v10612_v56 = vld [vmem:[%s13036_s11 + $0x180] sm:$0xff] }
 0x193   : > { %v1631_v25 = vld [vmem:[#allocation2 + $0x180] sm:$0x11] }
 0x194   : > { %v1632_v27 = vsel %vm11684_vm15, 0, %v1631_v25  ;;  %3962 = vmatpush.bf16.msra.mxu3 %v10624_v22 }
 0x195   : > { %1633 = vst [vmem:[#allocation2 + $0x180] sm:$0x11] %v1632_v27  ;;  %v1674_v27 = vshll.u32 %v1643_v20, 16  ;;  %v10643_v20 = vld [vmem:[%s13036_s11 + $0x278] sm:$0xff] }
 0x196   : > { %3903 = vmatpush.bf16.msra.mxu2 %v10616_v14  ;;  %4077 = vmatpush.bf16.msrb.mxu1 %v10643_v20 }
 0x197   : > { %v1676_v30 = vrot.slane %v1674_v27, 5 }
 0x19a   : > { %2789 = vmatmul.bf16.gmra.mxu0 %v8317_v37  ;;  %v1589_v37 = vld [vmem:[#allocation2 + $0x1b0] sm:$0xff] }
 0x19b   : > { %2848 = vmatmul.bf16.gmra.mxu1 %v8321_v38  ;;  %v8365_v38 = vor.u32 %v10483_v28, %v8364_v2  ;;  %v1590_v40 = vsel %vm11626_vm8, %v1480_v36, %v1589_v37  ;;  %v10615_v28 = vld [vmem:[%s13036_s11 + $0x198] sm:$0xff]  ;;  %v8420_v36 = vld [vmem:[#allocation2 + $0x188] sm:$0xf]  ;;  %v10496_v37 = vld [vmem:[#allocation2 + $0x19c] sm:$0xf0] }
 0x19c   : > { %2907 = vmatmul.bf16.gmra.mxu2 %v8325_v32  ;;  %v8366_v32 = vld [vmem:[#allocation2 + $0x138] sm:$0xf0]  ;;  %1591 = vst [vmem:[#allocation2 + $0x1b0] sm:$0xff] %v1590_v40  ;;  %v10492_v16 = vld [vmem:[#allocation2 + $0x184] sm:$0xf]  ;;  %v8421_v51 = vor.u32 %v10496_v37, %v8420_v36 }
 0x19d   : > { %2966 = vmatmul.bf16.gmra.mxu3 %v8329_v33  ;;  %v8373_v33 = vor.u32 %v10484_v18, %v8372_v1  ;;  %v8369_v39 = vor.u32 %v10480_v31, %v8366_v32  ;;  %v8389_v18 = vor.u32 %v10489_v61, %v8388_v60  ;;  %v10623_v2 = vld [vmem:[%s13036_s11 + $0x1d8] sm:$0xff]  ;;  %3904 = vmatpush.bf16.msra.mxu2 %v10615_v28  ;;  %v10614_v32 = vld [vmem:[%s13036_s11 + $0x190] sm:$0xff] }
 0x19e   : > { %v1677_v31 = vor.u32 %v1676_v30, %v1673_v29  ;;  %3963 = vmatpush.bf16.msra.mxu3 %v10623_v2  ;;  %v1645_v60 = vld [vmem:[#allocation2 + $0x38] sm:$0xff]  ;;  %v8446_v37 = vld [vmem:[#allocation2 + $0x1d0] sm:$0xf0] }
 0x19f   : > { %v1693_v9 = vshll.u32 %v1645_v60, 16  ;;  %v8444_v2 = vld [vmem:[#allocation2 + $0x1b8] sm:$0xf]  ;;  %v10499_v36 = vld [vmem:[#allocation2 + $0x1bc] sm:$0xf] }
 0x1a1   : > { %3905 = vmatpush.bf16.msra.mxu2 %v10614_v32 }
 0x1a2   : > { %3964 = vmatpush.bf16.msra.mxu3 %v10622_v6 }
 0x1a3   : > { %v1634_v49 = vld [vmem:[#allocation2 + $0x1b0] sm:$0x11] }
 0x1a4   : > { %v1635_v53 = vsel %vm11684_vm15, 0, %v1634_v49  ;;  %v8412_v49 = vld [vmem:[#allocation2 + $0x180] sm:$0xf] }
 0x1a5   : > { %1636 = vst [vmem:[#allocation2 + $0x1b0] sm:$0x11] %v1635_v53  ;;  %v10621_v53 = vld [vmem:[%s13036_s11 + $0x1c8] sm:$0xff]  ;;  %3906 = vmatpush.bf16.msra.mxu2 %v10613_v43 }
 0x1a6   : > { %3965 = vmatpush.bf16.msra.mxu3 %v10621_v53  ;;  %v10501_v43 = vld [vmem:[#allocation2 + $0x1c4] sm:$0xf0] }
 0x1a7   : > { %v1647_v53 = vld [vmem:[#allocation2 + $0x68] sm:$0xff] }
 0x1a9   : > { %3907 = vmatpush.bf16.msra.mxu2 %v10612_v56 }
 0x1aa   : > { %2794 = vmatmul.bf16.gmra.mxu0 %v8341_v62  ;;  %v10486_v62 = vld [vmem:[#allocation2 + $0x154] sm:$0xf] }
 0x1ab   : > { %2853 = vmatmul.bf16.gmra.mxu1 %v8345_v63  ;;  %v8393_v19 = vor.u32 %v10486_v62, %v8390_v0  ;;  %v10620_v0 = vld [vmem:[%s13036_s11 + $0x1c0] sm:$0xff] }
 0x1ac   : > { %2912 = vmatmul.bf16.gmra.mxu2 %v8349_v58  ;;  %v1686_v58 = vrot.slane %v1684_v35, 4  ;;  %3966 = vmatpush.bf16.msra.mxu3 %v10620_v0 }
 0x1ad   : > { %2971 = vmatmul.bf16.gmra.mxu3 %v8353_v59  ;;  %v8417_v59 = vor.u32 %v10492_v16, %v8414_v50  ;;  %v8449_v50 = vor.u32 %v10499_v36, %v8446_v37  ;;  %v1935_v16 = vld [vmem:[#allocation2 + $0x88] sm:$0xff] }
 0x1ae   : > { %v1687_v63 = vor.u32 %v1686_v58, %v11809_v57  ;;  %v8413_v58 = vor.u32 %v10495_v3, %v8412_v49  ;;  %v10498_v3 = vld [vmem:[#allocation2 + $0x1b4] sm:$0xf] }
 0x1b0   : > { %v1688_v11 = vrot.slane %v1687_v63, 4 }
 0x1b2   : > { %v1928_v25 = vsel %vm11837_vm5, %v1688_v11, %v1927_v17  ;;  %v10635_v17 = vld [vmem:[%s13036_s11 + $0x238] sm:$0xff] }
 0x1b3   : > { %1929 = vst [vmem:[#allocation2 + $0x28] sm:$0xff] %v1928_v25  ;;  %4018 = vmatpush.bf16.msra.mxu0 %v10635_v17  ;;  %v1648_v25 = vld [vmem:[#allocation2 + $0x80] sm:$0xff] }
 0x1b4   : > { %v1718_v27 = vshll.u32 %v1648_v25, 16  ;;  %v1722_v28 = vshrl.u32 %v1648_v25, 16  ;;  %v10555_v25 = vld [vmem:[#allocation2 + $0x44] sm:$0xf0] }
 0x1b6   : > { %v1724_v4 = vrot.slane %v1722_v28, 4 }
 0x1ba   : > { %2799 = vmatmul.bf16.gmra.mxu0 %v8365_v38  ;;  %v1981_v48 = vld [vmem:[#allocation2 + $0x28] sm:$0x88] }
 0x1bb   : > { %2858 = vmatmul.bf16.gmra.mxu1 %v8369_v39  ;;  %v1678_v39 = vrot.slane %v1677_v31, 4  ;;  %v1982_v35 = vsel %vm11879_vm3, 0, %v1981_v48  ;;  %v10502_v31 = vld [vmem:[#allocation2 + $0x1cc] sm:$0xf0]  ;;  %v8438_v48 = vld [vmem:[#allocation2 + $0x1c8] sm:$0xf0] }
 0x1bc   : > { %2917 = vmatmul.bf16.gmra.mxu2 %v8373_v33  ;;  %1983 = vst [vmem:[#allocation2 + $0x28] sm:$0x88] %v1982_v35  ;;  %v8445_v49 = vor.u32 %v10502_v31, %v8444_v2 }
 0x1bd   : > { %2976 = vmatmul.bf16.gmra.mxu3 %v8377_v34  ;;  %v1646_v34 = vld [vmem:[#allocation2 + $0x50] sm:$0xff]  ;;  %v1683_v44 = vsel %vm11863_vm0, %v1678_v39, %v11809_v57  ;;  %v1931_v57 = vld [vmem:[#allocation2 + $0x58] sm:$0xff] }
 0x1be   : > { %v1699_v40 = vshll.u32 %v1646_v34, 16  ;;  %v1703_v41 = vshrl.u32 %v1646_v34, 16  ;;  %1922 = vst [vmem:[#allocation2 + $0x10] sm:$0xff] %v1683_v44 }
 0x1c0   : > { %v11883_v46 = vrot.slane %v1699_v40, 5  ;;  %v1705_v47 = vrot.slane %v1703_v41, 4  ;;  %v1720_v41 = vrot.slane %v1718_v27, 5 }
 0x1c2   : > { %v1706_v12 = vor.u32 %v1705_v47, %v11883_v46  ;;  %v8436_v47 = vld [vmem:[#allocation2 + $0x1b0] sm:$0xf]  ;;  %v1725_v35 = vor.u32 %v1724_v4, %v1720_v41 }
 0x1c3   : > { %v10449_v4 = vld [vmem:[#allocation2 + $0x24] sm:$0xf0] }
 0x1c4   : > { %v1707_v54 = vrot.slane %v1706_v12, 4 }
 0x1c6   : > { %v1932_v61 = vsel %vm11837_vm5, %v1707_v54, %v1931_v57  ;;  %v1709_v57 = vshrl.u32 %v1647_v53, 16 }
 0x1c7   : > { %1933 = vst [vmem:[#allocation2 + $0x58] sm:$0xff] %v1932_v61 }
 0x1ca   : > { %2804 = vmatmul.bf16.gmra.mxu0 %v8389_v18  ;;  %v1695_v18 = vrot.slane %v1693_v9, 5 }
 0x1cb   : > { %2863 = vmatmul.bf16.gmra.mxu1 %v8393_v19 }
 0x1cc   : > { %2922 = vmatmul.bf16.gmra.mxu2 %v8397_v5  ;;  %v1690_v5 = vshrl.u32 %v1645_v60, 16 }
 0x1cd   : > { %2981 = vmatmul.bf16.gmra.mxu3 %v8401_v8 }
 0x1ce   : > { %v1692_v10 = vrot.slane %v1690_v5, 4  ;;  %v1984_v32 = vld [vmem:[#allocation2 + $0x58] sm:$0x88] }
 0x1cf   : > { %v1985_v40 = vsel %vm11879_vm3, 0, %v1984_v32 }
 0x1d0   : > { %v1696_v22 = vor.u32 %v1695_v18, %v1692_v10  ;;  %1986 = vst [vmem:[#allocation2 + $0x58] sm:$0x88] %v1985_v40 }
 0x1d2   : > { %v1697_v26 = vrot.slane %v1696_v22, 4 }
 0x1d4   : > { %v1702_v39 = vsel %vm11863_vm0, %v1697_v26, %v11883_v46  ;;  %v1726_v46 = vrot.slane %v1725_v35, 4  ;;  %v10552_v26 = vld [vmem:[#allocation2 + $0x34] sm:$0xf]  ;;  %v1649_v35 = vld [vmem:[#allocation2 + $0x98] sm:$0xff] }
 0x1d5   : > { %1930 = vst [vmem:[#allocation2 + $0x40] sm:$0xff] %v1702_v39  ;;  %v8236_v39 = vld [vmem:[#allocation2 + $0x10] sm:$0xf] }
 0x1d7   : > { %v2770_v62 = vpop.f32.mrf.mxu0 }
 0x1d8   : > { %v2829_v63 = vpop.f32.mrf.mxu1 }
 0x1d9   : > { %v2830_v8 = vadd.f32 %v2829_v63, %v2770_v62  ;;  %v1711_v63 = vrot.slane %v1709_v57, 4 }
 0x1da   : > { %2809 = vmatmul.bf16.gmra.mxu0 %v8413_v58  ;;  %v1712_v58 = vshll.u32 %v1647_v53, 16 }
 0x1db   : > { %2868 = vmatmul.bf16.gmra.mxu1 %v8417_v59  ;;  %v1936_v59 = vsel %vm11837_vm5, %v1726_v46, %v1935_v16 }
 0x1dc   : > { %2927 = vmatmul.bf16.gmra.mxu2 %v8421_v51  ;;  %v8437_v51 = vor.u32 %v10501_v43, %v8436_v47  ;;  %1937 = vst [vmem:[#allocation2 + $0x88] sm:$0xff] %v1936_v59  ;;  %v1714_v0 = vrot.slane %v1712_v58, 5 }
 0x1dd   : > { %2986 = vmatmul.bf16.gmra.mxu3 %v8425_v52  ;;  %v8441_v52 = vor.u32 %v10498_v3, %v8438_v48  ;;  %v1939_v48 = vld [vmem:[#allocation2 + $0xb8] sm:$0xff] }
 0x1de   : > { %v1715_v9 = vor.u32 %v1714_v0, %v1711_v63  ;;  %v1652_v63 = vld [vmem:[#allocation2 + $0xe0] sm:$0xff] }
 0x1df   : > { %v2888_v11 = vpop.f32.mrf.mxu2  ;;  %v2772_v29 = vpop.f32.mrf.mxu0  ;;  %v8772_v0 = vld [vmem:[#allocation2 + $0x60] sm:$0xf] }
 0x1e0   : > { %v2947_v14 = vpop.f32.mrf.mxu3  ;;  %v2889_v19 = vadd.f32 %v2888_v11, %v2830_v8  ;;  %v2831_v30 = vpop.f32.mrf.mxu1  ;;  %v10634_v8 = vld [vmem:[%s13036_s11 + $0x230] sm:$0xff]  ;;  %v1716_v17 = vrot.slane %v1715_v9, 4  ;;  %v1760_v9 = vshrl.u32 %v1652_v63, 16 }
 0x1e1   : > { %v2832_v34 = vadd.f32 %v2831_v30, %v2772_v29  ;;  %4019 = vmatpush.bf16.msra.mxu0 %v10634_v8  ;;  %v1650_v11 = vld [vmem:[#allocation2 + $0xb0] sm:$0xff]  ;;  %v8750_v29 = vld [vmem:[#allocation2 + $0x48] sm:$0xf0]  ;;  %v1756_v8 = vshll.u32 %v1652_v63, 16 }
 0x1e2   : > { %v11905_v24 = vadd.f32 %v2947_v14, %v2889_v19  ;;  %v8748_v14 = vld [vmem:[#allocation2 + $0x30] sm:$0xf]  ;;  %v1737_v18 = vshll.u32 %v1650_v11, 16  ;;  %v1741_v19 = vshrl.u32 %v1650_v11, 16  ;;  %v1721_v2 = vsel %vm11863_vm0, %v1716_v17, %v1720_v41  ;;  %v10561_v17 = vld [vmem:[#allocation2 + $0x74] sm:$0xf0] }
 0x1e3   : > { %v1987_v27 = vld [vmem:[#allocation2 + $0x88] sm:$0x88]  ;;  %v10642_v30 = vld [vmem:[%s13036_s11 + $0x270] sm:$0xff]  ;;  %1934 = vst [vmem:[#allocation2 + $0x70] sm:$0xff] %v1721_v2  ;;  %v8749_v43 = vor.u32 %v10555_v25, %v8748_v14 }
 0x1e4   : > { %v1988_v31 = vsel %vm11879_vm3, 0, %v1987_v27  ;;  %v1739_v32 = vrot.slane %v1737_v18, 5  ;;  %4078 = vmatpush.bf16.msrb.mxu1 %v10642_v30  ;;  %v10558_v18 = vld [vmem:[#allocation2 + $0x64] sm:$0xf]  ;;  %v10633_v25 = vld [vmem:[%s13036_s11 + $0x228] sm:$0xff]  ;;  %v1762_v30 = vrot.slane %v1760_v9, 4 }
 0x1e5   : > { %1989 = vst [vmem:[#allocation2 + $0x88] sm:$0x88] %v1988_v31  ;;  %4020 = vmatpush.bf16.msra.mxu0 %v10633_v25  ;;  %v8796_v9 = vld [vmem:[#allocation2 + $0x90] sm:$0xf] }
 0x1e7   : > { %v2890_v6 = vpop.f32.mrf.mxu2  ;;  %v2775_v54 = vpop.f32.mrf.mxu0 }
 0x1e8   : > { %v2949_v7 = vpop.f32.mrf.mxu3  ;;  %v2891_v44 = vadd.f32 %v2890_v6, %v2832_v34  ;;  %v2834_v56 = vpop.f32.mrf.mxu1  ;;  %v1743_v34 = vrot.slane %v1741_v19, 4  ;;  %v10446_v6 = vld [vmem:[#allocation2 + $0x14] sm:$0xf] }
 0x1e9   : > { %v2835_v60 = vadd.f32 %v2834_v56, %v2775_v54 }
 0x1ea   : > { %v11912_v12 = vadd.f32 %v2949_v7, %v2891_v44  ;;  %2814 = vmatmul.bf16.gmra.mxu0 %v8437_v51  ;;  %v8238_v7 = vld [vmem:[#allocation2 + $0x28] sm:$0xf0]  ;;  %v8753_v44 = vor.u32 %v10552_v26, %v8750_v29  ;;  %v1744_v47 = vor.u32 %v1743_v34, %v1739_v32  ;;  %v1728_v51 = vshrl.u32 %v1649_v35, 16  ;;  %v8260_v34 = vld [vmem:[#allocation2 + $0x40] sm:$0xf] }
 0x1eb   : > { %2873 = vmatmul.bf16.gmra.mxu1 %v8441_v52  ;;  %v1731_v52 = vshll.u32 %v1649_v35, 16  ;;  %v10641_v26 = vld [vmem:[%s13036_s11 + $0x268] sm:$0xff]  ;;  %v1758_v29 = vrot.slane %v1756_v8, 5 }
 0x1ec   : > { %2932 = vmatmul.bf16.gmra.mxu2 %v8445_v49  ;;  %v1745_v41 = vrot.slane %v1744_v47, 4  ;;  %v8237_v49 = vor.u32 %v10449_v4, %v8236_v39  ;;  %v1730_v58 = vrot.slane %v1728_v51, 4  ;;  %4079 = vmatpush.bf16.msrb.mxu1 %v10641_v26  ;;  %v10452_v39 = vld [vmem:[#allocation2 + $0x44] sm:$0xf]  ;;  %v8773_v4 = vor.u32 %v10561_v17, %v8772_v0 }
 0x1ed   : > { %2991 = vmatmul.bf16.gmra.mxu3 %v8449_v50  ;;  %v8241_v50 = vor.u32 %v10446_v6, %v8238_v7  ;;  %v1733_v59 = vrot.slane %v1731_v52, 5  ;;  %v1763_v7 = vor.u32 %v1762_v30, %v1758_v29  ;;  %v8284_v30 = vld [vmem:[#allocation2 + $0x70] sm:$0xf] }
 0x1ee   : > { %v1940_v53 = vsel %vm11837_vm5, %v1745_v41, %v1939_v48  ;;  %v1651_v48 = vld [vmem:[#allocation2 + $0xc8] sm:$0xff] }
 0x1ef   : > { %v2893_v61 = vpop.f32.mrf.mxu2  ;;  %v2777_v20 = vpop.f32.mrf.mxu0  ;;  %1941 = vst [vmem:[#allocation2 + $0xb8] sm:$0xff] %v1940_v53  ;;  %v1747_v35 = vshrl.u32 %v1651_v48, 16 }
 0x1f0   : > { %v2952_v62 = vpop.f32.mrf.mxu3  ;;  %v2894_v5 = vadd.f32 %v2893_v61, %v2835_v60  ;;  %v2836_v22 = vpop.f32.mrf.mxu1  ;;  %v1734_v61 = vor.u32 %v1733_v59, %v1730_v58 }
 0x1f1   : > { %v2837_v28 = vadd.f32 %v2836_v22, %v2777_v20  ;;  %v8774_v22 = vld [vmem:[#allocation2 + $0x78] sm:$0xf0] }
 0x1f2   : > { %v11919_v10 = vadd.f32 %v2952_v62, %v2894_v5  ;;  %v1735_v5 = vrot.slane %v1734_v61, 4  ;;  %v8777_v6 = vor.u32 %v10558_v18, %v8774_v22  ;;  %v10564_v18 = vld [vmem:[#allocation2 + $0x94] sm:$0xf] }
 0x1f4   : > { %v1740_v27 = vsel %vm11863_vm0, %v1735_v5, %v1739_v32 }
 0x1f5   : > { %1938 = vst [vmem:[#allocation2 + $0xa0] sm:$0xff] %v1740_v27 }
 0x1f6   : > { %v1990_v19 = vld [vmem:[#allocation2 + $0xb8] sm:$0x88] }
 0x1f7   : > { %v2895_v36 = vpop.f32.mrf.mxu2  ;;  %v2780_v46 = vpop.f32.mrf.mxu0 }
 0x1f8   : > { %v2954_v37 = vpop.f32.mrf.mxu3  ;;  %v2896_v40 = vadd.f32 %v2895_v36, %v2837_v28  ;;  %v2839_v16 = vpop.f32.mrf.mxu1  ;;  %v1991_v28 = vsel %vm11879_vm3, 0, %v1990_v19  ;;  %v8798_v19 = vld [vmem:[#allocation2 + $0xa8] sm:$0xf0] }
 0x1f9   : > { %v2840_v54 = vadd.f32 %v2839_v16, %v2780_v46  ;;  %1992 = vst [vmem:[#allocation2 + $0xb8] sm:$0x88] %v1991_v28  ;;  %v1750_v46 = vshll.u32 %v1651_v48, 16 }
 0x1fa   : > { %v11928_v3 = vadd.f32 %v2954_v37, %v2896_v40  ;;  %3005 = vmatmul.bf16.vlgmr.msrb.gmra.mxu0 %v8237_v49  ;;  %v10455_v37 = vld [vmem:[#allocation2 + $0x54] sm:$0xf0]  ;;  %v8262_v40 = vld [vmem:[#allocation2 + $0x58] sm:$0xf0] }
 0x1fb   : > { %3064 = vmatmul.bf16.vlgmr.msra.gmra.mxu1 %v8241_v50  ;;  %v8261_v47 = vor.u32 %v10455_v37, %v8260_v34  ;;  %v8265_v41 = vor.u32 %v10452_v39, %v8262_v40  ;;  %v10461_v34 = vld [vmem:[#allocation2 + $0x84] sm:$0xf0]  ;;  %v8801_v39 = vor.u32 %v10564_v18, %v8798_v19  ;;  %v10570_v18 = vld [vmem:[#allocation2 + $0xc4] sm:$0xf]  ;;  %v8822_v19 = vld [vmem:[#allocation2 + $0xd8] sm:$0xf0] }
 0x1fc   : > { %3908 = vmatmul.bf16.vlgmr.msra.gmra.mxu2 %v8749_v43  ;;  %v1764_v43 = vrot.slane %v1763_v7, 4  ;;  %v1947_v7 = vld [vmem:[#allocation2 + $0x118] sm:$0xff] }
 0x1fd   : > { %3967 = vmatmul.bf16.vlgmr.msra.gmra.mxu3 %v8753_v44  ;;  %v1943_v44 = vld [vmem:[#allocation2 + $0xe8] sm:$0xff] }
 0x1fe   : > { %v1944_v16 = vsel %vm11837_vm5, %v1764_v43, %v1943_v44  ;;  %v8285_v43 = vor.u32 %v10461_v34, %v8284_v30 }
 0x1ff   : > { %v2898_v56 = vpop.f32.mrf.mxu2  ;;  %v2782_v11 = vpop.f32.mrf.mxu0  ;;  %1945 = vst [vmem:[#allocation2 + $0xe8] sm:$0xff] %v1944_v16  ;;  %v10640_v16 = vld [vmem:[%s13036_s11 + $0x260] sm:$0xff] }
 0x200   : > { %v2957_v57 = vpop.f32.mrf.mxu3  ;;  %v2899_v60 = vadd.f32 %v2898_v56, %v2840_v54  ;;  %v2841_v14 = vpop.f32.mrf.mxu1  ;;  %v1749_v54 = vrot.slane %v1747_v35, 4  ;;  %v1752_v56 = vrot.slane %v1750_v46, 5  ;;  %4080 = vmatpush.bf16.msrb.mxu1 %v10640_v16  ;;  %v10467_v34 = vld [vmem:[#allocation2 + $0xb4] sm:$0xf0] }
 0x201   : > { %v2842_v20 = vadd.f32 %v2841_v14, %v2782_v11  ;;  %v10567_v11 = vld [vmem:[#allocation2 + $0xa4] sm:$0xf0] }
 0x202   : > { %v11932_v62 = vadd.f32 %v2957_v57, %v2899_v60  ;;  %v1753_v58 = vor.u32 %v1752_v56, %v1749_v54  ;;  %v1654_v60 = vld [vmem:[#allocation2 + $0x110] sm:$0xff]  ;;  %v8797_v37 = vor.u32 %v10567_v11, %v8796_v9  ;;  %v8820_v9 = vld [vmem:[#allocation2 + $0xc0] sm:$0xf]  ;;  %v10573_v11 = vld [vmem:[#allocation2 + $0xd4] sm:$0xf0] }
 0x203   : > { %v1775_v63 = vshll.u32 %v1654_v60, 16  ;;  %v1779_v0 = vshrl.u32 %v1654_v60, 16  ;;  %v1656_v60 = vld [vmem:[#allocation2 + $0x140] sm:$0xff] }
 0x204   : > { %v1754_v61 = vrot.slane %v1753_v58, 4 }
 0x205   : > { %v1777_v25 = vrot.slane %v1775_v63, 5  ;;  %v1781_v26 = vrot.slane %v1779_v0, 4  ;;  %v1794_v63 = vshll.u32 %v1656_v60, 16  ;;  %v1798_v0 = vshrl.u32 %v1656_v60, 16 }
 0x206   : > { %v1993_v14 = vld [vmem:[#allocation2 + $0xe8] sm:$0x88] }
 0x207   : > { %v2900_v2 = vpop.f32.mrf.mxu2  ;;  %v2785_v49 = vpop.f32.mrf.mxu0  ;;  %v1994_v22 = vsel %vm11879_vm3, 0, %v1993_v14  ;;  %v1782_v40 = vor.u32 %v1781_v26, %v1777_v25  ;;  %v1796_v26 = vrot.slane %v1794_v63, 5  ;;  %v1658_v63 = vld [vmem:[#allocation2 + $0x170] sm:$0xff] }
 0x208   : > { %v2959_v31 = vpop.f32.mrf.mxu3  ;;  %v2901_v36 = vadd.f32 %v2900_v2, %v2842_v20  ;;  %v2844_v50 = vpop.f32.mrf.mxu1  ;;  %v1759_v20 = vsel %vm11863_vm0, %v1754_v61, %v1758_v29  ;;  %v10458_v2 = vld [vmem:[#allocation2 + $0x74] sm:$0xf]  ;;  %1995 = vst [vmem:[#allocation2 + $0xe8] sm:$0x88] %v1994_v22  ;;  %v10632_v29 = vld [vmem:[%s13036_s11 + $0x220] sm:$0xff] }
 0x209   : > { %v2845_v51 = vadd.f32 %v2844_v50, %v2785_v49  ;;  %1942 = vst [vmem:[#allocation2 + $0xd0] sm:$0xff] %v1759_v20  ;;  %4021 = vmatpush.bf16.msra.mxu0 %v10632_v29  ;;  %v8825_v29 = vor.u32 %v10570_v18, %v8822_v19 }
 0x20a   : > { %v11944_v32 = vadd.f32 %v2959_v31, %v2901_v36  ;;  %3010 = vmatmul.bf16.gmra.mxu0 %v8261_v47  ;;  %v8286_v36 = vld [vmem:[#allocation2 + $0x88] sm:$0xf0]  ;;  %v1653_v47 = vld [vmem:[#allocation2 + $0xf8] sm:$0xff] }
 0x20b   : > { %3069 = vmatmul.bf16.gmra.mxu1 %v8265_v41  ;;  %v8289_v44 = vor.u32 %v10458_v2, %v8286_v36  ;;  %v1766_v49 = vshrl.u32 %v1653_v47, 16  ;;  %v1769_v50 = vshll.u32 %v1653_v47, 16  ;;  %v8308_v2 = vld [vmem:[#allocation2 + $0xa0] sm:$0xf]  ;;  %v10464_v36 = vld [vmem:[#allocation2 + $0xa4] sm:$0xf] }
 0x20c   : > { %3913 = vmatmul.bf16.gmra.mxu2 %v8773_v4  ;;  %v1655_v47 = vld [vmem:[#allocation2 + $0x128] sm:$0xff] }
 0x20d   : > { %3972 = vmatmul.bf16.gmra.mxu3 %v8777_v6  ;;  %v1783_v6 = vrot.slane %v1782_v40, 4  ;;  %v1771_v54 = vrot.slane %v1769_v50, 5  ;;  %v1788_v50 = vshll.u32 %v1655_v47, 16 }
 0x20f   : > { %v2903_v52 = vpop.f32.mrf.mxu2  ;;  %v2787_v5 = vpop.f32.mrf.mxu0  ;;  %v1948_v35 = vsel %vm11837_vm5, %v1783_v6, %v1947_v7  ;;  %v1951_v7 = vld [vmem:[#allocation2 + $0x148] sm:$0xff] }
 0x210   : > { %v2962_v53 = vpop.f32.mrf.mxu3  ;;  %v2904_v57 = vadd.f32 %v2903_v52, %v2845_v51  ;;  %v2846_v8 = vpop.f32.mrf.mxu1  ;;  %1949 = vst [vmem:[#allocation2 + $0x118] sm:$0xff] %v1948_v35 }
 0x211   : > { %v2847_v17 = vadd.f32 %v2846_v8, %v2787_v5 }
 0x212   : > { %v11948_v59 = vadd.f32 %v2962_v53, %v2904_v57  ;;  %v1768_v53 = vrot.slane %v1766_v49, 4  ;;  %v1785_v49 = vshrl.u32 %v1655_v47, 16  ;;  %v1955_v47 = vld [vmem:[#allocation2 + $0x178] sm:$0xff] }
 0x214   : > { %v1772_v57 = vor.u32 %v1771_v54, %v1768_v53  ;;  %v10639_v53 = vld [vmem:[%s13036_s11 + $0x258] sm:$0xff]  ;;  %v1787_v54 = vrot.slane %v1785_v49, 4 }
 0x215   : > { %4081 = vmatpush.bf16.msrb.mxu1 %v10639_v53  ;;  %v1657_v49 = vld [vmem:[#allocation2 + $0x158] sm:$0xff] }
 0x216   : > { %v1773_v61 = vrot.slane %v1772_v57, 4 }
 0x217   : > { %v2905_v27 = vpop.f32.mrf.mxu2  ;;  %v2790_v41 = vpop.f32.mrf.mxu0  ;;  %v1996_v14 = vld [vmem:[#allocation2 + $0x118] sm:$0x88] }
 0x218   : > { %v2964_v28 = vpop.f32.mrf.mxu3  ;;  %v2906_v31 = vadd.f32 %v2905_v27, %v2847_v17  ;;  %v2849_v48 = vpop.f32.mrf.mxu1  ;;  %v1778_v20 = vsel %vm11863_vm0, %v1773_v61, %v1777_v25  ;;  %v1997_v22 = vsel %vm11879_vm3, 0, %v1996_v14  ;;  %v1800_v27 = vrot.slane %v1798_v0, 4  ;;  %v8844_v14 = vld [vmem:[#allocation2 + $0xf0] sm:$0xf] }
 0x219   : > { %v2850_v46 = vadd.f32 %v2849_v48, %v2790_v41  ;;  %1946 = vst [vmem:[#allocation2 + $0x100] sm:$0xff] %v1778_v20  ;;  %v10576_v20 = vld [vmem:[#allocation2 + $0xf4] sm:$0xf] }
 0x21a   : > { %v11957_v4 = vadd.f32 %v2964_v28, %v2906_v31  ;;  %3015 = vmatmul.bf16.gmra.mxu0 %v8285_v43  ;;  %1998 = vst [vmem:[#allocation2 + $0x118] sm:$0x88] %v1997_v22  ;;  %v1801_v40 = vor.u32 %v1800_v27, %v1796_v26  ;;  %v8309_v43 = vor.u32 %v10467_v34, %v8308_v2  ;;  %v8846_v22 = vld [vmem:[#allocation2 + $0x108] sm:$0xf0] }
 0x21b   : > { %3074 = vmatmul.bf16.gmra.mxu1 %v8289_v44 }
 0x21c   : > { %3918 = vmatmul.bf16.gmra.mxu2 %v8797_v37  ;;  %v8310_v37 = vld [vmem:[#allocation2 + $0xb8] sm:$0xf0]  ;;  %v1802_v25 = vrot.slane %v1801_v40, 4  ;;  %v8334_v40 = vld [vmem:[#allocation2 + $0xe8] sm:$0xf0] }
 0x21d   : > { %3977 = vmatmul.bf16.gmra.mxu3 %v8801_v39  ;;  %v8821_v39 = vor.u32 %v10573_v11, %v8820_v9  ;;  %v8313_v44 = vor.u32 %v10464_v36, %v8310_v37  ;;  %v8332_v36 = vld [vmem:[#allocation2 + $0xd0] sm:$0xf] }
 0x21e   : > { %v1952_v35 = vsel %vm11837_vm5, %v1802_v25, %v1951_v7  ;;  %v8849_v7 = vor.u32 %v10576_v20, %v8846_v22  ;;  %v10585_v20 = vld [vmem:[#allocation2 + $0x134] sm:$0xf0]  ;;  %v10582_v22 = vld [vmem:[#allocation2 + $0x124] sm:$0xf] }
 0x21f   : > { %v2908_v51 = vpop.f32.mrf.mxu2  ;;  %v2792_v5 = vpop.f32.mrf.mxu0  ;;  %1953 = vst [vmem:[#allocation2 + $0x148] sm:$0xff] %v1952_v35 }
 0x220   : > { %v2967_v52 = vpop.f32.mrf.mxu3  ;;  %v2909_v56 = vadd.f32 %v2908_v51, %v2850_v46  ;;  %v2851_v8 = vpop.f32.mrf.mxu1 }
 0x221   : > { %v2852_v17 = vadd.f32 %v2851_v8, %v2792_v5  ;;  %v1813_v5 = vshll.u32 %v1658_v63, 16  ;;  %v1817_v8 = vshrl.u32 %v1658_v63, 16  ;;  %v10630_v63 = vld [vmem:[%s13036_s11 + $0x210] sm:$0xff] }
 0x222   : > { %v11964_v58 = vadd.f32 %v2967_v52, %v2909_v56  ;;  %v10631_v52 = vld [vmem:[%s13036_s11 + $0x218] sm:$0xff]  ;;  %v1790_v56 = vrot.slane %v1788_v50, 5 }
 0x223   : > { %4022 = vmatpush.bf16.msra.mxu0 %v10631_v52  ;;  %v1819_v2 = vrot.slane %v1817_v8, 4  ;;  %v1660_v8 = vld [vmem:[#allocation2 + $0x1a0] sm:$0xff] }
 0x224   : > { %v1791_v60 = vor.u32 %v1790_v56, %v1787_v54 }
 0x226   : > { %v1792_v0 = vrot.slane %v1791_v60, 4  ;;  %v1999_v18 = vld [vmem:[#allocation2 + $0x148] sm:$0x88] }
 0x227   : > { %v2910_v28 = vpop.f32.mrf.mxu2  ;;  %v2795_v41 = vpop.f32.mrf.mxu0  ;;  %4023 = vmatpush.bf16.msra.mxu0 %v10630_v63 }
 0x228   : > { %v2969_v30 = vpop.f32.mrf.mxu3  ;;  %v2911_v31 = vadd.f32 %v2910_v28, %v2852_v17  ;;  %v2854_v48 = vpop.f32.mrf.mxu1  ;;  %v10579_v17 = vld [vmem:[#allocation2 + $0x104] sm:$0xf0]  ;;  %v1797_v27 = vsel %vm11863_vm0, %v1792_v0, %v1796_v26  ;;  %v2000_v28 = vsel %vm11879_vm3, 0, %v1999_v18 }
 0x229   : > { %v2855_v46 = vadd.f32 %v2854_v48, %v2795_v41  ;;  %1950 = vst [vmem:[#allocation2 + $0x130] sm:$0xff] %v1797_v27  ;;  %v8845_v25 = vor.u32 %v10579_v17, %v8844_v14  ;;  %v1832_v14 = vshll.u32 %v1660_v8, 16  ;;  %v1836_v17 = vshrl.u32 %v1660_v8, 16 }
 0x22a   : > { %v11970_v6 = vadd.f32 %v2969_v30, %v2911_v31  ;;  %3020 = vmatmul.bf16.gmra.mxu0 %v8309_v43  ;;  %v1815_v30 = vrot.slane %v1813_v5, 5  ;;  %2001 = vst [vmem:[#allocation2 + $0x148] sm:$0x88] %v2000_v28 }
 0x22b   : > { %3079 = vmatmul.bf16.gmra.mxu1 %v8313_v44 }
 0x22c   : > { %3923 = vmatmul.bf16.gmra.mxu2 %v8821_v39  ;;  %v10473_v39 = vld [vmem:[#allocation2 + $0xe4] sm:$0xf0]  ;;  %v1820_v43 = vor.u32 %v1819_v2, %v1815_v30  ;;  %v8870_v2 = vld [vmem:[#allocation2 + $0x138] sm:$0xf0] }
 0x22d   : > { %3982 = vmatmul.bf16.gmra.mxu3 %v8825_v29  ;;  %v10470_v29 = vld [vmem:[#allocation2 + $0xd4] sm:$0xf]  ;;  %v8333_v41 = vor.u32 %v10473_v39, %v8332_v36  ;;  %v1838_v39 = vrot.slane %v1836_v17, 4 }
 0x22e   : > { %v1821_v26 = vrot.slane %v1820_v43, 4  ;;  %v8337_v48 = vor.u32 %v10470_v29, %v8334_v40  ;;  %v10479_v43 = vld [vmem:[#allocation2 + $0x114] sm:$0xf0] }
 0x22f   : > { %v2913_v16 = vpop.f32.mrf.mxu2  ;;  %v2797_v9 = vpop.f32.mrf.mxu0 }
 0x230   : > { %v2972_v51 = vpop.f32.mrf.mxu3  ;;  %v2914_v57 = vadd.f32 %v2913_v16, %v2855_v46  ;;  %v2856_v11 = vpop.f32.mrf.mxu1  ;;  %v1804_v46 = vshrl.u32 %v1657_v49, 16  ;;  %v1807_v16 = vshll.u32 %v1657_v49, 16 }
 0x231   : > { %v2857_v19 = vadd.f32 %v2856_v11, %v2797_v9  ;;  %v8868_v9 = vld [vmem:[#allocation2 + $0x120] sm:$0xf] }
 0x232   : > { %v11980_v61 = vadd.f32 %v2972_v51, %v2914_v57  ;;  %v1956_v51 = vsel %vm11837_vm5, %v1821_v26, %v1955_v47  ;;  %v1806_v56 = vrot.slane %v1804_v46, 4  ;;  %v1809_v57 = vrot.slane %v1807_v16, 5  ;;  %v10476_v26 = vld [vmem:[#allocation2 + $0x104] sm:$0xf]  ;;  %v8358_v47 = vld [vmem:[#allocation2 + $0x118] sm:$0xf0] }
 0x233   : > { %1957 = vst [vmem:[#allocation2 + $0x178] sm:$0xff] %v1956_v51  ;;  %v8361_v16 = vor.u32 %v10476_v26, %v8358_v47  ;;  %v1659_v51 = vld [vmem:[#allocation2 + $0x188] sm:$0xff] }
 0x234   : > { %v1810_v0 = vor.u32 %v1809_v57, %v1806_v56  ;;  %v1826_v56 = vshll.u32 %v1659_v51, 16 }
 0x236   : > { %v1811_v11 = vrot.slane %v1810_v0, 4 }
 0x237   : > { %v2915_v31 = vpop.f32.mrf.mxu2  ;;  %v2800_v50 = vpop.f32.mrf.mxu0 }
 0x238   : > { %v2974_v34 = vpop.f32.mrf.mxu3  ;;  %v2916_v37 = vadd.f32 %v2915_v31, %v2857_v19  ;;  %v2859_v35 = vpop.f32.mrf.mxu1  ;;  %v10638_v31 = vld [vmem:[%s13036_s11 + $0x250] sm:$0xff] }
 0x239   : > { %v2860_v52 = vadd.f32 %v2859_v35, %v2800_v50  ;;  %4082 = vmatpush.bf16.msrb.mxu1 %v10638_v31  ;;  %v1959_v35 = vld [vmem:[#allocation2 + $0x1a8] sm:$0xff] }
 0x23a   : > { %v11986_v44 = vadd.f32 %v2974_v34, %v2916_v37  ;;  %3025 = vmatmul.bf16.gmra.mxu0 %v8333_v41  ;;  %v2002_v27 = vld [vmem:[#allocation2 + $0x178] sm:$0x88]  ;;  %v1816_v34 = vsel %vm11863_vm0, %v1811_v11, %v1815_v30  ;;  %v1834_v37 = vrot.slane %v1832_v14, 5  ;;  %v8869_v41 = vor.u32 %v10585_v20, %v8868_v9  ;;  %v10591_v20 = vld [vmem:[#allocation2 + $0x164] sm:$0xf0] }
 0x23b   : > { %3084 = vmatmul.bf16.gmra.mxu1 %v8337_v48  ;;  %v2003_v36 = vsel %vm11879_vm3, 0, %v2002_v27  ;;  %1954 = vst [vmem:[#allocation2 + $0x160] sm:$0xff] %v1816_v34  ;;  %v8873_v48 = vor.u32 %v10582_v22, %v8870_v2  ;;  %v1828_v9 = vrot.slane %v1826_v56, 5  ;;  %v10588_v34 = vld [vmem:[#allocation2 + $0x154] sm:$0xf] }
 0x23c   : > { %3928 = vmatmul.bf16.gmra.mxu2 %v8845_v25  ;;  %v8356_v25 = vld [vmem:[#allocation2 + $0x100] sm:$0xf]  ;;  %2004 = vst [vmem:[#allocation2 + $0x178] sm:$0x88] %v2003_v36  ;;  %v1839_v49 = vor.u32 %v1838_v39, %v1834_v37  ;;  %v12008_v39 = vld [vmem:[#allocation2 + $0x1e8] sm:$0xff] }
 0x23d   : > { %3987 = vmatmul.bf16.gmra.mxu3 %v8849_v7  ;;  %v8357_v46 = vor.u32 %v10479_v43, %v8356_v25  ;;  %v10629_v25 = vld [vmem:[%s13036_s11 + $0x208] sm:$0xff] }
 0x23e   : > { %v1840_v30 = vrot.slane %v1839_v49, 4  ;;  %v1491_v49 = vshrl.u32 %v12008_v39, 16  ;;  %4024 = vmatpush.bf16.msra.mxu0 %v10629_v25 }
 0x23f   : > { %v2918_v53 = vpop.f32.mrf.mxu2  ;;  %v2802_v18 = vpop.f32.mrf.mxu0 }
 0x240   : > { %v2977_v54 = vpop.f32.mrf.mxu3  ;;  %v2919_v60 = vadd.f32 %v2918_v53, %v2860_v52  ;;  %v2861_v19 = vpop.f32.mrf.mxu1  ;;  %v1960_v57 = vsel %vm11837_vm5, %v1840_v30, %v1959_v35 }
 0x241   : > { %v2862_v28 = vadd.f32 %v2861_v19, %v2802_v18  ;;  %1961 = vst [vmem:[#allocation2 + $0x1a8] sm:$0xff] %v1960_v57  ;;  %v8892_v18 = vld [vmem:[#allocation2 + $0x150] sm:$0xf]  ;;  %v1493_v57 = vrot.slane %v1491_v49, 7 }
 0x242   : > { %v11993_v5 = vadd.f32 %v2977_v54, %v2919_v60  ;;  %v1823_v54 = vshrl.u32 %v1659_v51, 16  ;;  %v1662_v19 = vld [vmem:[#allocation2 + $0x1d0] sm:$0xff]  ;;  %v1494_v51 = vshll.u32 %v12008_v39, 16 }
 0x243   : > { %v1851_v27 = vshll.u32 %v1662_v19, 16 }
 0x244   : > { %v1825_v8 = vrot.slane %v1823_v54, 4 }
 0x245   : > { %v12020_v47 = vrot.slane %v1851_v27, 5 }
 0x246   : > { %v1829_v14 = vor.u32 %v1828_v9, %v1825_v8  ;;  %v1496_v8 = vor.u32 %v1494_v51, %v1493_v57  ;;  %v1593_v9 = vld [vmem:[#allocation2 + $0x1e0] sm:$0xff] }
 0x247   : > { %v2920_v29 = vpop.f32.mrf.mxu2  ;;  %v2805_v52 = vpop.f32.mrf.mxu0 }
 0x248   : > { %v2979_v40 = vpop.f32.mrf.mxu3  ;;  %v2921_v7 = vadd.f32 %v2920_v29, %v2862_v28  ;;  %v2864_v53 = vpop.f32.mrf.mxu1  ;;  %v1830_v22 = vrot.slane %v1829_v14, 4  ;;  %v1855_v28 = vshrl.u32 %v1662_v19, 16  ;;  %v2005_v36 = vld [vmem:[#allocation2 + $0x1a8] sm:$0x88] }
 0x249   : > { %v2865_v60 = vadd.f32 %v2864_v53, %v2805_v52  ;;  %v2006_v26 = vsel %vm11879_vm3, 0, %v2005_v36  ;;  %v10485_v52 = vld [vmem:[#allocation2 + $0x144] sm:$0xf0]  ;;  %v8382_v53 = vld [vmem:[#allocation2 + $0x148] sm:$0xf0]  ;;  %v10651_v36 = vld [vmem:[%s13036_s11 + $0x2b8] sm:$0xff] }
 0x24a   : > { %v12002_v50 = vadd.f32 %v2979_v40, %v2921_v7  ;;  %3030 = vmatmul.bf16.gmra.mxu0 %v8357_v46  ;;  %v8894_v40 = vld [vmem:[#allocation2 + $0x168] sm:$0xf0]  ;;  %v1835_v43 = vsel %vm11863_vm0, %v1830_v22, %v1834_v37  ;;  %v10482_v46 = vld [vmem:[#allocation2 + $0x134] sm:$0xf]  ;;  %2007 = vst [vmem:[#allocation2 + $0x1a8] sm:$0x88] %v2006_v26  ;;  %4136 = vmatpush.bf16.msrb.mxu2 %v10651_v36 }
 0x24b   : > { %3089 = vmatmul.bf16.gmra.mxu1 %v8361_v16  ;;  %v10637_v7 = vld [vmem:[%s13036_s11 + $0x248] sm:$0xff]  ;;  %1958 = vst [vmem:[#allocation2 + $0x190] sm:$0xff] %v1835_v43  ;;  %v8893_v16 = vor.u32 %v10591_v20, %v8892_v18  ;;  %v8897_v54 = vor.u32 %v10588_v34, %v8894_v40  ;;  %v8385_v14 = vor.u32 %v10482_v46, %v8382_v53  ;;  %v1661_v18 = vld [vmem:[#allocation2 + $0x1b8] sm:$0xff] }
 0x24c   : > { %3933 = vmatmul.bf16.gmra.mxu2 %v8869_v41  ;;  %v8380_v41 = vld [vmem:[#allocation2 + $0x130] sm:$0xf]  ;;  %4083 = vmatpush.bf16.msrb.mxu1 %v10637_v7  ;;  %v1842_v22 = vshrl.u32 %v1661_v18, 16  ;;  %v1845_v27 = vshll.u32 %v1661_v18, 16  ;;  %v1594_v34 = vsel %vm11626_vm8, %v1496_v8, %v1593_v9  ;;  %v8918_v18 = vld [vmem:[#allocation2 + $0x198] sm:$0xf0] }
 0x24d   : > { %3992 = vmatmul.bf16.gmra.mxu3 %v8873_v48  ;;  %v1857_v48 = vrot.slane %v1855_v28, 4  ;;  %1595 = vst [vmem:[#allocation2 + $0x1e0] sm:$0xff] %v1594_v34  ;;  %v10658_v8 = vld [vmem:[%s13036_s11 + $0x2f0] sm:$0xff]  ;;  %v10491_v36 = vld [vmem:[#allocation2 + $0x174] sm:$0xf0] }
 0x24e   : > { %v1847_v7 = vrot.slane %v1845_v27, 5  ;;  %v10488_v27 = vld [vmem:[#allocation2 + $0x164] sm:$0xf] }
 0x24f   : > { %v2923_v63 = vpop.f32.mrf.mxu2  ;;  %v2807_v2 = vpop.f32.mrf.mxu0  ;;  %v1858_v56 = vor.u32 %v1857_v48, %v12020_v47 }
 0x250   : > { %v2982_v0 = vpop.f32.mrf.mxu3  ;;  %v2924_v11 = vadd.f32 %v2923_v63, %v2865_v60  ;;  %v2866_v31 = vpop.f32.mrf.mxu1 }
 0x251   : > { %v2867_v29 = vadd.f32 %v2866_v31, %v2807_v2  ;;  %v1859_v63 = vrot.slane %v1858_v56, 4  ;;  %v12033_v31 = vld [vmem:[#allocation2 + $0x200] sm:$0xff] }
 0x252   : > { %v12006_v17 = vadd.f32 %v2982_v0, %v2924_v11  ;;  %v1963_v0 = vld [vmem:[#allocation2 + $0x1d8] sm:$0xff]  ;;  %v8381_v11 = vor.u32 %v10485_v52, %v8380_v41  ;;  %v1499_v43 = vshrl.u32 %v12033_v31, 16  ;;  %v1502_v48 = vshll.u32 %v12033_v31, 16  ;;  %v8916_v52 = vld [vmem:[#allocation2 + $0x180] sm:$0xf]  ;;  %v10729_v31 = vld [vmem:[%s13036_s11 + $0x348] sm:$0xff] }
 0x253   : > { %v1964_v28 = vsel %vm11837_vm5, %v1859_v63, %v1963_v0  ;;  %v10659_v41 = vld [vmem:[%s13036_s11 + $0x2f8] sm:$0xff]  ;;  %v8932_v39 = vld [vmem:[#allocation2 + $0x190] sm:$0xf] }
 0x254   : > { %1965 = vst [vmem:[#allocation2 + $0x1d8] sm:$0xff] %v1964_v28  ;;  %4195 = vmatpush.bf16.msrb.mxu3 %v10659_v41  ;;  %v10597_v0 = vld [vmem:[#allocation2 + $0x194] sm:$0xf0]  ;;  %v10649_v28 = vld [vmem:[%s13036_s11 + $0x2a8] sm:$0xff] }
 0x257   : > { %v2925_v30 = vpop.f32.mrf.mxu2  ;;  %v2810_v19 = vpop.f32.mrf.mxu0 }
 0x258   : > { %v2984_v35 = vpop.f32.mrf.mxu3  ;;  %v2926_v37 = vadd.f32 %v2925_v30, %v2867_v29  ;;  %v2869_v20 = vpop.f32.mrf.mxu1  ;;  %v1844_v29 = vrot.slane %v1842_v22, 4  ;;  %v8404_v22 = vld [vmem:[#allocation2 + $0x160] sm:$0xf]  ;;  %4196 = vmatpush.bf16.msrb.mxu3 %v10658_v8 }
 0x259   : > { %v2870_v2 = vadd.f32 %v2869_v20, %v2810_v19 }
 0x25a   : > { %v12027_v60 = vadd.f32 %v2984_v35, %v2926_v37  ;;  %3035 = vmatmul.bf16.gmra.mxu0 %v8381_v11  ;;  %v1848_v30 = vor.u32 %v1847_v7, %v1844_v29  ;;  %v1501_v35 = vrot.slane %v1499_v43, 7  ;;  %v1497_v37 = vrot.slane %v1493_v57, 4  ;;  %v1637_v29 = vld [vmem:[#allocation2 + $0x1e0] sm:$0x11] }
 0x25b   : > { %3094 = vmatmul.bf16.gmra.mxu1 %v8385_v14  ;;  %v2008_v9 = vld [vmem:[#allocation2 + $0x1d8] sm:$0x88]  ;;  %v10594_v14 = vld [vmem:[#allocation2 + $0x184] sm:$0xf]  ;;  %v1638_v41 = vsel %vm11684_vm15, 0, %v1637_v29 }
 0x25c   : > { %3938 = vmatmul.bf16.gmra.mxu2 %v8893_v16  ;;  %v10650_v16 = vld [vmem:[%s13036_s11 + $0x2b0] sm:$0xff]  ;;  %v1849_v53 = vrot.slane %v1848_v30, 4  ;;  %v2009_v19 = vsel %vm11879_vm3, 0, %v2008_v9  ;;  %v8921_v7 = vor.u32 %v10594_v14, %v8918_v18  ;;  %v10628_v30 = vld [vmem:[%s13036_s11 + $0x200] sm:$0xff]  ;;  %1639 = vst [vmem:[#allocation2 + $0x1e0] sm:$0x11] %v1638_v41 }
 0x25d   : > { %3997 = vmatmul.bf16.gmra.mxu3 %v8897_v54  ;;  %v1504_v54 = vor.u32 %v1502_v48, %v1501_v35  ;;  %4137 = vmatpush.bf16.msrb.mxu2 %v10650_v16  ;;  %2010 = vst [vmem:[#allocation2 + $0x1d8] sm:$0x88] %v2009_v19  ;;  %v10648_v16 = vld [vmem:[%s13036_s11 + $0x2a0] sm:$0xff]  ;;  %v10655_v14 = vld [vmem:[%s13036_s11 + $0x2d8] sm:$0xff]  ;;  %v10646_v19 = vld [vmem:[%s13036_s11 + $0x290] sm:$0xff] }
 0x25e   : > { %v1854_v57 = vsel %vm11863_vm0, %v1849_v53, %v12020_v47  ;;  %4025 = vmatpush.bf16.msra.mxu0 %v10628_v30  ;;  %v10636_v18 = vld [vmem:[%s13036_s11 + $0x240] sm:$0xff]  ;;  %v8942_v29 = vld [vmem:[#allocation2 + $0x1c8] sm:$0xf0]  ;;  %v10497_v30 = vld [vmem:[#allocation2 + $0x1a4] sm:$0xf0] }
 0x25f   : > { %v2928_v40 = vpop.f32.mrf.mxu2  ;;  %v2812_v56 = vpop.f32.mrf.mxu0  ;;  %v1505_v20 = vsel %vm11632_vm10, %v1497_v37, %v1504_v54  ;;  %1962 = vst [vmem:[#allocation2 + $0x1c0] sm:$0xff] %v1854_v57  ;;  %v8405_v37 = vor.u32 %v10491_v36, %v8404_v22  ;;  %4084 = vmatpush.bf16.msrb.mxu1 %v10636_v18  ;;  %v10600_v36 = vld [vmem:[#allocation2 + $0x1b4] sm:$0xf] }
 0x260   : > { %v2987_v25 = vpop.f32.mrf.mxu3  ;;  %v2929_v26 = vadd.f32 %v2928_v40, %v2870_v2  ;;  %v2871_v63 = vpop.f32.mrf.mxu1  ;;  %v8406_v40 = vld [vmem:[#allocation2 + $0x178] sm:$0xf0]  ;;  %1596 = vst [vmem:[#allocation2 + $0x1f8] sm:$0xff] %v1505_v20 }
 0x261   : > { %v2872_v11 = vadd.f32 %v2871_v63, %v2812_v56  ;;  %4138 = vmatpush.bf16.msrb.mxu2 %v10649_v28  ;;  %v10656_v56 = vld [vmem:[%s13036_s11 + $0x2e0] sm:$0xff]  ;;  %v10654_v28 = vld [vmem:[%s13036_s11 + $0x2d0] sm:$0xff] }
 0x262   : > { %v12047_v46 = vadd.f32 %v2987_v25, %v2929_v26  ;;  %v8917_v25 = vor.u32 %v10597_v0, %v8916_v52  ;;  %v10657_v26 = vld [vmem:[%s13036_s11 + $0x2e8] sm:$0xff]  ;;  %v8409_v52 = vor.u32 %v10488_v27, %v8406_v40  ;;  %v10647_v0 = vld [vmem:[%s13036_s11 + $0x298] sm:$0xff]  ;;  %v8940_v27 = vld [vmem:[#allocation2 + $0x1b0] sm:$0xf] }
 0x263   : > { %4197 = vmatpush.bf16.msrb.mxu3 %v10657_v26  ;;  %v10653_v26 = vld [vmem:[%s13036_s11 + $0x2c8] sm:$0xff] }
 0x265   : > { %4139 = vmatpush.bf16.msrb.mxu2 %v10648_v16  ;;  %v10494_v16 = vld [vmem:[#allocation2 + $0x194] sm:$0xf] }
 0x267   : > { %v2930_v2 = vpop.f32.mrf.mxu2  ;;  %v2815_v53 = vpop.f32.mrf.mxu0  ;;  %4198 = vmatpush.bf16.msrb.mxu3 %v10656_v56  ;;  %v10644_v56 = vld [vmem:[%s13036_s11 + $0x280] sm:$0xff] }
 0x268   : > { %v2989_v34 = vpop.f32.mrf.mxu3  ;;  %v2931_v47 = vadd.f32 %v2930_v2, %v2872_v11  ;;  %v2874_v54 = vpop.f32.mrf.mxu1 }
 0x269   : > { %v2875_v63 = vadd.f32 %v2874_v54, %v2815_v53  ;;  %4140 = vmatpush.bf16.msrb.mxu2 %v10647_v0  ;;  %v8945_v53 = vor.u32 %v10600_v36, %v8942_v29  ;;  %v8964_v29 = vld [vmem:[#allocation2 + $0x1e0] sm:$0xf] }
 0x26a   : > { %v12075_v35 = vadd.f32 %v2989_v34, %v2931_v47  ;;  %3040 = vmatmul.bf16.gmra.mxu0 %v8405_v37  ;;  %v10603_v34 = vld [vmem:[#allocation2 + $0x1c4] sm:$0xf0]  ;;  %v8430_v37 = vld [vmem:[#allocation2 + $0x1a8] sm:$0xf0] }
 0x26b   : > { %3099 = vmatmul.bf16.gmra.mxu1 %v8409_v52  ;;  %4199 = vmatpush.bf16.msrb.mxu3 %v10655_v14  ;;  %v10645_v47 = vld [vmem:[%s13036_s11 + $0x288] sm:$0xff]  ;;  %v8941_v52 = vor.u32 %v10603_v34, %v8940_v27  ;;  %v8433_v0 = vor.u32 %v10494_v16, %v8430_v37  ;;  %v10727_v27 = vld [vmem:[%s13036_s11 + $0x338] sm:$0xff]  ;;  %v10500_v37 = vld [vmem:[#allocation2 + $0x1c4] sm:$0xf] }
 0x26c   : > { %3943 = vmatmul.bf16.gmra.mxu2 %v8917_v25  ;;  %5059 = vmatpush.bf16.msrb.mxu0 %v10727_v27  ;;  %v10609_v34 = vld [vmem:[#allocation2 + $0x1f4] sm:$0xf0] }
 0x26d   : > { %4002 = vmatmul.bf16.gmra.mxu3 %v8921_v7  ;;  %4141 = vmatpush.bf16.msrb.mxu2 %v10646_v19  ;;  %v8428_v7 = vld [vmem:[#allocation2 + $0x190] sm:$0xf]  ;;  %v10503_v16 = vld [vmem:[#allocation2 + $0x1d4] sm:$0xf0] }
 0x26f   : > { %v2933_v8 = vpop.f32.mrf.mxu2  ;;  %v2817_v20 = vpop.f32.mrf.mxu0  ;;  %4200 = vmatpush.bf16.msrb.mxu3 %v10654_v28  ;;  %v10735_v28 = vld [vmem:[%s13036_s11 + $0x378] sm:$0xff] }
 0x270   : > { %v2992_v9 = vpop.f32.mrf.mxu3  ;;  %v2934_v11 = vadd.f32 %v2933_v8, %v2875_v63  ;;  %v2876_v22 = vpop.f32.mrf.mxu1  ;;  %v8429_v63 = vor.u32 %v10497_v30, %v8428_v7  ;;  %5118 = vmatpush.bf16.msra.mxu1 %v10735_v28 }
 0x271   : > { %v2877_v2 = vadd.f32 %v2876_v22, %v2817_v20  ;;  %4142 = vmatpush.bf16.msrb.mxu2 %v10645_v47  ;;  %v10606_v47 = vld [vmem:[#allocation2 + $0x1e4] sm:$0xf] }
 0x272   : > { %v12092_v57 = vadd.f32 %v2992_v9, %v2934_v11  ;;  %v10652_v11 = vld [vmem:[%s13036_s11 + $0x2c0] sm:$0xff] }
 0x273   : > { %4201 = vmatpush.bf16.msrb.mxu3 %v10653_v26 }
 0x275   : > { %4143 = vmatpush.bf16.msrb.mxu2 %v10644_v56 }
 0x277   : > { %v2935_v40 = vpop.f32.mrf.mxu2  ;;  %v3006_v8 = vpop.f32.mrf.mxu0  ;;  %4202 = vmatpush.bf16.msrb.mxu3 %v10652_v11 }
 0x278   : > { %v2994_v25 = vpop.f32.mrf.mxu3  ;;  %v2936_v41 = vadd.f32 %v2935_v40, %v2877_v2  ;;  %v3065_v9 = vpop.f32.mrf.mxu1  ;;  %v3007_v14 = vadd.f32 %v3006_v8, %v11905_v24  ;;  %v8966_v40 = vld [vmem:[#allocation2 + $0x1f8] sm:$0xf0] }
 0x279   : > { %v8969_v56 = vor.u32 %v10606_v47, %v8966_v40 }
 0x27a   : > { %v12106_v54 = vadd.f32 %v2994_v25, %v2936_v41  ;;  %v3066_v18 = vadd.f32 %v3065_v9, %v3007_v14  ;;  %3045 = vmatmul.bf16.gmra.mxu0 %v8429_v63  ;;  %v8452_v41 = vld [vmem:[#allocation2 + $0x1c0] sm:$0xf] }
 0x27b   : > { %3104 = vmatmul.bf16.gmra.mxu1 %v8433_v0  ;;  %v8453_v63 = vor.u32 %v10503_v16, %v8452_v41  ;;  %v10556_v41 = vld [vmem:[#allocation2 + $0x4c] sm:$0xf0]  ;;  %v10553_v16 = vld [vmem:[#allocation2 + $0x3c] sm:$0xf] }
 0x27c   : > { %3948 = vmatmul.bf16.gmra.mxu2 %v8941_v52  ;;  %3115 = vst [vmem:[#allocation4] sm:$0xff] %v3066_v18  ;;  %v8454_v52 = vld [vmem:[#allocation2 + $0x1d8] sm:$0xf0] }
 0x27d   : > { %4007 = vmatmul.bf16.gmra.mxu3 %v8945_v53  ;;  %v8965_v53 = vor.u32 %v10609_v34, %v8964_v29  ;;  %v8457_v0 = vor.u32 %v10500_v37, %v8454_v52  ;;  %v10557_v34 = vld [vmem:[#allocation2 + $0x54] sm:$0xf0]  ;;  %v8758_v37 = vld [vmem:[#allocation2 + $0x50] sm:$0xf0] }
 0x27f   : > { %v3909_v19 = vpop.f32.mrf.mxu2  ;;  %v3008_v24 = vpop.f32.mrf.mxu0 }
 0x280   : > { %v3968_v20 = vpop.f32.mrf.mxu3  ;;  %v3067_v2 = vpop.f32.mrf.mxu1  ;;  %v3009_v36 = vadd.f32 %v3008_v24, %v11912_v12  ;;  %v8764_v24 = vld [vmem:[#allocation2 + $0x40] sm:$0xf] }
 0x281   : > { %v12115_v22 = vadd.f32 %v3968_v20, %v3909_v19  ;;  %v10726_v20 = vld [vmem:[%s13036_s11 + $0x330] sm:$0xff]  ;;  %v8765_v52 = vor.u32 %v10557_v34, %v8764_v24  ;;  %v10563_v24 = vld [vmem:[#allocation2 + $0x84] sm:$0xf0]  ;;  %v8790_v34 = vld [vmem:[#allocation2 + $0x88] sm:$0xf0] }
 0x282   : > { %v3068_v25 = vadd.f32 %v3067_v2, %v3009_v36  ;;  %5060 = vmatpush.bf16.msrb.mxu0 %v10726_v20  ;;  %v8766_v36 = vld [vmem:[#allocation2 + $0x58] sm:$0xf0] }
 0x284   : > { %3116 = vst [vmem:[#allocation4 + $0x38] sm:$0xff] %v3068_v25  ;;  %v8756_v25 = vld [vmem:[#allocation2 + $0x38] sm:$0xf] }
 0x287   : > { %v3911_v7 = vpop.f32.mrf.mxu2  ;;  %v3011_v8 = vpop.f32.mrf.mxu0 }
 0x288   : > { %v3970_v26 = vpop.f32.mrf.mxu3  ;;  %v3070_v9 = vpop.f32.mrf.mxu1  ;;  %v3012_v12 = vadd.f32 %v3011_v8, %v11919_v10  ;;  %v10554_v10 = vld [vmem:[#allocation2 + $0x44] sm:$0xf] }
 0x289   : > { %v12124_v30 = vadd.f32 %v3970_v26, %v3911_v7  ;;  %v10734_v7 = vld [vmem:[%s13036_s11 + $0x370] sm:$0xff] }
 0x28a   : > { %v3071_v11 = vadd.f32 %v3070_v9, %v3012_v12  ;;  %3050 = vmatmul.bf16.gmra.mxu0 %v8453_v63  ;;  %5119 = vmatpush.bf16.msra.mxu1 %v10734_v7  ;;  %v10559_v7 = vld [vmem:[#allocation2 + $0x6c] sm:$0xf] }
 0x28b   : > { %3109 = vmatmul.bf16.gmra.mxu1 %v8457_v0 }
 0x28c   : > { %3953 = vmatmul.bf16.gmra.mxu2 %v8965_v53  ;;  %3117 = vst [vmem:[#allocation4 + $0x50] sm:$0xff] %v3071_v11  ;;  %v8769_v53 = vor.u32 %v10554_v10, %v8766_v36 }
 0x28d   : > { %4012 = vmatmul.bf16.gmra.mxu3 %v8969_v56  ;;  %v8761_v56 = vor.u32 %v10553_v16, %v8758_v37 }
 0x28f   : > { %v3914_v14 = vpop.f32.mrf.mxu2  ;;  %v3013_v27 = vpop.f32.mrf.mxu0 }
 0x290   : > { %v3973_v18 = vpop.f32.mrf.mxu3  ;;  %v3072_v28 = vpop.f32.mrf.mxu1  ;;  %v3014_v2 = vadd.f32 %v3013_v27, %v11928_v3  ;;  %v8757_v3 = vor.u32 %v10556_v41, %v8756_v25  ;;  %v8788_v27 = vld [vmem:[#allocation2 + $0x70] sm:$0xf]  ;;  %v10562_v25 = vld [vmem:[#allocation2 + $0x7c] sm:$0xf0]  ;;  %v8782_v41 = vld [vmem:[#allocation2 + $0x80] sm:$0xf0] }
 0x291   : > { %v12127_v19 = vadd.f32 %v3973_v18, %v3914_v14  ;;  %v8789_v16 = vor.u32 %v10563_v24, %v8788_v27  ;;  %v8812_v27 = vld [vmem:[#allocation2 + $0xa0] sm:$0xf]  ;;  %v10569_v24 = vld [vmem:[#allocation2 + $0xb4] sm:$0xf0] }
 0x292   : > { %v12133_v29 = vadd.f32 %v3072_v28, %v3014_v2  ;;  %v10560_v2 = vld [vmem:[#allocation2 + $0x74] sm:$0xf] }
 0x293   : > { %v8793_v37 = vor.u32 %v10560_v2, %v8790_v34  ;;  %v10566_v2 = vld [vmem:[#allocation2 + $0xa4] sm:$0xf]  ;;  %v8814_v34 = vld [vmem:[#allocation2 + $0xb8] sm:$0xf0] }
 0x297   : > { %v3916_v47 = vpop.f32.mrf.mxu2  ;;  %v3016_v63 = vpop.f32.mrf.mxu0 }
 0x298   : > { %v3975_v40 = vpop.f32.mrf.mxu3  ;;  %v3075_v0 = vpop.f32.mrf.mxu1  ;;  %v3017_v8 = vadd.f32 %v3016_v63, %v11932_v62 }
 0x299   : > { %v12138_v26 = vadd.f32 %v3975_v40, %v3916_v47  ;;  %v8780_v47 = vld [vmem:[#allocation2 + $0x68] sm:$0xf] }
 0x29a   : > { %v3076_v9 = vadd.f32 %v3075_v0, %v3017_v8  ;;  %4026 = vmatmul.bf16.vlgmr.msra.gmra.mxu0 %v8757_v3  ;;  %v8785_v3 = vor.u32 %v10559_v7, %v8782_v41  ;;  %v10568_v7 = vld [vmem:[#allocation2 + $0xac] sm:$0xf0]  ;;  %v10565_v41 = vld [vmem:[#allocation2 + $0x9c] sm:$0xf] }
 0x29b   : > { %4085 = vmatmul.bf16.vlgmr.msrb.gmra.mxu1 %v8761_v56 }
 0x29c   : > { %4144 = vmatmul.bf16.vlgmr.msrb.gmra.mxu2 %v8765_v52  ;;  %3119 = vst [vmem:[#allocation4 + $0x30] sm:$0xff] %v3076_v9  ;;  %v10725_v52 = vld [vmem:[%s13036_s11 + $0x328] sm:$0xff] }
 0x29d   : > { %4203 = vmatmul.bf16.vlgmr.msrb.gmra.mxu3 %v8769_v53  ;;  %v8781_v53 = vor.u32 %v10562_v25, %v8780_v47  ;;  %5061 = vmatpush.bf16.msrb.mxu0 %v10725_v52  ;;  %v8804_v47 = vld [vmem:[#allocation2 + $0x98] sm:$0xf]  ;;  %v8817_v52 = vor.u32 %v10566_v2, %v8814_v34  ;;  %v10575_v2 = vld [vmem:[#allocation2 + $0xe4] sm:$0xf0]  ;;  %v8838_v34 = vld [vmem:[#allocation2 + $0xe8] sm:$0xf0] }
 0x29f   : > { %v3919_v12 = vpop.f32.mrf.mxu2  ;;  %v3018_v18 = vpop.f32.mrf.mxu0 }
 0x2a0   : > { %v3978_v11 = vpop.f32.mrf.mxu3  ;;  %v3077_v20 = vpop.f32.mrf.mxu1  ;;  %v3019_v28 = vadd.f32 %v3018_v18, %v11944_v32  ;;  %v10733_v32 = vld [vmem:[%s13036_s11 + $0x368] sm:$0xff] }
 0x2a1   : > { %v12141_v14 = vadd.f32 %v3978_v11, %v3919_v12  ;;  %5120 = vmatpush.bf16.msra.mxu1 %v10733_v32  ;;  %v10724_v32 = vld [vmem:[%s13036_s11 + $0x320] sm:$0xff] }
 0x2a2   : > { %v12144_v10 = vadd.f32 %v3077_v20, %v3019_v28  ;;  %5062 = vmatpush.bf16.msrb.mxu0 %v10724_v32 }
 0x2a7   : > { %v3921_v36 = vpop.f32.mrf.mxu2  ;;  %v3021_v56 = vpop.f32.mrf.mxu0 }
 0x2a8   : > { %v3980_v62 = vpop.f32.mrf.mxu3  ;;  %v3080_v63 = vpop.f32.mrf.mxu1  ;;  %v3022_v0 = vadd.f32 %v3021_v56, %v11948_v59 }
 0x2a9   : > { %v12146_v40 = vadd.f32 %v3980_v62, %v3921_v36 }
 0x2aa   : > { %v3081_v8 = vadd.f32 %v3080_v63, %v3022_v0  ;;  %4031 = vmatmul.bf16.gmra.mxu0 %v8781_v53 }
 0x2ab   : > { %4090 = vmatmul.bf16.gmra.mxu1 %v8785_v3 }
 0x2ac   : > { %4149 = vmatmul.bf16.gmra.mxu2 %v8789_v16  ;;  %3121 = vst [vmem:[#allocation4 + $0x78] sm:$0xff] %v3081_v8  ;;  %v8806_v16 = vld [vmem:[#allocation2 + $0xb0] sm:$0xf0] }
 0x2ad   : > { %4208 = vmatmul.bf16.gmra.mxu3 %v8793_v37  ;;  %v8813_v37 = vor.u32 %v10569_v24, %v8812_v27  ;;  %v8809_v53 = vor.u32 %v10565_v41, %v8806_v16  ;;  %v10574_v16 = vld [vmem:[#allocation2 + $0xdc] sm:$0xf0] }
 0x2af   : > { %v3924_v9 = vpop.f32.mrf.mxu2  ;;  %v3023_v18 = vpop.f32.mrf.mxu0 }
 0x2b0   : > { %v3983_v12 = vpop.f32.mrf.mxu3  ;;  %v3082_v20 = vpop.f32.mrf.mxu1  ;;  %v3024_v28 = vadd.f32 %v3023_v18, %v11957_v4  ;;  %v8805_v4 = vor.u32 %v10568_v7, %v8804_v47  ;;  %v10732_v18 = vld [vmem:[%s13036_s11 + $0x360] sm:$0xff]  ;;  %v8828_v7 = vld [vmem:[#allocation2 + $0xc8] sm:$0xf] }
 0x2b1   : > { %v12155_v11 = vadd.f32 %v3983_v12, %v3924_v9  ;;  %5121 = vmatpush.bf16.msra.mxu1 %v10732_v18 }
 0x2b2   : > { %v12158_v36 = vadd.f32 %v3082_v20, %v3024_v28  ;;  %v8836_v28 = vld [vmem:[#allocation2 + $0xd0] sm:$0xf] }
 0x2b3   : > { %v8837_v32 = vor.u32 %v10575_v2, %v8836_v28 }
 0x2b7   : > { %v3926_v62 = vpop.f32.mrf.mxu2  ;;  %v3026_v3 = vpop.f32.mrf.mxu0 }
 0x2b8   : > { %v3985_v59 = vpop.f32.mrf.mxu3  ;;  %v3085_v56 = vpop.f32.mrf.mxu1  ;;  %v3027_v63 = vadd.f32 %v3026_v3, %v11964_v58  ;;  %v10572_v58 = vld [vmem:[#allocation2 + $0xd4] sm:$0xf] }
 0x2b9   : > { %v12160_v25 = vadd.f32 %v3985_v59, %v3926_v62 }
 0x2ba   : > { %v3086_v0 = vadd.f32 %v3085_v56, %v3027_v63  ;;  %4036 = vmatmul.bf16.gmra.mxu0 %v8805_v4  ;;  %v8841_v4 = vor.u32 %v10572_v58, %v8838_v34  ;;  %v10581_v58 = vld [vmem:[#allocation2 + $0x114] sm:$0xf0]  ;;  %v10578_v34 = vld [vmem:[#allocation2 + $0x104] sm:$0xf] }
 0x2bb   : > { %4095 = vmatmul.bf16.gmra.mxu1 %v8809_v53  ;;  %v8829_v53 = vor.u32 %v10574_v16, %v8828_v7  ;;  %v8852_v16 = vld [vmem:[#allocation2 + $0xf8] sm:$0xf] }
 0x2bc   : > { %4154 = vmatmul.bf16.gmra.mxu2 %v8813_v37  ;;  %3123 = vst [vmem:[#allocation4 + $0x8] sm:$0xff] %v3086_v0  ;;  %v10571_v37 = vld [vmem:[#allocation2 + $0xcc] sm:$0xf] }
 0x2bd   : > { %4213 = vmatmul.bf16.gmra.mxu3 %v8817_v52  ;;  %v8830_v52 = vld [vmem:[#allocation2 + $0xe0] sm:$0xf0] }
 0x2be   : > { %v8833_v3 = vor.u32 %v10571_v37, %v8830_v52  ;;  %v10580_v52 = vld [vmem:[#allocation2 + $0x10c] sm:$0xf0] }
 0x2bf   : > { %v3929_v8 = vpop.f32.mrf.mxu2  ;;  %v3028_v20 = vpop.f32.mrf.mxu0 }
 0x2c0   : > { %v3988_v9 = vpop.f32.mrf.mxu3  ;;  %v3087_v27 = vpop.f32.mrf.mxu1  ;;  %v3029_v24 = vadd.f32 %v3028_v20, %v11970_v6  ;;  %v10723_v20 = vld [vmem:[%s13036_s11 + $0x318] sm:$0xff] }
 0x2c1   : > { %v12166_v12 = vadd.f32 %v3988_v9, %v3929_v8  ;;  %5063 = vmatpush.bf16.msrb.mxu0 %v10723_v20 }
 0x2c2   : > { %v3088_v62 = vadd.f32 %v3087_v27, %v3029_v24  ;;  %v10731_v27 = vld [vmem:[%s13036_s11 + $0x358] sm:$0xff]  ;;  %v8860_v24 = vld [vmem:[#allocation2 + $0x100] sm:$0xf] }
 0x2c3   : > { %5122 = vmatpush.bf16.msra.mxu1 %v10731_v27 }
 0x2c4   : > { %3124 = vst [vmem:[#allocation4 + $0x88] sm:$0xff] %v3088_v62  ;;  %v8862_v62 = vld [vmem:[#allocation2 + $0x118] sm:$0xf0] }
 0x2c7   : > { %v3931_v59 = vpop.f32.mrf.mxu2  ;;  %v3031_v56 = vpop.f32.mrf.mxu0 }
 0x2c8   : > { %v3990_v47 = vpop.f32.mrf.mxu3  ;;  %v3090_v63 = vpop.f32.mrf.mxu1  ;;  %v3032_v6 = vadd.f32 %v3031_v56, %v11980_v61  ;;  %v8853_v56 = vor.u32 %v10580_v52, %v8852_v16  ;;  %v8876_v16 = vld [vmem:[#allocation2 + $0x128] sm:$0xf] }
 0x2c9   : > { %v12172_v41 = vadd.f32 %v3990_v47, %v3931_v59 }
 0x2ca   : > { %v3091_v0 = vadd.f32 %v3090_v63, %v3032_v6  ;;  %4041 = vmatmul.bf16.gmra.mxu0 %v8829_v53  ;;  %v8861_v53 = vor.u32 %v10581_v58, %v8860_v24 }
 0x2cb   : > { %4100 = vmatmul.bf16.gmra.mxu1 %v8833_v3  ;;  %v8865_v3 = vor.u32 %v10578_v34, %v8862_v62  ;;  %v10587_v34 = vld [vmem:[#allocation2 + $0x144] sm:$0xf0]  ;;  %v8886_v62 = vld [vmem:[#allocation2 + $0x148] sm:$0xf0] }
 0x2cc   : > { %4159 = vmatmul.bf16.gmra.mxu2 %v8837_v32  ;;  %3125 = vst [vmem:[#allocation4 + $0x28] sm:$0xff] %v3091_v0  ;;  %v10577_v32 = vld [vmem:[#allocation2 + $0xfc] sm:$0xf] }
 0x2cd   : > { %4218 = vmatmul.bf16.gmra.mxu3 %v8841_v4  ;;  %v8854_v4 = vld [vmem:[#allocation2 + $0x110] sm:$0xf0] }
 0x2ce   : > { %v8857_v63 = vor.u32 %v10577_v32, %v8854_v4  ;;  %v10586_v32 = vld [vmem:[#allocation2 + $0x13c] sm:$0xf0]  ;;  %v10583_v4 = vld [vmem:[#allocation2 + $0x12c] sm:$0xf] }
 0x2cf   : > { %v3934_v8 = vpop.f32.mrf.mxu2  ;;  %v3033_v28 = vpop.f32.mrf.mxu0 }
 0x2d0   : > { %v3993_v9 = vpop.f32.mrf.mxu3  ;;  %v3092_v61 = vpop.f32.mrf.mxu1  ;;  %v3034_v2 = vadd.f32 %v3033_v28, %v11986_v44  ;;  %v10722_v28 = vld [vmem:[%s13036_s11 + $0x310] sm:$0xff] }
 0x2d1   : > { %v12175_v18 = vadd.f32 %v3993_v9, %v3934_v8  ;;  %5064 = vmatpush.bf16.msrb.mxu0 %v10722_v28 }
 0x2d2   : > { %v3093_v59 = vadd.f32 %v3092_v61, %v3034_v2  ;;  %v8884_v2 = vld [vmem:[#allocation2 + $0x130] sm:$0xf] }
 0x2d4   : > { %3126 = vst [vmem:[#allocation4 + $0x40] sm:$0xff] %v3093_v59 }
 0x2d7   : > { %v3936_v47 = vpop.f32.mrf.mxu2  ;;  %v3036_v6 = vpop.f32.mrf.mxu0 }
 0x2d8   : > { %v3995_v7 = vpop.f32.mrf.mxu3  ;;  %v3095_v0 = vpop.f32.mrf.mxu1  ;;  %v3037_v44 = vadd.f32 %v3036_v6, %v11993_v5  ;;  %v10584_v5 = vld [vmem:[#allocation2 + $0x134] sm:$0xf] }
 0x2d9   : > { %v12184_v37 = vadd.f32 %v3995_v7, %v3936_v47 }
 0x2da   : > { %v3096_v8 = vadd.f32 %v3095_v0, %v3037_v44  ;;  %4046 = vmatmul.bf16.gmra.mxu0 %v8853_v56  ;;  %v8889_v56 = vor.u32 %v10584_v5, %v8886_v62  ;;  %v10590_v62 = vld [vmem:[#allocation2 + $0x164] sm:$0xf] }
 0x2db   : > { %4105 = vmatmul.bf16.gmra.mxu1 %v8857_v63  ;;  %v10730_v63 = vld [vmem:[%s13036_s11 + $0x350] sm:$0xff] }
 0x2dc   : > { %4164 = vmatmul.bf16.gmra.mxu2 %v8861_v53  ;;  %3127 = vst [vmem:[#allocation4 + $0x58] sm:$0xff] %v3096_v8  ;;  %v8878_v53 = vld [vmem:[#allocation2 + $0x140] sm:$0xf0]  ;;  %5123 = vmatpush.bf16.msra.mxu1 %v10730_v63  ;;  %v10589_v63 = vld [vmem:[#allocation2 + $0x15c] sm:$0xf] }
 0x2dd   : > { %4223 = vmatmul.bf16.gmra.mxu3 %v8865_v3  ;;  %v8885_v3 = vor.u32 %v10587_v34, %v8884_v2  ;;  %v8881_v6 = vor.u32 %v10583_v4, %v8878_v53  ;;  %v10593_v34 = vld [vmem:[#allocation2 + $0x174] sm:$0xf0] }
 0x2de   : > { %v8900_v4 = vld [vmem:[#allocation2 + $0x158] sm:$0xf] }
 0x2df   : > { %v3939_v9 = vpop.f32.mrf.mxu2  ;;  %v3038_v61 = vpop.f32.mrf.mxu0 }
 0x2e0   : > { %v3998_v20 = vpop.f32.mrf.mxu3  ;;  %v3097_v24 = vpop.f32.mrf.mxu1  ;;  %v3039_v58 = vadd.f32 %v3038_v61, %v12002_v50  ;;  %v8877_v50 = vor.u32 %v10586_v32, %v8876_v16  ;;  %5124 = vmatpush.bf16.msra.mxu1 %v10729_v31 }
 0x2e1   : > { %v12187_v27 = vadd.f32 %v3998_v20, %v3939_v9 }
 0x2e2   : > { %v3098_v59 = vadd.f32 %v3097_v24, %v3039_v58  ;;  %v8908_v58 = vld [vmem:[#allocation2 + $0x160] sm:$0xf] }
 0x2e4   : > { %3128 = vst [vmem:[#allocation4 + $0x10] sm:$0xff] %v3098_v59  ;;  %v8910_v59 = vld [vmem:[#allocation2 + $0x178] sm:$0xf0] }
 0x2e7   : > { %v3941_v47 = vpop.f32.mrf.mxu2  ;;  %v3041_v0 = vpop.f32.mrf.mxu0 }
 0x2e8   : > { %v4000_v7 = vpop.f32.mrf.mxu3  ;;  %v3100_v44 = vpop.f32.mrf.mxu1  ;;  %v3042_v8 = vadd.f32 %v3041_v0, %v12006_v17  ;;  %v1876_v17 = vrot.slane %v1499_v43, 4  ;;  %v1967_v0 = vld [vmem:[#allocation2 + $0x208] sm:$0xff] }
 0x2e9   : > { %v12193_v52 = vadd.f32 %v4000_v7, %v3941_v47  ;;  %v1872_v47 = vrot.slane %v1502_v48, 5  ;;  %v10721_v48 = vld [vmem:[%s13036_s11 + $0x308] sm:$0xff] }
 0x2ea   : > { %v3101_v9 = vadd.f32 %v3100_v44, %v3042_v8  ;;  %4051 = vmatmul.bf16.gmra.mxu0 %v8877_v50  ;;  %v8902_v50 = vld [vmem:[#allocation2 + $0x170] sm:$0xf0] }
 0x2eb   : > { %4110 = vmatmul.bf16.gmra.mxu1 %v8881_v6  ;;  %v1877_v53 = vor.u32 %v1876_v17, %v1872_v47  ;;  %v8909_v6 = vor.u32 %v10593_v34, %v8908_v58  ;;  %v8905_v8 = vor.u32 %v10589_v63, %v8902_v50  ;;  %5065 = vmatpush.bf16.msrb.mxu0 %v10721_v48  ;;  %v1863_v58 = vrot.slane %v1491_v49, 4  ;;  %v10742_v49 = vld [vmem:[%s13036_s11 + $0x3b0] sm:$0xff]  ;;  %v8934_v50 = vld [vmem:[#allocation2 + $0x1a8] sm:$0xf0] }
 0x2ec   : > { %4169 = vmatmul.bf16.gmra.mxu2 %v8885_v3  ;;  %3129 = vst [vmem:[#allocation4 + $0x98] sm:$0xff] %v3101_v9  ;;  %v10596_v63 = vld [vmem:[#allocation2 + $0x194] sm:$0xf]  ;;  %v10741_v48 = vld [vmem:[%s13036_s11 + $0x3a8] sm:$0xff] }
 0x2ed   : > { %4228 = vmatmul.bf16.gmra.mxu3 %v8889_v56  ;;  %v10592_v56 = vld [vmem:[#allocation2 + $0x16c] sm:$0xf0]  ;;  %v1878_v43 = vrot.slane %v1877_v53, 4 }
 0x2ee   : > { %v8901_v44 = vor.u32 %v10592_v56, %v8900_v4  ;;  %v10599_v56 = vld [vmem:[#allocation2 + $0x1a4] sm:$0xf0] }
 0x2ef   : > { %v3944_v20 = vpop.f32.mrf.mxu2  ;;  %v3043_v24 = vpop.f32.mrf.mxu0 }
 0x2f0   : > { %v4003_v28 = vpop.f32.mrf.mxu3  ;;  %v3102_v2 = vpop.f32.mrf.mxu1  ;;  %v3044_v5 = vadd.f32 %v3043_v24, %v12027_v60  ;;  %v8913_v60 = vor.u32 %v10590_v62, %v8910_v59  ;;  %v1866_v59 = vrot.slane %v1494_v51, 5  ;;  %v10750_v51 = vld [vmem:[%s13036_s11 + $0x3f0] sm:$0xff] }
 0x2f1   : > { %v12199_v61 = vadd.f32 %v4003_v28, %v3944_v20  ;;  %v1968_v28 = vsel %vm11837_vm5, %v1878_v43, %v1967_v0 }
 0x2f2   : > { %v3103_v7 = vadd.f32 %v3102_v2, %v3044_v5  ;;  %v10743_v2 = vld [vmem:[%s13036_s11 + $0x3b8] sm:$0xff]  ;;  %1969 = vst [vmem:[#allocation2 + $0x208] sm:$0xff] %v1968_v28  ;;  %v8926_v28 = vld [vmem:[#allocation2 + $0x1a0] sm:$0xf0] }
 0x2f3   : > { %5177 = vmatpush.bf16.msra.mxu2 %v10743_v2  ;;  %v10749_v2 = vld [vmem:[%s13036_s11 + $0x3e8] sm:$0xff] }
 0x2f4   : > { %3130 = vst [vmem:[#allocation4 + $0x60] sm:$0xff] %v3103_v7  ;;  %v1867_v7 = vor.u32 %v1866_v59, %v1863_v58  ;;  %v10720_v58 = vld [vmem:[%s13036_s11 + $0x300] sm:$0xff] }
 0x2f5   : > { %5066 = vmatpush.bf16.msrb.mxu0 %v10720_v58  ;;  %v8950_v58 = vld [vmem:[#allocation2 + $0x1d0] sm:$0xf0] }
 0x2f7   : > { %v3946_v16 = vpop.f32.mrf.mxu2  ;;  %v3046_v9 = vpop.f32.mrf.mxu0  ;;  %5178 = vmatpush.bf16.msra.mxu2 %v10742_v49 }
 0x2f8   : > { %v4005_v32 = vpop.f32.mrf.mxu3  ;;  %v3105_v20 = vpop.f32.mrf.mxu1  ;;  %v3047_v24 = vadd.f32 %v3046_v9, %v12047_v46  ;;  %v10751_v46 = vld [vmem:[%s13036_s11 + $0x3f8] sm:$0xff]  ;;  %v10595_v9 = vld [vmem:[#allocation2 + $0x18c] sm:$0xf] }
 0x2f9   : > { %v12206_v3 = vadd.f32 %v4005_v32, %v3946_v16  ;;  %5236 = vmatpush.bf16.msra.mxu3 %v10751_v46  ;;  %v1868_v16 = vrot.slane %v1867_v7, 4  ;;  %v2011_v31 = vld [vmem:[#allocation2 + $0x208] sm:$0x88]  ;;  %v10748_v7 = vld [vmem:[%s13036_s11 + $0x3e0] sm:$0xff] }
 0x2fa   : > { %v3106_v34 = vadd.f32 %v3105_v20, %v3047_v24  ;;  %4056 = vmatmul.bf16.gmra.mxu0 %v8901_v44  ;;  %v8937_v24 = vor.u32 %v10596_v63, %v8934_v50 }
 0x2fb   : > { %4115 = vmatmul.bf16.gmra.mxu1 %v8905_v8  ;;  %v10598_v8 = vld [vmem:[#allocation2 + $0x19c] sm:$0xf0]  ;;  %5179 = vmatpush.bf16.msra.mxu2 %v10741_v48 }
 0x2fc   : > { %4174 = vmatmul.bf16.gmra.mxu2 %v8909_v6  ;;  %3131 = vst [vmem:[#allocation4 + $0x20] sm:$0xff] %v3106_v34  ;;  %v1873_v6 = vsel %vm11863_vm0, %v1868_v16, %v1872_v47  ;;  %v8933_v47 = vor.u32 %v10599_v56, %v8932_v39  ;;  %v10740_v34 = vld [vmem:[%s13036_s11 + $0x3a0] sm:$0xff]  ;;  %v10739_v16 = vld [vmem:[%s13036_s11 + $0x398] sm:$0xff]  ;;  %v10738_v56 = vld [vmem:[%s13036_s11 + $0x390] sm:$0xff] }
 0x2fd   : > { %4233 = vmatmul.bf16.gmra.mxu3 %v8913_v60  ;;  %v8924_v60 = vld [vmem:[#allocation2 + $0x188] sm:$0xf]  ;;  %1966 = vst [vmem:[#allocation2 + $0x1f0] sm:$0xff] %v1873_v6  ;;  %v8956_v6 = vld [vmem:[#allocation2 + $0x1c0] sm:$0xf] }
 0x2fe   : > { %5237 = vmatpush.bf16.msra.mxu3 %v10750_v51  ;;  %v10728_v51 = vld [vmem:[%s13036_s11 + $0x340] sm:$0xff] }
 0x2ff   : > { %v3949_v5 = vpop.f32.mrf.mxu2  ;;  %v3048_v32 = vpop.f32.mrf.mxu0  ;;  %5180 = vmatpush.bf16.msra.mxu2 %v10740_v34  ;;  %5125 = vmatpush.bf16.msra.mxu1 %v10728_v51 }
 0x300   : > { %v4008_v62 = vpop.f32.mrf.mxu3  ;;  %v3107_v4 = vpop.f32.mrf.mxu1  ;;  %v3049_v53 = vadd.f32 %v3048_v32, %v12075_v35  ;;  %v2012_v35 = vsel %vm11879_vm3, 0, %v2011_v31  ;;  %v10605_v31 = vld [vmem:[#allocation2 + $0x1d4] sm:$0xf0] }
 0x301   : > { %v12224_v17 = vadd.f32 %v4008_v62, %v3949_v5  ;;  %2013 = vst [vmem:[#allocation2 + $0x208] sm:$0x88] %v2012_v35  ;;  %v8925_v5 = vor.u32 %v10598_v8, %v8924_v60  ;;  %v8929_v62 = vor.u32 %v10595_v9, %v8926_v28  ;;  %v10746_v60 = vld [vmem:[%s13036_s11 + $0x3d0] sm:$0xff]  ;;  %v8948_v28 = vld [vmem:[#allocation2 + $0x1b8] sm:$0xf]  ;;  %v8957_v34 = vor.u32 %v10605_v31, %v8956_v6 }
 0x302   : > { %v3108_v43 = vadd.f32 %v3107_v4, %v3049_v53  ;;  %5238 = vmatpush.bf16.msra.mxu3 %v10749_v2  ;;  %v10601_v2 = vld [vmem:[#allocation2 + $0x1bc] sm:$0xf] }
 0x303   : > { %5181 = vmatpush.bf16.msra.mxu2 %v10739_v16  ;;  %v10744_v16 = vld [vmem:[%s13036_s11 + $0x3c0] sm:$0xff] }
 0x304   : > { %3132 = vst [vmem:[#allocation4 + $0x48] sm:$0xff] %v3108_v43  ;;  %v10602_v43 = vld [vmem:[#allocation2 + $0x1c4] sm:$0xf] }
 0x306   : > { %5239 = vmatpush.bf16.msra.mxu3 %v10748_v7 }
 0x307   : > { %v3951_v0 = vpop.f32.mrf.mxu2  ;;  %v3051_v59 = vpop.f32.mrf.mxu0  ;;  %5182 = vmatpush.bf16.msra.mxu2 %v10738_v56  ;;  %v10767_v56 = vld [vmem:[%s13036_s11 + $0x478] sm:$0xff] }
 0x308   : > { %v4010_v44 = vpop.f32.mrf.mxu3  ;;  %v3110_v46 = vpop.f32.mrf.mxu1  ;;  %v3052_v49 = vadd.f32 %v3051_v59, %v12092_v57  ;;  %v10747_v57 = vld [vmem:[%s13036_s11 + $0x3d8] sm:$0xff]  ;;  %5354 = vmatpush.bf16.msrb.mxu1 %v10767_v56 }
 0x309   : > { %v12243_v20 = vadd.f32 %v4010_v44, %v3951_v0  ;;  %v8958_v0 = vld [vmem:[#allocation2 + $0x1d8] sm:$0xf0]  ;;  %v10737_v44 = vld [vmem:[%s13036_s11 + $0x388] sm:$0xff] }
 0x30a   : > { %v3111_v32 = vadd.f32 %v3110_v46, %v3052_v49  ;;  %4061 = vmatmul.bf16.gmra.mxu0 %v8925_v5  ;;  %5240 = vmatpush.bf16.msra.mxu3 %v10747_v57  ;;  %v10745_v5 = vld [vmem:[%s13036_s11 + $0x3c8] sm:$0xff]  ;;  %v8953_v46 = vor.u32 %v10601_v2, %v8950_v58  ;;  %v10759_v57 = vld [vmem:[%s13036_s11 + $0x438] sm:$0xff]  ;;  %v10610_v2 = vld [vmem:[#allocation2 + $0x1fc] sm:$0xf0] }
 0x30b   : > { %4120 = vmatmul.bf16.gmra.mxu1 %v8929_v62  ;;  %5183 = vmatpush.bf16.msra.mxu2 %v10737_v44  ;;  %v10736_v62 = vld [vmem:[%s13036_s11 + $0x380] sm:$0xff]  ;;  %v10608_v44 = vld [vmem:[#allocation2 + $0x1f4] sm:$0xf]  ;;  %v10607_v58 = vld [vmem:[#allocation2 + $0x1ec] sm:$0xf] }
 0x30c   : > { %4179 = vmatmul.bf16.gmra.mxu2 %v8933_v47  ;;  %3133 = vst [vmem:[#allocation4 + $0x70] sm:$0xff] %v3111_v32  ;;  %v10604_v47 = vld [vmem:[#allocation2 + $0x1cc] sm:$0xf0]  ;;  %5295 = vmatpush.bf16.msra.mxu0 %v10759_v57 }
 0x30d   : > { %4238 = vmatmul.bf16.gmra.mxu3 %v8937_v24  ;;  %v8949_v59 = vor.u32 %v10604_v47, %v8948_v28  ;;  %v8972_v47 = vld [vmem:[#allocation2 + $0x1e8] sm:$0xf] }
 0x30e   : > { %5241 = vmatpush.bf16.msra.mxu3 %v10746_v60  ;;  %v3135_v60 = vld [vmem:[#allocation4] sm:$0xff] }
 0x30f   : > { %v3954_v4 = vpop.f32.mrf.mxu2  ;;  %v3053_v63 = vpop.f32.mrf.mxu0  ;;  %5184 = vmatpush.bf16.msra.mxu2 %v10736_v62 }
 0x310   : > { %v4013_v39 = vpop.f32.mrf.mxu3  ;;  %v3112_v50 = vpop.f32.mrf.mxu1  ;;  %v3054_v48 = vadd.f32 %v3053_v63, %v12106_v54  ;;  %v8961_v54 = vor.u32 %v10602_v43, %v8958_v0  ;;  %v10611_v0 = vld [vmem:[#allocation2 + $0x204] sm:$0xf0] }
 0x311   : > { %v12264_v53 = vadd.f32 %v4013_v39, %v3954_v4 }
 0x312   : > { %v3113_v8 = vadd.f32 %v3112_v50, %v3054_v48  ;;  %5242 = vmatpush.bf16.msra.mxu3 %v10745_v5  ;;  %v8980_v48 = vld [vmem:[#allocation2 + $0x1f0] sm:$0xf] }
 0x314   : > { %3134 = vst [vmem:[#allocation4 + $0x90] sm:$0xff] %v3113_v8  ;;  %v8982_v8 = vld [vmem:[#allocation2 + $0x208] sm:$0xf0] }
 0x315   : > { %v8985_v5 = vor.u32 %v10608_v44, %v8982_v8  ;;  %v9286_v44 = vld [vmem:[#allocation2 + $0x80] sm:$0xf0] }
 0x316   : > { %5243 = vmatpush.bf16.msra.mxu3 %v10744_v16  ;;  %v3136_v16 = vld [vmem:[#allocation4 + $0x38] sm:$0xff] }
 0x317   : > { %v3956_v9 = vpop.f32.mrf.mxu2  ;;  %v4027_v7 = vpop.f32.mrf.mxu0 }
 0x318   : > { %v4015_v35 = vpop.f32.mrf.mxu3  ;;  %v4086_v49 = vpop.f32.mrf.mxu1  ;;  %v4028_v32 = vadd.f32 %v4027_v7, %v12115_v22 }
 0x319   : > { %v12279_v24 = vadd.f32 %v4015_v35, %v3956_v9 }
 0x31a   : > { %v4087_v4 = vadd.f32 %v4086_v49, %v4028_v32  ;;  %4066 = vmatmul.bf16.gmra.mxu0 %v8949_v59 }
 0x31b   : > { %4125 = vmatmul.bf16.gmra.mxu1 %v8953_v46  ;;  %v8973_v46 = vor.u32 %v10610_v2, %v8972_v47  ;;  %v10766_v47 = vld [vmem:[%s13036_s11 + $0x470] sm:$0xff]  ;;  %v10663_v2 = vld [vmem:[#allocation2 + $0x74] sm:$0xf0] }
 0x31c   : > { %4184 = vmatmul.bf16.gmra.mxu2 %v8957_v34  ;;  %v8974_v34 = vld [vmem:[#allocation2 + $0x200] sm:$0xf0]  ;;  %5355 = vmatpush.bf16.msrb.mxu1 %v10766_v47 }
 0x31d   : > { %4243 = vmatmul.bf16.gmra.mxu3 %v8961_v54  ;;  %v8981_v54 = vor.u32 %v10611_v0, %v8980_v48  ;;  %v8977_v7 = vor.u32 %v10607_v58, %v8974_v34  ;;  %v9284_v48 = vld [vmem:[#allocation2 + $0x68] sm:$0xf]  ;;  %v10661_v0 = vld [vmem:[#allocation2 + $0x6c] sm:$0xf]  ;;  %v10660_v58 = vld [vmem:[#allocation2 + $0x64] sm:$0xf] }
 0x31e   : > { %v9278_v34 = vld [vmem:[#allocation2 + $0x78] sm:$0xf0] }
 0x31f   : > { %v4145_v39 = vpop.f32.mrf.mxu2  ;;  %v4029_v22 = vpop.f32.mrf.mxu0 }
 0x320   : > { %v4204_v51 = vpop.f32.mrf.mxu3  ;;  %v4146_v63 = vadd.f32 %v4145_v39, %v4087_v4  ;;  %v4088_v6 = vpop.f32.mrf.mxu1  ;;  %v4030_v31 = vadd.f32 %v4029_v22, %v12124_v30 }
 0x322   : > { %v4205_v50 = vadd.f32 %v4204_v51, %v4146_v63  ;;  %v4089_v9 = vadd.f32 %v4088_v6, %v4030_v31  ;;  %v10758_v63 = vld [vmem:[%s13036_s11 + $0x430] sm:$0xff] }
 0x323   : > { %5296 = vmatpush.bf16.msra.mxu0 %v10758_v63 }
 0x324   : > { %v4254_v43 = vadd.f32 %v4205_v50, %v3135_v60  ;;  %v3137_v60 = vld [vmem:[#allocation4 + $0x50] sm:$0xff] }
 0x326   : > { %4274 = vst [vmem:[#allocation4] sm:$0xff] %v4254_v43  ;;  %v10664_v43 = vld [vmem:[#allocation2 + $0x7c] sm:$0xf0] }
 0x327   : > { %v4147_v35 = vpop.f32.mrf.mxu2  ;;  %v4032_v49 = vpop.f32.mrf.mxu0 }
 0x328   : > { %v4206_v28 = vpop.f32.mrf.mxu3  ;;  %v4148_v62 = vadd.f32 %v4147_v35, %v4089_v9  ;;  %v4091_v30 = vpop.f32.mrf.mxu1  ;;  %v4033_v32 = vadd.f32 %v4032_v49, %v12127_v19 }
 0x32a   : > { %v4207_v59 = vadd.f32 %v4206_v28, %v4148_v62  ;;  %v4092_v39 = vadd.f32 %v4091_v30, %v4033_v32  ;;  %4071 = vmatmul.bf16.gmra.mxu0 %v8973_v46  ;;  %v9276_v28 = vld [vmem:[#allocation2 + $0x60] sm:$0xf]  ;;  %v9281_v46 = vor.u32 %v10660_v58, %v9278_v34 }
 0x32b   : > { %4130 = vmatmul.bf16.gmra.mxu1 %v8977_v7 }
 0x32c   : > { %4189 = vmatmul.bf16.gmra.mxu2 %v8981_v54  ;;  %v4255_v4 = vadd.f32 %v4207_v59, %v3136_v16  ;;  %v9285_v54 = vor.u32 %v10664_v43, %v9284_v48  ;;  %v9277_v59 = vor.u32 %v10663_v2, %v9276_v28  ;;  %v10670_v48 = vld [vmem:[#allocation2 + $0xac] sm:$0xf0] }
 0x32d   : > { %4248 = vmatmul.bf16.gmra.mxu3 %v8985_v5  ;;  %v9289_v5 = vor.u32 %v10661_v0, %v9286_v44  ;;  %v9300_v0 = vld [vmem:[#allocation2 + $0x90] sm:$0xf]  ;;  %v10757_v44 = vld [vmem:[%s13036_s11 + $0x428] sm:$0xff] }
 0x32e   : > { %4275 = vst [vmem:[#allocation4 + $0x38] sm:$0xff] %v4255_v4  ;;  %5297 = vmatpush.bf16.msra.mxu0 %v10757_v44 }
 0x32f   : > { %v4150_v51 = vpop.f32.mrf.mxu2  ;;  %v4034_v22 = vpop.f32.mrf.mxu0 }
 0x330   : > { %v4209_v57 = vpop.f32.mrf.mxu3  ;;  %v4151_v56 = vadd.f32 %v4150_v51, %v4092_v39  ;;  %v4093_v6 = vpop.f32.mrf.mxu1  ;;  %v4035_v19 = vadd.f32 %v4034_v22, %v12138_v26  ;;  %v9308_v22 = vld [vmem:[#allocation2 + $0x98] sm:$0xf] }
 0x331   : > { %v9309_v28 = vor.u32 %v10670_v48, %v9308_v22  ;;  %v10675_v48 = vld [vmem:[#allocation2 + $0xd4] sm:$0xf0] }
 0x332   : > { %v4210_v50 = vadd.f32 %v4209_v57, %v4151_v56  ;;  %v4094_v8 = vadd.f32 %v4093_v6, %v4035_v19  ;;  %v10667_v19 = vld [vmem:[#allocation2 + $0x9c] sm:$0xf] }
 0x334   : > { %v4256_v31 = vadd.f32 %v4210_v50, %v3137_v60  ;;  %v3139_v50 = vld [vmem:[#allocation4 + $0x30] sm:$0xff] }
 0x336   : > { %4276 = vst [vmem:[#allocation4 + $0x50] sm:$0xff] %v4256_v31 }
 0x337   : > { %v4152_v9 = vpop.f32.mrf.mxu2  ;;  %v4037_v7 = vpop.f32.mrf.mxu0 }
 0x338   : > { %v4211_v35 = vpop.f32.mrf.mxu3  ;;  %v4153_v62 = vadd.f32 %v4152_v9, %v4094_v8  ;;  %v4096_v49 = vpop.f32.mrf.mxu1  ;;  %v4038_v30 = vadd.f32 %v4037_v7, %v12141_v14  ;;  %v9310_v14 = vld [vmem:[#allocation2 + $0xb0] sm:$0xf0]  ;;  %v10765_v8 = vld [vmem:[%s13036_s11 + $0x468] sm:$0xff] }
 0x339   : > { %v10669_v9 = vld [vmem:[#allocation2 + $0xa4] sm:$0xf0]  ;;  %v9313_v47 = vor.u32 %v10667_v19, %v9310_v14  ;;  %5356 = vmatpush.bf16.msrb.mxu1 %v10765_v8  ;;  %v10672_v19 = vld [vmem:[#allocation2 + $0xc4] sm:$0xf]  ;;  %v9326_v14 = vld [vmem:[#allocation2 + $0xd8] sm:$0xf0] }
 0x33a   : > { %v4212_v26 = vadd.f32 %v4211_v35, %v4153_v62  ;;  %v4097_v32 = vadd.f32 %v4096_v49, %v4038_v30  ;;  %5067 = vmatmul.bf16.vlgmr.msrb.gmra.mxu0 %v9277_v59  ;;  %v10666_v35 = vld [vmem:[#allocation2 + $0x94] sm:$0xf]  ;;  %v9301_v34 = vor.u32 %v10669_v9, %v9300_v0  ;;  %v10756_v0 = vld [vmem:[%s13036_s11 + $0x420] sm:$0xff]  ;;  %v9329_v8 = vor.u32 %v10672_v19, %v9326_v14 }
 0x33b   : > { %5126 = vmatmul.bf16.vlgmr.msra.gmra.mxu1 %v9281_v46  ;;  %5298 = vmatpush.bf16.msra.mxu0 %v10756_v0  ;;  %v10755_v0 = vld [vmem:[%s13036_s11 + $0x418] sm:$0xff] }
 0x33c   : > { %5185 = vmatmul.bf16.vlgmr.msra.gmra.mxu2 %v9285_v54  ;;  %v4257_v16 = vadd.f32 %v4212_v26, %v12133_v29 }
 0x33d   : > { %5244 = vmatmul.bf16.vlgmr.msra.gmra.mxu3 %v9289_v5 }
 0x33e   : > { %4277 = vst [vmem:[#allocation4 + $0x18] sm:$0xff] %v4257_v16 }
 0x33f   : > { %v4155_v4 = vpop.f32.mrf.mxu2  ;;  %v4039_v56 = vpop.f32.mrf.mxu0  ;;  %5299 = vmatpush.bf16.msra.mxu0 %v10755_v0 }
 0x340   : > { %v4214_v39 = vpop.f32.mrf.mxu3  ;;  %v4156_v51 = vadd.f32 %v4155_v4, %v4097_v32  ;;  %v4098_v63 = vpop.f32.mrf.mxu1  ;;  %v4040_v6 = vadd.f32 %v4039_v56, %v12146_v40  ;;  %v9302_v40 = vld [vmem:[#allocation2 + $0xa8] sm:$0xf0] }
 0x341   : > { %v9305_v54 = vor.u32 %v10666_v35, %v9302_v40 }
 0x342   : > { %v4215_v57 = vadd.f32 %v4214_v39, %v4156_v51  ;;  %v4099_v31 = vadd.f32 %v4098_v63, %v4040_v6  ;;  %v3141_v39 = vld [vmem:[#allocation4 + $0x78] sm:$0xff]  ;;  %v10676_v63 = vld [vmem:[#allocation2 + $0xdc] sm:$0xf0] }
 0x343   : > { %v9332_v51 = vld [vmem:[#allocation2 + $0xc8] sm:$0xf] }
 0x344   : > { %v4258_v60 = vadd.f32 %v4215_v57, %v3139_v50  ;;  %v10673_v50 = vld [vmem:[#allocation2 + $0xcc] sm:$0xf] }
 0x346   : > { %4278 = vst [vmem:[#allocation4 + $0x30] sm:$0xff] %v4258_v60  ;;  %v9324_v60 = vld [vmem:[#allocation2 + $0xc0] sm:$0xf] }
 0x347   : > { %v4157_v29 = vpop.f32.mrf.mxu2  ;;  %v4042_v5 = vpop.f32.mrf.mxu0  ;;  %v9325_v44 = vor.u32 %v10675_v48, %v9324_v60  ;;  %v3144_v48 = vld [vmem:[#allocation4 + $0x88] sm:$0xff] }
 0x348   : > { %v4216_v43 = vpop.f32.mrf.mxu3  ;;  %v4158_v2 = vadd.f32 %v4157_v29, %v4099_v31  ;;  %v4101_v62 = vpop.f32.mrf.mxu1  ;;  %v4043_v26 = vadd.f32 %v4042_v5, %v12155_v11  ;;  %v9334_v11 = vld [vmem:[#allocation2 + $0xe0] sm:$0xf0]  ;;  %v9333_v31 = vor.u32 %v10676_v63, %v9332_v51  ;;  %v10681_v51 = vld [vmem:[#allocation2 + $0x104] sm:$0xf0] }
 0x349   : > { %v9337_v29 = vor.u32 %v10673_v50, %v9334_v11 }
 0x34a   : > { %v4217_v58 = vadd.f32 %v4216_v43, %v4158_v2  ;;  %v4102_v46 = vadd.f32 %v4101_v62, %v4043_v26  ;;  %5072 = vmatmul.bf16.gmra.mxu0 %v9301_v34  ;;  %v10764_v34 = vld [vmem:[%s13036_s11 + $0x460] sm:$0xff] }
 0x34b   : > { %5131 = vmatmul.bf16.gmra.mxu1 %v9305_v54 }
 0x34c   : > { %5190 = vmatmul.bf16.gmra.mxu2 %v9309_v28  ;;  %v4259_v59 = vadd.f32 %v4217_v58, %v12144_v10  ;;  %5357 = vmatpush.bf16.msrb.mxu1 %v10764_v34  ;;  %v9382_v34 = vld [vmem:[#allocation2 + $0x140] sm:$0xf0] }
 0x34d   : > { %5249 = vmatmul.bf16.gmra.mxu3 %v9313_v47 }
 0x34e   : > { %4279 = vst [vmem:[#allocation4 + $0x68] sm:$0xff] %v4259_v59  ;;  %v3143_v59 = vld [vmem:[#allocation4 + $0x8] sm:$0xff] }
 0x34f   : > { %v4160_v7 = vpop.f32.mrf.mxu2  ;;  %v4044_v32 = vpop.f32.mrf.mxu0 }
 0x350   : > { %v4219_v49 = vpop.f32.mrf.mxu3  ;;  %v4161_v30 = vadd.f32 %v4160_v7, %v4102_v46  ;;  %v4103_v4 = vpop.f32.mrf.mxu1  ;;  %v4045_v57 = vadd.f32 %v4044_v32, %v12160_v25  ;;  %v9356_v46 = vld [vmem:[#allocation2 + $0xf8] sm:$0xf]  ;;  %v10682_v7 = vld [vmem:[#allocation2 + $0x10c] sm:$0xf0] }
 0x351   : > { %v9357_v63 = vor.u32 %v10682_v7, %v9356_v46  ;;  %v10684_v46 = vld [vmem:[#allocation2 + $0x124] sm:$0xf] }
 0x352   : > { %v4220_v16 = vadd.f32 %v4219_v49, %v4161_v30  ;;  %v4104_v22 = vadd.f32 %v4103_v4, %v4045_v57  ;;  %v10679_v49 = vld [vmem:[#allocation2 + $0xfc] sm:$0xf]  ;;  %v9358_v30 = vld [vmem:[#allocation2 + $0x110] sm:$0xf0] }
 0x353   : > { %v10678_v57 = vld [vmem:[#allocation2 + $0xf4] sm:$0xf]  ;;  %v9361_v50 = vor.u32 %v10679_v49, %v9358_v30 }
 0x354   : > { %v4260_v56 = vadd.f32 %v4220_v16, %v3141_v39  ;;  %v9348_v39 = vld [vmem:[#allocation2 + $0xf0] sm:$0xf] }
 0x356   : > { %4280 = vst [vmem:[#allocation4 + $0x78] sm:$0xff] %v4260_v56  ;;  %v9350_v56 = vld [vmem:[#allocation2 + $0x108] sm:$0xf0] }
 0x357   : > { %v4162_v10 = vpop.f32.mrf.mxu2  ;;  %v4047_v9 = vpop.f32.mrf.mxu0 }
 0x358   : > { %v4221_v6 = vpop.f32.mrf.mxu3  ;;  %v4163_v43 = vadd.f32 %v4162_v10, %v4104_v22  ;;  %v4106_v35 = vpop.f32.mrf.mxu1  ;;  %v4048_v40 = vadd.f32 %v4047_v9, %v12166_v12  ;;  %v9349_v10 = vor.u32 %v10681_v51, %v9348_v39  ;;  %v3146_v39 = vld [vmem:[#allocation4 + $0x40] sm:$0xff] }
 0x35a   : > { %v4222_v25 = vadd.f32 %v4221_v6, %v4163_v43  ;;  %v4107_v47 = vadd.f32 %v4106_v35, %v4048_v40  ;;  %5077 = vmatmul.bf16.gmra.mxu0 %v9325_v44  ;;  %v9353_v6 = vor.u32 %v10678_v57, %v9350_v56  ;;  %v3145_v35 = vld [vmem:[#allocation4 + $0x28] sm:$0xff]  ;;  %v9380_v40 = vld [vmem:[#allocation2 + $0x128] sm:$0xf] }
 0x35b   : > { %5136 = vmatmul.bf16.gmra.mxu1 %v9329_v8 }
 0x35c   : > { %5195 = vmatmul.bf16.gmra.mxu2 %v9333_v31  ;;  %v4261_v28 = vadd.f32 %v4222_v25, %v12158_v36  ;;  %v10763_v25 = vld [vmem:[%s13036_s11 + $0x458] sm:$0xff] }
 0x35d   : > { %5254 = vmatmul.bf16.gmra.mxu3 %v9337_v29  ;;  %5358 = vmatpush.bf16.msrb.mxu1 %v10763_v25 }
 0x35e   : > { %4281 = vst [vmem:[#allocation4 + $0x80] sm:$0xff] %v4261_v28 }
 0x35f   : > { %v4165_v2 = vpop.f32.mrf.mxu2  ;;  %v4049_v62 = vpop.f32.mrf.mxu0 }
 0x360   : > { %v4224_v58 = vpop.f32.mrf.mxu3  ;;  %v4166_v54 = vadd.f32 %v4165_v2, %v4107_v47  ;;  %v4108_v26 = vpop.f32.mrf.mxu1  ;;  %v4050_v12 = vadd.f32 %v4049_v62, %v12172_v41  ;;  %v10688_v2 = vld [vmem:[#allocation2 + $0x13c] sm:$0xf0] }
 0x362   : > { %v4225_v5 = vadd.f32 %v4224_v58, %v4166_v54  ;;  %v4109_v16 = vadd.f32 %v4108_v26, %v4050_v12  ;;  %v10685_v58 = vld [vmem:[#allocation2 + $0x12c] sm:$0xf]  ;;  %v9372_v26 = vld [vmem:[#allocation2 + $0x120] sm:$0xf]  ;;  %v9374_v12 = vld [vmem:[#allocation2 + $0x138] sm:$0xf0] }
 0x363   : > { %v9385_v7 = vor.u32 %v10685_v58, %v9382_v34 }
 0x364   : > { %v4262_v36 = vadd.f32 %v4225_v5, %v3143_v59  ;;  %v10687_v59 = vld [vmem:[#allocation2 + $0x134] sm:$0xf0] }
 0x366   : > { %4282 = vst [vmem:[#allocation4 + $0x8] sm:$0xff] %v4262_v36  ;;  %v9381_v36 = vor.u32 %v10688_v2, %v9380_v40 }
 0x367   : > { %v4167_v32 = vpop.f32.mrf.mxu2  ;;  %v4052_v60 = vpop.f32.mrf.mxu0 }
 0x368   : > { %v4226_v4 = vpop.f32.mrf.mxu3  ;;  %v4168_v11 = vadd.f32 %v4167_v32, %v4109_v16  ;;  %v4111_v41 = vpop.f32.mrf.mxu1  ;;  %v4053_v19 = vadd.f32 %v4052_v60, %v12175_v18  ;;  %v9373_v16 = vor.u32 %v10687_v59, %v9372_v26  ;;  %v9377_v32 = vor.u32 %v10684_v46, %v9374_v12 }
 0x36a   : > { %v4227_v22 = vadd.f32 %v4226_v4, %v4168_v11  ;;  %v4112_v31 = vadd.f32 %v4111_v41, %v4053_v19  ;;  %5082 = vmatmul.bf16.gmra.mxu0 %v9349_v10  ;;  %v3147_v41 = vld [vmem:[#allocation4 + $0x58] sm:$0xff] }
 0x36b   : > { %5141 = vmatmul.bf16.gmra.mxu1 %v9353_v6 }
 0x36c   : > { %5200 = vmatmul.bf16.gmra.mxu2 %v9357_v63  ;;  %v4263_v14 = vadd.f32 %v4227_v22, %v3144_v48  ;;  %v10754_v22 = vld [vmem:[%s13036_s11 + $0x410] sm:$0xff]  ;;  %v9404_v48 = vld [vmem:[#allocation2 + $0x158] sm:$0xf] }
 0x36d   : > { %5259 = vmatmul.bf16.gmra.mxu3 %v9361_v50  ;;  %5300 = vmatpush.bf16.msra.mxu0 %v10754_v22 }
 0x36e   : > { %4283 = vst [vmem:[#allocation4 + $0x88] sm:$0xff] %v4263_v14  ;;  %v10694_v14 = vld [vmem:[#allocation2 + $0x16c] sm:$0xf0] }
 0x36f   : > { %v4170_v29 = vpop.f32.mrf.mxu2  ;;  %v4054_v18 = vpop.f32.mrf.mxu0  ;;  %v9405_v40 = vor.u32 %v10694_v14, %v9404_v48  ;;  %v10696_v48 = vld [vmem:[#allocation2 + $0x184] sm:$0xf] }
 0x370   : > { %v4229_v43 = vpop.f32.mrf.mxu3  ;;  %v4171_v44 = vadd.f32 %v4170_v29, %v4112_v31  ;;  %v4113_v9 = vpop.f32.mrf.mxu1  ;;  %v4055_v28 = vadd.f32 %v4054_v18, %v12184_v37  ;;  %v10691_v31 = vld [vmem:[#allocation2 + $0x15c] sm:$0xf]  ;;  %v9406_v29 = vld [vmem:[#allocation2 + $0x170] sm:$0xf0]  ;;  %v10693_v18 = vld [vmem:[#allocation2 + $0x164] sm:$0xf0] }
 0x372   : > { %v4230_v8 = vadd.f32 %v4229_v43, %v4171_v44  ;;  %v4114_v54 = vadd.f32 %v4113_v9, %v4055_v28  ;;  %v9396_v44 = vld [vmem:[#allocation2 + $0x150] sm:$0xf]  ;;  %v10690_v9 = vld [vmem:[#allocation2 + $0x154] sm:$0xf]  ;;  %v9409_v28 = vor.u32 %v10691_v31, %v9406_v29 }
 0x373   : > { %v9397_v2 = vor.u32 %v10693_v18, %v9396_v44 }
 0x374   : > { %v4264_v47 = vadd.f32 %v4230_v8, %v3145_v35  ;;  %v10762_v8 = vld [vmem:[%s13036_s11 + $0x450] sm:$0xff]  ;;  %v9398_v35 = vld [vmem:[#allocation2 + $0x168] sm:$0xf0] }
 0x375   : > { %5359 = vmatpush.bf16.msrb.mxu1 %v10762_v8  ;;  %v9401_v58 = vor.u32 %v10690_v9, %v9398_v35  ;;  %v3150_v35 = vld [vmem:[#allocation4 + $0x60] sm:$0xff] }
 0x376   : > { %4284 = vst [vmem:[#allocation4 + $0x28] sm:$0xff] %v4264_v47 }
 0x377   : > { %v4172_v5 = vpop.f32.mrf.mxu2  ;;  %v4057_v4 = vpop.f32.mrf.mxu0 }
 0x378   : > { %v4231_v62 = vpop.f32.mrf.mxu3  ;;  %v4173_v49 = vadd.f32 %v4172_v5, %v4114_v54  ;;  %v4116_v37 = vpop.f32.mrf.mxu1  ;;  %v4058_v51 = vadd.f32 %v4057_v4, %v12187_v27  ;;  %v3148_v5 = vld [vmem:[#allocation4 + $0x10] sm:$0xff] }
 0x379   : > { %v10700_v4 = vld [vmem:[#allocation2 + $0x19c] sm:$0xf0] }
 0x37a   : > { %v4232_v30 = vadd.f32 %v4231_v62, %v4173_v49  ;;  %v4117_v56 = vadd.f32 %v4116_v37, %v4058_v51  ;;  %5087 = vmatmul.bf16.gmra.mxu0 %v9373_v16  ;;  %v12344_v37 = vld [vmem:[#allocation2 + $0x218] sm:$0xff] }
 0x37b   : > { %5146 = vmatmul.bf16.gmra.mxu1 %v9377_v32  ;;  %v9428_v32 = vld [vmem:[#allocation2 + $0x188] sm:$0xf] }
 0x37c   : > { %5205 = vmatmul.bf16.gmra.mxu2 %v9381_v36  ;;  %v4265_v57 = vadd.f32 %v4232_v30, %v3146_v39 }
 0x37d   : > { %5264 = vmatmul.bf16.gmra.mxu3 %v9385_v7  ;;  %v3149_v7 = vld [vmem:[#allocation4 + $0x98] sm:$0xff] }
 0x37e   : > { %4285 = vst [vmem:[#allocation4 + $0x40] sm:$0xff] %v4265_v57  ;;  %v9430_v57 = vld [vmem:[#allocation2 + $0x1a0] sm:$0xf0] }
 0x37f   : > { %v4175_v63 = vpop.f32.mrf.mxu2  ;;  %v4059_v6 = vpop.f32.mrf.mxu0 }
 0x380   : > { %v4234_v50 = vpop.f32.mrf.mxu3  ;;  %v4176_v11 = vadd.f32 %v4175_v63, %v4117_v56  ;;  %v4118_v60 = vpop.f32.mrf.mxu1  ;;  %v4060_v27 = vadd.f32 %v4059_v6, %v12193_v52  ;;  %v1507_v56 = vshrl.u32 %v12344_v37, 16  ;;  %v9420_v63 = vld [vmem:[#allocation2 + $0x180] sm:$0xf]  ;;  %v10761_v6 = vld [vmem:[%s13036_s11 + $0x448] sm:$0xff] }
 0x381   : > { %5360 = vmatpush.bf16.msrb.mxu1 %v10761_v6 }
 0x382   : > { %v4235_v10 = vadd.f32 %v4234_v50, %v4176_v11  ;;  %v4119_v43 = vadd.f32 %v4118_v60, %v4060_v27  ;;  %v1510_v60 = vshll.u32 %v12344_v37, 16  ;;  %v9422_v27 = vld [vmem:[#allocation2 + $0x198] sm:$0xf0]  ;;  %v9460_v37 = vld [vmem:[#allocation2 + $0x1c0] sm:$0xf] }
 0x383   : > { %v9425_v44 = vor.u32 %v10696_v48, %v9422_v27 }
 0x384   : > { %v4266_v19 = vadd.f32 %v4235_v10, %v3147_v41  ;;  %v10753_v10 = vld [vmem:[%s13036_s11 + $0x408] sm:$0xff]  ;;  %v10699_v41 = vld [vmem:[#allocation2 + $0x194] sm:$0xf0] }
 0x385   : > { %5301 = vmatpush.bf16.msra.mxu0 %v10753_v10  ;;  %v9446_v10 = vld [vmem:[#allocation2 + $0x1c8] sm:$0xf0] }
 0x386   : > { %4286 = vst [vmem:[#allocation4 + $0x58] sm:$0xff] %v4266_v19  ;;  %v9429_v19 = vor.u32 %v10700_v4, %v9428_v32  ;;  %v9454_v32 = vld [vmem:[#allocation2 + $0x1d0] sm:$0xf0] }
 0x387   : > { %v4177_v0 = vpop.f32.mrf.mxu2  ;;  %v4062_v34 = vpop.f32.mrf.mxu0 }
 0x388   : > { %v4236_v25 = vpop.f32.mrf.mxu3  ;;  %v4178_v47 = vadd.f32 %v4177_v0, %v4119_v43  ;;  %v4121_v54 = vpop.f32.mrf.mxu1  ;;  %v4063_v62 = vadd.f32 %v4062_v34, %v12199_v61  ;;  %v10697_v61 = vld [vmem:[#allocation2 + $0x18c] sm:$0xf]  ;;  %v1597_v43 = vld [vmem:[#allocation2 + $0x210] sm:$0xff] }
 0x389   : > { %v9433_v14 = vor.u32 %v10697_v61, %v9430_v57 }
 0x38a   : > { %v4237_v52 = vadd.f32 %v4236_v25, %v4178_v47  ;;  %v4122_v59 = vadd.f32 %v4121_v54, %v4063_v62  ;;  %5092 = vmatmul.bf16.gmra.mxu0 %v9397_v2  ;;  %v9421_v25 = vor.u32 %v10699_v41, %v9420_v63  ;;  %v12362_v47 = vld [vmem:[#allocation2 + $0x230] sm:$0xff] }
 0x38b   : > { %5151 = vmatmul.bf16.gmra.mxu1 %v9401_v58  ;;  %v1515_v21 = vshrl.u32 %v12362_v47, 16  ;;  %v1518_v34 = vshll.u32 %v12362_v47, 16  ;;  %v1882_v47 = vrot.slane %v1507_v56, 4 }
 0x38c   : > { %5210 = vmatmul.bf16.gmra.mxu2 %v9405_v40  ;;  %v4267_v26 = vadd.f32 %v4237_v52, %v3148_v5 }
 0x38d   : > { %5269 = vmatmul.bf16.gmra.mxu3 %v9409_v28  ;;  %v1517_v5 = vrot.slane %v1515_v21, 7 }
 0x38e   : > { %4287 = vst [vmem:[#allocation4 + $0x10] sm:$0xff] %v4267_v26 }
 0x38f   : > { %v4180_v46 = vpop.f32.mrf.mxu2  ;;  %v4064_v30 = vpop.f32.mrf.mxu0  ;;  %v1520_v26 = vor.u32 %v1518_v34, %v1517_v5  ;;  %v9478_v5 = vld [vmem:[#allocation2 + $0x200] sm:$0xf0] }
 0x390   : > { %v4239_v12 = vpop.f32.mrf.mxu3  ;;  %v4181_v36 = vadd.f32 %v4180_v46, %v4122_v59  ;;  %v4123_v16 = vpop.f32.mrf.mxu1  ;;  %v4065_v39 = vadd.f32 %v4064_v30, %v12206_v3  ;;  %v1509_v3 = vrot.slane %v1507_v56, 7 }
 0x392   : > { %v4240_v49 = vadd.f32 %v4239_v12, %v4181_v36  ;;  %v4124_v50 = vadd.f32 %v4123_v16, %v4065_v39  ;;  %v1512_v29 = vor.u32 %v1510_v60, %v1509_v3  ;;  %v1513_v62 = vrot.slane %v1509_v3, 4  ;;  %v3151_v12 = vld [vmem:[#allocation4 + $0x20] sm:$0xff]  ;;  %v9452_v36 = vld [vmem:[#allocation2 + $0x1b8] sm:$0xf]  ;;  %v10703_v16 = vld [vmem:[#allocation2 + $0x1bc] sm:$0xf] }
 0x393   : > { %v9457_v6 = vor.u32 %v10703_v16, %v9454_v32  ;;  %v10752_v3 = vld [vmem:[%s13036_s11 + $0x400] sm:$0xff] }
 0x394   : > { %v4268_v51 = vadd.f32 %v4240_v49, %v3149_v7  ;;  %v1598_v8 = vsel %vm11626_vm8, %v1512_v29, %v1597_v43  ;;  %v10706_v7 = vld [vmem:[#allocation2 + $0x1cc] sm:$0xf0]  ;;  %v1521_v4 = vsel %vm11632_vm10, %v1513_v62, %v1520_v26  ;;  %5302 = vmatpush.bf16.msra.mxu0 %v10752_v3  ;;  %v9468_v26 = vld [vmem:[#allocation2 + $0x1e0] sm:$0xf] }
 0x395   : > { %1599 = vst [vmem:[#allocation2 + $0x210] sm:$0xff] %v1598_v8 }
 0x396   : > { %4288 = vst [vmem:[#allocation4 + $0x98] sm:$0xff] %v4268_v51  ;;  %v9444_v51 = vld [vmem:[#allocation2 + $0x1b0] sm:$0xf] }
 0x397   : > { %v4182_v11 = vpop.f32.mrf.mxu2  ;;  %v4067_v18 = vpop.f32.mrf.mxu0  ;;  %1600 = vst [vmem:[#allocation2 + $0x228] sm:$0xff] %v1521_v4 }
 0x398   : > { %v4241_v22 = vpop.f32.mrf.mxu3  ;;  %v4183_v31 = vadd.f32 %v4182_v11, %v4124_v50  ;;  %v4126_v9 = vpop.f32.mrf.mxu1  ;;  %v4068_v40 = vadd.f32 %v4067_v18, %v12224_v17  ;;  %v10705_v11 = vld [vmem:[#allocation2 + $0x1c4] sm:$0xf0] }
 0x399   : > { %v9445_v27 = vor.u32 %v10705_v11, %v9444_v51  ;;  %v9500_v11 = vld [vmem:[#allocation2 + $0x218] sm:$0xf] }
 0x39a   : > { %v4242_v0 = vadd.f32 %v4241_v22, %v4183_v31  ;;  %v4127_v52 = vadd.f32 %v4126_v9, %v4068_v40  ;;  %5097 = vmatmul.bf16.gmra.mxu0 %v9421_v25  ;;  %v10702_v22 = vld [vmem:[#allocation2 + $0x1b4] sm:$0xf]  ;;  %v3152_v31 = vld [vmem:[#allocation4 + $0x48] sm:$0xff] }
 0x39b   : > { %5156 = vmatmul.bf16.gmra.mxu1 %v9425_v44  ;;  %v9449_v55 = vor.u32 %v10702_v22, %v9446_v10  ;;  %v10718_v10 = vld [vmem:[#allocation2 + $0x22c] sm:$0xf0] }
 0x39c   : > { %5215 = vmatmul.bf16.gmra.mxu2 %v9429_v19  ;;  %v4269_v28 = vadd.f32 %v4242_v0, %v3150_v35  ;;  %v1640_v39 = vld [vmem:[#allocation2 + $0x210] sm:$0x11]  ;;  %v10760_v0 = vld [vmem:[%s13036_s11 + $0x440] sm:$0xff] }
 0x39d   : > { %5274 = vmatmul.bf16.gmra.mxu3 %v9433_v14  ;;  %v1641_v61 = vsel %vm11684_vm15, 0, %v1640_v39  ;;  %5361 = vmatpush.bf16.msrb.mxu1 %v10760_v0  ;;  %v3154_v39 = vld [vmem:[#allocation4 + $0x90] sm:$0xff] }
 0x39e   : > { %4289 = vst [vmem:[#allocation4 + $0x60] sm:$0xff] %v4269_v28  ;;  %v3153_v28 = vld [vmem:[#allocation4 + $0x70] sm:$0xff]  ;;  %v10717_v3 = vld [vmem:[#allocation2 + $0x224] sm:$0xf0] }
 0x39f   : > { %v4185_v2 = vpop.f32.mrf.mxu2  ;;  %v4069_v59 = vpop.f32.mrf.mxu0  ;;  %1642 = vst [vmem:[#allocation2 + $0x210] sm:$0x11] %v1641_v61 }
 0x3a0   : > { %v4244_v58 = vpop.f32.mrf.mxu3  ;;  %v4186_v54 = vadd.f32 %v4185_v2, %v4127_v52  ;;  %v4128_v46 = vpop.f32.mrf.mxu1  ;;  %v4070_v49 = vadd.f32 %v4069_v59, %v12243_v20  ;;  %v9453_v20 = vor.u32 %v10706_v7, %v9452_v36  ;;  %v9476_v52 = vld [vmem:[#allocation2 + $0x1e8] sm:$0xf]  ;;  %v9470_v36 = vld [vmem:[#allocation2 + $0x1f8] sm:$0xf0] }
 0x3a2   : > { %v4245_v17 = vadd.f32 %v4244_v58, %v4186_v54  ;;  %v4129_v57 = vadd.f32 %v4128_v46, %v4070_v49  ;;  %v10712_v58 = vld [vmem:[#allocation2 + $0x1fc] sm:$0xf0]  ;;  %v10709_v54 = vld [vmem:[#allocation2 + $0x1ec] sm:$0xf]  ;;  %v10711_v46 = vld [vmem:[#allocation2 + $0x1f4] sm:$0xf0] }
 0x3a3   : > { %v9477_v7 = vor.u32 %v10712_v58, %v9476_v52  ;;  %v9481_v49 = vor.u32 %v10709_v54, %v9478_v5  ;;  %v9469_v32 = vor.u32 %v10711_v46, %v9468_v26  ;;  %v10671_v26 = vld [vmem:[#allocation2 + $0xb4] sm:$0xf0]  ;;  %v9318_v46 = vld [vmem:[#allocation2 + $0xb8] sm:$0xf0] }
 0x3a4   : > { %v4270_v30 = vadd.f32 %v4245_v17, %v3151_v12  ;;  %v10708_v12 = vld [vmem:[#allocation2 + $0x1e4] sm:$0xf] }
 0x3a5   : > { %v9473_v4 = vor.u32 %v10708_v12, %v9470_v36 }
 0x3a6   : > { %4290 = vst [vmem:[#allocation4 + $0x20] sm:$0xff] %v4270_v30 }
 0x3a7   : > { %v4187_v63 = vpop.f32.mrf.mxu2  ;;  %v4072_v19 = vpop.f32.mrf.mxu0 }
 0x3a8   : > { %v4246_v50 = vpop.f32.mrf.mxu3  ;;  %v4188_v41 = vadd.f32 %v4187_v63, %v4129_v57  ;;  %v4131_v14 = vpop.f32.mrf.mxu1  ;;  %v4073_v29 = vadd.f32 %v4072_v19, %v12264_v53 }
 0x3aa   : > { %v4247_v48 = vadd.f32 %v4246_v50, %v4188_v41  ;;  %v4132_v25 = vadd.f32 %v4131_v14, %v4073_v29  ;;  %5102 = vmatmul.bf16.gmra.mxu0 %v9445_v27  ;;  %v9492_v41 = vld [vmem:[#allocation2 + $0x210] sm:$0xf]  ;;  %v9494_v27 = vld [vmem:[#allocation2 + $0x228] sm:$0xf0] }
 0x3ab   : > { %5161 = vmatmul.bf16.gmra.mxu1 %v9449_v55  ;;  %v9501_v55 = vor.u32 %v10718_v10, %v9500_v11  ;;  %v9493_v14 = vor.u32 %v10717_v3, %v9492_v41 }
 0x3ac   : > { %5220 = vmatmul.bf16.gmra.mxu2 %v9453_v20  ;;  %v4271_v43 = vadd.f32 %v4247_v48, %v3152_v31  ;;  %v10715_v20 = vld [vmem:[#allocation2 + $0x21c] sm:$0xf]  ;;  %v10714_v48 = vld [vmem:[#allocation2 + $0x214] sm:$0xf] }
 0x3ad   : > { %5279 = vmatmul.bf16.gmra.mxu3 %v9457_v6  ;;  %v9502_v6 = vld [vmem:[#allocation2 + $0x230] sm:$0xf0]  ;;  %v9497_v31 = vor.u32 %v10714_v48, %v9494_v27  ;;  %v9364_v48 = vld [vmem:[#allocation2 + $0x100] sm:$0xf]  ;;  %v10683_v27 = vld [vmem:[#allocation2 + $0x114] sm:$0xf0] }
 0x3ae   : > { %4291 = vst [vmem:[#allocation4 + $0x48] sm:$0xff] %v4271_v43  ;;  %v9505_v19 = vor.u32 %v10715_v20, %v9502_v6 }
 0x3af   : > { %v4190_v44 = vpop.f32.mrf.mxu2  ;;  %v4074_v35 = vpop.f32.mrf.mxu0 }
 0x3b0   : > { %v4249_v8 = vpop.f32.mrf.mxu3  ;;  %v4191_v18 = vadd.f32 %v4190_v44, %v4132_v25  ;;  %v4133_v40 = vpop.f32.mrf.mxu1  ;;  %v4075_v53 = vadd.f32 %v4074_v35, %v12279_v24  ;;  %v10662_v35 = vld [vmem:[#allocation2 + $0x74] sm:$0xf] }
 0x3b2   : > { %v4250_v9 = vadd.f32 %v4249_v8, %v4191_v18  ;;  %v4134_v62 = vadd.f32 %v4133_v40, %v4075_v53  ;;  %v9292_v18 = vld [vmem:[#allocation2 + $0x70] sm:$0xf]  ;;  %v9294_v40 = vld [vmem:[#allocation2 + $0x88] sm:$0xf0] }
 0x3b3   : > { %v9297_v52 = vor.u32 %v10662_v35, %v9294_v40  ;;  %v9388_v35 = vld [vmem:[#allocation2 + $0x130] sm:$0xf]  ;;  %v10689_v40 = vld [vmem:[#allocation2 + $0x144] sm:$0xf0] }
 0x3b4   : > { %v4272_v2 = vadd.f32 %v4250_v9, %v3153_v28  ;;  %v10665_v9 = vld [vmem:[#allocation2 + $0x84] sm:$0xf0] }
 0x3b5   : > { %v9293_v28 = vor.u32 %v10665_v9, %v9292_v18 }
 0x3b6   : > { %4292 = vst [vmem:[#allocation4 + $0x70] sm:$0xff] %v4272_v2 }
 0x3b7   : > { %v4192_v17 = vpop.f32.mrf.mxu2  ;;  %v5068_v24 = vpop.f32.mrf.mxu0 }
 0x3b8   : > { %v4251_v59 = vpop.f32.mrf.mxu3  ;;  %v4193_v30 = vadd.f32 %v4192_v17, %v4134_v62  ;;  %v5127_v51 = vpop.f32.mrf.mxu1  ;;  %v9316_v17 = vld [vmem:[#allocation2 + $0xa0] sm:$0xf] }
 0x3b9   : > { %v12383_v57 = vadd.f32 %v5127_v51, %v5068_v24  ;;  %v9317_v12 = vor.u32 %v10671_v26, %v9316_v17  ;;  %v10677_v24 = vld [vmem:[#allocation2 + $0xe4] sm:$0xf0]  ;;  %v10674_v51 = vld [vmem:[#allocation2 + $0xd4] sm:$0xf] }
 0x3ba   : > { %v4252_v16 = vadd.f32 %v4251_v59, %v4193_v30  ;;  %5107 = vmatmul.bf16.gmra.mxu0 %v9469_v32  ;;  %v10668_v59 = vld [vmem:[#allocation2 + $0xa4] sm:$0xf] }
 0x3bb   : > { %5166 = vmatmul.bf16.gmra.mxu1 %v9473_v4  ;;  %v9321_v36 = vor.u32 %v10668_v59, %v9318_v46 }
 0x3bc   : > { %5225 = vmatmul.bf16.gmra.mxu2 %v9477_v7  ;;  %v4273_v61 = vadd.f32 %v4252_v16, %v3154_v39  ;;  %v9340_v39 = vld [vmem:[#allocation2 + $0xd0] sm:$0xf] }
 0x3bd   : > { %5284 = vmatmul.bf16.gmra.mxu3 %v9481_v49 }
 0x3be   : > { %4293 = vst [vmem:[#allocation4 + $0x90] sm:$0xff] %v4273_v61  ;;  %v9342_v61 = vld [vmem:[#allocation2 + $0xe8] sm:$0xf0] }
 0x3bf   : > { %v5070_v63 = vpop.f32.mrf.mxu0 }
 0x3c0   : > { %v5129_v50 = vpop.f32.mrf.mxu1 }
 0x3c1   : > { %v12385_v22 = vadd.f32 %v5129_v50, %v5070_v63  ;;  %v9341_v63 = vor.u32 %v10677_v24, %v9340_v39  ;;  %v9345_v50 = vor.u32 %v10674_v51, %v9342_v61  ;;  %v5186_v51 = vpop.f32.mrf.mxu2 }
 0x3c7   : > { %v5073_v29 = vpop.f32.mrf.mxu0 }
 0x3c8   : > { %v5132_v43 = vpop.f32.mrf.mxu1 }
 0x3c9   : > { %v12387_v0 = vadd.f32 %v5132_v43, %v5073_v29 }
 0x3ca   : > { %5112 = vmatmul.bf16.gmra.mxu0 %v9493_v14  ;;  %v9365_v14 = vor.u32 %v10683_v27, %v9364_v48  ;;  %v5188_v48 = vpop.f32.mrf.mxu2  ;;  %v9436_v27 = vld [vmem:[#allocation2 + $0x190] sm:$0xf] }
 0x3cb   : > { %5171 = vmatmul.bf16.gmra.mxu1 %v9497_v31 }
 0x3cc   : > { %5230 = vmatmul.bf16.gmra.mxu2 %v9501_v55  ;;  %v10680_v55 = vld [vmem:[#allocation2 + $0x104] sm:$0xf] }
 0x3cd   : > { %5289 = vmatmul.bf16.gmra.mxu3 %v9505_v19  ;;  %v9366_v19 = vld [vmem:[#allocation2 + $0x118] sm:$0xf0] }
 0x3ce   : > { %v9369_v31 = vor.u32 %v10680_v55, %v9366_v19  ;;  %v10701_v19 = vld [vmem:[#allocation2 + $0x1a4] sm:$0xf0] }
 0x3cf   : > { %v5075_v25 = vpop.f32.mrf.mxu0 }
 0x3d0   : > { %v5134_v44 = vpop.f32.mrf.mxu1 }
 0x3d1   : > { %v12389_v8 = vadd.f32 %v5134_v44, %v5075_v25 }
 0x3d7   : > { %v5078_v53 = vpop.f32.mrf.mxu0 }
 0x3d8   : > { %v5137_v2 = vpop.f32.mrf.mxu1 }
 0x3d9   : > { %v12391_v58 = vadd.f32 %v5137_v2, %v5078_v53  ;;  %v9389_v53 = vor.u32 %v10689_v40, %v9388_v35 }
 0x3da   : > { %5303 = vmatmul.bf16.vlgmr.msra.gmra.mxu0 %v9293_v28  ;;  %v10686_v28 = vld [vmem:[#allocation2 + $0x134] sm:$0xf] }
 0x3db   : > { %5362 = vmatmul.bf16.vlgmr.msrb.gmra.mxu1 %v9297_v52  ;;  %v9390_v52 = vld [vmem:[#allocation2 + $0x148] sm:$0xf0] }
 0x3dc   : > { %v9393_v2 = vor.u32 %v10686_v28, %v9390_v52 }
 0x3df   : > { %v5080_v54 = vpop.f32.mrf.mxu0 }
 0x3e0   : > { %v5139_v5 = vpop.f32.mrf.mxu1 }
 0x3e1   : > { %v12393_v62 = vadd.f32 %v5139_v5, %v5080_v54 }
 0x3e7   : > { %v5083_v7 = vpop.f32.mrf.mxu0 }
 0x3e8   : > { %v5142_v49 = vpop.f32.mrf.mxu1 }
 0x3e9   : > { %v12395_v30 = vadd.f32 %v5142_v49, %v5083_v7  ;;  %v10692_v7 = vld [vmem:[#allocation2 + $0x164] sm:$0xf]  ;;  %v9414_v49 = vld [vmem:[#allocation2 + $0x178] sm:$0xf0] }
 0x3ea   : > { %5308 = vmatmul.bf16.gmra.mxu0 %v9317_v12  ;;  %v9412_v12 = vld [vmem:[#allocation2 + $0x160] sm:$0xf] }
 0x3eb   : > { %5367 = vmatmul.bf16.gmra.mxu1 %v9321_v36  ;;  %v10695_v36 = vld [vmem:[#allocation2 + $0x174] sm:$0xf0] }
 0x3ef   : > { %v5085_v16 = vpop.f32.mrf.mxu0 }
 0x3f0   : > { %v5144_v32 = vpop.f32.mrf.mxu1 }
 0x3f1   : > { %v12397_v4 = vadd.f32 %v5144_v32, %v5085_v16  ;;  %v9413_v16 = vor.u32 %v10695_v36, %v9412_v12  ;;  %v9417_v32 = vor.u32 %v10692_v7, %v9414_v49  ;;  %v10704_v7 = vld [vmem:[#allocation2 + $0x1c4] sm:$0xf]  ;;  %v9462_v49 = vld [vmem:[#allocation2 + $0x1d8] sm:$0xf0] }
 0x3f7   : > { %v5088_v11 = vpop.f32.mrf.mxu0 }
 0x3f8   : > { %v5147_v10 = vpop.f32.mrf.mxu1 }
 0x3f9   : > { %v12399_v20 = vadd.f32 %v5147_v10, %v5088_v11 }
 0x3fa   : > { %5313 = vmatmul.bf16.gmra.mxu0 %v9341_v63  ;;  %v5245_v63 = vpop.f32.mrf.mxu3 }
 0x3fb   : > { %5372 = vmatmul.bf16.gmra.mxu1 %v9345_v50 }
 0x3ff   : > { %v5090_v6 = vpop.f32.mrf.mxu0 }
 0x400   : > { %v5149_v3 = vpop.f32.mrf.mxu1 }
 0x401   : > { %v12401_v41 = vadd.f32 %v5149_v3, %v5090_v6  ;;  %v1891_v6 = vrot.slane %v1518_v34, 5  ;;  %v1895_v3 = vrot.slane %v1515_v21, 4  ;;  %v1885_v21 = vrot.slane %v1510_v60, 5  ;;  %v10707_v60 = vld [vmem:[#allocation2 + $0x1d4] sm:$0xf0] }
 0x403   : > { %v1896_v55 = vor.u32 %v1895_v3, %v1891_v6 }
 0x407   : > { %v5093_v29 = vpop.f32.mrf.mxu0 }
 0x408   : > { %v5152_v43 = vpop.f32.mrf.mxu1 }
 0x409   : > { %v12403_v25 = vadd.f32 %v5152_v43, %v5093_v29  ;;  %v1897_v29 = vrot.slane %v1896_v55, 4  ;;  %v1971_v43 = vld [vmem:[#allocation2 + $0x238] sm:$0xff] }
 0x40a   : > { %5318 = vmatmul.bf16.gmra.mxu0 %v9365_v14  ;;  %v10698_v14 = vld [vmem:[#allocation2 + $0x194] sm:$0xf] }
 0x40b   : > { %5377 = vmatmul.bf16.gmra.mxu1 %v9369_v31  ;;  %v9438_v31 = vld [vmem:[#allocation2 + $0x1a8] sm:$0xf0]  ;;  %v1972_v40 = vsel %vm11837_vm5, %v1897_v29, %v1971_v43  ;;  %v10710_v29 = vld [vmem:[#allocation2 + $0x1f4] sm:$0xf] }
 0x40c   : > { %v9441_v35 = vor.u32 %v10698_v14, %v9438_v31  ;;  %1973 = vst [vmem:[#allocation2 + $0x238] sm:$0xff] %v1972_v40  ;;  %v9484_v14 = vld [vmem:[#allocation2 + $0x1f0] sm:$0xf]  ;;  %v10713_v31 = vld [vmem:[#allocation2 + $0x204] sm:$0xf0] }
 0x40d   : > { %v9486_v43 = vld [vmem:[#allocation2 + $0x208] sm:$0xf0]  ;;  %v9485_v40 = vor.u32 %v10713_v31, %v9484_v14 }
 0x40f   : > { %v5095_v44 = vpop.f32.mrf.mxu0 }
 0x410   : > { %v5154_v18 = vpop.f32.mrf.mxu1 }
 0x411   : > { %v12405_v9 = vadd.f32 %v5154_v18, %v5095_v44  ;;  %v5247_v44 = vpop.f32.mrf.mxu3  ;;  %v9437_v18 = vor.u32 %v10701_v19, %v9436_v27  ;;  %v5187_v19 = vadd.f32 %v5186_v51, %v12383_v57  ;;  %v12450_v57 = vld [vmem:[%s13061_s29] ss:$0 sm:$0xff]  ;;  %v4294_v51 = vld [vmem:[#allocation4] sm:$0xff] }
 0x417   : > { %v5098_v54 = vpop.f32.mrf.mxu0 }
 0x418   : > { %v5157_v5 = vpop.f32.mrf.mxu1 }
 0x419   : > { %v12407_v17 = vadd.f32 %v5157_v5, %v5098_v54  ;;  %v5250_v12 = vpop.f32.mrf.mxu3 }
 0x41a   : > { %5323 = vmatmul.bf16.gmra.mxu0 %v9389_v53  ;;  %v1886_v53 = vor.u32 %v1885_v21, %v1882_v47 }
 0x41b   : > { %5382 = vmatmul.bf16.gmra.mxu1 %v9393_v2  ;;  %v5191_v2 = vpop.f32.mrf.mxu2 }
 0x41c   : > { %v1887_v54 = vrot.slane %v1886_v53, 4  ;;  %v5189_v53 = vadd.f32 %v5188_v48, %v12385_v22 }
 0x41e   : > { %v1892_v1 = vsel %vm11863_vm0, %v1887_v54, %v1891_v6 }
 0x41f   : > { %v5100_v26 = vpop.f32.mrf.mxu0  ;;  %1970 = vst [vmem:[#allocation2 + $0x220] sm:$0xff] %v1892_v1 }
 0x420   : > { %v5159_v59 = vpop.f32.mrf.mxu1 }
 0x421   : > { %v12409_v46 = vadd.f32 %v5159_v59, %v5100_v26  ;;  %v2014_v59 = vld [vmem:[#allocation2 + $0x238] sm:$0x88]  ;;  %v12435_v6 = vpop.f32.mrf.mxu3 }
 0x422   : > { %v2015_v56 = vsel %vm11879_vm3, 0, %v2014_v59 }
 0x423   : > { %2016 = vst [vmem:[#allocation2 + $0x238] sm:$0x88] %v2015_v56 }
 0x427   : > { %v5103_v39 = vpop.f32.mrf.mxu0 }
 0x428   : > { %v5162_v24 = vpop.f32.mrf.mxu1 }
 0x429   : > { %v12411_v61 = vadd.f32 %v5162_v24, %v5103_v39  ;;  %v9465_v39 = vor.u32 %v10704_v7, %v9462_v49  ;;  %v4295_v49 = vld [vmem:[#allocation4 + $0x38] sm:$0xff] }
 0x42a   : > { %5328 = vmatmul.bf16.gmra.mxu0 %v9413_v16  ;;  %v5193_v16 = vpop.f32.mrf.mxu2 }
 0x42b   : > { %5387 = vmatmul.bf16.gmra.mxu1 %v9417_v32  ;;  %v9461_v32 = vor.u32 %v10707_v60, %v9460_v37  ;;  %v5192_v60 = vadd.f32 %v5191_v2, %v12387_v0 }
 0x42f   : > { %v5105_v50 = vpop.f32.mrf.mxu0 }
 0x430   : > { %v5164_v11 = vpop.f32.mrf.mxu1 }
 0x431   : > { %v12413_v10 = vadd.f32 %v5164_v11, %v5105_v50 }
 0x432   : > { %v12437_v45 = vpop.f32.mrf.mxu2 }
 0x437   : > { %v5108_v28 = vpop.f32.mrf.mxu0 }
 0x438   : > { %v5167_v52 = vpop.f32.mrf.mxu1 }
 0x439   : > { %v12421_v34 = vadd.f32 %v5167_v52, %v5108_v28  ;;  %v9489_v28 = vor.u32 %v10710_v29, %v9486_v43 }
 0x43a   : > { %5333 = vmatmul.bf16.gmra.mxu0 %v9437_v18  ;;  %v12442_v18 = vpop.f32.mrf.mxu3  ;;  %v12445_v54 = vpop.f32.mrf.mxu2 }
 0x43b   : > { %5392 = vmatmul.bf16.gmra.mxu1 %v9441_v35  ;;  %v5246_v35 = vadd.f32 %v5245_v63, %v5187_v19  ;;  %v5248_v63 = vadd.f32 %v5247_v44, %v5189_v53  ;;  %v5251_v19 = vadd.f32 %v5250_v12, %v5192_v60 }
 0x43f   : > { %v5110_v5 = vpop.f32.mrf.mxu0 }
 0x440   : > { %v5169_v26 = vpop.f32.mrf.mxu1 }
 0x441   : > { %v12429_v36 = vadd.f32 %v5169_v26, %v5110_v5 }
 0x442   : > { %v12452_v1 = vpop.f32.mrf.mxu3 }
 0x447   : > { %v5113_v24 = vpop.f32.mrf.mxu0 }
 0x448   : > { %v5172_v50 = vpop.f32.mrf.mxu1 }
 0x449   : > { %v12433_v11 = vadd.f32 %v5172_v50, %v5113_v24  ;;  %v10719_v24 = vld [vmem:[#allocation2 + $0x234] sm:$0xf0]  ;;  %v10716_v50 = vld [vmem:[#allocation2 + $0x224] sm:$0xf] }
 0x44a   : > { %5338 = vmatmul.bf16.gmra.mxu0 %v9461_v32 }
 0x44b   : > { %5397 = vmatmul.bf16.gmra.mxu1 %v9465_v39  ;;  %v9508_v39 = vld [vmem:[#allocation2 + $0x220] sm:$0xf] }
 0x44c   : > { %v9509_v31 = vor.u32 %v10719_v24, %v9508_v39 }
 0x44f   : > { %v5115_v3 = vpop.f32.mrf.mxu0 }
 0x450   : > { %v5174_v27 = vpop.f32.mrf.mxu1 }
 0x451   : > { %v12439_v55 = vadd.f32 %v5174_v27, %v5115_v3  ;;  %v9510_v3 = vld [vmem:[#allocation2 + $0x238] sm:$0xf0]  ;;  %v5201_v27 = vpop.f32.mrf.mxu2 }
 0x452   : > { %v9513_v29 = vor.u32 %v10716_v50, %v9510_v3  ;;  %v5199_v3 = vadd.f32 %v12445_v54, %v12393_v62  ;;  %v4299_v54 = vld [vmem:[#allocation4 + $0x68] sm:$0xff] }
 0x457   : > { %v5304_v52 = vpop.f32.mrf.mxu0 }
 0x458   : > { %v5363_v47 = vpop.f32.mrf.mxu1  ;;  %v5305_v21 = vadd.f32 %v5304_v52, %v5246_v35 }
 0x45a   : > { %v5364_v5 = vadd.f32 %v5363_v47, %v5305_v21  ;;  %5343 = vmatmul.bf16.gmra.mxu0 %v9485_v40  ;;  %v5260_v40 = vpop.f32.mrf.mxu3  ;;  %v4296_v21 = vld [vmem:[#allocation4 + $0x50] sm:$0xff] }
 0x45b   : > { %5402 = vmatmul.bf16.gmra.mxu1 %v9489_v28  ;;  %v5194_v28 = vadd.f32 %v5193_v16, %v12389_v8  ;;  %v5197_v8 = vadd.f32 %v12437_v45, %v12391_v58 }
 0x45c   : > { %v5413_v26 = vadd.f32 %v5364_v5, %v4294_v51  ;;  %v5203_v5 = vpop.f32.mrf.mxu2 }
 0x45d   : > { %v5253_v12 = vadd.f32 %v12435_v6, %v5194_v28 }
 0x45e   : > { %5433 = vst [vmem:[#allocation4] sm:$0xff] %v5413_v26  ;;  %v5477_v59 = vadd.f32 %v12450_v57, %v5413_v26 }
 0x45f   : > { %v5306_v56 = vpop.f32.mrf.mxu0 }
 0x460   : > { %v5365_v22 = vpop.f32.mrf.mxu1  ;;  %v5497_v48 = vmax.f32 %v5477_v59, 0.0  ;;  %v5307_v37 = vadd.f32 %v5306_v56, %v5248_v63 }
 0x462   : > { %v5517_v7 = vpack.c.bf16 %v5497_v48, %v5497_v48  ;;  %v5366_v32 = vadd.f32 %v5365_v22, %v5307_v37  ;;  %v5262_v16 = vpop.f32.mrf.mxu3  ;;  %v4297_v37 = vld [vmem:[#allocation4 + $0x18] sm:$0xff] }
 0x464   : > { %5537 = vst [vmem:[#allocation3 + $0x4] sm:$0xf] %v5517_v7  ;;  %v5414_v44 = vadd.f32 %v5366_v32, %v4295_v49  ;;  %v5256_v7 = vadd.f32 %v12442_v18, %v5197_v8  ;;  %v5206_v39 = vpop.f32.mrf.mxu2 }
 0x466   : > { %5434 = vst [vmem:[#allocation4 + $0x38] sm:$0xff] %v5414_v44  ;;  %v5478_v14 = vadd.f32 %v12450_v57, %v5414_v44  ;;  %v4298_v44 = vld [vmem:[#allocation4 + $0x30] sm:$0xff] }
 0x467   : > { %v5309_v43 = vpop.f32.mrf.mxu0 }
 0x468   : > { %v5368_v35 = vpop.f32.mrf.mxu1  ;;  %v5498_v0 = vmax.f32 %v5478_v14, 0.0  ;;  %v5310_v2 = vadd.f32 %v5309_v43, %v5251_v19 }
 0x46a   : > { %v5518_v52 = vpack.c.bf16 %v5498_v0, %v5498_v0  ;;  %v5369_v47 = vadd.f32 %v5368_v35, %v5310_v2  ;;  %5348 = vmatmul.bf16.gmra.mxu0 %v9509_v31  ;;  %v5265_v19 = vpop.f32.mrf.mxu3  ;;  %v5258_v31 = vadd.f32 %v12452_v1, %v5199_v3  ;;  %v5202_v2 = vadd.f32 %v5201_v27, %v12395_v30  ;;  %v4300_v30 = vld [vmem:[#allocation4 + $0x78] sm:$0xff] }
 0x46b   : > { %5407 = vmatmul.bf16.gmra.mxu1 %v9513_v29 }
 0x46c   : > { %5538 = vst [vmem:[#allocation3 + $0x10] sm:$0xf] %v5518_v52  ;;  %v5415_v53 = vadd.f32 %v5369_v47, %v4296_v21  ;;  %v5208_v28 = vpop.f32.mrf.mxu2  ;;  %v5261_v21 = vadd.f32 %v5260_v40, %v5202_v2 }
 0x46e   : > { %5435 = vst [vmem:[#allocation4 + $0x50] sm:$0xff] %v5415_v53  ;;  %v5479_v51 = vadd.f32 %v12450_v57, %v5415_v53 }
 0x46f   : > { %v5311_v26 = vpop.f32.mrf.mxu0 }
 0x470   : > { %v5370_v63 = vpop.f32.mrf.mxu1  ;;  %v5499_v59 = vmax.f32 %v5479_v51, 0.0  ;;  %v5312_v56 = vadd.f32 %v5311_v26, %v5253_v12 }
 0x472   : > { %v5519_v22 = vpack.c.bf16 %v5499_v59, %v5499_v59  ;;  %v5371_v48 = vadd.f32 %v5370_v63, %v5312_v56  ;;  %v5267_v53 = vpop.f32.mrf.mxu3  ;;  %v5204_v59 = vadd.f32 %v5203_v5, %v12397_v4  ;;  %v4301_v4 = vld [vmem:[#allocation4 + $0x80] sm:$0xff] }
 0x474   : > { %5539 = vst [vmem:[#allocation3 + $0x1c] sm:$0xf] %v5519_v22  ;;  %v5416_v60 = vadd.f32 %v5371_v48, %v4297_v37  ;;  %v5211_v27 = vpop.f32.mrf.mxu2  ;;  %v5263_v48 = vadd.f32 %v5262_v16, %v5204_v59 }
 0x476   : > { %5436 = vst [vmem:[#allocation4 + $0x18] sm:$0xff] %v5416_v60  ;;  %v5480_v6 = vadd.f32 %v12450_v57, %v5416_v60 }
 0x477   : > { %v5314_v49 = vpop.f32.mrf.mxu0 }
 0x478   : > { %v5373_v32 = vpop.f32.mrf.mxu1  ;;  %v5500_v24 = vmax.f32 %v5480_v6, 0.0  ;;  %v5315_v50 = vadd.f32 %v5314_v49, %v5256_v7 }
 0x47a   : > { %v5520_v58 = vpack.c.bf16 %v5500_v24, %v5500_v24  ;;  %v5374_v45 = vadd.f32 %v5373_v32, %v5315_v50  ;;  %v5270_v7 = vpop.f32.mrf.mxu3  ;;  %v5207_v32 = vadd.f32 %v5206_v39, %v12399_v20  ;;  %v4302_v20 = vld [vmem:[#allocation4 + $0x8] sm:$0xff] }
 0x47c   : > { %5540 = vst [vmem:[#allocation3 + $0x28] sm:$0xf] %v5520_v58  ;;  %v5417_v14 = vadd.f32 %v5374_v45, %v4298_v44  ;;  %v5266_v3 = vadd.f32 %v5265_v19, %v5207_v32  ;;  %v5213_v58 = vpop.f32.mrf.mxu2 }
 0x47e   : > { %5437 = vst [vmem:[#allocation4 + $0x30] sm:$0xff] %v5417_v14  ;;  %v5481_v18 = vadd.f32 %v12450_v57, %v5417_v14 }
 0x47f   : > { %v5316_v29 = vpop.f32.mrf.mxu0 }
 0x480   : > { %v5375_v43 = vpop.f32.mrf.mxu1  ;;  %v5501_v35 = vmax.f32 %v5481_v18, 0.0  ;;  %v5317_v0 = vadd.f32 %v5316_v29, %v5258_v31  ;;  %v5209_v18 = vadd.f32 %v5208_v28, %v12401_v41  ;;  %v4303_v41 = vld [vmem:[#allocation4 + $0x88] sm:$0xff] }
 0x482   : > { %v5521_v52 = vpack.c.bf16 %v5501_v35, %v5501_v35  ;;  %v5376_v62 = vadd.f32 %v5375_v43, %v5317_v0  ;;  %v5272_v29 = vpop.f32.mrf.mxu3  ;;  %v5268_v0 = vadd.f32 %v5267_v53, %v5209_v18 }
 0x484   : > { %5541 = vst [vmem:[#allocation3 + $0x34] sm:$0xf] %v5521_v52  ;;  %v5418_v47 = vadd.f32 %v5376_v62, %v4299_v54  ;;  %v5216_v62 = vpop.f32.mrf.mxu2 }
 0x486   : > { %5438 = vst [vmem:[#allocation4 + $0x68] sm:$0xff] %v5418_v47  ;;  %v5482_v1 = vadd.f32 %v12450_v57, %v5418_v47 }
 0x487   : > { %v5319_v12 = vpop.f32.mrf.mxu0 }
 0x488   : > { %v5378_v51 = vpop.f32.mrf.mxu1  ;;  %v5502_v26 = vmax.f32 %v5482_v1, 0.0  ;;  %v5320_v63 = vadd.f32 %v5319_v12, %v5261_v21  ;;  %v5212_v21 = vadd.f32 %v5211_v27, %v12403_v25  ;;  %v4304_v25 = vld [vmem:[#allocation4 + $0x28] sm:$0xff] }
 0x48a   : > { %v5522_v56 = vpack.c.bf16 %v5502_v26, %v5502_v26  ;;  %v5379_v8 = vadd.f32 %v5378_v51, %v5320_v63  ;;  %v5275_v28 = vpop.f32.mrf.mxu3  ;;  %v5271_v26 = vadd.f32 %v5270_v7, %v5212_v21 }
 0x48c   : > { %5542 = vst [vmem:[#allocation3 + $0x40] sm:$0xf] %v5522_v56  ;;  %v5419_v22 = vadd.f32 %v5379_v8, %v4300_v30  ;;  %v5214_v30 = vadd.f32 %v5213_v58, %v12405_v9  ;;  %v4305_v9 = vld [vmem:[#allocation4 + $0x40] sm:$0xff] }
 0x48e   : > { %5439 = vst [vmem:[#allocation4 + $0x78] sm:$0xff] %v5419_v22  ;;  %v5483_v40 = vadd.f32 %v12450_v57, %v5419_v22  ;;  %v5218_v22 = vpop.f32.mrf.mxu2 }
 0x48f   : > { %v5321_v37 = vpop.f32.mrf.mxu0 }
 0x490   : > { %v5380_v60 = vpop.f32.mrf.mxu1  ;;  %v5503_v6 = vmax.f32 %v5483_v40, 0.0  ;;  %v5322_v49 = vadd.f32 %v5321_v37, %v5263_v48  ;;  %v5273_v37 = vadd.f32 %v5272_v29, %v5214_v30 }
 0x492   : > { %v5523_v24 = vpack.c.bf16 %v5503_v6, %v5503_v6  ;;  %v5381_v50 = vadd.f32 %v5380_v60, %v5322_v49  ;;  %v5277_v60 = vpop.f32.mrf.mxu3 }
 0x494   : > { %5543 = vst [vmem:[#allocation3 + $0x4c] sm:$0xf] %v5523_v24  ;;  %v5420_v5 = vadd.f32 %v5381_v50, %v4301_v4  ;;  %v5217_v50 = vadd.f32 %v5216_v62, %v12407_v17  ;;  %v4306_v17 = vld [vmem:[#allocation4 + $0x58] sm:$0xff] }
 0x496   : > { %5440 = vst [vmem:[#allocation4 + $0x80] sm:$0xff] %v5420_v5  ;;  %v5484_v16 = vadd.f32 %v12450_v57, %v5420_v5 }
 0x497   : > { %v5324_v45 = vpop.f32.mrf.mxu0 }
 0x498   : > { %v5383_v44 = vpop.f32.mrf.mxu1  ;;  %v5504_v14 = vmax.f32 %v5484_v16, 0.0  ;;  %v5325_v31 = vadd.f32 %v5324_v45, %v5266_v3  ;;  %v5221_v3 = vpop.f32.mrf.mxu2  ;;  %v5276_v16 = vadd.f32 %v5275_v28, %v5217_v50 }
 0x499   : > { %v5222_v21 = vadd.f32 %v5221_v3, %v12411_v61  ;;  %v4308_v61 = vld [vmem:[#allocation4 + $0x98] sm:$0xff] }
 0x49a   : > { %v5524_v43 = vpack.c.bf16 %v5504_v14, %v5504_v14  ;;  %v5384_v35 = vadd.f32 %v5383_v44, %v5325_v31  ;;  %v5280_v31 = vpop.f32.mrf.mxu3 }
 0x49c   : > { %5544 = vst [vmem:[#allocation3 + $0x58] sm:$0xf] %v5524_v43  ;;  %v5421_v39 = vadd.f32 %v5384_v35, %v4302_v20  ;;  %v5219_v43 = vadd.f32 %v5218_v22, %v12409_v46  ;;  %v4307_v46 = vld [vmem:[#allocation4 + $0x10] sm:$0xff] }
 0x49e   : > { %5441 = vst [vmem:[#allocation4 + $0x8] sm:$0xff] %v5421_v39  ;;  %v5485_v19 = vadd.f32 %v12450_v57, %v5421_v39 }
 0x49f   : > { %v5326_v2 = vpop.f32.mrf.mxu0 }
 0x4a0   : > { %v5385_v52 = vpop.f32.mrf.mxu1  ;;  %v5505_v54 = vmax.f32 %v5485_v19, 0.0  ;;  %v5327_v47 = vadd.f32 %v5326_v2, %v5268_v0  ;;  %v5278_v0 = vadd.f32 %v5277_v60, %v5219_v43  ;;  %v5223_v19 = vpop.f32.mrf.mxu2 }
 0x4a1   : > { %v5224_v30 = vadd.f32 %v5223_v19, %v12413_v10  ;;  %v4309_v10 = vld [vmem:[#allocation4 + $0x60] sm:$0xff] }
 0x4a2   : > { %v5525_v1 = vpack.c.bf16 %v5505_v54, %v5505_v54  ;;  %v5386_v12 = vadd.f32 %v5385_v52, %v5327_v47 }
 0x4a4   : > { %5545 = vst [vmem:[#allocation3 + $0x64] sm:$0xf] %v5525_v1  ;;  %v5422_v51 = vadd.f32 %v5386_v12, %v4303_v41  ;;  %v5282_v1 = vpop.f32.mrf.mxu3 }
 0x4a6   : > { %5442 = vst [vmem:[#allocation4 + $0x88] sm:$0xff] %v5422_v51  ;;  %v5486_v53 = vadd.f32 %v12450_v57, %v5422_v51  ;;  %v5281_v51 = vadd.f32 %v5280_v31, %v5222_v21 }
 0x4a7   : > { %v5329_v63 = vpop.f32.mrf.mxu0 }
 0x4a8   : > { %v5388_v59 = vpop.f32.mrf.mxu1  ;;  %v5506_v56 = vmax.f32 %v5486_v53, 0.0  ;;  %v5330_v8 = vadd.f32 %v5329_v63, %v5271_v26 }
 0x4aa   : > { %v5526_v48 = vpack.c.bf16 %v5506_v56, %v5506_v56  ;;  %v5389_v40 = vadd.f32 %v5388_v59, %v5330_v8  ;;  %v5226_v59 = vpop.f32.mrf.mxu2 }
 0x4ac   : > { %5546 = vst [vmem:[#allocation3 + $0x70] sm:$0xf] %v5526_v48  ;;  %v5423_v27 = vadd.f32 %v5389_v40, %v4304_v25  ;;  %v5285_v40 = vpop.f32.mrf.mxu3 }
 0x4ae   : > { %5443 = vst [vmem:[#allocation4 + $0x28] sm:$0xff] %v5423_v27  ;;  %v5487_v7 = vadd.f32 %v12450_v57, %v5423_v27  ;;  %v5283_v27 = vadd.f32 %v5282_v1, %v5224_v30 }
 0x4af   : > { %v5331_v6 = vpop.f32.mrf.mxu0 }
 0x4b0   : > { %v5390_v49 = vpop.f32.mrf.mxu1  ;;  %v5507_v32 = vmax.f32 %v5487_v7, 0.0  ;;  %v5332_v24 = vadd.f32 %v5331_v6, %v5273_v37 }
 0x4b2   : > { %v5527_v4 = vpack.c.bf16 %v5507_v32, %v5507_v32  ;;  %v5391_v5 = vadd.f32 %v5390_v49, %v5332_v24  ;;  %v5227_v32 = vadd.f32 %v5226_v59, %v12421_v34  ;;  %v5228_v24 = vpop.f32.mrf.mxu2  ;;  %v4310_v34 = vld [vmem:[#allocation4 + $0x20] sm:$0xff] }
 0x4b3   : > { %v5229_v31 = vadd.f32 %v5228_v24, %v12429_v36  ;;  %v4311_v36 = vld [vmem:[#allocation4 + $0x48] sm:$0xff] }
 0x4b4   : > { %5547 = vst [vmem:[#allocation3 + $0x7c] sm:$0xf] %v5527_v4  ;;  %v5424_v58 = vadd.f32 %v5391_v5, %v4305_v9  ;;  %v5286_v9 = vadd.f32 %v5285_v40, %v5227_v32  ;;  %v5287_v3 = vpop.f32.mrf.mxu3 }
 0x4b6   : > { %5444 = vst [vmem:[#allocation4 + $0x40] sm:$0xff] %v5424_v58  ;;  %v5488_v45 = vadd.f32 %v12450_v57, %v5424_v58 }
 0x4b7   : > { %v5334_v44 = vpop.f32.mrf.mxu0 }
 0x4b8   : > { %v5393_v14 = vpop.f32.mrf.mxu1  ;;  %v5508_v18 = vmax.f32 %v5488_v45, 0.0  ;;  %v5335_v29 = vadd.f32 %v5334_v44, %v5276_v16 }
 0x4ba   : > { %v5528_v35 = vpack.c.bf16 %v5508_v18, %v5508_v18  ;;  %v5394_v20 = vadd.f32 %v5393_v14, %v5335_v29  ;;  %v5231_v43 = vpop.f32.mrf.mxu2 }
 0x4bc   : > { %5548 = vst [vmem:[#allocation3 + $0x88] sm:$0xf] %v5528_v35  ;;  %v5425_v39 = vadd.f32 %v5394_v20, %v4306_v17  ;;  %v5288_v20 = vadd.f32 %v5287_v3, %v5229_v31 }
 0x4be   : > { %5445 = vst [vmem:[#allocation4 + $0x58] sm:$0xff] %v5425_v39  ;;  %v5489_v2 = vadd.f32 %v12450_v57, %v5425_v39 }
 0x4bf   : > { %v5336_v52 = vpop.f32.mrf.mxu0 }
 0x4c0   : > { %v5395_v62 = vpop.f32.mrf.mxu1  ;;  %v5509_v54 = vmax.f32 %v5489_v2, 0.0  ;;  %v5337_v47 = vadd.f32 %v5336_v52, %v5278_v0  ;;  %v5290_v52 = vpop.f32.mrf.mxu3 }
 0x4c2   : > { %v5529_v12 = vpack.c.bf16 %v5509_v54, %v5509_v54  ;;  %v5396_v41 = vadd.f32 %v5395_v62, %v5337_v47  ;;  %v5232_v62 = vadd.f32 %v5231_v43, %v12433_v11  ;;  %v4312_v11 = vld [vmem:[#allocation4 + $0x70] sm:$0xff] }
 0x4c4   : > { %5549 = vst [vmem:[#allocation3 + $0x94] sm:$0xf] %v5529_v12  ;;  %v5426_v28 = vadd.f32 %v5396_v41, %v4307_v46  ;;  %v5291_v1 = vadd.f32 %v5290_v52, %v5232_v62  ;;  %v5233_v12 = vpop.f32.mrf.mxu2 }
 0x4c6   : > { %5446 = vst [vmem:[#allocation4 + $0x10] sm:$0xff] %v5426_v28  ;;  %v5490_v26 = vadd.f32 %v12450_v57, %v5426_v28 }
 0x4c7   : > { %v5339_v53 = vpop.f32.mrf.mxu0 }
 0x4c8   : > { %v5398_v63 = vpop.f32.mrf.mxu1  ;;  %v5510_v56 = vmax.f32 %v5490_v26, 0.0  ;;  %v5340_v8 = vadd.f32 %v5339_v53, %v5281_v51  ;;  %v5234_v53 = vadd.f32 %v5233_v12, %v12439_v55 }
 0x4ca   : > { %v5530_v22 = vpack.c.bf16 %v5510_v56, %v5510_v56  ;;  %v5399_v48 = vadd.f32 %v5398_v63, %v5340_v8  ;;  %v5292_v56 = vpop.f32.mrf.mxu3 }
 0x4cb   : > { %v5293_v30 = vadd.f32 %v5292_v56, %v5234_v53 }
 0x4cc   : > { %5550 = vst [vmem:[#allocation3 + $0xa0] sm:$0xf] %v5530_v22  ;;  %v5427_v25 = vadd.f32 %v5399_v48, %v4308_v61 }
 0x4ce   : > { %5447 = vst [vmem:[#allocation4 + $0x98] sm:$0xff] %v5427_v25  ;;  %v5491_v37 = vadd.f32 %v12450_v57, %v5427_v25 }
 0x4cf   : > { %v5341_v60 = vpop.f32.mrf.mxu0 }
 0x4d0   : > { %v5400_v7 = vpop.f32.mrf.mxu1  ;;  %v5511_v6 = vmax.f32 %v5491_v37, 0.0  ;;  %v5342_v49 = vadd.f32 %v5341_v60, %v5283_v27  ;;  %v4313_v60 = vld [vmem:[#allocation4 + $0x90] sm:$0xff] }
 0x4d2   : > { %v5531_v50 = vpack.c.bf16 %v5511_v6, %v5511_v6  ;;  %v5401_v4 = vadd.f32 %v5400_v7, %v5342_v49 }
 0x4d4   : > { %5551 = vst [vmem:[#allocation3 + $0xac] sm:$0xf] %v5531_v50  ;;  %v5428_v5 = vadd.f32 %v5401_v4, %v4309_v10 }
 0x4d6   : > { %5448 = vst [vmem:[#allocation4 + $0x60] sm:$0xff] %v5428_v5  ;;  %v5492_v58 = vadd.f32 %v12450_v57, %v5428_v5 }
 0x4d7   : > { %v5344_v16 = vpop.f32.mrf.mxu0 }
 0x4d8   : > { %v5403_v45 = vpop.f32.mrf.mxu1  ;;  %v5512_v44 = vmax.f32 %v5492_v58, 0.0  ;;  %v5345_v14 = vadd.f32 %v5344_v16, %v5286_v9 }
 0x4da   : > { %v5532_v18 = vpack.c.bf16 %v5512_v44, %v5512_v44  ;;  %v5404_v29 = vadd.f32 %v5403_v45, %v5345_v14 }
 0x4dc   : > { %5552 = vst [vmem:[#allocation3 + $0xb8] sm:$0xf] %v5532_v18  ;;  %v5429_v35 = vadd.f32 %v5404_v29, %v4310_v34 }
 0x4de   : > { %5449 = vst [vmem:[#allocation4 + $0x20] sm:$0xff] %v5429_v35  ;;  %v5493_v17 = vadd.f32 %v12450_v57, %v5429_v35 }
 0x4df   : > { %v5346_v39 = vpop.f32.mrf.mxu0 }
 0x4e0   : > { %v5405_v0 = vpop.f32.mrf.mxu1  ;;  %v5513_v19 = vmax.f32 %v5493_v17, 0.0  ;;  %v5347_v2 = vadd.f32 %v5346_v39, %v5288_v20 }
 0x4e2   : > { %v5533_v54 = vpack.c.bf16 %v5513_v19, %v5513_v19  ;;  %v5406_v47 = vadd.f32 %v5405_v0, %v5347_v2 }
 0x4e4   : > { %5553 = vst [vmem:[#allocation3 + $0xc4] sm:$0xf] %v5533_v54  ;;  %v5430_v21 = vadd.f32 %v5406_v47, %v4311_v36 }
 0x4e6   : > { %5450 = vst [vmem:[#allocation4 + $0x48] sm:$0xff] %v5430_v21  ;;  %v5494_v41 = vadd.f32 %v12450_v57, %v5430_v21 }
 0x4e7   : > { %v5349_v46 = vpop.f32.mrf.mxu0 }
 0x4e8   : > { %v5408_v28 = vpop.f32.mrf.mxu1  ;;  %v5514_v51 = vmax.f32 %v5494_v41, 0.0  ;;  %v5350_v26 = vadd.f32 %v5349_v46, %v5291_v1 }
 0x4ea   : > { %v5534_v63 = vpack.c.bf16 %v5514_v51, %v5514_v51  ;;  %v5409_v59 = vadd.f32 %v5408_v28, %v5350_v26 }
 0x4ec   : > { %5554 = vst [vmem:[#allocation3 + $0xd0] sm:$0xf] %v5534_v63  ;;  %v5431_v8 = vadd.f32 %v5409_v59, %v4312_v11 }
 0x4ee   : > { %5451 = vst [vmem:[#allocation4 + $0x70] sm:$0xff] %v5431_v8  ;;  %v5495_v22 = vadd.f32 %v12450_v57, %v5431_v8 }
 0x4ef   : > { %v5351_v48 = vpop.f32.mrf.mxu0 }
 0x4f0   : > { %v5515_v61 = vmax.f32 %v5495_v22, 0.0  ;;  %v5352_v40 = vadd.f32 %v5351_v48, %v5293_v30  ;;  %v5410_v25 = vpop.f32.mrf.mxu1 }
 0x4f2   : > { %v5535_v27 = vpack.c.bf16 %v5515_v61, %v5515_v61  ;;  %v5411_v37 = vadd.f32 %v5410_v25, %v5352_v40 }
 0x4f4   : > { %5555 = vst [vmem:[#allocation3 + $0xdc] sm:$0xf] %v5535_v27  ;;  %v5432_v7 = vadd.f32 %v5411_v37, %v4313_v60 }
 0x4f6   : > { %5452 = vst [vmem:[#allocation4 + $0x90] sm:$0xff] %v5432_v7  ;;  %v5496_v55 = vadd.f32 %v12450_v57, %v5432_v7 }
 0x4f8   : > { %v5516_v6 = vmax.f32 %v5496_v55, 0.0  ;;  %5559 = sbr.rel (%p8216_p13) target bundleno = 1280 (0x500), region = 80 }
 0x4fa   : > { %v5536_v49 = vpack.c.bf16 %v5516_v6, %v5516_v6 }
 0x4fc   : > { %5556 = vst [vmem:[#allocation3 + $0xe8] sm:$0xf] %v5536_v49 }
 0x4fd   : > { %v11062_v32 = vmov 0  }
 0x4fe   : > { %5560 = vst [vmem:[#allocation3 + $0x4] sm:$0xf] %v11062_v32 }
 0x4ff   : > { %5561 = vst [vmem:[#allocation3 + $0x10] sm:$0xf] %v11062_v32 }
 0x500 PF: > { %5564 = sbr.rel (%p8217_p0) target bundleno = 1288 (0x508), region = 84 }
 0x505   : > { %v11063_v24 = vmov 0  }
 0x506   : > { %5566 = vst [vmem:[#allocation3 + $0xdc] sm:$0xf] %v11063_v24 }
 0x507   : > { %5567 = vst [vmem:[#allocation3 + $0xe8] sm:$0xf] %v11063_v24 }
 0x508 PF: > { %s13062_s26 = sld [smem:[#allocation12_spill]]  ;;  %v5568_v5 = vld [vmem:[#allocation3 + $0x4] sm:$0xf]  ;;  %v5570_v43 = vld [vmem:[#allocation3 + $0x1c] sm:$0xf] }
 0x509   : > { %v5569_v9 = vld [vmem:[#allocation3 + $0x10] sm:$0xf]  ;;  %v5589_v16 = vshrl.u32 %v5568_v5, 16  ;;  %v5592_v45 = vshll.u32 %v5568_v5, 16  ;;  %v5768_v35 = vld [vmem:[#allocation3] sm:$0xf] }
 0x50a   : > { %v5597_v44 = vshrl.u32 %v5569_v9, 16  ;;  %v5600_v14 = vshll.u32 %v5569_v9, 16  ;;  %v5571_v20 = vld [vmem:[#allocation3 + $0x28] sm:$0xf]  ;;  %v5605_v17 = vshrl.u32 %v5570_v43, 16  ;;  %v5608_v39 = vshll.u32 %v5570_v43, 16 }
 0x50b   : > { %v5591_v29 = vrot.slane %v5589_v16, 7  ;;  %v5613_v52 = vshrl.u32 %v5571_v20, 16  ;;  %v5572_v62 = vld [vmem:[#allocation3 + $0x34] sm:$0xf]  ;;  %v5616_v47 = vshll.u32 %v5571_v20, 16  ;;  %s13063_s22 = sld [smem:[#allocation13_spill]] }
 0x50c   : > { %v5599_v34 = vrot.slane %v5597_v44, 7  ;;  %v5607_v54 = vrot.slane %v5605_v17, 7  ;;  %v5621_v36 = vshrl.u32 %v5572_v62, 16  ;;  %v5624_v21 = vshll.u32 %v5572_v62, 16  ;;  %v5772_v46 = vld [vmem:[#allocation3 + $0x18] sm:$0xf] }
 0x50d   : > { %v5594_v0 = vor.u32 %v5592_v45, %v5591_v29  ;;  %v5595_v19 = vrot.slane %v5591_v29, 4  ;;  %v5615_v41 = vrot.slane %v5613_v52, 7  ;;  %v5776_v56 = vld [vmem:[#allocation3 + $0x30] sm:$0xf]  ;;  %v5573_v8 = vld [vmem:[#allocation3 + $0x40] sm:$0xf] }
 0x50e   : > { %v10799_v57 = vld [vmem:[%s13062_s26 + $0x38] sm:$0xff]  ;;  %v10798_v4 = vld [vmem:[%s13062_s26 + $0x30] sm:$0xff]  ;;  %v10797_v3 = vld [vmem:[%s13062_s26 + $0x28] sm:$0xff]  ;;  %v5602_v2 = vor.u32 %v5600_v14, %v5599_v34  ;;  %v5610_v28 = vor.u32 %v5608_v39, %v5607_v54  ;;  %v5611_v51 = vrot.slane %v5607_v54, 4  ;;  %v5623_v26 = vrot.slane %v5621_v36, 7 }
 0x50f   : > { %v10807_v50 = vld [vmem:[%s13062_s26 + $0x78] sm:$0xff]  ;;  %6490 = vmatpush.bf16.msrb.mxu2 %v10799_v57  ;;  %v10806_v10 = vld [vmem:[%s13062_s26 + $0x70] sm:$0xff]  ;;  %v10805_v58 = vld [vmem:[%s13062_s26 + $0x68] sm:$0xff]  ;;  %v5769_v12 = vsel %vm11609_vm6, %v5594_v0, %v5768_v35  ;;  %v5618_v59 = vor.u32 %v5616_v47, %v5615_v41  ;;  %v5629_v48 = vshrl.u32 %v5573_v8, 16  ;;  %v5632_v61 = vshll.u32 %v5573_v8, 16 }
 0x510   : > { %6539 = vmatpush.bf16.msrb.mxu3 %v10807_v50  ;;  %v10796_v31 = vld [vmem:[%s13062_s26 + $0x20] sm:$0xff]  ;;  %v5603_v1 = vsel %vm11632_vm10, %v5595_v19, %v5602_v2  ;;  %5770 = vst [vmem:[#allocation3] sm:$0xf] %v5769_v12  ;;  %v10795_v53 = vld [vmem:[%s13062_s26 + $0x18] sm:$0xff]  ;;  %v5773_v11 = vsel %vm11609_vm6, %v5610_v28, %v5772_v46  ;;  %v5626_v30 = vor.u32 %v5624_v21, %v5623_v26  ;;  %v10794_v25 = vld [vmem:[%s13062_s26 + $0x10] sm:$0xff]  ;;  %v5627_v37 = vrot.slane %v5623_v26, 4 }
 0x511   : > { %v10804_v18 = vld [vmem:[%s13062_s26 + $0x60] sm:$0xff]  ;;  %v10803_v63 = vld [vmem:[%s13062_s26 + $0x58] sm:$0xff]  ;;  %5771 = vst [vmem:[#allocation3 + $0xc] sm:$0xf] %v5603_v1  ;;  %v5619_v22 = vsel %vm11632_vm10, %v5611_v51, %v5618_v59  ;;  %v10802_v27 = vld [vmem:[%s13062_s26 + $0x50] sm:$0xff]  ;;  %v5631_v60 = vrot.slane %v5629_v48, 7 }
 0x512   : > { %5774 = vst [vmem:[#allocation3 + $0x18] sm:$0xf] %v5773_v11  ;;  %v5777_v40 = vsel %vm11609_vm6, %v5626_v30, %v5776_v56  ;;  %v10793_v49 = vld [vmem:[%s13062_s26 + $0x8] sm:$0xff]  ;;  %v10800_v16 = vld [vmem:[%s13062_s26 + $0x40] sm:$0xff]  ;;  %v9712_v44 = vld [vmem:[#allocation3 + $0xc] sm:$0xf0] }
 0x513   : > { %6491 = vmatpush.bf16.msrb.mxu2 %v10798_v4  ;;  %5775 = vst [vmem:[#allocation3 + $0x24] sm:$0xf] %v5619_v22  ;;  %v5634_v55 = vor.u32 %v5632_v61, %v5631_v60  ;;  %v10801_v32 = vld [vmem:[%s13062_s26 + $0x48] sm:$0xff]  ;;  %v10768_v45 = vld [vmem:[#allocation3 + $0x4] sm:$0xf]  ;;  %v10847_v29 = vld [vmem:[%s13062_s26 + $0xf8] sm:$0xff] }
 0x514   : > { %6540 = vmatpush.bf16.msrb.mxu3 %v10806_v10  ;;  %5778 = vst [vmem:[#allocation3 + $0x30] sm:$0xf] %v5777_v40  ;;  %v5574_v57 = vld [vmem:[#allocation3 + $0x4c] sm:$0xf]  ;;  %v10792_v10 = vld [vmem:[%s13062_s26] sm:$0xff]  ;;  %v9715_v20 = vor.u32 %v10768_v45, %v9712_v44  ;;  %v10814_v0 = vld [vmem:[%s13062_s26 + $0xb0] sm:$0xff] }
 0x515   : > { %v5635_v24 = vsel %vm11632_vm10, %v5627_v37, %v5634_v55  ;;  %v5637_v4 = vshrl.u32 %v5574_v57, 16  ;;  %v5780_v43 = vld [vmem:[#allocation3 + $0x48] sm:$0xf]  ;;  %v10846_v19 = vld [vmem:[%s13062_s26 + $0xf0] sm:$0xff]  ;;  %v5575_v2 = vld [vmem:[#allocation3 + $0x58] sm:$0xf] }
 0x516   : > { %5779 = vst [vmem:[#allocation3 + $0x3c] sm:$0xf] %v5635_v24  ;;  %v5645_v52 = vshrl.u32 %v5575_v2, 16  ;;  %v5648_v62 = vshll.u32 %v5575_v2, 16  ;;  %v10813_v36 = vld [vmem:[%s13062_s26 + $0xa8] sm:$0xff]  ;;  %v10844_v37 = vld [vmem:[%s13062_s26 + $0xe0] sm:$0xff] }
 0x517   : > { %6492 = vmatpush.bf16.msrb.mxu2 %v10797_v3  ;;  %v5808_v7 = vld [vmem:[#allocation3] sm:$0x1]  ;;  %v5639_v3 = vrot.slane %v5637_v4, 7  ;;  %v10845_v21 = vld [vmem:[%s13062_s26 + $0xe8] sm:$0xff]  ;;  %v5576_v46 = vld [vmem:[#allocation3 + $0x64] sm:$0xf] }
 0x518   : > { %6541 = vmatpush.bf16.msrb.mxu3 %v10805_v58  ;;  %v5809_v6 = vsel %vm11654_vm13, 0, %v5808_v7  ;;  %v5640_v58 = vshll.u32 %v5574_v57, 16  ;;  %v5647_v47 = vrot.slane %v5645_v52, 7  ;;  %v5653_v51 = vshrl.u32 %v5576_v46, 16  ;;  %v10771_v26 = vld [vmem:[#allocation3 + $0x1c] sm:$0xf] }
 0x519   : > { %5810 = vst [vmem:[#allocation3] sm:$0x1] %v5809_v6  ;;  %v5811_v50 = vld [vmem:[#allocation3 + $0x18] sm:$0x1]  ;;  %v5643_v54 = vrot.slane %v5639_v3, 4 }
 0x51a   : > { %v5812_v5 = vsel %vm11654_vm13, 0, %v5811_v50  ;;  %v5642_v34 = vor.u32 %v5640_v58, %v5639_v3  ;;  %v5650_v1 = vor.u32 %v5648_v62, %v5647_v47  ;;  %v10772_v56 = vld [vmem:[#allocation3 + $0x20] sm:$0xf0]  ;;  %v9724_v11 = vld [vmem:[#allocation3 + $0x24] sm:$0xf0] }
 0x51b   : > { %6493 = vmatpush.bf16.msrb.mxu2 %v10796_v31  ;;  %5813 = vst [vmem:[#allocation3 + $0x18] sm:$0x1] %v5812_v5  ;;  %v5814_v9 = vld [vmem:[#allocation3 + $0x30] sm:$0x1]  ;;  %v10769_v31 = vld [vmem:[#allocation3 + $0x8] sm:$0xf0]  ;;  %v9727_v48 = vor.u32 %v10771_v26, %v9724_v11 }
 0x51c   : > { %6542 = vmatpush.bf16.msrb.mxu3 %v10804_v18  ;;  %v5815_v14 = vsel %vm11654_vm13, 0, %v5814_v9  ;;  %v10815_v18 = vld [vmem:[%s13062_s26 + $0xb8] sm:$0xff]  ;;  %v5781_v17 = vsel %vm11609_vm6, %v5642_v34, %v5780_v43  ;;  %v5651_v12 = vsel %vm11632_vm10, %v5643_v54, %v5650_v1  ;;  %v5784_v30 = vld [vmem:[#allocation3 + $0x60] sm:$0xf]  ;;  %v5577_v40 = vld [vmem:[#allocation3 + $0x70] sm:$0xf] }
 0x51d   : > { %5816 = vst [vmem:[#allocation3 + $0x30] sm:$0x1] %v5815_v14  ;;  %v5664_v60 = vshll.u32 %v5577_v40, 16  ;;  %v5578_v24 = vld [vmem:[#allocation3 + $0x7c] sm:$0xf] }
 0x51e   : > { %5782 = vst [vmem:[#allocation3 + $0x48] sm:$0xf] %v5781_v17  ;;  %v5669_v50 = vshrl.u32 %v5578_v24, 16  ;;  %v10775_v4 = vld [vmem:[#allocation3 + $0x38] sm:$0xf0]  ;;  %v5672_v5 = vshll.u32 %v5578_v24, 16 }
 0x51f   : > { %6494 = vmatpush.bf16.msrb.mxu2 %v10795_v53  ;;  %5783 = vst [vmem:[#allocation3 + $0x54] sm:$0xf] %v5651_v12  ;;  %v5655_v53 = vrot.slane %v5653_v51, 7  ;;  %v10774_v3 = vld [vmem:[#allocation3 + $0x34] sm:$0xf]  ;;  %v10811_v34 = vld [vmem:[%s13062_s26 + $0x98] sm:$0xff] }
 0x520   : > { %6543 = vmatpush.bf16.msrb.mxu3 %v10803_v63  ;;  %v9710_v35 = vld [vmem:[#allocation3] sm:$0xf]  ;;  %v5656_v63 = vshll.u32 %v5576_v46, 16  ;;  %v5788_v45 = vld [vmem:[#allocation3 + $0x78] sm:$0xf] }
 0x521   : > { %v9711_v39 = vor.u32 %v10769_v31, %v9710_v35  ;;  %v5659_v7 = vrot.slane %v5655_v53, 4  ;;  %v9736_v58 = vld [vmem:[#allocation3 + $0x3c] sm:$0xf0]  ;;  %v10843_v43 = vld [vmem:[%s13062_s26 + $0xd8] sm:$0xff]  ;;  %v5580_v2 = vld [vmem:[#allocation3 + $0x94] sm:$0xf] }
 0x522   : > { %v9722_v59 = vld [vmem:[#allocation3 + $0x18] sm:$0xf]  ;;  %v5658_v8 = vor.u32 %v5656_v63, %v5655_v53  ;;  %v9739_v14 = vor.u32 %v10774_v3, %v9736_v58  ;;  %v5685_v62 = vshrl.u32 %v5580_v2, 16  ;;  %v10777_v1 = vld [vmem:[#allocation3 + $0x4c] sm:$0xf] }
 0x523   : > { %6495 = vmatpush.bf16.msrb.mxu2 %v10794_v25  ;;  %v9723_v22 = vor.u32 %v10772_v56, %v9722_v59  ;;  %v5661_v25 = vshrl.u32 %v5577_v40, 16  ;;  %v9748_v12 = vld [vmem:[#allocation3 + $0x54] sm:$0xf0]  ;;  %v5792_v46 = vld [vmem:[#allocation3 + $0x90] sm:$0xf]  ;;  %v10809_v3 = vld [vmem:[%s13062_s26 + $0x88] sm:$0xff] }
 0x524   : > { %6544 = vmatpush.bf16.msrb.mxu3 %v10802_v27  ;;  %v5785_v61 = vsel %vm11609_vm6, %v5658_v8, %v5784_v30  ;;  %v10812_v27 = vld [vmem:[%s13062_s26 + $0xa0] sm:$0xff]  ;;  %v9734_v9 = vld [vmem:[#allocation3 + $0x30] sm:$0xf]  ;;  %v5687_v47 = vrot.slane %v5685_v62, 7  ;;  %v9751_v51 = vor.u32 %v10777_v1, %v9748_v12  ;;  %v5582_v40 = vld [vmem:[#allocation3 + $0xac] sm:$0xf] }
 0x525   : > { %v5817_v41 = vld [vmem:[#allocation3 + $0x48] sm:$0x1]  ;;  %5786 = vst [vmem:[#allocation3 + $0x60] sm:$0xf] %v5785_v61  ;;  %v5663_v55 = vrot.slane %v5661_v25, 7  ;;  %v9735_v44 = vor.u32 %v10775_v4, %v9734_v9  ;;  %v10810_v59 = vld [vmem:[%s13062_s26 + $0x90] sm:$0xff] }
 0x526   : > { %v5818_v28 = vsel %vm11654_vm13, 0, %v5817_v41  ;;  %v10778_v54 = vld [vmem:[#allocation3 + $0x50] sm:$0xf0]  ;;  %v5581_v53 = vld [vmem:[#allocation3 + $0xa0] sm:$0xf]  ;;  %v5691_v8 = vrot.slane %v5687_v47, 4 }
 0x527   : > { %6496 = vmatpush.bf16.msrb.mxu2 %v10793_v49  ;;  %5819 = vst [vmem:[#allocation3 + $0x48] sm:$0x1] %v5818_v28  ;;  %v5666_v6 = vor.u32 %v5664_v60, %v5663_v55  ;;  %v5693_v63 = vshrl.u32 %v5581_v53, 16  ;;  %v10842_v56 = vld [vmem:[%s13062_s26 + $0xd0] sm:$0xff]  ;;  %v5696_v11 = vshll.u32 %v5581_v53, 16  ;;  %v10841_v58 = vld [vmem:[%s13062_s26 + $0xc8] sm:$0xff] }
 0x528   : > { %6545 = vmatpush.bf16.msrb.mxu3 %v10801_v32  ;;  %v5796_v24 = vld [vmem:[#allocation3 + $0xa8] sm:$0xf] }
 0x529   : > { %v5667_v49 = vsel %vm11632_vm10, %v5659_v7, %v5666_v6  ;;  %v5695_v30 = vrot.slane %v5693_v63, 7  ;;  %v5704_v7 = vshll.u32 %v5582_v40, 16  ;;  %v10780_v6 = vld [vmem:[#allocation3 + $0x64] sm:$0xf]  ;;  %v9772_v62 = vld [vmem:[#allocation3 + $0x84] sm:$0xf0] }
 0x52a   : > { %5787 = vst [vmem:[#allocation3 + $0x6c] sm:$0xf] %v5667_v49  ;;  %v9760_v49 = vld [vmem:[#allocation3 + $0x6c] sm:$0xf0] }
 0x52b   : > { %6497 = vmatpush.bf16.msrb.mxu2 %v10792_v10  ;;  %v5671_v10 = vrot.slane %v5669_v50, 7  ;;  %v9763_v50 = vor.u32 %v10780_v6, %v9760_v49  ;;  %v6073_v6 = vld [vmem:[#allocation3 + $0x2c] sm:$0xf] }
 0x52c   : > { %6546 = vmatpush.bf16.msrb.mxu3 %v10800_v16  ;;  %v5820_v32 = vld [vmem:[#allocation3 + $0x60] sm:$0x1] }
 0x52d   : > { %v5821_v57 = vsel %vm11654_vm13, 0, %v5820_v32  ;;  %v5674_v16 = vor.u32 %v5672_v5, %v5671_v10  ;;  %v10855_v5 = vld [vmem:[%s13062_s26 + $0x138] sm:$0xff] }
 0x52e   : > { %6498 = vmatmul.bf16.vlgmr.msrb.gmra.mxu2 %v9711_v39  ;;  %5822 = vst [vmem:[#allocation3 + $0x60] sm:$0x1] %v5821_v57  ;;  %7072 = vmatpush.bf16.msrb.mxu0 %v10855_v5 }
 0x52f   : > { %6588 = vmatpush.bf16.msra.mxu2 %v10815_v18  ;;  %6547 = vmatmul.bf16.vlgmr.msrb.gmra.mxu3 %v9715_v20  ;;  %v5789_v31 = vsel %vm11609_vm6, %v5674_v16, %v5788_v45  ;;  %v5579_v18 = vld [vmem:[#allocation3 + $0x88] sm:$0xf]  ;;  %v5675_v20 = vrot.slane %v5671_v10, 4  ;;  %v5583_v10 = vld [vmem:[#allocation3 + $0xb8] sm:$0xf]  ;;  %v10854_v45 = vld [vmem:[%s13062_s26 + $0x130] sm:$0xff] }
 0x530   : > { %7023 = vmatpush.bf16.msra.mxu3 %v10847_v29  ;;  %5790 = vst [vmem:[#allocation3 + $0x78] sm:$0xf] %v5789_v31  ;;  %v5677_v29 = vshrl.u32 %v5579_v18, 16  ;;  %v5680_v35 = vshll.u32 %v5579_v18, 16  ;;  %v5709_v9 = vshrl.u32 %v5583_v10, 16  ;;  %v5712_v16 = vshll.u32 %v5583_v10, 16 }
 0x531   : > { %v10862_v18 = vld [vmem:[%s13062_s26 + $0x170] sm:$0xff] }
 0x532   : > { %v5679_v17 = vrot.slane %v5677_v29, 7  ;;  %v5711_v31 = vrot.slane %v5709_v9, 7  ;;  %7073 = vmatpush.bf16.msrb.mxu0 %v10854_v45 }
 0x533   : > { %6589 = vmatpush.bf16.msra.mxu2 %v10814_v0 }
 0x534   : > { %7024 = vmatpush.bf16.msra.mxu3 %v10846_v19  ;;  %v5682_v39 = vor.u32 %v5680_v35, %v5679_v17  ;;  %v5714_v29 = vor.u32 %v5712_v16, %v5711_v31 }
 0x535   : > { %v9758_v55 = vld [vmem:[#allocation3 + $0x60] sm:$0xf] }
 0x536   : > { %v5683_v0 = vsel %vm11632_vm10, %v5675_v20, %v5682_v39  ;;  %v10853_v20 = vld [vmem:[%s13062_s26 + $0x128] sm:$0xff] }
 0x537   : > { %6590 = vmatpush.bf16.msra.mxu2 %v10813_v36  ;;  %v5823_v19 = vld [vmem:[#allocation3 + $0x78] sm:$0x1]  ;;  %5791 = vst [vmem:[#allocation3 + $0x84] sm:$0xf] %v5683_v0  ;;  %v5688_v36 = vshll.u32 %v5580_v2, 16  ;;  %7074 = vmatpush.bf16.msrb.mxu0 %v10853_v20 }
 0x538   : > { %7025 = vmatpush.bf16.msra.mxu3 %v10845_v21  ;;  %v5824_v52 = vsel %vm11654_vm13, 0, %v5823_v19  ;;  %v9746_v21 = vld [vmem:[#allocation3 + $0x48] sm:$0xf] }
 0x539   : > { %5825 = vst [vmem:[#allocation3 + $0x78] sm:$0x1] %v5824_v52  ;;  %v5690_v41 = vor.u32 %v5688_v36, %v5687_v47  ;;  %v9747_v28 = vor.u32 %v10778_v54, %v9746_v21  ;;  %v10783_v52 = vld [vmem:[#allocation3 + $0x7c] sm:$0xf]  ;;  %v10852_v21 = vld [vmem:[%s13062_s26 + $0x120] sm:$0xff] }
 0x53a   : > { %v9775_v12 = vor.u32 %v10783_v52, %v9772_v62  ;;  %v9952_v52 = vld [vmem:[#allocation3 + $0x24] sm:$0xf0] }
 0x53b   : > { %6591 = vmatpush.bf16.msra.mxu2 %v10812_v27  ;;  %v5793_v26 = vsel %vm11609_vm6, %v5690_v41, %v5792_v46  ;;  %v5701_v27 = vshrl.u32 %v5582_v40, 16  ;;  %v6069_v41 = vld [vmem:[#allocation3 + $0x14] sm:$0xf]  ;;  %v5841_v46 = vld [vmem:[#allocation3 + $0x28] sm:$0xf]  ;;  %7075 = vmatpush.bf16.msrb.mxu0 %v10852_v21  ;;  %v10895_v21 = vld [vmem:[%s13062_s26 + $0x1b8] sm:$0xff] }
 0x53c   : > { %7026 = vmatpush.bf16.msra.mxu3 %v10844_v37  ;;  %5794 = vst [vmem:[#allocation3 + $0x90] sm:$0xf] %v5793_v26  ;;  %v10781_v37 = vld [vmem:[#allocation3 + $0x68] sm:$0xf0]  ;;  %v5887_v53 = vshll.u32 %v5841_v46, 16  ;;  %v5891_v63 = vshrl.u32 %v5841_v46, 16 }
 0x53d   : > { %v5703_v60 = vrot.slane %v5701_v27, 7  ;;  %v9759_v57 = vor.u32 %v10781_v37, %v9758_v55  ;;  %v10850_v27 = vld [vmem:[%s13062_s26 + $0x110] sm:$0xff]  ;;  %v10860_v37 = vld [vmem:[%s13062_s26 + $0x160] sm:$0xff] }
 0x53e   : > { %6503 = vmatmul.bf16.gmra.mxu2 %v9723_v22  ;;  %v5698_v22 = vor.u32 %v5696_v11, %v5695_v30  ;;  %v10784_v36 = vld [vmem:[#allocation3 + $0x80] sm:$0xf0]  ;;  %v10851_v11 = vld [vmem:[%s13062_s26 + $0x118] sm:$0xff]  ;;  %v5889_v30 = vrot.slane %v5887_v53, 5  ;;  %v5842_v53 = vld [vmem:[#allocation3 + $0x34] sm:$0xf] }
 0x53f   : > { %6552 = vmatmul.bf16.gmra.mxu3 %v9727_v48  ;;  %6592 = vmatpush.bf16.msra.mxu2 %v10811_v34  ;;  %v5706_v32 = vor.u32 %v5704_v7, %v5703_v60  ;;  %v5839_v34 = vld [vmem:[#allocation3 + $0x10] sm:$0xf] }
 0x540   : > { %7027 = vmatpush.bf16.msra.mxu3 %v10843_v43  ;;  %v5699_v48 = vsel %vm11632_vm10, %v5691_v8, %v5698_v22  ;;  %v5868_v43 = vshll.u32 %v5839_v34, 16  ;;  %v5872_v35 = vshrl.u32 %v5839_v34, 16  ;;  %v9770_v47 = vld [vmem:[#allocation3 + $0x78] sm:$0xf]  ;;  %v10861_v8 = vld [vmem:[%s13062_s26 + $0x168] sm:$0xff]  ;;  %v5893_v22 = vrot.slane %v5891_v63, 4  ;;  %7076 = vmatpush.bf16.msrb.mxu0 %v10851_v11 }
 0x541   : > { %5795 = vst [vmem:[#allocation3 + $0x9c] sm:$0xf] %v5699_v48  ;;  %v5797_v4 = vsel %vm11609_vm6, %v5706_v32, %v5796_v24  ;;  %v10808_v48 = vld [vmem:[%s13062_s26 + $0x80] sm:$0xff]  ;;  %v5840_v32 = vld [vmem:[#allocation3 + $0x1c] sm:$0xf]  ;;  %v10849_v24 = vld [vmem:[%s13062_s26 + $0x108] sm:$0xff] }
 0x542   : > { %5798 = vst [vmem:[#allocation3 + $0xa8] sm:$0xf] %v5797_v4  ;;  %v5870_v19 = vrot.slane %v5868_v43, 5  ;;  %v5874_v2 = vrot.slane %v5872_v35, 4  ;;  %v5878_v4 = vshrl.u32 %v5840_v32, 16  ;;  %v5881_v10 = vshll.u32 %v5840_v32, 16 }
 0x543   : > { %6593 = vmatpush.bf16.msra.mxu2 %v10810_v59  ;;  %v5826_v61 = vld [vmem:[#allocation3 + $0x90] sm:$0x1]  ;;  %v5843_v35 = vld [vmem:[#allocation3 + $0x40] sm:$0xf] }
 0x544   : > { %7028 = vmatpush.bf16.msra.mxu3 %v10842_v56  ;;  %v5827_v25 = vsel %vm11654_vm13, 0, %v5826_v61  ;;  %v5875_v54 = vor.u32 %v5874_v2, %v5870_v19  ;;  %v10840_v61 = vld [vmem:[%s13062_s26 + $0xc0] sm:$0xff]  ;;  %7077 = vmatpush.bf16.msrb.mxu0 %v10850_v27  ;;  %v5880_v16 = vrot.slane %v5878_v4, 4  ;;  %v5883_v45 = vrot.slane %v5881_v10, 5  ;;  %v9796_v27 = vld [vmem:[#allocation3 + $0xb4] sm:$0xf0] }
 0x545   : > { %5828 = vst [vmem:[#allocation3 + $0x90] sm:$0x1] %v5827_v25  ;;  %v9964_v4 = vld [vmem:[#allocation3 + $0x3c] sm:$0xf0] }
 0x546   : > { %v5876_v1 = vrot.slane %v5875_v54, 4  ;;  %v5884_v34 = vor.u32 %v5883_v45, %v5880_v16  ;;  %v10857_v54 = vld [vmem:[%s13062_s26 + $0x148] sm:$0xff]  ;;  %v10894_v16 = vld [vmem:[%s13062_s26 + $0x1b0] sm:$0xff] }
 0x547   : > { %6594 = vmatpush.bf16.msra.mxu2 %v10809_v3  ;;  %v10902_v45 = vld [vmem:[%s13062_s26 + $0x1f0] sm:$0xff] }
 0x548   : > { %7029 = vmatpush.bf16.msra.mxu3 %v10841_v58  ;;  %v6070_v26 = vsel %vm11826_vm4, %v5876_v1, %v6069_v41  ;;  %v10787_v58 = vld [vmem:[#allocation3 + $0x98] sm:$0xf0]  ;;  %7078 = vmatpush.bf16.msrb.mxu0 %v10849_v24  ;;  %v5885_v43 = vrot.slane %v5884_v34, 4 }
 0x549   : > { %v5829_v39 = vld [vmem:[#allocation3 + $0xa8] sm:$0x1]  ;;  %6071 = vst [vmem:[#allocation3 + $0x14] sm:$0xf] %v6070_v26  ;;  %v10903_v1 = vld [vmem:[%s13062_s26 + $0x1f8] sm:$0xff] }
 0x54a   : > { %v5830_v0 = vsel %vm11654_vm13, 0, %v5829_v39  ;;  %v5906_v39 = vshll.u32 %v5843_v35, 16  ;;  %v5890_v2 = vsel %vm11863_vm0, %v5885_v43, %v5889_v30  ;;  %v10911_v26 = vld [vmem:[%s13062_s26 + $0x238] sm:$0xff] }
 0x54b   : > { %5831 = vst [vmem:[#allocation3 + $0xa8] sm:$0x1] %v5830_v0  ;;  %6595 = vmatpush.bf16.msra.mxu2 %v10808_v48  ;;  %v5910_v0 = vshrl.u32 %v5843_v35, 16 }
 0x54c   : > { %7030 = vmatpush.bf16.msra.mxu3 %v10840_v61  ;;  %v9782_v31 = vld [vmem:[#allocation3 + $0x90] sm:$0xf]  ;;  %6072 = vst [vmem:[#allocation3 + $0x20] sm:$0xf] %v5890_v2 }
 0x54d   : > { %v9783_v20 = vor.u32 %v10787_v58, %v9782_v31  ;;  %v5912_v41 = vrot.slane %v5910_v0, 4  ;;  %v6081_v31 = vld [vmem:[#allocation3 + $0x5c] sm:$0xf] }
 0x54e   : > { %6508 = vmatmul.bf16.gmra.mxu2 %v9735_v44  ;;  %v10863_v44 = vld [vmem:[%s13062_s26 + $0x178] sm:$0xff] }
 0x54f   : > { %6557 = vmatmul.bf16.gmra.mxu3 %v9739_v14  ;;  %v5707_v14 = vrot.slane %v5703_v60, 4  ;;  %7121 = vmatpush.bf16.msra.mxu1 %v10863_v44  ;;  %v5894_v60 = vor.u32 %v5893_v22, %v5889_v30  ;;  %v10786_v44 = vld [vmem:[#allocation3 + $0x94] sm:$0xf] }
 0x550   : > { %7572 = vmatpush.bf16.msrb.mxu2 %v10895_v21  ;;  %7621 = vmatpush.bf16.msrb.mxu3 %v10903_v1  ;;  %v5847_v21 = vld [vmem:[#allocation3 + $0x70] sm:$0xf] }
 0x551   : > { %v5715_v17 = vsel %vm11632_vm10, %v5707_v14, %v5714_v29  ;;  %v5895_v55 = vrot.slane %v5894_v60, 4  ;;  %v9784_v14 = vld [vmem:[#allocation3 + $0x9c] sm:$0xf0]  ;;  %v10858_v29 = vld [vmem:[%s13062_s26 + $0x150] sm:$0xff] }
 0x552   : > { %5799 = vst [vmem:[#allocation3 + $0xb4] sm:$0xf] %v5715_v17  ;;  %v9787_v17 = vor.u32 %v10786_v44, %v9784_v14 }
 0x553   : > { %7122 = vmatpush.bf16.msra.mxu1 %v10862_v18  ;;  %v6074_v5 = vsel %vm11826_vm4, %v5895_v55, %v6073_v6  ;;  %v10848_v18 = vld [vmem:[%s13062_s26 + $0x100] sm:$0xff]  ;;  %v5845_v55 = vld [vmem:[#allocation3 + $0x58] sm:$0xf] }
 0x554   : > { %6075 = vst [vmem:[#allocation3 + $0x2c] sm:$0xf] %v6074_v5  ;;  %7079 = vmatpush.bf16.msrb.mxu0 %v10848_v18  ;;  %v9958_v11 = vld [vmem:[#allocation3 + $0x20] sm:$0xf]  ;;  %v5925_v32 = vshll.u32 %v5845_v55, 16  ;;  %v5929_v24 = vshrl.u32 %v5845_v55, 16  ;;  %7573 = vmatpush.bf16.msrb.mxu2 %v10894_v16 }
 0x555   : > { %7622 = vmatpush.bf16.msrb.mxu3 %v10902_v45  ;;  %v10910_v18 = vld [vmem:[%s13062_s26 + $0x230] sm:$0xff] }
 0x556   : > { %v5931_v58 = vrot.slane %v5929_v24, 4 }
 0x557   : > { %7123 = vmatpush.bf16.msra.mxu1 %v10861_v8 }
 0x558   : > { %7670 = vmatpush.bf16.msra.mxu0 %v10911_v26  ;;  %v9976_v26 = vld [vmem:[#allocation3 + $0x54] sm:$0xf0] }
 0x559   : > { %v10790_v48 = vld [vmem:[#allocation3 + $0xb0] sm:$0xf0] }
 0x55b   : > { %7124 = vmatpush.bf16.msra.mxu1 %v10860_v37 }
 0x55c   : > { %7671 = vmatpush.bf16.msra.mxu0 %v10910_v18 }
 0x55e   : > { %6513 = vmatmul.bf16.gmra.mxu2 %v9747_v28  ;;  %v9771_v28 = vor.u32 %v10784_v36, %v9770_v47  ;;  %v6111_v47 = vld [vmem:[#allocation3 + $0x2c] sm:$0x8]  ;;  %v5908_v36 = vrot.slane %v5906_v39, 5 }
 0x55f   : > { %6562 = vmatmul.bf16.gmra.mxu3 %v9751_v51  ;;  %v5838_v51 = vld [vmem:[#allocation3 + $0x4] sm:$0xf] }
 0x560   : > { %v5859_v59 = vshrl.u32 %v5838_v51, 16  ;;  %v5862_v56 = vshll.u32 %v5838_v51, 16  ;;  %v5913_v46 = vor.u32 %v5912_v41, %v5908_v36  ;;  %v6077_v51 = vld [vmem:[#allocation3 + $0x44] sm:$0xf]  ;;  %v5944_v41 = vshll.u32 %v5847_v21, 16 }
 0x562   : > { %v5861_v40 = vrot.slane %v5859_v59, 4  ;;  %v5864_v25 = vrot.slane %v5862_v56, 5  ;;  %v5914_v63 = vrot.slane %v5913_v46, 4  ;;  %v5897_v59 = vshrl.u32 %v5842_v53, 16 }
 0x563   : > { %v5900_v56 = vshll.u32 %v5842_v53, 16  ;;  %v5948_v46 = vshrl.u32 %v5847_v21, 16 }
 0x564   : > { %v5865_v7 = vor.u32 %v5864_v25, %v5861_v40  ;;  %v6078_v8 = vsel %vm11826_vm4, %v5914_v63, %v6077_v51  ;;  %v5899_v30 = vrot.slane %v5897_v59, 4  ;;  %v9794_v40 = vld [vmem:[#allocation3 + $0xa8] sm:$0xf]  ;;  %v10789_v25 = vld [vmem:[#allocation3 + $0xac] sm:$0xf] }
 0x565   : > { %v5902_v22 = vrot.slane %v5900_v56, 5  ;;  %6079 = vst [vmem:[#allocation3 + $0x44] sm:$0xf] %v6078_v8  ;;  %v9795_v6 = vor.u32 %v10790_v48, %v9794_v40  ;;  %v5946_v56 = vrot.slane %v5944_v41, 5  ;;  %v10893_v8 = vld [vmem:[%s13062_s26 + $0x1a8] sm:$0xff]  ;;  %v10908_v41 = vld [vmem:[%s13062_s26 + $0x220] sm:$0xff] }
 0x566   : > { %v5866_v49 = vrot.slane %v5865_v7, 4  ;;  %7574 = vmatpush.bf16.msrb.mxu2 %v10893_v8 }
 0x567   : > { %v5903_v60 = vor.u32 %v5902_v22, %v5899_v30  ;;  %v10901_v30 = vld [vmem:[%s13062_s26 + $0x1e8] sm:$0xff] }
 0x568   : > { %v5871_v9 = vsel %vm11863_vm0, %v5866_v49, %v5870_v19  ;;  %v10816_v19 = vld [vmem:[#allocation3 + $0x1c] sm:$0xf]  ;;  %v9799_v49 = vor.u32 %v10789_v25, %v9796_v27  ;;  %7623 = vmatpush.bf16.msrb.mxu3 %v10901_v30  ;;  %v6085_v25 = vld [vmem:[#allocation3 + $0x74] sm:$0xf] }
 0x569   : > { %6068 = vst [vmem:[#allocation3 + $0x8] sm:$0xf] %v5871_v9  ;;  %v9955_v62 = vor.u32 %v10816_v19, %v9952_v52  ;;  %v5904_v7 = vrot.slane %v5903_v60, 4  ;;  %v9950_v19 = vld [vmem:[#allocation3 + $0x18] sm:$0xf] }
 0x56a   : > { %v5846_v60 = vld [vmem:[#allocation3 + $0x64] sm:$0xf] }
 0x56b   : > { %7080 = vmatmul.bf16.vlgmr.msrb.gmra.mxu0 %v9955_v62  ;;  %v5935_v55 = vshrl.u32 %v5846_v60, 16 }
 0x56c   : > { %v6114_v10 = vld [vmem:[#allocation3 + $0x44] sm:$0x8] }
 0x56d   : > { %v6115_v9 = vsel %vm11858_vm12, 0, %v6114_v10  ;;  %v5937_v24 = vrot.slane %v5935_v55, 4 }
 0x56e   : > { %6518 = vmatmul.bf16.gmra.mxu2 %v9759_v57  ;;  %v10859_v57 = vld [vmem:[%s13062_s26 + $0x158] sm:$0xff]  ;;  %6116 = vst [vmem:[#allocation3 + $0x44] sm:$0x8] %v6115_v9 }
 0x56f   : > { %6567 = vmatmul.bf16.gmra.mxu3 %v9763_v50  ;;  %v6108_v50 = vld [vmem:[#allocation3 + $0x14] sm:$0x8]  ;;  %7125 = vmatpush.bf16.msra.mxu1 %v10859_v57  ;;  %v10820_v9 = vld [vmem:[#allocation3 + $0x38] sm:$0xf0] }
 0x570   : > { %v6109_v3 = vsel %vm11858_vm12, 0, %v6108_v50  ;;  %v10819_v57 = vld [vmem:[#allocation3 + $0x34] sm:$0xf]  ;;  %v5909_v50 = vsel %vm11863_vm0, %v5904_v7, %v5908_v36  ;;  %v9718_v52 = vld [vmem:[#allocation3 + $0x8] sm:$0xf] }
 0x571   : > { %6110 = vst [vmem:[#allocation3 + $0x14] sm:$0x8] %v6109_v3  ;;  %v9967_v5 = vor.u32 %v10819_v57, %v9964_v4  ;;  %v5927_v3 = vrot.slane %v5925_v32, 5 }
 0x572   : > { %6076 = vst [vmem:[#allocation3 + $0x38] sm:$0xf] %v5909_v50  ;;  %v9730_v50 = vld [vmem:[#allocation3 + $0x20] sm:$0xf] }
 0x573   : > { %7126 = vmatpush.bf16.msra.mxu1 %v10858_v29  ;;  %v5932_v44 = vor.u32 %v5931_v58, %v5927_v3  ;;  %v5844_v29 = vld [vmem:[#allocation3 + $0x4c] sm:$0xf] }
 0x574   : > { %v5916_v43 = vshrl.u32 %v5844_v29, 16  ;;  %v5919_v35 = vshll.u32 %v5844_v29, 16 }
 0x575   : > { %v5933_v14 = vrot.slane %v5932_v44, 4  ;;  %v10776_v8 = vld [vmem:[#allocation3 + $0x40] sm:$0xf0] }
 0x576   : > { %v5918_v39 = vrot.slane %v5916_v43, 4  ;;  %v5921_v0 = vrot.slane %v5919_v35, 5  ;;  %v10825_v43 = vld [vmem:[#allocation3 + $0x64] sm:$0xf] }
 0x577   : > { %7127 = vmatpush.bf16.msra.mxu1 %v10857_v54  ;;  %v10817_v54 = vld [vmem:[#allocation3 + $0x20] sm:$0xf0] }
 0x578   : > { %v10770_v62 = vld [vmem:[#allocation3 + $0x10] sm:$0xf0] }
 0x579   : > { %v9970_v34 = vld [vmem:[#allocation3 + $0x38] sm:$0xf]  ;;  %v9719_v1 = vor.u32 %v10770_v62, %v9718_v52  ;;  %v10892_v52 = vld [vmem:[%s13062_s26 + $0x1a0] sm:$0xff] }
 0x57a   : > { %v10900_v62 = vld [vmem:[%s13062_s26 + $0x1e0] sm:$0xff]  ;;  %7575 = vmatpush.bf16.msrb.mxu2 %v10892_v52 }
 0x57b   : > { %7085 = vmatmul.bf16.gmra.mxu0 %v9967_v5  ;;  %v9962_v5 = vld [vmem:[#allocation3 + $0x30] sm:$0xf]  ;;  %7624 = vmatpush.bf16.msrb.mxu3 %v10900_v62 }
 0x57c   : > { %v9963_v18 = vor.u32 %v10820_v9, %v9962_v5 }
 0x57e   : > { %6523 = vmatmul.bf16.gmra.mxu2 %v9771_v28  ;;  %v10856_v28 = vld [vmem:[%s13062_s26 + $0x140] sm:$0xff] }
 0x57f   : > { %6572 = vmatmul.bf16.gmra.mxu3 %v9775_v12  ;;  %v6112_v12 = vsel %vm11858_vm12, 0, %v6111_v47  ;;  %7128 = vmatpush.bf16.msra.mxu1 %v10856_v28  ;;  %v5922_v47 = vor.u32 %v5921_v0, %v5918_v39  ;;  %v10822_v28 = vld [vmem:[#allocation3 + $0x4c] sm:$0xf] }
 0x580   : > { %6113 = vst [vmem:[#allocation3 + $0x2c] sm:$0x8] %v6112_v12  ;;  %v9951_v12 = vor.u32 %v10817_v54, %v9950_v19  ;;  %v9979_v63 = vor.u32 %v10822_v28, %v9976_v26 }
 0x581   : > { %v5923_v36 = vrot.slane %v5922_v47, 4 }
 0x583   : > { %v5928_v51 = vsel %vm11863_vm0, %v5923_v36, %v5927_v3 }
 0x584   : > { %6080 = vst [vmem:[#allocation3 + $0x50] sm:$0xf] %v5928_v51 }
 0x587   : > { %v10818_v61 = vld [vmem:[#allocation3 + $0x28] sm:$0xf0] }
 0x588   : > { %v9959_v37 = vor.u32 %v10818_v61, %v9958_v11  ;;  %v5950_v11 = vrot.slane %v5948_v46, 4  ;;  %v10773_v4 = vld [vmem:[#allocation3 + $0x28] sm:$0xf0]  ;;  %v5848_v46 = vld [vmem:[#allocation3 + $0x7c] sm:$0xf] }
 0x589   : > { %v9731_v45 = vor.u32 %v10773_v4, %v9730_v50  ;;  %v5954_v51 = vshrl.u32 %v5848_v46, 16  ;;  %v5957_v26 = vshll.u32 %v5848_v46, 16  ;;  %v10000_v50 = vld [vmem:[#allocation3 + $0x84] sm:$0xf0] }
 0x58a   : > { %7129 = vmatmul.bf16.vlgmr.msra.gmra.mxu1 %v9959_v37  ;;  %v5951_v22 = vor.u32 %v5950_v11, %v5946_v56  ;;  %v10909_v37 = vld [vmem:[%s13062_s26 + $0x228] sm:$0xff]  ;;  %v9742_v11 = vld [vmem:[#allocation3 + $0x38] sm:$0xf] }
 0x58b   : > { %7090 = vmatmul.bf16.gmra.mxu0 %v9979_v63  ;;  %v9982_v7 = vld [vmem:[#allocation3 + $0x50] sm:$0xf] }
 0x58c   : > { %v5952_v40 = vrot.slane %v5951_v22, 4  ;;  %7672 = vmatpush.bf16.msra.mxu0 %v10909_v37  ;;  %v9974_v22 = vld [vmem:[#allocation3 + $0x48] sm:$0xf]  ;;  %v9743_v37 = vor.u32 %v10776_v8, %v9742_v11  ;;  %v9754_v62 = vld [vmem:[#allocation3 + $0x50] sm:$0xf] }
 0x58d   : > { %v10831_v11 = vld [vmem:[#allocation3 + $0x94] sm:$0xf] }
 0x58e   : > { %6528 = vmatmul.bf16.gmra.mxu2 %v9783_v20  ;;  %v6082_v20 = vsel %vm11826_vm4, %v5933_v14, %v6081_v31  ;;  %v5849_v14 = vld [vmem:[#allocation3 + $0x88] sm:$0xf] }
 0x58f   : > { %6577 = vmatmul.bf16.gmra.mxu3 %v9787_v17  ;;  %6083 = vst [vmem:[#allocation3 + $0x5c] sm:$0xf] %v6082_v20  ;;  %v10821_v17 = vld [vmem:[#allocation3 + $0x40] sm:$0xf0]  ;;  %v5963_v29 = vshll.u32 %v5849_v14, 16 }
 0x590   : > { %v9971_v2 = vor.u32 %v10821_v17, %v9970_v34  ;;  %v5967_v34 = vshrl.u32 %v5849_v14, 16  ;;  %v9988_v20 = vld [vmem:[#allocation3 + $0x6c] sm:$0xf0]  ;;  %7673 = vmatpush.bf16.msra.mxu0 %v10908_v41 }
 0x591   : > { %v9991_v39 = vor.u32 %v10825_v43, %v9988_v20  ;;  %v5965_v19 = vrot.slane %v5963_v29, 5  ;;  %v6093_v29 = vld [vmem:[#allocation3 + $0xa4] sm:$0xf]  ;;  %v10907_v43 = vld [vmem:[%s13062_s26 + $0x218] sm:$0xff] }
 0x594   : > { %7674 = vmatpush.bf16.msra.mxu0 %v10907_v43  ;;  %v9998_v43 = vld [vmem:[#allocation3 + $0x78] sm:$0xf] }
 0x596   : > { %v6117_v53 = vld [vmem:[#allocation3 + $0x5c] sm:$0x8] }
 0x597   : > { %v6118_v59 = vsel %vm11858_vm12, 0, %v6117_v53 }
 0x598   : > { %6119 = vst [vmem:[#allocation3 + $0x5c] sm:$0x8] %v6118_v59  ;;  %v5956_v59 = vrot.slane %v5954_v51, 4 }
 0x59a   : > { %7134 = vmatmul.bf16.gmra.mxu1 %v9971_v2  ;;  %v5969_v2 = vrot.slane %v5967_v34, 4 }
 0x59b   : > { %7095 = vmatmul.bf16.gmra.mxu0 %v9991_v39 }
 0x59c   : > { %v5970_v54 = vor.u32 %v5969_v2, %v5965_v19 }
 0x59e   : > { %6533 = vmatmul.bf16.gmra.mxu2 %v9795_v6  ;;  %v5938_v6 = vshll.u32 %v5846_v60, 16  ;;  %v5971_v21 = vrot.slane %v5970_v54, 4 }
 0x59f   : > { %6582 = vmatmul.bf16.gmra.mxu3 %v9799_v49  ;;  %v6086_v49 = vsel %vm11826_vm4, %v5952_v40, %v6085_v25  ;;  %v10824_v32 = vld [vmem:[#allocation3 + $0x58] sm:$0xf0] }
 0x5a0   : > { %6087 = vst [vmem:[#allocation3 + $0x74] sm:$0xf] %v6086_v49  ;;  %v5940_v57 = vrot.slane %v5938_v6, 5  ;;  %v9983_v10 = vor.u32 %v10824_v32, %v9982_v7  ;;  %v5851_v7 = vld [vmem:[#allocation3 + $0xa0] sm:$0xf] }
 0x5a1   : > { %v5982_v49 = vshll.u32 %v5851_v7, 16  ;;  %v5986_v32 = vshrl.u32 %v5851_v7, 16  ;;  %v10779_v54 = vld [vmem:[#allocation3 + $0x58] sm:$0xf0] }
 0x5a2   : > { %v5941_v3 = vor.u32 %v5940_v57, %v5937_v24  ;;  %v10828_v24 = vld [vmem:[#allocation3 + $0x7c] sm:$0xf] }
 0x5a3   : > { %v5984_v9 = vrot.slane %v5982_v49, 5 }
 0x5a4   : > { %v5942_v44 = vrot.slane %v5941_v3, 4  ;;  %v5988_v3 = vrot.slane %v5986_v32, 4 }
 0x5a6   : > { %v5947_v35 = vsel %vm11863_vm0, %v5942_v44, %v5946_v56  ;;  %v5959_v56 = vrot.slane %v5957_v26, 5  ;;  %v5853_v26 = vld [vmem:[#allocation3 + $0xb8] sm:$0xf] }
 0x5a7   : > { %6084 = vst [vmem:[#allocation3 + $0x68] sm:$0xf] %v5947_v35  ;;  %v6120_v17 = vld [vmem:[#allocation3 + $0x74] sm:$0x8] }
 0x5a8   : > { %v6121_v0 = vsel %vm11858_vm12, 0, %v6120_v17  ;;  %v5850_v35 = vld [vmem:[#allocation3 + $0x94] sm:$0xf] }
 0x5a9   : > { %6122 = vst [vmem:[#allocation3 + $0x74] sm:$0x8] %v6121_v0  ;;  %v5973_v17 = vshrl.u32 %v5850_v35, 16  ;;  %v5976_v39 = vshll.u32 %v5850_v35, 16  ;;  %v10829_v35 = vld [vmem:[#allocation3 + $0x80] sm:$0xf0] }
 0x5aa   : > { %7139 = vmatmul.bf16.gmra.mxu1 %v9983_v10  ;;  %v10003_v10 = vor.u32 %v10828_v24, %v10000_v50  ;;  %v6097_v24 = vld [vmem:[#allocation3 + $0xbc] sm:$0xf]  ;;  %v10906_v50 = vld [vmem:[%s13062_s26 + $0x210] sm:$0xff] }
 0x5ab   : > { %v5975_v2 = vrot.slane %v5973_v17, 4  ;;  %v5978_v52 = vrot.slane %v5976_v39, 5  ;;  %7675 = vmatpush.bf16.msra.mxu0 %v10906_v50  ;;  %v10905_v50 = vld [vmem:[%s13062_s26 + $0x208] sm:$0xff] }
 0x5ac   : > { %7100 = vmatmul.bf16.gmra.mxu0 %v10003_v10 }
 0x5ae   : > { %6596 = vmatmul.bf16.vlgmr.msra.gmra.mxu2 %v9719_v1  ;;  %v6089_v1 = vld [vmem:[#allocation3 + $0x8c] sm:$0xf]  ;;  %v9994_v28 = vld [vmem:[#allocation3 + $0x68] sm:$0xf] }
 0x5af   : > { %7031 = vmatmul.bf16.vlgmr.msra.gmra.mxu3 %v9951_v12  ;;  %v6090_v53 = vsel %vm11826_vm4, %v5971_v21, %v6089_v1  ;;  %v10826_v21 = vld [vmem:[#allocation3 + $0x68] sm:$0xf0]  ;;  %v5979_v1 = vor.u32 %v5978_v52, %v5975_v2  ;;  %7676 = vmatpush.bf16.msra.mxu0 %v10905_v50 }
 0x5b0   : > { %6091 = vst [vmem:[#allocation3 + $0x8c] sm:$0xf] %v6090_v53  ;;  %v10827_v63 = vld [vmem:[#allocation3 + $0x70] sm:$0xf0] }
 0x5b1   : > { %v6499_v48 = vpop.f32.mrf.mxu2  ;;  %v9995_v30 = vor.u32 %v10827_v63, %v9994_v28  ;;  %v9755_v28 = vor.u32 %v10779_v54, %v9754_v62  ;;  %v5980_v51 = vrot.slane %v5979_v1, 4  ;;  %v9999_v54 = vor.u32 %v10829_v35, %v9998_v43 }
 0x5b2   : > { %v6548_v61 = vpop.f32.mrf.mxu3 }
 0x5b3   : > { %v12741_v27 = vadd.f32 %v6548_v61, %v6499_v48  ;;  %v10823_v48 = vld [vmem:[#allocation3 + $0x50] sm:$0xf0]  ;;  %v5960_v61 = vor.u32 %v5959_v56, %v5956_v59  ;;  %v6001_v59 = vshll.u32 %v5853_v26, 16  ;;  %v6005_v56 = vshrl.u32 %v5853_v26, 16 }
 0x5b4   : > { %v9975_v6 = vor.u32 %v10823_v48, %v9974_v22  ;;  %v5985_v8 = vsel %vm11863_vm0, %v5980_v51, %v5984_v9  ;;  %v10834_v51 = vld [vmem:[#allocation3 + $0xac] sm:$0xf] }
 0x5b5   : > { %v5961_v60 = vrot.slane %v5960_v61, 4  ;;  %6092 = vst [vmem:[#allocation3 + $0x98] sm:$0xf] %v5985_v8  ;;  %v5585_v8 = vld [vmem:[#allocation3 + $0xd0] sm:$0xf] }
 0x5b7   : > { %v5966_v57 = vsel %vm11863_vm0, %v5961_v60, %v5965_v19  ;;  %v6123_v4 = vld [vmem:[#allocation3 + $0x8c] sm:$0x8]  ;;  %v10898_v60 = vld [vmem:[%s13062_s26 + $0x1d0] sm:$0xff] }
 0x5b8   : > { %6088 = vst [vmem:[#allocation3 + $0x80] sm:$0xf] %v5966_v57  ;;  %v6124_v5 = vsel %vm11858_vm12, 0, %v6123_v4  ;;  %v5852_v4 = vld [vmem:[#allocation3 + $0xac] sm:$0xf] }
 0x5b9   : > { %v6501_v58 = vpop.f32.mrf.mxu2  ;;  %6125 = vst [vmem:[#allocation3 + $0x8c] sm:$0x8] %v6124_v5  ;;  %v5992_v5 = vshrl.u32 %v5852_v4, 16 }
 0x5ba   : > { %v6550_v16 = vpop.f32.mrf.mxu3  ;;  %7144 = vmatmul.bf16.gmra.mxu1 %v9995_v30  ;;  %v10012_v30 = vld [vmem:[#allocation3 + $0x9c] sm:$0xf0] }
 0x5bb   : > { %v12748_v31 = vadd.f32 %v6550_v16, %v6501_v58  ;;  %v10891_v58 = vld [vmem:[%s13062_s26 + $0x198] sm:$0xff]  ;;  %v10015_v48 = vor.u32 %v10831_v11, %v10012_v30 }
 0x5bc   : > { %v10899_v16 = vld [vmem:[%s13062_s26 + $0x1d8] sm:$0xff]  ;;  %7576 = vmatpush.bf16.msrb.mxu2 %v10891_v58  ;;  %v5584_v58 = vld [vmem:[#allocation3 + $0xc4] sm:$0xf] }
 0x5bd   : > { %7625 = vmatpush.bf16.msrb.mxu3 %v10899_v16  ;;  %7105 = vmatmul.bf16.gmra.mxu0 %v10015_v48  ;;  %v10018_v10 = vld [vmem:[#allocation3 + $0x98] sm:$0xf]  ;;  %v9766_v16 = vld [vmem:[#allocation3 + $0x68] sm:$0xf]  ;;  %v5720_v39 = vshll.u32 %v5584_v58, 16 }
 0x5be   : > { %6601 = vmatmul.bf16.gmra.mxu2 %v9731_v45  ;;  %v5989_v45 = vor.u32 %v5988_v3, %v5984_v9  ;;  %v5995_v9 = vshll.u32 %v5852_v4, 16  ;;  %v10897_v48 = vld [vmem:[%s13062_s26 + $0x1c8] sm:$0xff] }
 0x5bf   : > { %7036 = vmatmul.bf16.gmra.mxu3 %v9963_v18  ;;  %v10006_v20 = vld [vmem:[#allocation3 + $0x80] sm:$0xf] }
 0x5c0   : > { %v5990_v18 = vrot.slane %v5989_v45, 4  ;;  %v10830_v19 = vld [vmem:[#allocation3 + $0x88] sm:$0xf0]  ;;  %v5717_v45 = vshrl.u32 %v5584_v58, 16 }
 0x5c1   : > { %v6504_v47 = vpop.f32.mrf.mxu2  ;;  %7626 = vmatpush.bf16.msrb.mxu3 %v10898_v60  ;;  %v10785_v35 = vld [vmem:[#allocation3 + $0x88] sm:$0xf0] }
 0x5c2   : > { %v6553_v36 = vpop.f32.mrf.mxu3  ;;  %v6094_v0 = vsel %vm11826_vm4, %v5990_v18, %v6093_v29  ;;  %v5994_v18 = vrot.slane %v5992_v5, 4  ;;  %v5997_v29 = vrot.slane %v5995_v9, 5  ;;  %v5719_v17 = vrot.slane %v5717_v45, 7 }
 0x5c3   : > { %v12760_v12 = vadd.f32 %v6553_v36, %v6504_v47  ;;  %6095 = vst [vmem:[#allocation3 + $0xa4] sm:$0xf] %v6094_v0  ;;  %v10007_v47 = vor.u32 %v10830_v19, %v10006_v20  ;;  %v9986_v36 = vld [vmem:[#allocation3 + $0x60] sm:$0xf] }
 0x5c4   : > { %v9987_v63 = vor.u32 %v10826_v21, %v9986_v36  ;;  %v5998_v0 = vor.u32 %v5997_v29, %v5994_v18  ;;  %v5722_v19 = vor.u32 %v5720_v39, %v5719_v17  ;;  %v5800_v36 = vld [vmem:[#allocation3 + $0xc0] sm:$0xf]  ;;  %v5855_v21 = vld [vmem:[#allocation3 + $0xd0] sm:$0xf] }
 0x5c5   : > { %7627 = vmatpush.bf16.msrb.mxu3 %v10897_v48  ;;  %v10010_v39 = vld [vmem:[#allocation3 + $0x90] sm:$0xf]  ;;  %v9790_v48 = vld [vmem:[#allocation3 + $0x98] sm:$0xf] }
 0x5c9   : > { %v6506_v40 = vpop.f32.mrf.mxu2 }
 0x5ca   : > { %v6555_v25 = vpop.f32.mrf.mxu3  ;;  %7149 = vmatmul.bf16.gmra.mxu1 %v10007_v47  ;;  %v6126_v22 = vld [vmem:[#allocation3 + $0xa4] sm:$0x8]  ;;  %v5999_v47 = vrot.slane %v5998_v0, 4  ;;  %v10832_v0 = vld [vmem:[#allocation3 + $0x98] sm:$0xf0] }
 0x5cb   : > { %v12767_v55 = vadd.f32 %v6555_v25, %v6506_v40  ;;  %v6127_v61 = vsel %vm11858_vm12, 0, %v6126_v22  ;;  %v6003_v40 = vrot.slane %v6001_v59, 5  ;;  %v6007_v25 = vrot.slane %v6005_v56, 4  ;;  %v10889_v22 = vld [vmem:[%s13062_s26 + $0x188] sm:$0xff] }
 0x5cc   : > { %6128 = vst [vmem:[#allocation3 + $0xa4] sm:$0x8] %v6127_v61  ;;  %v5725_v61 = vshrl.u32 %v5585_v8, 16 }
 0x5cd   : > { %v6008_v7 = vor.u32 %v6007_v25, %v6003_v40  ;;  %v6004_v26 = vsel %vm11863_vm0, %v5999_v47, %v6003_v40  ;;  %v5728_v25 = vshll.u32 %v5585_v8, 16  ;;  %v10011_v47 = vor.u32 %v10832_v0, %v10010_v39 }
 0x5ce   : > { %6606 = vmatmul.bf16.gmra.mxu2 %v9743_v37  ;;  %v10890_v37 = vld [vmem:[%s13062_s26 + $0x190] sm:$0xff]  ;;  %6096 = vst [vmem:[#allocation3 + $0xb0] sm:$0xf] %v6004_v26  ;;  %v10896_v26 = vld [vmem:[%s13062_s26 + $0x1c0] sm:$0xff] }
 0x5cf   : > { %7041 = vmatmul.bf16.gmra.mxu3 %v9975_v6  ;;  %7577 = vmatpush.bf16.msrb.mxu2 %v10890_v37  ;;  %v6009_v32 = vrot.slane %v6008_v7, 4  ;;  %v5727_v37 = vrot.slane %v5725_v61, 7 }
 0x5d0   : > { %7628 = vmatpush.bf16.msrb.mxu3 %v10896_v26  ;;  %v10865_v26 = vld [vmem:[#allocation3 + $0x38] sm:$0xf0] }
 0x5d1   : > { %v6509_v44 = vpop.f32.mrf.mxu2  ;;  %v6098_v3 = vsel %vm11826_vm4, %v6009_v32, %v6097_v24  ;;  %v6101_v32 = vld [vmem:[#allocation3 + $0xd4] sm:$0xf]  ;;  %v5730_v4 = vor.u32 %v5728_v25, %v5727_v37 }
 0x5d2   : > { %v6558_v14 = vpop.f32.mrf.mxu3  ;;  %6099 = vst [vmem:[#allocation3 + $0xbc] sm:$0xf] %v6098_v3  ;;  %v10835_v25 = vld [vmem:[#allocation3 + $0xb0] sm:$0xf0] }
 0x5d3   : > { %v12779_v34 = vadd.f32 %v6558_v14, %v6509_v44  ;;  %v10782_v44 = vld [vmem:[#allocation3 + $0x70] sm:$0xf0]  ;;  %v10833_v14 = vld [vmem:[#allocation3 + $0xa0] sm:$0xf0]  ;;  %7578 = vmatpush.bf16.msrb.mxu2 %v10889_v22 }
 0x5d4   : > { %v10019_v20 = vor.u32 %v10833_v14, %v10018_v10  ;;  %v9767_v62 = vor.u32 %v10782_v44, %v9766_v16  ;;  %v5854_v10 = vld [vmem:[#allocation3 + $0xc4] sm:$0xf]  ;;  %v9778_v14 = vld [vmem:[#allocation3 + $0x80] sm:$0xf] }
 0x5d5   : > { %v10030_v9 = vld [vmem:[#allocation3 + $0xb0] sm:$0xf]  ;;  %v6011_v3 = vshrl.u32 %v5854_v10, 16  ;;  %v6014_v58 = vshll.u32 %v5854_v10, 16  ;;  %v10788_v61 = vld [vmem:[#allocation3 + $0xa0] sm:$0xf0] }
 0x5d7   : > { %v6013_v43 = vrot.slane %v6011_v3, 4 }
 0x5d9   : > { %v6511_v41 = vpop.f32.mrf.mxu2  ;;  %v6129_v59 = vld [vmem:[#allocation3 + $0xbc] sm:$0x8] }
 0x5da   : > { %v6560_v46 = vpop.f32.mrf.mxu3  ;;  %7154 = vmatmul.bf16.gmra.mxu1 %v10019_v20  ;;  %v6130_v11 = vsel %vm11858_vm12, 0, %v6129_v59 }
 0x5db   : > { %v12786_v53 = vadd.f32 %v6560_v46, %v6511_v41  ;;  %v5801_v41 = vsel %vm11609_vm6, %v5722_v19, %v5800_v36  ;;  %v6020_v46 = vshll.u32 %v5855_v21, 16  ;;  %6131 = vst [vmem:[#allocation3 + $0xbc] sm:$0x8] %v6130_v11 }
 0x5dc   : > { %5802 = vst [vmem:[#allocation3 + $0xc0] sm:$0xf] %v5801_v41  ;;  %v10036_v41 = vld [vmem:[#allocation3 + $0xcc] sm:$0xf0] }
 0x5dd   : > { %v6022_v30 = vrot.slane %v6020_v46, 5 }
 0x5de   : > { %6611 = vmatmul.bf16.gmra.mxu2 %v9755_v28  ;;  %v6024_v28 = vshrl.u32 %v5855_v21, 16  ;;  %v10837_v21 = vld [vmem:[#allocation3 + $0xc4] sm:$0xf] }
 0x5df   : > { %7046 = vmatmul.bf16.gmra.mxu3 %v9987_v63  ;;  %v10024_v63 = vld [vmem:[#allocation3 + $0xb4] sm:$0xf0]  ;;  %v10039_v46 = vor.u32 %v10837_v21, %v10036_v41 }
 0x5e0   : > { %v10027_v56 = vor.u32 %v10834_v51, %v10024_v63  ;;  %v6026_v40 = vrot.slane %v6024_v28, 4  ;;  %v10888_v51 = vld [vmem:[%s13062_s26 + $0x180] sm:$0xff] }
 0x5e1   : > { %v6514_v6 = vpop.f32.mrf.mxu2  ;;  %7579 = vmatpush.bf16.msrb.mxu2 %v10888_v51 }
 0x5e2   : > { %v6563_v49 = vpop.f32.mrf.mxu3  ;;  %7110 = vmatmul.bf16.gmra.mxu0 %v10027_v56  ;;  %v6027_v60 = vor.u32 %v6026_v40, %v6022_v30  ;;  %v10836_v18 = vld [vmem:[#allocation3 + $0xb8] sm:$0xf0]  ;;  %v10022_v40 = vld [vmem:[#allocation3 + $0xa8] sm:$0xf] }
 0x5e3   : > { %v12798_v57 = vadd.f32 %v6563_v49, %v6514_v6  ;;  %v5723_v49 = vrot.slane %v5719_v17, 4  ;;  %v5832_v45 = vld [vmem:[#allocation3 + $0xc0] sm:$0x1]  ;;  %v10031_v20 = vor.u32 %v10836_v18, %v10030_v9  ;;  %v6016_v17 = vrot.slane %v6014_v58, 5  ;;  %v10791_v18 = vld [vmem:[#allocation3 + $0xb8] sm:$0xf0] }
 0x5e4   : > { %v6028_v5 = vrot.slane %v6027_v60, 4  ;;  %v5833_v29 = vsel %vm11654_vm13, 0, %v5832_v45  ;;  %v10023_v50 = vor.u32 %v10835_v25, %v10022_v40  ;;  %v10222_v40 = vld [vmem:[#allocation3 + $0x68] sm:$0xf]  ;;  %v10872_v25 = vld [vmem:[#allocation3 + $0x70] sm:$0xf0] }
 0x5e5   : > { %v5731_v16 = vsel %vm11632_vm10, %v5723_v49, %v5730_v4  ;;  %5834 = vst [vmem:[#allocation3 + $0xc0] sm:$0x1] %v5833_v29  ;;  %v6017_v19 = vor.u32 %v6016_v17, %v6013_v43  ;;  %v10198_v4 = vld [vmem:[#allocation3 + $0x38] sm:$0xf] }
 0x5e6   : > { %v6102_v44 = vsel %vm11826_vm4, %v6028_v5, %v6101_v32  ;;  %5803 = vst [vmem:[#allocation3 + $0xcc] sm:$0xf] %v5731_v16  ;;  %v9791_v32 = vor.u32 %v10788_v61, %v9790_v48  ;;  %v10866_v5 = vld [vmem:[#allocation3 + $0x40] sm:$0xf0] }
 0x5e7   : > { %6103 = vst [vmem:[#allocation3 + $0xd4] sm:$0xf] %v6102_v44  ;;  %v6018_v36 = vrot.slane %v6017_v19, 4  ;;  %v10199_v9 = vor.u32 %v10866_v5, %v10198_v4  ;;  %v9802_v44 = vld [vmem:[#allocation3 + $0xb0] sm:$0xf] }
 0x5e8   : > { %v7081_v10 = vpop.f32.mrf.mxu0  ;;  %v9803_v39 = vor.u32 %v10791_v18, %v9802_v44  ;;  %v10867_v44 = vld [vmem:[#allocation3 + $0x4c] sm:$0xf]  ;;  %v10204_v18 = vld [vmem:[#allocation3 + $0x54] sm:$0xf0] }
 0x5e9   : > { %v6516_v2 = vpop.f32.mrf.mxu2  ;;  %v6023_v28 = vsel %vm11863_vm0, %v6018_v36, %v6022_v30  ;;  %v10904_v30 = vld [vmem:[%s13062_s26 + $0x200] sm:$0xff] }
 0x5ea   : > { %v6565_v52 = vpop.f32.mrf.mxu3  ;;  %7159 = vmatmul.bf16.gmra.mxu1 %v10031_v20  ;;  %6100 = vst [vmem:[#allocation3 + $0xc8] sm:$0xf] %v6023_v28  ;;  %7677 = vmatpush.bf16.msra.mxu0 %v10904_v30  ;;  %v10190_v28 = vld [vmem:[#allocation3 + $0x30] sm:$0xf] }
 0x5eb   : > { %v12805_v1 = vadd.f32 %v6565_v52, %v6516_v2 }
 0x5ec   : > { %v10034_v29 = vld [vmem:[#allocation3 + $0xc0] sm:$0xf] }
 0x5ed   : > { %v10838_v43 = vld [vmem:[#allocation3 + $0xc8] sm:$0xf0] }
 0x5ee   : > { %6616 = vmatmul.bf16.gmra.mxu2 %v9767_v62  ;;  %v6132_v63 = vld [vmem:[#allocation3 + $0xd4] sm:$0x8]  ;;  %v10035_v0 = vor.u32 %v10838_v43, %v10034_v29 }
 0x5ef   : > { %7051 = vmatmul.bf16.gmra.mxu3 %v9999_v54  ;;  %v9779_v54 = vor.u32 %v10785_v35, %v9778_v14  ;;  %v6133_v59 = vsel %vm11858_vm12, 0, %v6132_v63  ;;  %v10864_v63 = vld [vmem:[#allocation3 + $0x34] sm:$0xf] }
 0x5f0   : > { %6134 = vst [vmem:[#allocation3 + $0xd4] sm:$0x8] %v6133_v59  ;;  %v7083_v45 = vpop.f32.mrf.mxu0  ;;  %v10192_v59 = vld [vmem:[#allocation3 + $0x3c] sm:$0xf0] }
 0x5f1   : > { %v6519_v7 = vpop.f32.mrf.mxu2  ;;  %v10042_v22 = vld [vmem:[#allocation3 + $0xc8] sm:$0xf]  ;;  %v10195_v48 = vor.u32 %v10864_v63, %v10192_v59 }
 0x5f2   : > { %v6568_v6 = vpop.f32.mrf.mxu3  ;;  %7115 = vmatmul.bf16.gmra.mxu0 %v10039_v46 }
 0x5f3   : > { %v12819_v24 = vadd.f32 %v6568_v6, %v6519_v7 }
 0x5f7   : > { %v10839_v37 = vld [vmem:[#allocation3 + $0xd0] sm:$0xf0] }
 0x5f8   : > { %v10043_v60 = vor.u32 %v10839_v37, %v10042_v22  ;;  %v7086_v19 = vpop.f32.mrf.mxu0  ;;  %v10191_v22 = vor.u32 %v10865_v26, %v10190_v28  ;;  %v10223_v37 = vor.u32 %v10872_v25, %v10222_v40 }
 0x5f9   : > { %v6521_v2 = vpop.f32.mrf.mxu2 }
 0x5fa   : > { %v6570_v52 = vpop.f32.mrf.mxu3  ;;  %7164 = vmatmul.bf16.gmra.mxu1 %v10043_v60 }
 0x5fb   : > { %v12830_v62 = vadd.f32 %v6570_v52, %v6521_v2  ;;  %v10210_v2 = vld [vmem:[#allocation3 + $0x50] sm:$0xf]  ;;  %v10869_v52 = vld [vmem:[#allocation3 + $0x58] sm:$0xf0] }
 0x5fe   : > { %6621 = vmatmul.bf16.gmra.mxu2 %v9779_v54  ;;  %v10211_v54 = vor.u32 %v10869_v52, %v10210_v2 }
 0x5ff   : > { %7056 = vmatmul.bf16.gmra.mxu3 %v10011_v47 }
 0x600   : > { %v7088_v46 = vpop.f32.mrf.mxu0 }
 0x601   : > { %v6524_v56 = vpop.f32.mrf.mxu2 }
 0x602   : > { %v6573_v11 = vpop.f32.mrf.mxu3  ;;  %7678 = vmatmul.bf16.vlgmr.msra.gmra.mxu0 %v10199_v9 }
 0x603   : > { %v12842_v8 = vadd.f32 %v6573_v11, %v6524_v56 }
 0x607   : > { %v7130_v14 = vpop.f32.mrf.mxu1 }
 0x608   : > { %v12857_v61 = vpop.f32.mrf.mxu0 }
 0x609   : > { %v6526_v7 = vpop.f32.mrf.mxu2 }
 0x60a   : > { %v6575_v6 = vpop.f32.mrf.mxu3 }
 0x60b   : > { %v12847_v49 = vadd.f32 %v6575_v6, %v6526_v7 }
 0x60e   : > { %6626 = vmatmul.bf16.gmra.mxu2 %v9791_v32 }
 0x60f   : > { %7061 = vmatmul.bf16.gmra.mxu3 %v10023_v50  ;;  %v7132_v47 = vpop.f32.mrf.mxu1 }
 0x610   : > { %v12860_v5 = vpop.f32.mrf.mxu0 }
 0x611   : > { %v6529_v3 = vpop.f32.mrf.mxu2 }
 0x612   : > { %v6578_v58 = vpop.f32.mrf.mxu3  ;;  %7683 = vmatmul.bf16.gmra.mxu0 %v10211_v54 }
 0x613   : > { %v12849_v16 = vadd.f32 %v6578_v58, %v6529_v3  ;;  %v10202_v3 = vld [vmem:[#allocation3 + $0x48] sm:$0xf]  ;;  %v10868_v58 = vld [vmem:[#allocation3 + $0x50] sm:$0xf0] }
 0x617   : > { %v7135_v51 = vpop.f32.mrf.mxu1 }
 0x619   : > { %v6531_v35 = vpop.f32.mrf.mxu2 }
 0x61a   : > { %v6580_v20 = vpop.f32.mrf.mxu3 }
 0x61b   : > { %v12851_v17 = vadd.f32 %v6580_v20, %v6531_v35 }
 0x61e   : > { %6631 = vmatmul.bf16.gmra.mxu2 %v9803_v39  ;;  %v10203_v39 = vor.u32 %v10868_v58, %v10202_v3 }
 0x61f   : > { %7066 = vmatmul.bf16.gmra.mxu3 %v10035_v0  ;;  %v7137_v60 = vpop.f32.mrf.mxu1  ;;  %v10207_v0 = vor.u32 %v10867_v44, %v10204_v18 }
 0x621   : > { %v6534_v36 = vpop.f32.mrf.mxu2 }
 0x622   : > { %v6583_v21 = vpop.f32.mrf.mxu3  ;;  %7688 = vmatmul.bf16.gmra.mxu0 %v10223_v37 }
 0x623   : > { %v12853_v41 = vadd.f32 %v6583_v21, %v6534_v36 }
 0x627   : > { %v7140_v2 = vpop.f32.mrf.mxu1 }
 0x629   : > { %v6536_v56 = vpop.f32.mrf.mxu2 }
 0x62a   : > { %v6585_v11 = vpop.f32.mrf.mxu3 }
 0x62b   : > { %v12855_v30 = vadd.f32 %v6585_v11, %v6536_v56  ;;  %v10214_v56 = vld [vmem:[#allocation3 + $0x60] sm:$0xf]  ;;  %v10871_v11 = vld [vmem:[#allocation3 + $0x68] sm:$0xf0] }
 0x62e   : > { %7580 = vmatmul.bf16.vlgmr.msrb.gmra.mxu2 %v10191_v22  ;;  %v10870_v22 = vld [vmem:[#allocation3 + $0x64] sm:$0xf] }
 0x62f   : > { %7629 = vmatmul.bf16.vlgmr.msrb.gmra.mxu3 %v10195_v48  ;;  %v7142_v63 = vpop.f32.mrf.mxu1  ;;  %v10216_v48 = vld [vmem:[#allocation3 + $0x6c] sm:$0xf0] }
 0x631   : > { %v6597_v7 = vpop.f32.mrf.mxu2 }
 0x632   : > { %v7032_v6 = vpop.f32.mrf.mxu3  ;;  %v6598_v32 = vadd.f32 %v6597_v7, %v12741_v27  ;;  %v12865_v27 = vpop.f32.mrf.mxu0 }
 0x633   : > { %v7082_v50 = vadd.f32 %v7081_v10, %v7032_v6  ;;  %v10234_v10 = vld [vmem:[#allocation3 + $0x80] sm:$0xf]  ;;  %v10215_v6 = vor.u32 %v10871_v11, %v10214_v56 }
 0x635   : > { %v7131_v4 = vadd.f32 %v7130_v14, %v7082_v50  ;;  %v10875_v14 = vld [vmem:[#allocation3 + $0x88] sm:$0xf0] }
 0x636   : > { %v10235_v54 = vor.u32 %v10875_v14, %v10234_v10 }
 0x637   : > { %v12862_v9 = vadd.f32 %v7131_v4, %v6598_v32  ;;  %v10219_v32 = vor.u32 %v10870_v22, %v10216_v48  ;;  %v7145_v58 = vpop.f32.mrf.mxu1  ;;  %v5857_v48 = vld [vmem:[#allocation3 + $0xe8] sm:$0xf] }
 0x638   : > { %7693 = vmatmul.bf16.gmra.mxu0 %v10235_v54 }
 0x639   : > { %v6599_v29 = vpop.f32.mrf.mxu2 }
 0x63a   : > { %v7034_v43 = vpop.f32.mrf.mxu3  ;;  %v6600_v35 = vadd.f32 %v6599_v29, %v12748_v31  ;;  %v12870_v59 = vpop.f32.mrf.mxu0 }
 0x63b   : > { %v7084_v20 = vadd.f32 %v7083_v45, %v7034_v43 }
 0x63d   : > { %v7133_v52 = vadd.f32 %v7132_v47, %v7084_v20  ;;  %v10874_v20 = vld [vmem:[#allocation3 + $0x80] sm:$0xf0] }
 0x63e   : > { %7585 = vmatmul.bf16.gmra.mxu2 %v10203_v39  ;;  %v10873_v39 = vld [vmem:[#allocation3 + $0x7c] sm:$0xf] }
 0x63f   : > { %v12867_v36 = vadd.f32 %v7133_v52, %v6600_v35  ;;  %7634 = vmatmul.bf16.gmra.mxu3 %v10207_v0  ;;  %v10226_v35 = vld [vmem:[#allocation3 + $0x78] sm:$0xf]  ;;  %v10228_v0 = vld [vmem:[#allocation3 + $0x84] sm:$0xf0]  ;;  %v7147_v52 = vpop.f32.mrf.mxu1 }
 0x641   : > { %v6602_v21 = vpop.f32.mrf.mxu2 }
 0x642   : > { %v7037_v28 = vpop.f32.mrf.mxu3  ;;  %v6603_v26 = vadd.f32 %v6602_v21, %v12760_v12  ;;  %v12875_v12 = vpop.f32.mrf.mxu0 }
 0x643   : > { %v7087_v31 = vadd.f32 %v7086_v19, %v7037_v28  ;;  %v10246_v19 = vld [vmem:[#allocation3 + $0x98] sm:$0xf]  ;;  %v10227_v28 = vor.u32 %v10874_v20, %v10226_v35 }
 0x645   : > { %v7136_v45 = vadd.f32 %v7135_v51, %v7087_v31  ;;  %v10878_v51 = vld [vmem:[#allocation3 + $0xa0] sm:$0xf0]  ;;  %v10881_v31 = vld [vmem:[#allocation3 + $0xb8] sm:$0xf0] }
 0x646   : > { %v10247_v4 = vor.u32 %v10878_v51, %v10246_v19 }
 0x647   : > { %v12872_v47 = vadd.f32 %v7136_v45, %v6603_v26 }
 0x648   : > { %7698 = vmatmul.bf16.gmra.mxu0 %v10247_v4  ;;  %v10238_v4 = vld [vmem:[#allocation3 + $0x90] sm:$0xf] }
 0x649   : > { %v6604_v40 = vpop.f32.mrf.mxu2 }
 0x64a   : > { %v7039_v25 = vpop.f32.mrf.mxu3  ;;  %v6605_v37 = vadd.f32 %v6604_v40, %v12767_v55  ;;  %v12881_v43 = vpop.f32.mrf.mxu0 }
 0x64b   : > { %v7089_v7 = vadd.f32 %v7088_v46, %v7039_v25  ;;  %v7150_v40 = vpop.f32.mrf.mxu1  ;;  %v6039_v25 = vshll.u32 %v5857_v48, 16 }
 0x64d   : > { %v7138_v50 = vadd.f32 %v7137_v60, %v7089_v7 }
 0x64e   : > { %7590 = vmatmul.bf16.gmra.mxu2 %v10215_v6 }
 0x64f   : > { %v12877_v3 = vadd.f32 %v7138_v50, %v6605_v37  ;;  %7639 = vmatmul.bf16.gmra.mxu3 %v10219_v32  ;;  %v5586_v37 = vld [vmem:[#allocation3 + $0xdc] sm:$0xf]  ;;  %v12895_v50 = vrot.slane %v6039_v25, 5 }
 0x650   : > { %v5733_v32 = vshrl.u32 %v5586_v37, 16 }
 0x651   : > { %v6607_v44 = vpop.f32.mrf.mxu2 }
 0x652   : > { %v7042_v18 = vpop.f32.mrf.mxu3  ;;  %v6608_v29 = vadd.f32 %v6607_v44, %v12779_v34  ;;  %v10231_v34 = vor.u32 %v10873_v39, %v10228_v0  ;;  %v10877_v44 = vld [vmem:[#allocation3 + $0x98] sm:$0xf0]  ;;  %v5804_v0 = vld [vmem:[#allocation3 + $0xd8] sm:$0xf] }
 0x653   : > { %v7092_v55 = vadd.f32 %v12857_v61, %v7042_v18  ;;  %v12887_v61 = vpop.f32.mrf.mxu0  ;;  %v5735_v18 = vrot.slane %v5733_v32, 7  ;;  %v10239_v39 = vor.u32 %v10877_v44, %v10238_v4 }
 0x655   : > { %v7141_v46 = vadd.f32 %v7140_v2, %v7092_v55  ;;  %v10258_v2 = vld [vmem:[#allocation3 + $0xb0] sm:$0xf]  ;;  %v10240_v55 = vld [vmem:[#allocation3 + $0x9c] sm:$0xf0]  ;;  %v5739_v32 = vrot.slane %v5735_v18, 4 }
 0x656   : > { %v10259_v45 = vor.u32 %v10881_v31, %v10258_v2  ;;  %v7152_v31 = vpop.f32.mrf.mxu1 }
 0x657   : > { %v12883_v60 = vadd.f32 %v7141_v46, %v6608_v29  ;;  %v5736_v29 = vshll.u32 %v5586_v37, 16 }
 0x658   : > { %7703 = vmatmul.bf16.gmra.mxu0 %v10259_v45 }
 0x659   : > { %v6609_v10 = vpop.f32.mrf.mxu2  ;;  %v5738_v46 = vor.u32 %v5736_v29, %v5735_v18 }
 0x65a   : > { %v7044_v14 = vpop.f32.mrf.mxu3  ;;  %v6610_v54 = vadd.f32 %v6609_v10, %v12786_v53  ;;  %v6105_v10 = vld [vmem:[#allocation3 + $0xec] sm:$0xf] }
 0x65b   : > { %v7094_v21 = vadd.f32 %v12860_v5, %v7044_v14  ;;  %v12893_v6 = vpop.f32.mrf.mxu0 }
 0x65d   : > { %v7143_v26 = vadd.f32 %v7142_v63, %v7094_v21  ;;  %v6043_v63 = vshrl.u32 %v5857_v48, 16 }
 0x65e   : > { %7595 = vmatmul.bf16.gmra.mxu2 %v10227_v28  ;;  %v5805_v28 = vsel %vm11609_vm6, %v5738_v46, %v5804_v0 }
 0x65f   : > { %v12889_v56 = vadd.f32 %v7143_v26, %v6610_v54  ;;  %7644 = vmatmul.bf16.gmra.mxu3 %v10231_v34  ;;  %v6045_v19 = vrot.slane %v6043_v63, 4  ;;  %v5856_v34 = vld [vmem:[#allocation3 + $0xdc] sm:$0xf]  ;;  %5806 = vst [vmem:[#allocation3 + $0xd8] sm:$0xf] %v5805_v28 }
 0x661   : > { %v6612_v11 = vpop.f32.mrf.mxu2 }
 0x662   : > { %v7047_v22 = vpop.f32.mrf.mxu3  ;;  %v6613_v53 = vadd.f32 %v6612_v11, %v12798_v57  ;;  %v6046_v57 = vor.u32 %v6045_v19, %v12895_v50  ;;  %v10270_v11 = vld [vmem:[#allocation3 + $0xc8] sm:$0xf] }
 0x663   : > { %v7097_v5 = vadd.f32 %v12865_v27, %v7047_v22  ;;  %v10876_v27 = vld [vmem:[#allocation3 + $0x94] sm:$0xf]  ;;  %v12906_v45 = vpop.f32.mrf.mxu0 }
 0x664   : > { %v6047_v35 = vrot.slane %v6046_v57, 4  ;;  %v10243_v21 = vor.u32 %v10876_v27, %v10240_v55  ;;  %v10884_v22 = vld [vmem:[#allocation3 + $0xd0] sm:$0xf0] }
 0x665   : > { %v7146_v7 = vadd.f32 %v7145_v58, %v7097_v5  ;;  %v10271_v48 = vor.u32 %v10884_v22, %v10270_v11  ;;  %v6033_v5 = vshll.u32 %v5856_v34, 16 }
 0x666   : > { %v6106_v26 = vsel %vm11826_vm4, %v6047_v35, %v6105_v10  ;;  %v5835_v46 = vld [vmem:[#allocation3 + $0xd8] sm:$0x1]  ;;  %v10250_v35 = vld [vmem:[#allocation3 + $0xa8] sm:$0xf] }
 0x667   : > { %v12897_v51 = vadd.f32 %v7146_v7, %v6613_v53  ;;  %v5587_v53 = vld [vmem:[#allocation3 + $0xe8] sm:$0xf]  ;;  %6107 = vst [vmem:[#allocation3 + $0xec] sm:$0xf] %v6106_v26  ;;  %v10252_v10 = vld [vmem:[#allocation3 + $0xb4] sm:$0xf0] }
 0x668   : > { %v5741_v15 = vshrl.u32 %v5587_v53, 16  ;;  %7708 = vmatmul.bf16.gmra.mxu0 %v10271_v48  ;;  %v5744_v13 = vshll.u32 %v5587_v53, 16 }
 0x669   : > { %v6614_v20 = vpop.f32.mrf.mxu2 }
 0x66a   : > { %v7049_v58 = vpop.f32.mrf.mxu3  ;;  %v6615_v14 = vadd.f32 %v6614_v20, %v12805_v1  ;;  %v6030_v1 = vshrl.u32 %v5856_v34, 16  ;;  %v5743_v63 = vrot.slane %v5741_v15, 7  ;;  %v5836_v20 = vsel %vm11654_vm13, 0, %v5835_v46  ;;  %v10883_v15 = vld [vmem:[#allocation3 + $0xc8] sm:$0xf0] }
 0x66b   : > { %v7099_v54 = vadd.f32 %v12870_v59, %v7049_v58  ;;  %v7113_v0 = vpop.f32.mrf.mxu0  ;;  %5837 = vst [vmem:[#allocation3 + $0xd8] sm:$0x1] %v5836_v20 }
 0x66c   : > { %v6032_v25 = vrot.slane %v6030_v1, 4  ;;  %v5746_v29 = vor.u32 %v5744_v13, %v5743_v63  ;;  %v10882_v13 = vld [vmem:[#allocation3 + $0xc4] sm:$0xf] }
 0x66d   : > { %v7148_v2 = vadd.f32 %v7147_v52, %v7099_v54  ;;  %v6035_v52 = vrot.slane %v6033_v5, 5 }
 0x66e   : > { %7600 = vmatmul.bf16.gmra.mxu2 %v10239_v39  ;;  %v5747_v55 = vsel %vm11632_vm10, %v5739_v32, %v5746_v29  ;;  %v6135_v58 = vld [vmem:[#allocation3 + $0xec] sm:$0x8]  ;;  %v7155_v39 = vpop.f32.mrf.mxu1 }
 0x66f   : > { %v12908_v59 = vadd.f32 %v7148_v2, %v6615_v14  ;;  %7649 = vmatmul.bf16.gmra.mxu3 %v10243_v21  ;;  %v6036_v19 = vor.u32 %v6035_v52, %v6032_v25  ;;  %5807 = vst [vmem:[#allocation3 + $0xe4] sm:$0xf] %v5747_v55  ;;  %v6136_v23 = vsel %vm11858_vm12, 0, %v6135_v58  ;;  %v10264_v25 = vld [vmem:[#allocation3 + $0xcc] sm:$0xf0] }
 0x670   : > { %6137 = vst [vmem:[#allocation3 + $0xec] sm:$0x8] %v6136_v23 }
 0x671   : > { %v6617_v37 = vpop.f32.mrf.mxu2  ;;  %v6037_v57 = vrot.slane %v6036_v19, 4  ;;  %v10267_v19 = vor.u32 %v10882_v13, %v10264_v25 }
 0x672   : > { %v7052_v7 = vpop.f32.mrf.mxu3  ;;  %v6618_v4 = vadd.f32 %v6617_v37, %v12819_v24 }
 0x673   : > { %v7102_v44 = vadd.f32 %v12875_v12, %v7052_v7  ;;  %v6042_v18 = vsel %vm11863_vm0, %v6037_v57, %v12895_v50  ;;  %v10880_v12 = vld [vmem:[#allocation3 + $0xb0] sm:$0xf0]  ;;  %v7116_v11 = vpop.f32.mrf.mxu0 }
 0x674   : > { %6104 = vst [vmem:[#allocation3 + $0xe0] sm:$0xf] %v6042_v18  ;;  %v10251_v50 = vor.u32 %v10880_v12, %v10250_v35  ;;  %v10274_v18 = vld [vmem:[#allocation3 + $0xd8] sm:$0xf]  ;;  %v10276_v12 = vld [vmem:[#allocation3 + $0xe4] sm:$0xf0] }
 0x675   : > { %v7151_v27 = vadd.f32 %v7150_v40, %v7102_v44  ;;  %v10879_v40 = vld [vmem:[#allocation3 + $0xac] sm:$0xf] }
 0x676   : > { %v10255_v21 = vor.u32 %v10879_v40, %v10252_v10  ;;  %v7157_v2 = vpop.f32.mrf.mxu1  ;;  %v10886_v58 = vld [vmem:[#allocation3 + $0xe0] sm:$0xf0] }
 0x677   : > { %v12919_v24 = vadd.f32 %v7151_v27, %v6618_v4  ;;  %v10887_v33 = vld [vmem:[#allocation3 + $0xe8] sm:$0xf0] }
 0x679   : > { %v6619_v42 = vpop.f32.mrf.mxu2 }
 0x67a   : > { %v7054_v14 = vpop.f32.mrf.mxu3  ;;  %v6620_v54 = vadd.f32 %v6619_v42, %v12830_v62  ;;  %v10275_v42 = vor.u32 %v10886_v58, %v10274_v18 }
 0x67b   : > { %v7104_v38 = vadd.f32 %v12881_v43, %v7054_v14  ;;  %v10282_v26 = vld [vmem:[#allocation3 + $0xe0] sm:$0xf] }
 0x67c   : > { %v10283_v22 = vor.u32 %v10887_v33, %v10282_v26 }
 0x67d   : > { %v7153_v28 = vadd.f32 %v7152_v31, %v7104_v38  ;;  %v10262_v31 = vld [vmem:[#allocation3 + $0xc0] sm:$0xf] }
 0x67e   : > { %7605 = vmatmul.bf16.gmra.mxu2 %v10251_v50  ;;  %7713 = vmatmul.bf16.gmra.mxu0 %v10283_v22  ;;  %v10263_v32 = vor.u32 %v10883_v15, %v10262_v31  ;;  %v7160_v4 = vpop.f32.mrf.mxu1 }
 0x67f   : > { %v12925_v34 = vadd.f32 %v7153_v28, %v6620_v54  ;;  %7654 = vmatmul.bf16.gmra.mxu3 %v10255_v21 }
 0x681   : > { %v6622_v48 = vpop.f32.mrf.mxu2 }
 0x682   : > { %v7057_v53 = vpop.f32.mrf.mxu3  ;;  %v6623_v1 = vadd.f32 %v6622_v48, %v12842_v8  ;;  %v7118_v8 = vpop.f32.mrf.mxu0 }
 0x683   : > { %v7107_v62 = vadd.f32 %v12887_v61, %v7057_v53 }
 0x685   : > { %v7156_v43 = vadd.f32 %v7155_v39, %v7107_v62 }
 0x686   : > { %v7162_v35 = vpop.f32.mrf.mxu1 }
 0x687   : > { %v12929_v5 = vadd.f32 %v7156_v43, %v6623_v1 }
 0x689   : > { %v6624_v52 = vpop.f32.mrf.mxu2 }
 0x68a   : > { %v7059_v63 = vpop.f32.mrf.mxu3  ;;  %v6625_v37 = vadd.f32 %v6624_v52, %v12847_v49  ;;  %v7679_v49 = vpop.f32.mrf.mxu0 }
 0x68b   : > { %v7109_v7 = vadd.f32 %v12893_v6, %v7059_v63  ;;  %v10885_v6 = vld [vmem:[#allocation3 + $0xdc] sm:$0xf] }
 0x68c   : > { %v10279_v14 = vor.u32 %v10885_v6, %v10276_v12 }
 0x68d   : > { %v7158_v44 = vadd.f32 %v7157_v2, %v7109_v7 }
 0x68e   : > { %7610 = vmatmul.bf16.gmra.mxu2 %v10263_v32 }
 0x68f   : > { %v12933_v61 = vadd.f32 %v7158_v44, %v6625_v37  ;;  %7659 = vmatmul.bf16.gmra.mxu3 %v10267_v19  ;;  %v12952_v37 = vld [vmem:[%s13063_s22] ss:$0 sm:$0xff] }
 0x691   : > { %v6627_v29 = vpop.f32.mrf.mxu2 }
 0x692   : > { %v7062_v57 = vpop.f32.mrf.mxu3  ;;  %v6628_v27 = vadd.f32 %v6627_v29, %v12849_v16  ;;  %v7681_v38 = vpop.f32.mrf.mxu0 }
 0x693   : > { %v7112_v55 = vadd.f32 %v12906_v45, %v7062_v57  ;;  %v7165_v45 = vpop.f32.mrf.mxu1 }
 0x695   : > { %v7161_v46 = vadd.f32 %v7160_v4, %v7112_v55 }
 0x697   : > { %v12937_v20 = vadd.f32 %v7161_v46, %v6628_v27 }
 0x699   : > { %v6629_v39 = vpop.f32.mrf.mxu2 }
 0x69a   : > { %v7064_v23 = vpop.f32.mrf.mxu3  ;;  %v6630_v40 = vadd.f32 %v6629_v39, %v12851_v17  ;;  %v7684_v17 = vpop.f32.mrf.mxu0 }
 0x69b   : > { %v7114_v10 = vadd.f32 %v7113_v0, %v7064_v23  ;;  %v7167_v22 = vpop.f32.mrf.mxu1 }
 0x69d   : > { %v7163_v54 = vadd.f32 %v7162_v35, %v7114_v10 }
 0x69e   : > { %7615 = vmatmul.bf16.gmra.mxu2 %v10275_v42 }
 0x69f   : > { %v12940_v16 = vadd.f32 %v7163_v54, %v6630_v40  ;;  %7664 = vmatmul.bf16.gmra.mxu3 %v10279_v14 }
 0x6a1   : > { %v6632_v50 = vpop.f32.mrf.mxu2 }
 0x6a2   : > { %v7067_v21 = vpop.f32.mrf.mxu3  ;;  %v6633_v28 = vadd.f32 %v6632_v50, %v12853_v41  ;;  %v7686_v25 = vpop.f32.mrf.mxu0 }
 0x6a3   : > { %v7117_v26 = vadd.f32 %v7116_v11, %v7067_v21 }
 0x6a5   : > { %v7166_v33 = vadd.f32 %v7165_v45, %v7117_v26 }
 0x6a7   : > { %v12943_v2 = vadd.f32 %v7166_v33, %v6633_v28 }
 0x6a9   : > { %v6634_v0 = vpop.f32.mrf.mxu2 }
 0x6aa   : > { %v7069_v48 = vpop.f32.mrf.mxu3  ;;  %v6635_v53 = vadd.f32 %v6634_v0, %v12855_v30  ;;  %v7689_v32 = vpop.f32.mrf.mxu0 }
 0x6ab   : > { %v7119_v1 = vadd.f32 %v7118_v8, %v7069_v48 }
 0x6ad   : > { %v7168_v62 = vadd.f32 %v7167_v22, %v7119_v1 }
 0x6af   : > { %v12946_v43 = vadd.f32 %v7168_v62, %v6635_v53 }
 0x6b1   : > { %v7581_v31 = vpop.f32.mrf.mxu2 }
 0x6b2   : > { %v7630_v15 = vpop.f32.mrf.mxu3 }
 0x6b3   : > { %v7631_v13 = vadd.f32 %v7630_v15, %v7581_v31 }
 0x6b5   : > { %v7680_v52 = vadd.f32 %v7679_v49, %v7631_v13  ;;  %v7691_v49 = vpop.f32.mrf.mxu0 }
 0x6b7   : > { %v7719_v41 = vadd.f32 %v7680_v52, %v12862_v9 }
 0x6b9   : > { %7735 = vst [vmem:[#allocation4] sm:$0xff] %v7719_v41  ;;  %v7583_v11 = vpop.f32.mrf.mxu2  ;;  %v7771_v19 = vadd.f32 %v12952_v37, %v7719_v41 }
 0x6ba   : > { %v7632_v63 = vpop.f32.mrf.mxu3 }
 0x6bb   : > { %v7633_v30 = vadd.f32 %v7632_v63, %v7583_v11  ;;  %v7787_v29 = vmax.f32 %v7771_v19, 0.0 }
 0x6bd   : > { %v7682_v7 = vadd.f32 %v7681_v38, %v7633_v30  ;;  %v7694_v40 = vpop.f32.mrf.mxu0 }
 0x6bf   : > { %v7720_v4 = vadd.f32 %v7682_v7, %v12867_v36 }
 0x6c1   : > { %7736 = vst [vmem:[#allocation4 + $0x38] sm:$0xff] %v7720_v4  ;;  %v7772_v8 = vadd.f32 %v12952_v37, %v7720_v4  ;;  %v7586_v9 = vpop.f32.mrf.mxu2 }
 0x6c2   : > { %v7635_v44 = vpop.f32.mrf.mxu3 }
 0x6c3   : > { %v7788_v57 = vmax.f32 %v7772_v8, 0.0  ;;  %v7636_v27 = vadd.f32 %v7635_v44, %v7586_v9 }
 0x6c5   : > { %v10915_v55 = vpack.c.bf16 %v7788_v57, %v7787_v29  ;;  %v7685_v46 = vadd.f32 %v7684_v17, %v7636_v27 }
 0x6c7   : > { %10916 = vst [vmem:[%s11270_s23] sm:$0xff] %v10915_v55   ;;  %v7721_v35 = vadd.f32 %v7685_v46, %v12872_v47 }
 0x6c9   : > { %7737 = vst [vmem:[#allocation4 + $0x50] sm:$0xff] %v7721_v35  ;;  %v7588_v6 = vpop.f32.mrf.mxu2  ;;  %v7773_v12 = vadd.f32 %v12952_v37, %v7721_v35 }
 0x6ca   : > { %v7637_v18 = vpop.f32.mrf.mxu3 }
 0x6cb   : > { %v7638_v58 = vadd.f32 %v7637_v18, %v7588_v6  ;;  %v7789_v14 = vmax.f32 %v7773_v12, 0.0 }
 0x6cd   : > { %v7687_v36 = vadd.f32 %v7686_v25, %v7638_v58 }
 0x6cf   : > { %v7722_v39 = vadd.f32 %v7687_v36, %v12877_v3  ;;  %v7696_v3 = vpop.f32.mrf.mxu0 }
 0x6d1   : > { %7738 = vst [vmem:[#allocation4 + $0x18] sm:$0xff] %v7722_v39  ;;  %v7774_v23 = vadd.f32 %v12952_v37, %v7722_v39  ;;  %v7591_v10 = vpop.f32.mrf.mxu2 }
 0x6d2   : > { %v7640_v42 = vpop.f32.mrf.mxu3 }
 0x6d3   : > { %v7790_v54 = vmax.f32 %v7774_v23, 0.0  ;;  %v7641_v47 = vadd.f32 %v7640_v42, %v7591_v10 }
 0x6d5   : > { %v10920_v45 = vpack.c.bf16 %v7790_v54, %v7789_v14  ;;  %v7690_v38 = vadd.f32 %v7689_v32, %v7641_v47 }
 0x6d7   : > { %10956 = vst [vmem:[%s11270_s23 + $0x8] sm:$0xff] %v10920_v45   ;;  %v7723_v50 = vadd.f32 %v7690_v38, %v12883_v60  ;;  %v7699_v13 = vpop.f32.mrf.mxu0 }
 0x6d9   : > { %7739 = vst [vmem:[#allocation4 + $0x30] sm:$0xff] %v7723_v50  ;;  %v7593_v21 = vpop.f32.mrf.mxu2  ;;  %v7775_v22 = vadd.f32 %v12952_v37, %v7723_v50 }
 0x6da   : > { %v7642_v28 = vpop.f32.mrf.mxu3 }
 0x6db   : > { %v7643_v26 = vadd.f32 %v7642_v28, %v7593_v21  ;;  %v7791_v1 = vmax.f32 %v7775_v22, 0.0 }
 0x6dd   : > { %v7692_v33 = vadd.f32 %v7691_v49, %v7643_v26 }
 0x6df   : > { %v7724_v17 = vadd.f32 %v7692_v33, %v12889_v56  ;;  %v7701_v7 = vpop.f32.mrf.mxu0 }
 0x6e1   : > { %7740 = vst [vmem:[#allocation4 + $0x68] sm:$0xff] %v7724_v17  ;;  %v7776_v0 = vadd.f32 %v12952_v37, %v7724_v17  ;;  %v7596_v48 = vpop.f32.mrf.mxu2 }
 0x6e2   : > { %v7645_v53 = vpop.f32.mrf.mxu3 }
 0x6e3   : > { %v7792_v62 = vmax.f32 %v7776_v0, 0.0  ;;  %v7646_v31 = vadd.f32 %v7645_v53, %v7596_v48 }
 0x6e5   : > { %v10925_v60 = vpack.c.bf16 %v7792_v62, %v7791_v1  ;;  %v7695_v15 = vadd.f32 %v7694_v40, %v7646_v31 }
 0x6e7   : > { %10957 = vst [vmem:[%s11270_s23 + $0x10] sm:$0xff] %v10925_v60   ;;  %v7725_v25 = vadd.f32 %v7695_v15, %v12897_v51  ;;  %v7704_v27 = vpop.f32.mrf.mxu0 }
 0x6e9   : > { %7741 = vst [vmem:[#allocation4 + $0x78] sm:$0xff] %v7725_v25  ;;  %v7598_v52 = vpop.f32.mrf.mxu2  ;;  %v7777_v63 = vadd.f32 %v12952_v37, %v7725_v25 }
 0x6ea   : > { %v7647_v41 = vpop.f32.mrf.mxu3 }
 0x6eb   : > { %v7648_v11 = vadd.f32 %v7647_v41, %v7598_v52  ;;  %v7793_v8 = vmax.f32 %v7777_v63, 0.0 }
 0x6ed   : > { %v7697_v56 = vadd.f32 %v7696_v3, %v7648_v11 }
 0x6ef   : > { %v7726_v30 = vadd.f32 %v7697_v56, %v12908_v59 }
 0x6f1   : > { %7742 = vst [vmem:[#allocation4 + $0x80] sm:$0xff] %v7726_v30  ;;  %v7778_v32 = vadd.f32 %v12952_v37, %v7726_v30  ;;  %v7601_v19 = vpop.f32.mrf.mxu2 }
 0x6f2   : > { %v7650_v4 = vpop.f32.mrf.mxu3 }
 0x6f3   : > { %v7794_v9 = vmax.f32 %v7778_v32, 0.0  ;;  %v7651_v44 = vadd.f32 %v7650_v4, %v7601_v19 }
 0x6f5   : > { %v10930_v51 = vpack.c.bf16 %v7794_v9, %v7793_v8  ;;  %v7700_v29 = vadd.f32 %v7699_v13, %v7651_v44 }
 0x6f7   : > { %10958 = vst [vmem:[%s11270_s23 + $0x18] sm:$0xff] %v10930_v51   ;;  %v7727_v57 = vadd.f32 %v7700_v29, %v12919_v24  ;;  %v7706_v24 = vpop.f32.mrf.mxu0 }
 0x6f9   : > { %7743 = vst [vmem:[#allocation4 + $0x8] sm:$0xff] %v7727_v57  ;;  %v7603_v55 = vpop.f32.mrf.mxu2  ;;  %v7779_v49 = vadd.f32 %v12952_v37, %v7727_v57 }
 0x6fa   : > { %v7652_v46 = vpop.f32.mrf.mxu3 }
 0x6fb   : > { %v7653_v59 = vadd.f32 %v7652_v46, %v7603_v55  ;;  %v7795_v12 = vmax.f32 %v7779_v49, 0.0 }
 0x6fd   : > { %v7702_v35 = vadd.f32 %v7701_v7, %v7653_v59 }
 0x6ff   : > { %v7728_v6 = vadd.f32 %v7702_v35, %v12925_v34  ;;  %v7709_v45 = vpop.f32.mrf.mxu0 }
 0x701   : > { %7744 = vst [vmem:[#allocation4 + $0x88] sm:$0xff] %v7728_v6  ;;  %v7780_v18 = vadd.f32 %v12952_v37, %v7728_v6  ;;  %v7606_v58 = vpop.f32.mrf.mxu2 }
 0x702   : > { %v7655_v36 = vpop.f32.mrf.mxu3 }
 0x703   : > { %v7796_v39 = vmax.f32 %v7780_v18, 0.0  ;;  %v7656_v23 = vadd.f32 %v7655_v36, %v7606_v58 }
 0x705   : > { %v10935_v40 = vpack.c.bf16 %v7796_v39, %v7795_v12  ;;  %v7705_v10 = vadd.f32 %v7704_v27, %v7656_v23 }
 0x707   : > { %10959 = vst [vmem:[%s11270_s23 + $0x20] sm:$0xff] %v10935_v40   ;;  %v7729_v42 = vadd.f32 %v7705_v10, %v12929_v5  ;;  %v7711_v48 = vpop.f32.mrf.mxu0 }
 0x709   : > { %7745 = vst [vmem:[#allocation4 + $0x28] sm:$0xff] %v7729_v42  ;;  %v7608_v14 = vpop.f32.mrf.mxu2  ;;  %v7781_v38 = vadd.f32 %v12952_v37, %v7729_v42 }
 0x70a   : > { %v7657_v54 = vpop.f32.mrf.mxu3 }
 0x70b   : > { %v7658_v47 = vadd.f32 %v7657_v54, %v7608_v14  ;;  %v7797_v3 = vmax.f32 %v7781_v38, 0.0 }
 0x70d   : > { %v7707_v34 = vadd.f32 %v7706_v24, %v7658_v47 }
 0x70f   : > { %v7730_v50 = vadd.f32 %v7707_v34, %v12933_v61  ;;  %v7714_v13 = vpop.f32.mrf.mxu0 }
 0x711   : > { %7746 = vst [vmem:[#allocation4 + $0x40] sm:$0xff] %v7730_v50  ;;  %v7782_v21 = vadd.f32 %v12952_v37, %v7730_v50  ;;  %v7611_v28 = vpop.f32.mrf.mxu2 }
 0x712   : > { %v7660_v26 = vpop.f32.mrf.mxu3 }
 0x713   : > { %v7798_v33 = vmax.f32 %v7782_v21, 0.0  ;;  %v7661_v22 = vadd.f32 %v7660_v26, %v7611_v28 }
 0x715   : > { %v10940_v5 = vpack.c.bf16 %v7798_v33, %v7797_v3  ;;  %v7710_v17 = vadd.f32 %v7709_v45, %v7661_v22 }
 0x717   : > { %10960 = vst [vmem:[%s11270_s23 + $0x28] sm:$0xff] %v10940_v5   ;;  %v7731_v0 = vadd.f32 %v7710_v17, %v12937_v20 }
 0x719   : > { %7747 = vst [vmem:[#allocation4 + $0x58] sm:$0xff] %v7731_v0  ;;  %v7613_v53 = vpop.f32.mrf.mxu2  ;;  %v7783_v31 = vadd.f32 %v12952_v37, %v7731_v0 }
 0x71a   : > { %v7662_v1 = vpop.f32.mrf.mxu3 }
 0x71b   : > { %v7663_v62 = vadd.f32 %v7662_v1, %v7613_v53  ;;  %v7799_v41 = vmax.f32 %v7783_v31, 0.0 }
 0x71d   : > { %v7712_v61 = vadd.f32 %v7711_v48, %v7663_v62 }
 0x71f   : > { %v7732_v60 = vadd.f32 %v7712_v61, %v12940_v16  ;;  %v7716_v16 = vpop.f32.mrf.mxu0 }
 0x721   : > { %7748 = vst [vmem:[#allocation4 + $0x10] sm:$0xff] %v7732_v60  ;;  %v7784_v15 = vadd.f32 %v12952_v37, %v7732_v60  ;;  %v7616_v25 = vpop.f32.mrf.mxu2 }
 0x722   : > { %v7665_v52 = vpop.f32.mrf.mxu3 }
 0x723   : > { %v7800_v11 = vmax.f32 %v7784_v15, 0.0  ;;  %v7666_v20 = vadd.f32 %v7665_v52, %v7616_v25 }
 0x725   : > { %v10945_v56 = vpack.c.bf16 %v7800_v11, %v7799_v41  ;;  %v7715_v63 = vadd.f32 %v7714_v13, %v7666_v20 }
 0x727   : > { %10961 = vst [vmem:[%s11270_s23 + $0x30] sm:$0xff] %v10945_v56   ;;  %v7733_v30 = vadd.f32 %v7715_v63, %v12943_v2 }
 0x729   : > { %7749 = vst [vmem:[#allocation4 + $0x98] sm:$0xff] %v7733_v30  ;;  %v7618_v7 = vpop.f32.mrf.mxu2  ;;  %v7785_v8 = vadd.f32 %v12952_v37, %v7733_v30 }
 0x72a   : > { %v7667_v32 = vpop.f32.mrf.mxu3 }
 0x72b   : > { %v7668_v19 = vadd.f32 %v7667_v32, %v7618_v7  ;;  %v7801_v51 = vmax.f32 %v7785_v8, 0.0 }
 0x72d   : > { %v7717_v4 = vadd.f32 %v7716_v16, %v7668_v19 }
 0x72f   : > { %v7734_v9 = vadd.f32 %v7717_v4, %v12946_v43 }
 0x731   : > { %7750 = vst [vmem:[#allocation4 + $0x60] sm:$0xff] %v7734_v9  ;;  %v7786_v44 = vadd.f32 %v12952_v37, %v7734_v9 }
 0x733   : > { %v7802_v29 = vmax.f32 %v7786_v44, 0.0 }
 0x735   : > { %v10950_v57 = vpack.c.bf16 %v7802_v29, %v7801_v51 }
 0x737   : > { %10962 = vst [vmem:[%s11270_s23 + $0x38] sm:$0xff] %v10950_v57  }
 0x738 PF: > { %s13064_s8 = sld [smem:[#allocation7_spill]] }
 0x739   : > { %s13065_s21 = sld [smem:[#allocation5_spill]] }
 0x73a   : > { %s13066_s22 = sld [smem:[#allocation6_spill]] }
 0x73b   : > { %s13067_s23 = sld [smem:[#allocation8_spill]] }
 0x73c   : > { %s13068_s24 = sld [smem:[#allocation9_spill]] }
 0x73e   : > { %s22_s25 = sadd.s32 1, %s13064_s8  }
 0x73f   : > { %p19_p1 = scmp.ge.s32.totalorder %s22_s25, 6  }
 0x741   :  { %21 = sbr.rel (!%p19_p1) target bundleno = 5 (0x5), region = 147 }

</bundles_post_ra>
